<compile_context>
chip_gen: v6e
topology: v6e:2x2x1
jax: 0.10.0
libtpu: 0.0.40
codegen_flags: <defaults>
</compile_context>

<pallas_src>
import functools

import jax
import jax.numpy as jnp
from jax.experimental import pallas as pl
from jax.experimental.pallas import tpu as pltpu

LEAKY_SLOPE = 0.2
BN_EPS = 1e-5


def _round_up(x, m):
    return (x + m - 1) // m * m


def _padded_block_bytes(shape, dtype):
    """Rough VMEM footprint of one block after (sublane, lane) tiling."""
    item = jnp.dtype(dtype).itemsize
    sub_pack = 8 * max(1, 4 // item)          # 8 rows for f32, 16 for bf16
    lane = _round_up(int(shape[-1]), 128)
    sub = _round_up(int(shape[-2]) if len(shape) >= 2 else 1, sub_pack)
    lead = 1
    for d in shape[:-2]:
        lead *= int(d)
    return lead * sub * lane * item


def _pick_cout_tile(cout):
    """Output-channel tile: full extent when small, else 256/128 (2-TC friendly)."""
    if cout <= 256:
        return cout
    for cand in (256, 128):
        if cout % cand == 0:
            return cand
    return cout


def _vmem_limit(working_set_bytes):
    """Explicit scoped-VMEM request with headroom vs. physical capacity."""
    try:
        cap = int(getattr(pltpu.get_tpu_info(), "vmem_capacity_bytes", 128 << 20))
    except Exception:  # pragma: no cover - conservative fallback
        cap = 128 << 20
    ceiling = (cap * 3) // 4                   # leave compiler headroom (v7x: 64 MiB phys)
    want = working_set_bytes + (4 << 20)
    return int(max(16 << 20, min(ceiling, want)))


# ----------------------------------------------------------------------------
# Conv3x3 (+ folded BN + LeakyReLU) Pallas kernel
# ----------------------------------------------------------------------------
def _make_conv_kernel(s, Ho, Wo, Hph, Cin, tn, neg_slope):
    """One 3x3 conv layer.  Grid = (batch, cout_tiles); all 9 taps in-kernel."""

    def kernel(x_ref, w_ref, scale_ref, shift_ref, o_ref):
        # x_ref:     (s, s*Hph, Wph, Cin) bf16  (padded / phase-split image)
        # w_ref:     (3, 3, Cin, tn)      bf16
        # scale_ref: (1, tn) f32, shift_ref: (1, tn) f32
        # o_ref:     (1, Ho, Wo, tn)      bf16
        acc = jnp.zeros((Ho * Wo, tn), jnp.float32)
        for dy in range(3):                   # static unroll: 9 chained MXU dots
            py, oy = dy % s, dy // s
            for dx in range(3):
                px, ox = dx % s, dx // s
                slab = x_ref[py, pl.ds(px * Hph + oy, Ho), pl.ds(ox, Wo), :]
                slab = slab.reshape(Ho * Wo, Cin)          # (Ho*Wo, Cin)
                acc = acc + jnp.dot(slab, w_ref[dy, dx],
                                    preferred_element_type=jnp.float32)
        y = acc * scale_ref[...] + shift_ref[...]          # f32 BN epilogue
        y = jnp.where(y >= 0.0, y, neg_slope * y)          # LeakyReLU
        o_ref[0] = y.reshape(Ho, Wo, tn).astype(o_ref.dtype)

    return kernel


def conv3x3_bn_lrelu(x, w, scale, shift, stride, neg_slope=LEAKY_SLOPE):
    """x: (N,H,W,Cin) bf16, w: (3,3,Cin,Cout) bf16, scale/shift: (1,Cout) f32."""
    N, H, W, Cin = x.shape
    Cout = w.shape[-1]
    s = int(stride)
    Ho = (H + 2 - 3) // s + 1
    Wo = (W + 2 - 3) // s + 1

    if s == 1:
        # plain spatial zero-pad; single "phase"
        Hph, Wph = H + 2, W + 2
        xt = jnp.pad(x, ((0, 0), (1, 1), (1, 1), (0, 0)))
        # shape (N, Hph, Wph, Cin)
    else:
        # phase-decompose the padded image so every tap is an unstrided slice:
        # xt[n*2+py, px*Hph+i, j, :] == xpad[n, 2i+py, 2j+px, :]
        Hph, Wph = Ho + 1, Wo + 1
        xp = jnp.pad(x, ((0, 0),
                         (1, 2 * Hph - H - 1),
                         (1, 2 * Wph - W - 1),
                         (0, 0)))
        xt = xp.reshape(N, Hph, 2, Wph, 2, Cin)
        xt = jnp.transpose(xt, (0, 2, 4, 1, 3, 5))    # (N, py, px, Hph, Wph, C)
        xt = xt.reshape(N * 2, 2 * Hph, Wph, Cin)

    tn = _pick_cout_tile(Cout)
    assert Cout % tn == 0, (Cout, tn)
    n_j = Cout // tn
    grid = (N, n_j)

    in_specs = [
        # both vertical phases of one image in one block -> fetched once per (n, j)
        pl.BlockSpec((s, s * Hph, Wph, Cin), lambda n, j: (n, 0, 0, 0)),
        pl.BlockSpec((3, 3, Cin, tn), lambda n, j: (0, 0, 0, j)),
        pl.BlockSpec((1, tn), lambda n, j: (0, j)),
        pl.BlockSpec((1, tn), lambda n, j: (0, j)),
    ]
    out_specs = pl.BlockSpec((1, Ho, Wo, tn), lambda n, j: (n, 0, 0, j))

    # VMEM budget ~ block working set (double-buffered) + possible f32 acc spill
    est = (2 * (_padded_block_bytes((s, s * Hph, Wph, Cin), jnp.bfloat16)
                + _padded_block_bytes((3, 3, Cin, tn), jnp.bfloat16)
                + _padded_block_bytes((1, Ho, Wo, tn), jnp.bfloat16)
                + 2 * _padded_block_bytes((1, tn), jnp.float32))
           + _padded_block_bytes((Ho * Wo, tn), jnp.float32))
    vlim = _vmem_limit(est)

    kernel = _make_conv_kernel(s, Ho, Wo, Hph, Cin, tn, neg_slope)
    return pl.pallas_call(
        kernel,
        out_shape=jax.ShapeDtypeStruct((N, Ho, Wo, Cout), jnp.bfloat16),
        grid_spec=pltpu.PrefetchScalarGridSpec(
            num_scalar_prefetch=0,
            grid=grid,
            in_specs=in_specs,
            out_specs=out_specs,
        ),
        compiler_params=pltpu.CompilerParams(
            dimension_semantics=("parallel", "parallel"),
            vmem_limit_bytes=vlim,
        ),
    )(xt, w, scale, shift)


# ----------------------------------------------------------------------------
# Fused tail: AdaptiveAvgPool2d(1) + 1x1 conv + LeakyReLU + 1x1 conv + sigmoid
# ----------------------------------------------------------------------------
def _tail_kernel(x_ref, w1_ref, b1_ref, w2_ref, b2_ref, o_ref):
    x = x_ref[...].astype(jnp.float32)            # (N, S, C8)
    pooled = jnp.mean(x, axis=1)                  # AdaptiveAvgPool2d(1)
    h = jnp.dot(pooled, w1_ref[...],
                preferred_element_type=jnp.float32) + b1_ref[...]
    h = jnp.where(h >= 0.0, h, LEAKY_SLOPE * h)
    z = jnp.dot(h, w2_ref[...],
                preferred_element_type=jnp.float32) + b2_ref[...]
    o_ref[...] = jax.nn.sigmoid(z)


def pool_fc_head(x, w1, b1, w2, b2):
    N, Ho, Wo, C = x.shape
    xf = x.reshape(N, Ho * Wo, C)
    vmem = pl.BlockSpec(memory_space=pltpu.MemorySpace.VMEM)
    return pl.pallas_call(
        _tail_kernel,
        out_shape=jax.ShapeDtypeStruct((N, 1), jnp.float32),
        in_specs=[vmem] * 5,
        out_specs=vmem,
    )(xf, w1, b1.reshape(1, -1), w2, b2.reshape(1, -1))


# ----------------------------------------------------------------------------
# Parameters (deterministic, synthetic)
# ----------------------------------------------------------------------------
def init_params(key, version):
    fsize = {0: int(64 * 0.25), 1: int(64 * 0.5), 2: 64}[version]
    conv_cfg = [
        # (cin, cout, stride, has_batchnorm)
        (3, fsize, 1, False),
        (fsize, fsize, 2, True),
        (fsize, 2 * fsize, 1, True),
        (2 * fsize, 2 * fsize, 2, True),
        (2 * fsize, 4 * fsize, 1, True),
        (4 * fsize, 4 * fsize, 2, True),
        (4 * fsize, 8 * fsize, 1, True),
        (8 * fsize, 8 * fsize, 2, True),
    ]
    params = {"convs": [], "fsize": fsize}
    for cin, cout, stride, bn in conv_cfg:
        key, kw = jax.random.split(key)
        # weight stored as (ky, kx, cin, cout) = tap-major GEMM layout
        w = jax.random.normal(kw, (3, 3, cin, cout), jnp.float32) / jnp.sqrt(9.0 * cin)
        params["convs"].append(dict(
            w=w, b=jnp.zeros((cout,), jnp.float32), stride=stride, bn=bn,
            gamma=jnp.ones((cout,), jnp.float32),
            beta=jnp.zeros((cout,), jnp.float32),
            running_mean=jnp.zeros((cout,), jnp.float32),
            running_var=jnp.ones((cout,), jnp.float32),
        ))
    key, k1 = jax.random.split(key)
    key, k2 = jax.random.split(key)
    params["fc1_w"] = jax.random.normal(
        k1, (8 * fsize, 16 * fsize), jnp.float32) / jnp.sqrt(8.0 * fsize)
    params["fc1_b"] = jnp.zeros((16 * fsize,), jnp.float32)
    params["fc2_w"] = jax.random.normal(
        k2, (16 * fsize, 1), jnp.float32) / jnp.sqrt(16.0 * fsize)
    params["fc2_b"] = jnp.zeros((1,), jnp.float32)
    return params


def _fold_bn(layer):
    cout = layer["w"].shape[-1]
    if layer["bn"]:
        s = layer["gamma"] / jnp.sqrt(layer["running_var"] + BN_EPS)
        t = layer["beta"] - layer["running_mean"] * s
    else:
        s = jnp.ones((cout,), jnp.float32)
        t = jnp.zeros((cout,), jnp.float32)
    scale = s
    shift = layer["b"] * s + t            # conv bias folded through BN
    return (scale.reshape(1, cout).astype(jnp.float32),
            shift.reshape(1, cout).astype(jnp.float32))


# ----------------------------------------------------------------------------
# Forward pass (matches Discriminator.forward)
# ----------------------------------------------------------------------------
def discriminator_forward(params, x_nchw):
    x = jnp.transpose(x_nchw, (0, 2, 3, 1)).astype(jnp.bfloat16)   # NHWC bf16
    N = x.shape[0]

    for layer in params["convs"]:
        scale, shift = _fold_bn(layer)
        x = conv3x3_bn_lrelu(
            x, layer["w"].astype(jnp.bfloat16), scale, shift, layer["stride"])

    out = pool_fc_head(x, params["fc1_w"], params["fc1_b"],
                       params["fc2_w"], params["fc2_b"])
    # PyTorch output shape is (N, 1, 1, 1) in NCHW.
    return out.reshape(N, 1, 1, 1)


if __name__ == "__main__":
    class Cfg:
        version = 0   # fsize = 16 -> small, demo-friendly channel counts

    key = jax.random.PRNGKey(0)
    kp, kx = jax.random.split(key)
    params = init_params(kp, Cfg.version)

    # NCHW input, like the PyTorch module
    x = jax.random.normal(kx, (2, 3, 16, 16), jnp.float32)

    fwd = jax.jit(functools.partial(discriminator_forward, params))
    out = fwd(x)
    jax.block_until_ready(out)

    assert out.shape == (2, 1, 1, 1), out.shape
    assert bool(jnp.all((out >= 0.0) & (out <= 1.0)))
    print("KERNEL_OK")
</pallas_src>

<mosaic_0001>
module attributes {stable_mosaic.version = 11 : i64} {
  func.func @kernel(%arg0: i32, %arg1: i32, %arg2: memref<1x18x18x3xbf16, #tpu.memory_space<vmem>>, %arg3: memref<3x3x3x16xbf16, #tpu.memory_space<vmem>>, %arg4: memref<1x16xf32, #tpu.memory_space<vmem>>, %arg5: memref<1x16xf32, #tpu.memory_space<vmem>>, %arg6: memref<1x16x16x16xbf16, #tpu.memory_space<vmem>>) attributes {dimension_semantics = [#tpu.dimension_semantics<parallel>, #tpu.dimension_semantics<parallel>], iteration_bounds = array<i64: 2, 1>, scalar_prefetch = 0 : i64, scratch_operands = 0 : i64, tpu.core_type = #tpu.core_type<tc>, window_params = [{transform_indices = @transform_0, window_bounds = array<i64: 1, 18, 18, 3>}, {transform_indices = @transform_1, window_bounds = array<i64: 3, 3, 3, 16>}, {transform_indices = @transform_2, window_bounds = array<i64: 1, 16>}, {transform_indices = @transform_3, window_bounds = array<i64: 1, 16>}, {transform_indices = @transform_4, window_bounds = array<i64: 1, 16, 16, 16>}]} {
    %cst = arith.constant 0.000000e+00 : f32
    %0 = vector.broadcast %cst : f32 to vector<256x16xf32>
    %c0 = arith.constant 0 : index
    %c0_0 = arith.constant 0 : index
    %c0_1 = arith.constant 0 : index
    %c0_2 = arith.constant 0 : index
    %1 = vector.load %arg2[%c0, %c0_0, %c0_1, %c0_2] : memref<1x18x18x3xbf16, #tpu.memory_space<vmem>>, vector<1x16x16x3xbf16>
    %2 = vector.shape_cast %1 : vector<1x16x16x3xbf16> to vector<16x16x3xbf16>
    %3 = vector.shape_cast %2 : vector<16x16x3xbf16> to vector<256x3xbf16>
    %c0_3 = arith.constant 0 : index
    %c0_4 = arith.constant 0 : index
    %c0_5 = arith.constant 0 : index
    %c0_6 = arith.constant 0 : index
    %4 = vector.load %arg3[%c0_3, %c0_4, %c0_5, %c0_6] : memref<3x3x3x16xbf16, #tpu.memory_space<vmem>>, vector<1x1x3x16xbf16>
    %5 = vector.shape_cast %4 : vector<1x1x3x16xbf16> to vector<3x16xbf16>
    %cst_7 = arith.constant dense<0.000000e+00> : vector<256x16xf32>
    %6 = tpu.matmul %3, %5, %cst_7 {dimension_numbers = #tpu.dot_dimension_numbers<[1], [0], [0], [1], [0, 0, 1, 1], [], []>} : vector<256x3xbf16>, vector<3x16xbf16>, vector<256x16xf32> -> vector<256x16xf32>
    %7 = arith.addf %0, %6 : vector<256x16xf32>
    %c0_8 = arith.constant 0 : index
    %c0_9 = arith.constant 0 : index
    %c1 = arith.constant 1 : index
    %c0_10 = arith.constant 0 : index
    %8 = vector.load %arg2[%c0_8, %c0_9, %c1, %c0_10] : memref<1x18x18x3xbf16, #tpu.memory_space<vmem>>, vector<1x16x16x3xbf16>
    %9 = vector.shape_cast %8 : vector<1x16x16x3xbf16> to vector<16x16x3xbf16>
    %10 = vector.shape_cast %9 : vector<16x16x3xbf16> to vector<256x3xbf16>
    %c0_11 = arith.constant 0 : index
    %c1_12 = arith.constant 1 : index
    %c0_13 = arith.constant 0 : index
    %c0_14 = arith.constant 0 : index
    %11 = vector.load %arg3[%c0_11, %c1_12, %c0_13, %c0_14] : memref<3x3x3x16xbf16, #tpu.memory_space<vmem>>, vector<1x1x3x16xbf16>
    %12 = vector.shape_cast %11 : vector<1x1x3x16xbf16> to vector<3x16xbf16>
    %cst_15 = arith.constant dense<0.000000e+00> : vector<256x16xf32>
    %13 = tpu.matmul %10, %12, %cst_15 {dimension_numbers = #tpu.dot_dimension_numbers<[1], [0], [0], [1], [0, 0, 1, 1], [], []>} : vector<256x3xbf16>, vector<3x16xbf16>, vector<256x16xf32> -> vector<256x16xf32>
    %14 = arith.addf %7, %13 : vector<256x16xf32>
    %c0_16 = arith.constant 0 : index
    %c0_17 = arith.constant 0 : index
    %c2 = arith.constant 2 : index
    %c0_18 = arith.constant 0 : index
    %15 = vector.load %arg2[%c0_16, %c0_17, %c2, %c0_18] : memref<1x18x18x3xbf16, #tpu.memory_space<vmem>>, vector<1x16x16x3xbf16>
    %16 = vector.shape_cast %15 : vector<1x16x16x3xbf16> to vector<16x16x3xbf16>
    %17 = vector.shape_cast %16 : vector<16x16x3xbf16> to vector<256x3xbf16>
    %c0_19 = arith.constant 0 : index
    %c2_20 = arith.constant 2 : index
    %c0_21 = arith.constant 0 : index
    %c0_22 = arith.constant 0 : index
    %18 = vector.load %arg3[%c0_19, %c2_20, %c0_21, %c0_22] : memref<3x3x3x16xbf16, #tpu.memory_space<vmem>>, vector<1x1x3x16xbf16>
    %19 = vector.shape_cast %18 : vector<1x1x3x16xbf16> to vector<3x16xbf16>
    %cst_23 = arith.constant dense<0.000000e+00> : vector<256x16xf32>
    %20 = tpu.matmul %17, %19, %cst_23 {dimension_numbers = #tpu.dot_dimension_numbers<[1], [0], [0], [1], [0, 0, 1, 1], [], []>} : vector<256x3xbf16>, vector<3x16xbf16>, vector<256x16xf32> -> vector<256x16xf32>
    %21 = arith.addf %14, %20 : vector<256x16xf32>
    %c0_24 = arith.constant 0 : index
    %c1_25 = arith.constant 1 : index
    %c0_26 = arith.constant 0 : index
    %c0_27 = arith.constant 0 : index
    %22 = vector.load %arg2[%c0_24, %c1_25, %c0_26, %c0_27] : memref<1x18x18x3xbf16, #tpu.memory_space<vmem>>, vector<1x16x16x3xbf16>
    %23 = vector.shape_cast %22 : vector<1x16x16x3xbf16> to vector<16x16x3xbf16>
    %24 = vector.shape_cast %23 : vector<16x16x3xbf16> to vector<256x3xbf16>
    %c1_28 = arith.constant 1 : index
    %c0_29 = arith.constant 0 : index
    %c0_30 = arith.constant 0 : index
    %c0_31 = arith.constant 0 : index
    %25 = vector.load %arg3[%c1_28, %c0_29, %c0_30, %c0_31] : memref<3x3x3x16xbf16, #tpu.memory_space<vmem>>, vector<1x1x3x16xbf16>
    %26 = vector.shape_cast %25 : vector<1x1x3x16xbf16> to vector<3x16xbf16>
    %cst_32 = arith.constant dense<0.000000e+00> : vector<256x16xf32>
    %27 = tpu.matmul %24, %26, %cst_32 {dimension_numbers = #tpu.dot_dimension_numbers<[1], [0], [0], [1], [0, 0, 1, 1], [], []>} : vector<256x3xbf16>, vector<3x16xbf16>, vector<256x16xf32> -> vector<256x16xf32>
    %28 = arith.addf %21, %27 : vector<256x16xf32>
    %c0_33 = arith.constant 0 : index
    %c1_34 = arith.constant 1 : index
    %c1_35 = arith.constant 1 : index
    %c0_36 = arith.constant 0 : index
    %29 = vector.load %arg2[%c0_33, %c1_34, %c1_35, %c0_36] : memref<1x18x18x3xbf16, #tpu.memory_space<vmem>>, vector<1x16x16x3xbf16>
    %30 = vector.shape_cast %29 : vector<1x16x16x3xbf16> to vector<16x16x3xbf16>
    %31 = vector.shape_cast %30 : vector<16x16x3xbf16> to vector<256x3xbf16>
    %c1_37 = arith.constant 1 : index
    %c1_38 = arith.constant 1 : index
    %c0_39 = arith.constant 0 : index
    %c0_40 = arith.constant 0 : index
    %32 = vector.load %arg3[%c1_37, %c1_38, %c0_39, %c0_40] : memref<3x3x3x16xbf16, #tpu.memory_space<vmem>>, vector<1x1x3x16xbf16>
    %33 = vector.shape_cast %32 : vector<1x1x3x16xbf16> to vector<3x16xbf16>
    %cst_41 = arith.constant dense<0.000000e+00> : vector<256x16xf32>
    %34 = tpu.matmul %31, %33, %cst_41 {dimension_numbers = #tpu.dot_dimension_numbers<[1], [0], [0], [1], [0, 0, 1, 1], [], []>} : vector<256x3xbf16>, vector<3x16xbf16>, vector<256x16xf32> -> vector<256x16xf32>
    %35 = arith.addf %28, %34 : vector<256x16xf32>
    %c0_42 = arith.constant 0 : index
    %c1_43 = arith.constant 1 : index
    %c2_44 = arith.constant 2 : index
    %c0_45 = arith.constant 0 : index
    %36 = vector.load %arg2[%c0_42, %c1_43, %c2_44, %c0_45] : memref<1x18x18x3xbf16, #tpu.memory_space<vmem>>, vector<1x16x16x3xbf16>
    %37 = vector.shape_cast %36 : vector<1x16x16x3xbf16> to vector<16x16x3xbf16>
    %38 = vector.shape_cast %37 : vector<16x16x3xbf16> to vector<256x3xbf16>
    %c1_46 = arith.constant 1 : index
    %c2_47 = arith.constant 2 : index
    %c0_48 = arith.constant 0 : index
    %c0_49 = arith.constant 0 : index
    %39 = vector.load %arg3[%c1_46, %c2_47, %c0_48, %c0_49] : memref<3x3x3x16xbf16, #tpu.memory_space<vmem>>, vector<1x1x3x16xbf16>
    %40 = vector.shape_cast %39 : vector<1x1x3x16xbf16> to vector<3x16xbf16>
    %cst_50 = arith.constant dense<0.000000e+00> : vector<256x16xf32>
    %41 = tpu.matmul %38, %40, %cst_50 {dimension_numbers = #tpu.dot_dimension_numbers<[1], [0], [0], [1], [0, 0, 1, 1], [], []>} : vector<256x3xbf16>, vector<3x16xbf16>, vector<256x16xf32> -> vector<256x16xf32>
    %42 = arith.addf %35, %41 : vector<256x16xf32>
    %c0_51 = arith.constant 0 : index
    %c2_52 = arith.constant 2 : index
    %c0_53 = arith.constant 0 : index
    %c0_54 = arith.constant 0 : index
    %43 = vector.load %arg2[%c0_51, %c2_52, %c0_53, %c0_54] : memref<1x18x18x3xbf16, #tpu.memory_space<vmem>>, vector<1x16x16x3xbf16>
    %44 = vector.shape_cast %43 : vector<1x16x16x3xbf16> to vector<16x16x3xbf16>
    %45 = vector.shape_cast %44 : vector<16x16x3xbf16> to vector<256x3xbf16>
    %c2_55 = arith.constant 2 : index
    %c0_56 = arith.constant 0 : index
    %c0_57 = arith.constant 0 : index
    %c0_58 = arith.constant 0 : index
    %46 = vector.load %arg3[%c2_55, %c0_56, %c0_57, %c0_58] : memref<3x3x3x16xbf16, #tpu.memory_space<vmem>>, vector<1x1x3x16xbf16>
    %47 = vector.shape_cast %46 : vector<1x1x3x16xbf16> to vector<3x16xbf16>
    %cst_59 = arith.constant dense<0.000000e+00> : vector<256x16xf32>
    %48 = tpu.matmul %45, %47, %cst_59 {dimension_numbers = #tpu.dot_dimension_numbers<[1], [0], [0], [1], [0, 0, 1, 1], [], []>} : vector<256x3xbf16>, vector<3x16xbf16>, vector<256x16xf32> -> vector<256x16xf32>
    %49 = arith.addf %42, %48 : vector<256x16xf32>
    %c0_60 = arith.constant 0 : index
    %c2_61 = arith.constant 2 : index
    %c1_62 = arith.constant 1 : index
    %c0_63 = arith.constant 0 : index
    %50 = vector.load %arg2[%c0_60, %c2_61, %c1_62, %c0_63] : memref<1x18x18x3xbf16, #tpu.memory_space<vmem>>, vector<1x16x16x3xbf16>
    %51 = vector.shape_cast %50 : vector<1x16x16x3xbf16> to vector<16x16x3xbf16>
    %52 = vector.shape_cast %51 : vector<16x16x3xbf16> to vector<256x3xbf16>
    %c2_64 = arith.constant 2 : index
    %c1_65 = arith.constant 1 : index
    %c0_66 = arith.constant 0 : index
    %c0_67 = arith.constant 0 : index
    %53 = vector.load %arg3[%c2_64, %c1_65, %c0_66, %c0_67] : memref<3x3x3x16xbf16, #tpu.memory_space<vmem>>, vector<1x1x3x16xbf16>
    %54 = vector.shape_cast %53 : vector<1x1x3x16xbf16> to vector<3x16xbf16>
    %cst_68 = arith.constant dense<0.000000e+00> : vector<256x16xf32>
    %55 = tpu.matmul %52, %54, %cst_68 {dimension_numbers = #tpu.dot_dimension_numbers<[1], [0], [0], [1], [0, 0, 1, 1], [], []>} : vector<256x3xbf16>, vector<3x16xbf16>, vector<256x16xf32> -> vector<256x16xf32>
    %56 = arith.addf %49, %55 : vector<256x16xf32>
    %c0_69 = arith.constant 0 : index
    %c2_70 = arith.constant 2 : index
    %c2_71 = arith.constant 2 : index
    %c0_72 = arith.constant 0 : index
    %57 = vector.load %arg2[%c0_69, %c2_70, %c2_71, %c0_72] : memref<1x18x18x3xbf16, #tpu.memory_space<vmem>>, vector<1x16x16x3xbf16>
    %58 = vector.shape_cast %57 : vector<1x16x16x3xbf16> to vector<16x16x3xbf16>
    %59 = vector.shape_cast %58 : vector<16x16x3xbf16> to vector<256x3xbf16>
    %c2_73 = arith.constant 2 : index
    %c2_74 = arith.constant 2 : index
    %c0_75 = arith.constant 0 : index
    %c0_76 = arith.constant 0 : index
    %60 = vector.load %arg3[%c2_73, %c2_74, %c0_75, %c0_76] : memref<3x3x3x16xbf16, #tpu.memory_space<vmem>>, vector<1x1x3x16xbf16>
    %61 = vector.shape_cast %60 : vector<1x1x3x16xbf16> to vector<3x16xbf16>
    %cst_77 = arith.constant dense<0.000000e+00> : vector<256x16xf32>
    %62 = tpu.matmul %59, %61, %cst_77 {dimension_numbers = #tpu.dot_dimension_numbers<[1], [0], [0], [1], [0, 0, 1, 1], [], []>} : vector<256x3xbf16>, vector<3x16xbf16>, vector<256x16xf32> -> vector<256x16xf32>
    %63 = arith.addf %56, %62 : vector<256x16xf32>
    %c0_78 = arith.constant 0 : index
    %c0_79 = arith.constant 0 : index
    %64 = vector.load %arg4[%c0_78, %c0_79] : memref<1x16xf32, #tpu.memory_space<vmem>>, vector<1x16xf32>
    %65 = vector.broadcast %64 : vector<1x16xf32> to vector<256x16xf32>
    %66 = arith.mulf %63, %65 : vector<256x16xf32>
    %c0_80 = arith.constant 0 : index
    %c0_81 = arith.constant 0 : index
    %67 = vector.load %arg5[%c0_80, %c0_81] : memref<1x16xf32, #tpu.memory_space<vmem>>, vector<1x16xf32>
    %68 = vector.broadcast %67 : vector<1x16xf32> to vector<256x16xf32>
    %69 = arith.addf %66, %68 : vector<256x16xf32>
    %cst_82 = arith.constant 0.000000e+00 : f32
    %70 = vector.broadcast %cst_82 : f32 to vector<256x16xf32>
    %71 = arith.cmpf oge, %69, %70 : vector<256x16xf32>
    %cst_83 = arith.constant 2.000000e-01 : f32
    %72 = vector.broadcast %cst_83 : f32 to vector<256x16xf32>
    %73 = arith.mulf %72, %69 : vector<256x16xf32>
    %74 = arith.select %71, %69, %73 : vector<256x16xi1>, vector<256x16xf32>
    %75 = vector.shape_cast %74 : vector<256x16xf32> to vector<16x16x16xf32>
    %76 = arith.truncf %75 : vector<16x16x16xf32> to vector<16x16x16xbf16>
    %c0_84 = arith.constant 0 : index
    %c0_85 = arith.constant 0 : index
    %c0_86 = arith.constant 0 : index
    %c0_87 = arith.constant 0 : index
    %77 = vector.load %arg6[%c0_84, %c0_85, %c0_86, %c0_87] : memref<1x16x16x16xbf16, #tpu.memory_space<vmem>>, vector<1x16x16x16xbf16>
    %78 = vector.shape_cast %77 : vector<1x16x16x16xbf16> to vector<16x16x16xbf16>
    %79 = vector.shape_cast %76 : vector<16x16x16xbf16> to vector<1x16x16x16xbf16>
    tpu.vector_store %arg6[%c0_84, %c0_85, %c0_86, %c0_87], %79 {strides = array<i32>} : memref<1x16x16x16xbf16, #tpu.memory_space<vmem>>, vector<1x16x16x16xbf16>,
    return
  }
  func.func @transform_0(%arg0: i32, %arg1: i32) -> (i32, i32, i32, i32) {
    %c0_i32 = arith.constant 0 : i32
    %c0_i32_0 = arith.constant 0 : i32
    %c0_i32_1 = arith.constant 0 : i32
    %c0_i32_2 = arith.constant 0 : i32
    return %arg0, %c0_i32, %c0_i32_0, %c0_i32_1 : i32, i32, i32, i32
  }
  func.func @transform_1(%arg0: i32, %arg1: i32) -> (i32, i32, i32, i32) {
    %c0_i32 = arith.constant 0 : i32
    %c0_i32_0 = arith.constant 0 : i32
    %c0_i32_1 = arith.constant 0 : i32
    %c0_i32_2 = arith.constant 0 : i32
    return %c0_i32, %c0_i32_0, %c0_i32_1, %arg1 : i32, i32, i32, i32
  }
  func.func @transform_2(%arg0: i32, %arg1: i32) -> (i32, i32) {
    %c0_i32 = arith.constant 0 : i32
    %c0_i32_0 = arith.constant 0 : i32
    return %c0_i32, %arg1 : i32, i32
  }
  func.func @transform_3(%arg0: i32, %arg1: i32) -> (i32, i32) {
    %c0_i32 = arith.constant 0 : i32
    %c0_i32_0 = arith.constant 0 : i32
    return %c0_i32, %arg1 : i32, i32
  }
  func.func @transform_4(%arg0: i32, %arg1: i32) -> (i32, i32, i32, i32) {
    %c0_i32 = arith.constant 0 : i32
    %c0_i32_0 = arith.constant 0 : i32
    %c0_i32_1 = arith.constant 0 : i32
    return %arg0, %c0_i32, %c0_i32_0, %arg1 : i32, i32, i32, i32
  }
}

module attributes {stable_mosaic.version = 11 : i64} {
  func.func @kernel(%arg0: i32, %arg1: i32, %arg2: memref<2x18x9x16xbf16, #tpu.memory_space<vmem>>, %arg3: memref<3x3x16x16xbf16, #tpu.memory_space<vmem>>, %arg4: memref<1x16xf32, #tpu.memory_space<vmem>>, %arg5: memref<1x16xf32, #tpu.memory_space<vmem>>, %arg6: memref<1x8x8x16xbf16, #tpu.memory_space<vmem>>) attributes {dimension_semantics = [#tpu.dimension_semantics<parallel>, #tpu.dimension_semantics<parallel>], iteration_bounds = array<i64: 2, 1>, scalar_prefetch = 0 : i64, scratch_operands = 0 : i64, tpu.core_type = #tpu.core_type<tc>, window_params = [{transform_indices = @transform_0, window_bounds = array<i64: 2, 18, 9, 16>}, {transform_indices = @transform_1, window_bounds = array<i64: 3, 3, 16, 16>}, {transform_indices = @transform_2, window_bounds = array<i64: 1, 16>}, {transform_indices = @transform_3, window_bounds = array<i64: 1, 16>}, {transform_indices = @transform_4, window_bounds = array<i64: 1, 8, 8, 16>}]} {
    %cst = arith.constant 0.000000e+00 : f32
    %0 = vector.broadcast %cst : f32 to vector<64x16xf32>
    %c0 = arith.constant 0 : index
    %c0_0 = arith.constant 0 : index
    %c0_1 = arith.constant 0 : index
    %c0_2 = arith.constant 0 : index
    %1 = vector.load %arg2[%c0, %c0_0, %c0_1, %c0_2] : memref<2x18x9x16xbf16, #tpu.memory_space<vmem>>, vector<1x8x8x16xbf16>
    %2 = vector.shape_cast %1 : vector<1x8x8x16xbf16> to vector<8x8x16xbf16>
    %3 = vector.shape_cast %2 : vector<8x8x16xbf16> to vector<64x16xbf16>
    %c0_3 = arith.constant 0 : index
    %c0_4 = arith.constant 0 : index
    %c0_5 = arith.constant 0 : index
    %c0_6 = arith.constant 0 : index
    %4 = vector.load %arg3[%c0_3, %c0_4, %c0_5, %c0_6] : memref<3x3x16x16xbf16, #tpu.memory_space<vmem>>, vector<1x1x16x16xbf16>
    %5 = vector.shape_cast %4 : vector<1x1x16x16xbf16> to vector<16x16xbf16>
    %cst_7 = arith.constant dense<0.000000e+00> : vector<64x16xf32>
    %6 = tpu.matmul %3, %5, %cst_7 {dimension_numbers = #tpu.dot_dimension_numbers<[1], [0], [0], [1], [0, 0, 1, 1], [], []>} : vector<64x16xbf16>, vector<16x16xbf16>, vector<64x16xf32> -> vector<64x16xf32>
    %7 = arith.addf %0, %6 : vector<64x16xf32>
    %c0_8 = arith.constant 0 : index
    %c9 = arith.constant 9 : index
    %c0_9 = arith.constant 0 : index
    %c0_10 = arith.constant 0 : index
    %8 = vector.load %arg2[%c0_8, %c9, %c0_9, %c0_10] : memref<2x18x9x16xbf16, #tpu.memory_space<vmem>>, vector<1x8x8x16xbf16>
    %9 = vector.shape_cast %8 : vector<1x8x8x16xbf16> to vector<8x8x16xbf16>
    %10 = vector.shape_cast %9 : vector<8x8x16xbf16> to vector<64x16xbf16>
    %c0_11 = arith.constant 0 : index
    %c1 = arith.constant 1 : index
    %c0_12 = arith.constant 0 : index
    %c0_13 = arith.constant 0 : index
    %11 = vector.load %arg3[%c0_11, %c1, %c0_12, %c0_13] : memref<3x3x16x16xbf16, #tpu.memory_space<vmem>>, vector<1x1x16x16xbf16>
    %12 = vector.shape_cast %11 : vector<1x1x16x16xbf16> to vector<16x16xbf16>
    %cst_14 = arith.constant dense<0.000000e+00> : vector<64x16xf32>
    %13 = tpu.matmul %10, %12, %cst_14 {dimension_numbers = #tpu.dot_dimension_numbers<[1], [0], [0], [1], [0, 0, 1, 1], [], []>} : vector<64x16xbf16>, vector<16x16xbf16>, vector<64x16xf32> -> vector<64x16xf32>
    %14 = arith.addf %7, %13 : vector<64x16xf32>
    %c0_15 = arith.constant 0 : index
    %c0_16 = arith.constant 0 : index
    %c1_17 = arith.constant 1 : index
    %c0_18 = arith.constant 0 : index
    %15 = vector.load %arg2[%c0_15, %c0_16, %c1_17, %c0_18] : memref<2x18x9x16xbf16, #tpu.memory_space<vmem>>, vector<1x8x8x16xbf16>
    %16 = vector.shape_cast %15 : vector<1x8x8x16xbf16> to vector<8x8x16xbf16>
    %17 = vector.shape_cast %16 : vector<8x8x16xbf16> to vector<64x16xbf16>
    %c0_19 = arith.constant 0 : index
    %c2 = arith.constant 2 : index
    %c0_20 = arith.constant 0 : index
    %c0_21 = arith.constant 0 : index
    %18 = vector.load %arg3[%c0_19, %c2, %c0_20, %c0_21] : memref<3x3x16x16xbf16, #tpu.memory_space<vmem>>, vector<1x1x16x16xbf16>
    %19 = vector.shape_cast %18 : vector<1x1x16x16xbf16> to vector<16x16xbf16>
    %cst_22 = arith.constant dense<0.000000e+00> : vector<64x16xf32>
    %20 = tpu.matmul %17, %19, %cst_22 {dimension_numbers = #tpu.dot_dimension_numbers<[1], [0], [0], [1], [0, 0, 1, 1], [], []>} : vector<64x16xbf16>, vector<16x16xbf16>, vector<64x16xf32> -> vector<64x16xf32>
    %21 = arith.addf %14, %20 : vector<64x16xf32>
    %c1_23 = arith.constant 1 : index
    %c0_24 = arith.constant 0 : index
    %c0_25 = arith.constant 0 : index
    %c0_26 = arith.constant 0 : index
    %22 = vector.load %arg2[%c1_23, %c0_24, %c0_25, %c0_26] : memref<2x18x9x16xbf16, #tpu.memory_space<vmem>>, vector<1x8x8x16xbf16>
    %23 = vector.shape_cast %22 : vector<1x8x8x16xbf16> to vector<8x8x16xbf16>
    %24 = vector.shape_cast %23 : vector<8x8x16xbf16> to vector<64x16xbf16>
    %c1_27 = arith.constant 1 : index
    %c0_28 = arith.constant 0 : index
    %c0_29 = arith.constant 0 : index
    %c0_30 = arith.constant 0 : index
    %25 = vector.load %arg3[%c1_27, %c0_28, %c0_29, %c0_30] : memref<3x3x16x16xbf16, #tpu.memory_space<vmem>>, vector<1x1x16x16xbf16>
    %26 = vector.shape_cast %25 : vector<1x1x16x16xbf16> to vector<16x16xbf16>
    %cst_31 = arith.constant dense<0.000000e+00> : vector<64x16xf32>
    %27 = tpu.matmul %24, %26, %cst_31 {dimension_numbers = #tpu.dot_dimension_numbers<[1], [0], [0], [1], [0, 0, 1, 1], [], []>} : vector<64x16xbf16>, vector<16x16xbf16>, vector<64x16xf32> -> vector<64x16xf32>
    %28 = arith.addf %21, %27 : vector<64x16xf32>
    %c1_32 = arith.constant 1 : index
    %c9_33 = arith.constant 9 : index
    %c0_34 = arith.constant 0 : index
    %c0_35 = arith.constant 0 : index
    %29 = vector.load %arg2[%c1_32, %c9_33, %c0_34, %c0_35] : memref<2x18x9x16xbf16, #tpu.memory_space<vmem>>, vector<1x8x8x16xbf16>
    %30 = vector.shape_cast %29 : vector<1x8x8x16xbf16> to vector<8x8x16xbf16>
    %31 = vector.shape_cast %30 : vector<8x8x16xbf16> to vector<64x16xbf16>
    %c1_36 = arith.constant 1 : index
    %c1_37 = arith.constant 1 : index
    %c0_38 = arith.constant 0 : index
    %c0_39 = arith.constant 0 : index
    %32 = vector.load %arg3[%c1_36, %c1_37, %c0_38, %c0_39] : memref<3x3x16x16xbf16, #tpu.memory_space<vmem>>, vector<1x1x16x16xbf16>
    %33 = vector.shape_cast %32 : vector<1x1x16x16xbf16> to vector<16x16xbf16>
    %cst_40 = arith.constant dense<0.000000e+00> : vector<64x16xf32>
    %34 = tpu.matmul %31, %33, %cst_40 {dimension_numbers = #tpu.dot_dimension_numbers<[1], [0], [0], [1], [0, 0, 1, 1], [], []>} : vector<64x16xbf16>, vector<16x16xbf16>, vector<64x16xf32> -> vector<64x16xf32>
    %35 = arith.addf %28, %34 : vector<64x16xf32>
    %c1_41 = arith.constant 1 : index
    %c0_42 = arith.constant 0 : index
    %c1_43 = arith.constant 1 : index
    %c0_44 = arith.constant 0 : index
    %36 = vector.load %arg2[%c1_41, %c0_42, %c1_43, %c0_44] : memref<2x18x9x16xbf16, #tpu.memory_space<vmem>>, vector<1x8x8x16xbf16>
    %37 = vector.shape_cast %36 : vector<1x8x8x16xbf16> to vector<8x8x16xbf16>
    %38 = vector.shape_cast %37 : vector<8x8x16xbf16> to vector<64x16xbf16>
    %c1_45 = arith.constant 1 : index
    %c2_46 = arith.constant 2 : index
    %c0_47 = arith.constant 0 : index
    %c0_48 = arith.constant 0 : index
    %39 = vector.load %arg3[%c1_45, %c2_46, %c0_47, %c0_48] : memref<3x3x16x16xbf16, #tpu.memory_space<vmem>>, vector<1x1x16x16xbf16>
    %40 = vector.shape_cast %39 : vector<1x1x16x16xbf16> to vector<16x16xbf16>
    %cst_49 = arith.constant dense<0.000000e+00> : vector<64x16xf32>
    %41 = tpu.matmul %38, %40, %cst_49 {dimension_numbers = #tpu.dot_dimension_numbers<[1], [0], [0], [1], [0, 0, 1, 1], [], []>} : vector<64x16xbf16>, vector<16x16xbf16>, vector<64x16xf32> -> vector<64x16xf32>
    %42 = arith.addf %35, %41 : vector<64x16xf32>
    %c0_50 = arith.constant 0 : index
    %c1_51 = arith.constant 1 : index
    %c0_52 = arith.constant 0 : index
    %c0_53 = arith.constant 0 : index
    %43 = vector.load %arg2[%c0_50, %c1_51, %c0_52, %c0_53] : memref<2x18x9x16xbf16, #tpu.memory_space<vmem>>, vector<1x8x8x16xbf16>
    %44 = vector.shape_cast %43 : vector<1x8x8x16xbf16> to vector<8x8x16xbf16>
    %45 = vector.shape_cast %44 : vector<8x8x16xbf16> to vector<64x16xbf16>
    %c2_54 = arith.constant 2 : index
    %c0_55 = arith.constant 0 : index
    %c0_56 = arith.constant 0 : index
    %c0_57 = arith.constant 0 : index
    %46 = vector.load %arg3[%c2_54, %c0_55, %c0_56, %c0_57] : memref<3x3x16x16xbf16, #tpu.memory_space<vmem>>, vector<1x1x16x16xbf16>
    %47 = vector.shape_cast %46 : vector<1x1x16x16xbf16> to vector<16x16xbf16>
    %cst_58 = arith.constant dense<0.000000e+00> : vector<64x16xf32>
    %48 = tpu.matmul %45, %47, %cst_58 {dimension_numbers = #tpu.dot_dimension_numbers<[1], [0], [0], [1], [0, 0, 1, 1], [], []>} : vector<64x16xbf16>, vector<16x16xbf16>, vector<64x16xf32> -> vector<64x16xf32>
    %49 = arith.addf %42, %48 : vector<64x16xf32>
    %c0_59 = arith.constant 0 : index
    %c10 = arith.constant 10 : index
    %c0_60 = arith.constant 0 : index
    %c0_61 = arith.constant 0 : index
    %50 = vector.load %arg2[%c0_59, %c10, %c0_60, %c0_61] : memref<2x18x9x16xbf16, #tpu.memory_space<vmem>>, vector<1x8x8x16xbf16>
    %51 = vector.shape_cast %50 : vector<1x8x8x16xbf16> to vector<8x8x16xbf16>
    %52 = vector.shape_cast %51 : vector<8x8x16xbf16> to vector<64x16xbf16>
    %c2_62 = arith.constant 2 : index
    %c1_63 = arith.constant 1 : index
    %c0_64 = arith.constant 0 : index
    %c0_65 = arith.constant 0 : index
    %53 = vector.load %arg3[%c2_62, %c1_63, %c0_64, %c0_65] : memref<3x3x16x16xbf16, #tpu.memory_space<vmem>>, vector<1x1x16x16xbf16>
    %54 = vector.shape_cast %53 : vector<1x1x16x16xbf16> to vector<16x16xbf16>
    %cst_66 = arith.constant dense<0.000000e+00> : vector<64x16xf32>
    %55 = tpu.matmul %52, %54, %cst_66 {dimension_numbers = #tpu.dot_dimension_numbers<[1], [0], [0], [1], [0, 0, 1, 1], [], []>} : vector<64x16xbf16>, vector<16x16xbf16>, vector<64x16xf32> -> vector<64x16xf32>
    %56 = arith.addf %49, %55 : vector<64x16xf32>
    %c0_67 = arith.constant 0 : index
    %c1_68 = arith.constant 1 : index
    %c1_69 = arith.constant 1 : index
    %c0_70 = arith.constant 0 : index
    %57 = vector.load %arg2[%c0_67, %c1_68, %c1_69, %c0_70] : memref<2x18x9x16xbf16, #tpu.memory_space<vmem>>, vector<1x8x8x16xbf16>
    %58 = vector.shape_cast %57 : vector<1x8x8x16xbf16> to vector<8x8x16xbf16>
    %59 = vector.shape_cast %58 : vector<8x8x16xbf16> to vector<64x16xbf16>
    %c2_71 = arith.constant 2 : index
    %c2_72 = arith.constant 2 : index
    %c0_73 = arith.constant 0 : index
    %c0_74 = arith.constant 0 : index
    %60 = vector.load %arg3[%c2_71, %c2_72, %c0_73, %c0_74] : memref<3x3x16x16xbf16, #tpu.memory_space<vmem>>, vector<1x1x16x16xbf16>
    %61 = vector.shape_cast %60 : vector<1x1x16x16xbf16> to vector<16x16xbf16>
    %cst_75 = arith.constant dense<0.000000e+00> : vector<64x16xf32>
    %62 = tpu.matmul %59, %61, %cst_75 {dimension_numbers = #tpu.dot_dimension_numbers<[1], [0], [0], [1], [0, 0, 1, 1], [], []>} : vector<64x16xbf16>, vector<16x16xbf16>, vector<64x16xf32> -> vector<64x16xf32>
    %63 = arith.addf %56, %62 : vector<64x16xf32>
    %c0_76 = arith.constant 0 : index
    %c0_77 = arith.constant 0 : index
    %64 = vector.load %arg4[%c0_76, %c0_77] : memref<1x16xf32, #tpu.memory_space<vmem>>, vector<1x16xf32>
    %65 = vector.broadcast %64 : vector<1x16xf32> to vector<64x16xf32>
    %66 = arith.mulf %63, %65 : vector<64x16xf32>
    %c0_78 = arith.constant 0 : index
    %c0_79 = arith.constant 0 : index
    %67 = vector.load %arg5[%c0_78, %c0_79] : memref<1x16xf32, #tpu.memory_space<vmem>>, vector<1x16xf32>
    %68 = vector.broadcast %67 : vector<1x16xf32> to vector<64x16xf32>
    %69 = arith.addf %66, %68 : vector<64x16xf32>
    %cst_80 = arith.constant 0.000000e+00 : f32
    %70 = vector.broadcast %cst_80 : f32 to vector<64x16xf32>
    %71 = arith.cmpf oge, %69, %70 : vector<64x16xf32>
    %cst_81 = arith.constant 2.000000e-01 : f32
    %72 = vector.broadcast %cst_81 : f32 to vector<64x16xf32>
    %73 = arith.mulf %72, %69 : vector<64x16xf32>
    %74 = arith.select %71, %69, %73 : vector<64x16xi1>, vector<64x16xf32>
    %75 = vector.shape_cast %74 : vector<64x16xf32> to vector<8x8x16xf32>
    %76 = arith.truncf %75 : vector<8x8x16xf32> to vector<8x8x16xbf16>
    %c0_82 = arith.constant 0 : index
    %c0_83 = arith.constant 0 : index
    %c0_84 = arith.constant 0 : index
    %c0_85 = arith.constant 0 : index
    %77 = vector.load %arg6[%c0_82, %c0_83, %c0_84, %c0_85] : memref<1x8x8x16xbf16, #tpu.memory_space<vmem>>, vector<1x8x8x16xbf16>
    %78 = vector.shape_cast %77 : vector<1x8x8x16xbf16> to vector<8x8x16xbf16>
    %79 = vector.shape_cast %76 : vector<8x8x16xbf16> to vector<1x8x8x16xbf16>
    tpu.vector_store %arg6[%c0_82, %c0_83, %c0_84, %c0_85], %79 {strides = array<i32>} : memref<1x8x8x16xbf16, #tpu.memory_space<vmem>>, vector<1x8x8x16xbf16>,
    return
  }
  func.func @transform_0(%arg0: i32, %arg1: i32) -> (i32, i32, i32, i32) {
    %c0_i32 = arith.constant 0 : i32
    %c0_i32_0 = arith.constant 0 : i32
    %c0_i32_1 = arith.constant 0 : i32
    %c0_i32_2 = arith.constant 0 : i32
    return %arg0, %c0_i32, %c0_i32_0, %c0_i32_1 : i32, i32, i32, i32
  }
  func.func @transform_1(%arg0: i32, %arg1: i32) -> (i32, i32, i32, i32) {
    %c0_i32 = arith.constant 0 : i32
    %c0_i32_0 = arith.constant 0 : i32
    %c0_i32_1 = arith.constant 0 : i32
    %c0_i32_2 = arith.constant 0 : i32
    return %c0_i32, %c0_i32_0, %c0_i32_1, %arg1 : i32, i32, i32, i32
  }
  func.func @transform_2(%arg0: i32, %arg1: i32) -> (i32, i32) {
    %c0_i32 = arith.constant 0 : i32
    %c0_i32_0 = arith.constant 0 : i32
    return %c0_i32, %arg1 : i32, i32
  }
  func.func @transform_3(%arg0: i32, %arg1: i32) -> (i32, i32) {
    %c0_i32 = arith.constant 0 : i32
    %c0_i32_0 = arith.constant 0 : i32
    return %c0_i32, %arg1 : i32, i32
  }
  func.func @transform_4(%arg0: i32, %arg1: i32) -> (i32, i32, i32, i32) {
    %c0_i32 = arith.constant 0 : i32
    %c0_i32_0 = arith.constant 0 : i32
    %c0_i32_1 = arith.constant 0 : i32
    return %arg0, %c0_i32, %c0_i32_0, %arg1 : i32, i32, i32, i32
  }
}

module attributes {stable_mosaic.version = 11 : i64} {
  func.func @kernel(%arg0: i32, %arg1: i32, %arg2: memref<1x10x10x16xbf16, #tpu.memory_space<vmem>>, %arg3: memref<3x3x16x32xbf16, #tpu.memory_space<vmem>>, %arg4: memref<1x32xf32, #tpu.memory_space<vmem>>, %arg5: memref<1x32xf32, #tpu.memory_space<vmem>>, %arg6: memref<1x8x8x32xbf16, #tpu.memory_space<vmem>>) attributes {dimension_semantics = [#tpu.dimension_semantics<parallel>, #tpu.dimension_semantics<parallel>], iteration_bounds = array<i64: 2, 1>, scalar_prefetch = 0 : i64, scratch_operands = 0 : i64, tpu.core_type = #tpu.core_type<tc>, window_params = [{transform_indices = @transform_0, window_bounds = array<i64: 1, 10, 10, 16>}, {transform_indices = @transform_1, window_bounds = array<i64: 3, 3, 16, 32>}, {transform_indices = @transform_2, window_bounds = array<i64: 1, 32>}, {transform_indices = @transform_3, window_bounds = array<i64: 1, 32>}, {transform_indices = @transform_4, window_bounds = array<i64: 1, 8, 8, 32>}]} {
    %cst = arith.constant 0.000000e+00 : f32
    %0 = vector.broadcast %cst : f32 to vector<64x32xf32>
    %c0 = arith.constant 0 : index
    %c0_0 = arith.constant 0 : index
    %c0_1 = arith.constant 0 : index
    %c0_2 = arith.constant 0 : index
    %1 = vector.load %arg2[%c0, %c0_0, %c0_1, %c0_2] : memref<1x10x10x16xbf16, #tpu.memory_space<vmem>>, vector<1x8x8x16xbf16>
    %2 = vector.shape_cast %1 : vector<1x8x8x16xbf16> to vector<8x8x16xbf16>
    %3 = vector.shape_cast %2 : vector<8x8x16xbf16> to vector<64x16xbf16>
    %c0_3 = arith.constant 0 : index
    %c0_4 = arith.constant 0 : index
    %c0_5 = arith.constant 0 : index
    %c0_6 = arith.constant 0 : index
    %4 = vector.load %arg3[%c0_3, %c0_4, %c0_5, %c0_6] : memref<3x3x16x32xbf16, #tpu.memory_space<vmem>>, vector<1x1x16x32xbf16>
    %5 = vector.shape_cast %4 : vector<1x1x16x32xbf16> to vector<16x32xbf16>
    %cst_7 = arith.constant dense<0.000000e+00> : vector<64x32xf32>
    %6 = tpu.matmul %3, %5, %cst_7 {dimension_numbers = #tpu.dot_dimension_numbers<[1], [0], [0], [1], [0, 0, 1, 1], [], []>} : vector<64x16xbf16>, vector<16x32xbf16>, vector<64x32xf32> -> vector<64x32xf32>
    %7 = arith.addf %0, %6 : vector<64x32xf32>
    %c0_8 = arith.constant 0 : index
    %c0_9 = arith.constant 0 : index
    %c1 = arith.constant 1 : index
    %c0_10 = arith.constant 0 : index
    %8 = vector.load %arg2[%c0_8, %c0_9, %c1, %c0_10] : memref<1x10x10x16xbf16, #tpu.memory_space<vmem>>, vector<1x8x8x16xbf16>
    %9 = vector.shape_cast %8 : vector<1x8x8x16xbf16> to vector<8x8x16xbf16>
    %10 = vector.shape_cast %9 : vector<8x8x16xbf16> to vector<64x16xbf16>
    %c0_11 = arith.constant 0 : index
    %c1_12 = arith.constant 1 : index
    %c0_13 = arith.constant 0 : index
    %c0_14 = arith.constant 0 : index
    %11 = vector.load %arg3[%c0_11, %c1_12, %c0_13, %c0_14] : memref<3x3x16x32xbf16, #tpu.memory_space<vmem>>, vector<1x1x16x32xbf16>
    %12 = vector.shape_cast %11 : vector<1x1x16x32xbf16> to vector<16x32xbf16>
    %cst_15 = arith.constant dense<0.000000e+00> : vector<64x32xf32>
    %13 = tpu.matmul %10, %12, %cst_15 {dimension_numbers = #tpu.dot_dimension_numbers<[1], [0], [0], [1], [0, 0, 1, 1], [], []>} : vector<64x16xbf16>, vector<16x32xbf16>, vector<64x32xf32> -> vector<64x32xf32>
    %14 = arith.addf %7, %13 : vector<64x32xf32>
    %c0_16 = arith.constant 0 : index
    %c0_17 = arith.constant 0 : index
    %c2 = arith.constant 2 : index
    %c0_18 = arith.constant 0 : index
    %15 = vector.load %arg2[%c0_16, %c0_17, %c2, %c0_18] : memref<1x10x10x16xbf16, #tpu.memory_space<vmem>>, vector<1x8x8x16xbf16>
    %16 = vector.shape_cast %15 : vector<1x8x8x16xbf16> to vector<8x8x16xbf16>
    %17 = vector.shape_cast %16 : vector<8x8x16xbf16> to vector<64x16xbf16>
    %c0_19 = arith.constant 0 : index
    %c2_20 = arith.constant 2 : index
    %c0_21 = arith.constant 0 : index
    %c0_22 = arith.constant 0 : index
    %18 = vector.load %arg3[%c0_19, %c2_20, %c0_21, %c0_22] : memref<3x3x16x32xbf16, #tpu.memory_space<vmem>>, vector<1x1x16x32xbf16>
    %19 = vector.shape_cast %18 : vector<1x1x16x32xbf16> to vector<16x32xbf16>
    %cst_23 = arith.constant dense<0.000000e+00> : vector<64x32xf32>
    %20 = tpu.matmul %17, %19, %cst_23 {dimension_numbers = #tpu.dot_dimension_numbers<[1], [0], [0], [1], [0, 0, 1, 1], [], []>} : vector<64x16xbf16>, vector<16x32xbf16>, vector<64x32xf32> -> vector<64x32xf32>
    %21 = arith.addf %14, %20 : vector<64x32xf32>
    %c0_24 = arith.constant 0 : index
    %c1_25 = arith.constant 1 : index
    %c0_26 = arith.constant 0 : index
    %c0_27 = arith.constant 0 : index
    %22 = vector.load %arg2[%c0_24, %c1_25, %c0_26, %c0_27] : memref<1x10x10x16xbf16, #tpu.memory_space<vmem>>, vector<1x8x8x16xbf16>
    %23 = vector.shape_cast %22 : vector<1x8x8x16xbf16> to vector<8x8x16xbf16>
    %24 = vector.shape_cast %23 : vector<8x8x16xbf16> to vector<64x16xbf16>
    %c1_28 = arith.constant 1 : index
    %c0_29 = arith.constant 0 : index
    %c0_30 = arith.constant 0 : index
    %c0_31 = arith.constant 0 : index
    %25 = vector.load %arg3[%c1_28, %c0_29, %c0_30, %c0_31] : memref<3x3x16x32xbf16, #tpu.memory_space<vmem>>, vector<1x1x16x32xbf16>
    %26 = vector.shape_cast %25 : vector<1x1x16x32xbf16> to vector<16x32xbf16>
    %cst_32 = arith.constant dense<0.000000e+00> : vector<64x32xf32>
    %27 = tpu.matmul %24, %26, %cst_32 {dimension_numbers = #tpu.dot_dimension_numbers<[1], [0], [0], [1], [0, 0, 1, 1], [], []>} : vector<64x16xbf16>, vector<16x32xbf16>, vector<64x32xf32> -> vector<64x32xf32>
    %28 = arith.addf %21, %27 : vector<64x32xf32>
    %c0_33 = arith.constant 0 : index
    %c1_34 = arith.constant 1 : index
    %c1_35 = arith.constant 1 : index
    %c0_36 = arith.constant 0 : index
    %29 = vector.load %arg2[%c0_33, %c1_34, %c1_35, %c0_36] : memref<1x10x10x16xbf16, #tpu.memory_space<vmem>>, vector<1x8x8x16xbf16>
    %30 = vector.shape_cast %29 : vector<1x8x8x16xbf16> to vector<8x8x16xbf16>
    %31 = vector.shape_cast %30 : vector<8x8x16xbf16> to vector<64x16xbf16>
    %c1_37 = arith.constant 1 : index
    %c1_38 = arith.constant 1 : index
    %c0_39 = arith.constant 0 : index
    %c0_40 = arith.constant 0 : index
    %32 = vector.load %arg3[%c1_37, %c1_38, %c0_39, %c0_40] : memref<3x3x16x32xbf16, #tpu.memory_space<vmem>>, vector<1x1x16x32xbf16>
    %33 = vector.shape_cast %32 : vector<1x1x16x32xbf16> to vector<16x32xbf16>
    %cst_41 = arith.constant dense<0.000000e+00> : vector<64x32xf32>
    %34 = tpu.matmul %31, %33, %cst_41 {dimension_numbers = #tpu.dot_dimension_numbers<[1], [0], [0], [1], [0, 0, 1, 1], [], []>} : vector<64x16xbf16>, vector<16x32xbf16>, vector<64x32xf32> -> vector<64x32xf32>
    %35 = arith.addf %28, %34 : vector<64x32xf32>
    %c0_42 = arith.constant 0 : index
    %c1_43 = arith.constant 1 : index
    %c2_44 = arith.constant 2 : index
    %c0_45 = arith.constant 0 : index
    %36 = vector.load %arg2[%c0_42, %c1_43, %c2_44, %c0_45] : memref<1x10x10x16xbf16, #tpu.memory_space<vmem>>, vector<1x8x8x16xbf16>
    %37 = vector.shape_cast %36 : vector<1x8x8x16xbf16> to vector<8x8x16xbf16>
    %38 = vector.shape_cast %37 : vector<8x8x16xbf16> to vector<64x16xbf16>
    %c1_46 = arith.constant 1 : index
    %c2_47 = arith.constant 2 : index
    %c0_48 = arith.constant 0 : index
    %c0_49 = arith.constant 0 : index
    %39 = vector.load %arg3[%c1_46, %c2_47, %c0_48, %c0_49] : memref<3x3x16x32xbf16, #tpu.memory_space<vmem>>, vector<1x1x16x32xbf16>
    %40 = vector.shape_cast %39 : vector<1x1x16x32xbf16> to vector<16x32xbf16>
    %cst_50 = arith.constant dense<0.000000e+00> : vector<64x32xf32>
    %41 = tpu.matmul %38, %40, %cst_50 {dimension_numbers = #tpu.dot_dimension_numbers<[1], [0], [0], [1], [0, 0, 1, 1], [], []>} : vector<64x16xbf16>, vector<16x32xbf16>, vector<64x32xf32> -> vector<64x32xf32>
    %42 = arith.addf %35, %41 : vector<64x32xf32>
    %c0_51 = arith.constant 0 : index
    %c2_52 = arith.constant 2 : index
    %c0_53 = arith.constant 0 : index
    %c0_54 = arith.constant 0 : index
    %43 = vector.load %arg2[%c0_51, %c2_52, %c0_53, %c0_54] : memref<1x10x10x16xbf16, #tpu.memory_space<vmem>>, vector<1x8x8x16xbf16>
    %44 = vector.shape_cast %43 : vector<1x8x8x16xbf16> to vector<8x8x16xbf16>
    %45 = vector.shape_cast %44 : vector<8x8x16xbf16> to vector<64x16xbf16>
    %c2_55 = arith.constant 2 : index
    %c0_56 = arith.constant 0 : index
    %c0_57 = arith.constant 0 : index
    %c0_58 = arith.constant 0 : index
    %46 = vector.load %arg3[%c2_55, %c0_56, %c0_57, %c0_58] : memref<3x3x16x32xbf16, #tpu.memory_space<vmem>>, vector<1x1x16x32xbf16>
    %47 = vector.shape_cast %46 : vector<1x1x16x32xbf16> to vector<16x32xbf16>
    %cst_59 = arith.constant dense<0.000000e+00> : vector<64x32xf32>
    %48 = tpu.matmul %45, %47, %cst_59 {dimension_numbers = #tpu.dot_dimension_numbers<[1], [0], [0], [1], [0, 0, 1, 1], [], []>} : vector<64x16xbf16>, vector<16x32xbf16>, vector<64x32xf32> -> vector<64x32xf32>
    %49 = arith.addf %42, %48 : vector<64x32xf32>
    %c0_60 = arith.constant 0 : index
    %c2_61 = arith.constant 2 : index
    %c1_62 = arith.constant 1 : index
    %c0_63 = arith.constant 0 : index
    %50 = vector.load %arg2[%c0_60, %c2_61, %c1_62, %c0_63] : memref<1x10x10x16xbf16, #tpu.memory_space<vmem>>, vector<1x8x8x16xbf16>
    %51 = vector.shape_cast %50 : vector<1x8x8x16xbf16> to vector<8x8x16xbf16>
    %52 = vector.shape_cast %51 : vector<8x8x16xbf16> to vector<64x16xbf16>
    %c2_64 = arith.constant 2 : index
    %c1_65 = arith.constant 1 : index
    %c0_66 = arith.constant 0 : index
    %c0_67 = arith.constant 0 : index
    %53 = vector.load %arg3[%c2_64, %c1_65, %c0_66, %c0_67] : memref<3x3x16x32xbf16, #tpu.memory_space<vmem>>, vector<1x1x16x32xbf16>
    %54 = vector.shape_cast %53 : vector<1x1x16x32xbf16> to vector<16x32xbf16>
    %cst_68 = arith.constant dense<0.000000e+00> : vector<64x32xf32>
    %55 = tpu.matmul %52, %54, %cst_68 {dimension_numbers = #tpu.dot_dimension_numbers<[1], [0], [0], [1], [0, 0, 1, 1], [], []>} : vector<64x16xbf16>, vector<16x32xbf16>, vector<64x32xf32> -> vector<64x32xf32>
    %56 = arith.addf %49, %55 : vector<64x32xf32>
    %c0_69 = arith.constant 0 : index
    %c2_70 = arith.constant 2 : index
    %c2_71 = arith.constant 2 : index
    %c0_72 = arith.constant 0 : index
    %57 = vector.load %arg2[%c0_69, %c2_70, %c2_71, %c0_72] : memref<1x10x10x16xbf16, #tpu.memory_space<vmem>>, vector<1x8x8x16xbf16>
    %58 = vector.shape_cast %57 : vector<1x8x8x16xbf16> to vector<8x8x16xbf16>
    %59 = vector.shape_cast %58 : vector<8x8x16xbf16> to vector<64x16xbf16>
    %c2_73 = arith.constant 2 : index
    %c2_74 = arith.constant 2 : index
    %c0_75 = arith.constant 0 : index
    %c0_76 = arith.constant 0 : index
    %60 = vector.load %arg3[%c2_73, %c2_74, %c0_75, %c0_76] : memref<3x3x16x32xbf16, #tpu.memory_space<vmem>>, vector<1x1x16x32xbf16>
    %61 = vector.shape_cast %60 : vector<1x1x16x32xbf16> to vector<16x32xbf16>
    %cst_77 = arith.constant dense<0.000000e+00> : vector<64x32xf32>
    %62 = tpu.matmul %59, %61, %cst_77 {dimension_numbers = #tpu.dot_dimension_numbers<[1], [0], [0], [1], [0, 0, 1, 1], [], []>} : vector<64x16xbf16>, vector<16x32xbf16>, vector<64x32xf32> -> vector<64x32xf32>
    %63 = arith.addf %56, %62 : vector<64x32xf32>
    %c0_78 = arith.constant 0 : index
    %c0_79 = arith.constant 0 : index
    %64 = vector.load %arg4[%c0_78, %c0_79] : memref<1x32xf32, #tpu.memory_space<vmem>>, vector<1x32xf32>
    %65 = vector.broadcast %64 : vector<1x32xf32> to vector<64x32xf32>
    %66 = arith.mulf %63, %65 : vector<64x32xf32>
    %c0_80 = arith.constant 0 : index
    %c0_81 = arith.constant 0 : index
    %67 = vector.load %arg5[%c0_80, %c0_81] : memref<1x32xf32, #tpu.memory_space<vmem>>, vector<1x32xf32>
    %68 = vector.broadcast %67 : vector<1x32xf32> to vector<64x32xf32>
    %69 = arith.addf %66, %68 : vector<64x32xf32>
    %cst_82 = arith.constant 0.000000e+00 : f32
    %70 = vector.broadcast %cst_82 : f32 to vector<64x32xf32>
    %71 = arith.cmpf oge, %69, %70 : vector<64x32xf32>
    %cst_83 = arith.constant 2.000000e-01 : f32
    %72 = vector.broadcast %cst_83 : f32 to vector<64x32xf32>
    %73 = arith.mulf %72, %69 : vector<64x32xf32>
    %74 = arith.select %71, %69, %73 : vector<64x32xi1>, vector<64x32xf32>
    %75 = vector.shape_cast %74 : vector<64x32xf32> to vector<8x8x32xf32>
    %76 = arith.truncf %75 : vector<8x8x32xf32> to vector<8x8x32xbf16>
    %c0_84 = arith.constant 0 : index
    %c0_85 = arith.constant 0 : index
    %c0_86 = arith.constant 0 : index
    %c0_87 = arith.constant 0 : index
    %77 = vector.load %arg6[%c0_84, %c0_85, %c0_86, %c0_87] : memref<1x8x8x32xbf16, #tpu.memory_space<vmem>>, vector<1x8x8x32xbf16>
    %78 = vector.shape_cast %77 : vector<1x8x8x32xbf16> to vector<8x8x32xbf16>
    %79 = vector.shape_cast %76 : vector<8x8x32xbf16> to vector<1x8x8x32xbf16>
    tpu.vector_store %arg6[%c0_84, %c0_85, %c0_86, %c0_87], %79 {strides = array<i32>} : memref<1x8x8x32xbf16, #tpu.memory_space<vmem>>, vector<1x8x8x32xbf16>,
    return
  }
  func.func @transform_0(%arg0: i32, %arg1: i32) -> (i32, i32, i32, i32) {
    %c0_i32 = arith.constant 0 : i32
    %c0_i32_0 = arith.constant 0 : i32
    %c0_i32_1 = arith.constant 0 : i32
    %c0_i32_2 = arith.constant 0 : i32
    return %arg0, %c0_i32, %c0_i32_0, %c0_i32_1 : i32, i32, i32, i32
  }
  func.func @transform_1(%arg0: i32, %arg1: i32) -> (i32, i32, i32, i32) {
    %c0_i32 = arith.constant 0 : i32
    %c0_i32_0 = arith.constant 0 : i32
    %c0_i32_1 = arith.constant 0 : i32
    %c0_i32_2 = arith.constant 0 : i32
    return %c0_i32, %c0_i32_0, %c0_i32_1, %arg1 : i32, i32, i32, i32
  }
  func.func @transform_2(%arg0: i32, %arg1: i32) -> (i32, i32) {
    %c0_i32 = arith.constant 0 : i32
    %c0_i32_0 = arith.constant 0 : i32
    return %c0_i32, %arg1 : i32, i32
  }
  func.func @transform_3(%arg0: i32, %arg1: i32) -> (i32, i32) {
    %c0_i32 = arith.constant 0 : i32
    %c0_i32_0 = arith.constant 0 : i32
    return %c0_i32, %arg1 : i32, i32
  }
  func.func @transform_4(%arg0: i32, %arg1: i32) -> (i32, i32, i32, i32) {
    %c0_i32 = arith.constant 0 : i32
    %c0_i32_0 = arith.constant 0 : i32
    %c0_i32_1 = arith.constant 0 : i32
    return %arg0, %c0_i32, %c0_i32_0, %arg1 : i32, i32, i32, i32
  }
}

module attributes {stable_mosaic.version = 11 : i64} {
  func.func @kernel(%arg0: i32, %arg1: i32, %arg2: memref<2x10x5x32xbf16, #tpu.memory_space<vmem>>, %arg3: memref<3x3x32x32xbf16, #tpu.memory_space<vmem>>, %arg4: memref<1x32xf32, #tpu.memory_space<vmem>>, %arg5: memref<1x32xf32, #tpu.memory_space<vmem>>, %arg6: memref<1x4x4x32xbf16, #tpu.memory_space<vmem>>) attributes {dimension_semantics = [#tpu.dimension_semantics<parallel>, #tpu.dimension_semantics<parallel>], iteration_bounds = array<i64: 2, 1>, scalar_prefetch = 0 : i64, scratch_operands = 0 : i64, tpu.core_type = #tpu.core_type<tc>, window_params = [{transform_indices = @transform_0, window_bounds = array<i64: 2, 10, 5, 32>}, {transform_indices = @transform_1, window_bounds = array<i64: 3, 3, 32, 32>}, {transform_indices = @transform_2, window_bounds = array<i64: 1, 32>}, {transform_indices = @transform_3, window_bounds = array<i64: 1, 32>}, {transform_indices = @transform_4, window_bounds = array<i64: 1, 4, 4, 32>}]} {
    %cst = arith.constant 0.000000e+00 : f32
    %0 = vector.broadcast %cst : f32 to vector<16x32xf32>
    %c0 = arith.constant 0 : index
    %c0_0 = arith.constant 0 : index
    %c0_1 = arith.constant 0 : index
    %c0_2 = arith.constant 0 : index
    %1 = vector.load %arg2[%c0, %c0_0, %c0_1, %c0_2] : memref<2x10x5x32xbf16, #tpu.memory_space<vmem>>, vector<1x4x4x32xbf16>
    %2 = vector.shape_cast %1 : vector<1x4x4x32xbf16> to vector<4x4x32xbf16>
    %3 = vector.shape_cast %2 : vector<4x4x32xbf16> to vector<16x32xbf16>
    %c0_3 = arith.constant 0 : index
    %c0_4 = arith.constant 0 : index
    %c0_5 = arith.constant 0 : index
    %c0_6 = arith.constant 0 : index
    %4 = vector.load %arg3[%c0_3, %c0_4, %c0_5, %c0_6] : memref<3x3x32x32xbf16, #tpu.memory_space<vmem>>, vector<1x1x32x32xbf16>
    %5 = vector.shape_cast %4 : vector<1x1x32x32xbf16> to vector<32x32xbf16>
    %cst_7 = arith.constant dense<0.000000e+00> : vector<16x32xf32>
    %6 = tpu.matmul %3, %5, %cst_7 {dimension_numbers = #tpu.dot_dimension_numbers<[1], [0], [0], [1], [0, 0, 1, 1], [], []>} : vector<16x32xbf16>, vector<32x32xbf16>, vector<16x32xf32> -> vector<16x32xf32>
    %7 = arith.addf %0, %6 : vector<16x32xf32>
    %c0_8 = arith.constant 0 : index
    %c5 = arith.constant 5 : index
    %c0_9 = arith.constant 0 : index
    %c0_10 = arith.constant 0 : index
    %8 = vector.load %arg2[%c0_8, %c5, %c0_9, %c0_10] : memref<2x10x5x32xbf16, #tpu.memory_space<vmem>>, vector<1x4x4x32xbf16>
    %9 = vector.shape_cast %8 : vector<1x4x4x32xbf16> to vector<4x4x32xbf16>
    %10 = vector.shape_cast %9 : vector<4x4x32xbf16> to vector<16x32xbf16>
    %c0_11 = arith.constant 0 : index
    %c1 = arith.constant 1 : index
    %c0_12 = arith.constant 0 : index
    %c0_13 = arith.constant 0 : index
    %11 = vector.load %arg3[%c0_11, %c1, %c0_12, %c0_13] : memref<3x3x32x32xbf16, #tpu.memory_space<vmem>>, vector<1x1x32x32xbf16>
    %12 = vector.shape_cast %11 : vector<1x1x32x32xbf16> to vector<32x32xbf16>
    %cst_14 = arith.constant dense<0.000000e+00> : vector<16x32xf32>
    %13 = tpu.matmul %10, %12, %cst_14 {dimension_numbers = #tpu.dot_dimension_numbers<[1], [0], [0], [1], [0, 0, 1, 1], [], []>} : vector<16x32xbf16>, vector<32x32xbf16>, vector<16x32xf32> -> vector<16x32xf32>
    %14 = arith.addf %7, %13 : vector<16x32xf32>
    %c0_15 = arith.constant 0 : index
    %c0_16 = arith.constant 0 : index
    %c1_17 = arith.constant 1 : index
    %c0_18 = arith.constant 0 : index
    %15 = vector.load %arg2[%c0_15, %c0_16, %c1_17, %c0_18] : memref<2x10x5x32xbf16, #tpu.memory_space<vmem>>, vector<1x4x4x32xbf16>
    %16 = vector.shape_cast %15 : vector<1x4x4x32xbf16> to vector<4x4x32xbf16>
    %17 = vector.shape_cast %16 : vector<4x4x32xbf16> to vector<16x32xbf16>
    %c0_19 = arith.constant 0 : index
    %c2 = arith.constant 2 : index
    %c0_20 = arith.constant 0 : index
    %c0_21 = arith.constant 0 : index
    %18 = vector.load %arg3[%c0_19, %c2, %c0_20, %c0_21] : memref<3x3x32x32xbf16, #tpu.memory_space<vmem>>, vector<1x1x32x32xbf16>
    %19 = vector.shape_cast %18 : vector<1x1x32x32xbf16> to vector<32x32xbf16>
    %cst_22 = arith.constant dense<0.000000e+00> : vector<16x32xf32>
    %20 = tpu.matmul %17, %19, %cst_22 {dimension_numbers = #tpu.dot_dimension_numbers<[1], [0], [0], [1], [0, 0, 1, 1], [], []>} : vector<16x32xbf16>, vector<32x32xbf16>, vector<16x32xf32> -> vector<16x32xf32>
    %21 = arith.addf %14, %20 : vector<16x32xf32>
    %c1_23 = arith.constant 1 : index
    %c0_24 = arith.constant 0 : index
    %c0_25 = arith.constant 0 : index
    %c0_26 = arith.constant 0 : index
    %22 = vector.load %arg2[%c1_23, %c0_24, %c0_25, %c0_26] : memref<2x10x5x32xbf16, #tpu.memory_space<vmem>>, vector<1x4x4x32xbf16>
    %23 = vector.shape_cast %22 : vector<1x4x4x32xbf16> to vector<4x4x32xbf16>
    %24 = vector.shape_cast %23 : vector<4x4x32xbf16> to vector<16x32xbf16>
    %c1_27 = arith.constant 1 : index
    %c0_28 = arith.constant 0 : index
    %c0_29 = arith.constant 0 : index
    %c0_30 = arith.constant 0 : index
    %25 = vector.load %arg3[%c1_27, %c0_28, %c0_29, %c0_30] : memref<3x3x32x32xbf16, #tpu.memory_space<vmem>>, vector<1x1x32x32xbf16>
    %26 = vector.shape_cast %25 : vector<1x1x32x32xbf16> to vector<32x32xbf16>
    %cst_31 = arith.constant dense<0.000000e+00> : vector<16x32xf32>
    %27 = tpu.matmul %24, %26, %cst_31 {dimension_numbers = #tpu.dot_dimension_numbers<[1], [0], [0], [1], [0, 0, 1, 1], [], []>} : vector<16x32xbf16>, vector<32x32xbf16>, vector<16x32xf32> -> vector<16x32xf32>
    %28 = arith.addf %21, %27 : vector<16x32xf32>
    %c1_32 = arith.constant 1 : index
    %c5_33 = arith.constant 5 : index
    %c0_34 = arith.constant 0 : index
    %c0_35 = arith.constant 0 : index
    %29 = vector.load %arg2[%c1_32, %c5_33, %c0_34, %c0_35] : memref<2x10x5x32xbf16, #tpu.memory_space<vmem>>, vector<1x4x4x32xbf16>
    %30 = vector.shape_cast %29 : vector<1x4x4x32xbf16> to vector<4x4x32xbf16>
    %31 = vector.shape_cast %30 : vector<4x4x32xbf16> to vector<16x32xbf16>
    %c1_36 = arith.constant 1 : index
    %c1_37 = arith.constant 1 : index
    %c0_38 = arith.constant 0 : index
    %c0_39 = arith.constant 0 : index
    %32 = vector.load %arg3[%c1_36, %c1_37, %c0_38, %c0_39] : memref<3x3x32x32xbf16, #tpu.memory_space<vmem>>, vector<1x1x32x32xbf16>
    %33 = vector.shape_cast %32 : vector<1x1x32x32xbf16> to vector<32x32xbf16>
    %cst_40 = arith.constant dense<0.000000e+00> : vector<16x32xf32>
    %34 = tpu.matmul %31, %33, %cst_40 {dimension_numbers = #tpu.dot_dimension_numbers<[1], [0], [0], [1], [0, 0, 1, 1], [], []>} : vector<16x32xbf16>, vector<32x32xbf16>, vector<16x32xf32> -> vector<16x32xf32>
    %35 = arith.addf %28, %34 : vector<16x32xf32>
    %c1_41 = arith.constant 1 : index
    %c0_42 = arith.constant 0 : index
    %c1_43 = arith.constant 1 : index
    %c0_44 = arith.constant 0 : index
    %36 = vector.load %arg2[%c1_41, %c0_42, %c1_43, %c0_44] : memref<2x10x5x32xbf16, #tpu.memory_space<vmem>>, vector<1x4x4x32xbf16>
    %37 = vector.shape_cast %36 : vector<1x4x4x32xbf16> to vector<4x4x32xbf16>
    %38 = vector.shape_cast %37 : vector<4x4x32xbf16> to vector<16x32xbf16>
    %c1_45 = arith.constant 1 : index
    %c2_46 = arith.constant 2 : index
    %c0_47 = arith.constant 0 : index
    %c0_48 = arith.constant 0 : index
    %39 = vector.load %arg3[%c1_45, %c2_46, %c0_47, %c0_48] : memref<3x3x32x32xbf16, #tpu.memory_space<vmem>>, vector<1x1x32x32xbf16>
    %40 = vector.shape_cast %39 : vector<1x1x32x32xbf16> to vector<32x32xbf16>
    %cst_49 = arith.constant dense<0.000000e+00> : vector<16x32xf32>
    %41 = tpu.matmul %38, %40, %cst_49 {dimension_numbers = #tpu.dot_dimension_numbers<[1], [0], [0], [1], [0, 0, 1, 1], [], []>} : vector<16x32xbf16>, vector<32x32xbf16>, vector<16x32xf32> -> vector<16x32xf32>
    %42 = arith.addf %35, %41 : vector<16x32xf32>
    %c0_50 = arith.constant 0 : index
    %c1_51 = arith.constant 1 : index
    %c0_52 = arith.constant 0 : index
    %c0_53 = arith.constant 0 : index
    %43 = vector.load %arg2[%c0_50, %c1_51, %c0_52, %c0_53] : memref<2x10x5x32xbf16, #tpu.memory_space<vmem>>, vector<1x4x4x32xbf16>
    %44 = vector.shape_cast %43 : vector<1x4x4x32xbf16> to vector<4x4x32xbf16>
    %45 = vector.shape_cast %44 : vector<4x4x32xbf16> to vector<16x32xbf16>
    %c2_54 = arith.constant 2 : index
    %c0_55 = arith.constant 0 : index
    %c0_56 = arith.constant 0 : index
    %c0_57 = arith.constant 0 : index
    %46 = vector.load %arg3[%c2_54, %c0_55, %c0_56, %c0_57] : memref<3x3x32x32xbf16, #tpu.memory_space<vmem>>, vector<1x1x32x32xbf16>
    %47 = vector.shape_cast %46 : vector<1x1x32x32xbf16> to vector<32x32xbf16>
    %cst_58 = arith.constant dense<0.000000e+00> : vector<16x32xf32>
    %48 = tpu.matmul %45, %47, %cst_58 {dimension_numbers = #tpu.dot_dimension_numbers<[1], [0], [0], [1], [0, 0, 1, 1], [], []>} : vector<16x32xbf16>, vector<32x32xbf16>, vector<16x32xf32> -> vector<16x32xf32>
    %49 = arith.addf %42, %48 : vector<16x32xf32>
    %c0_59 = arith.constant 0 : index
    %c6 = arith.constant 6 : index
    %c0_60 = arith.constant 0 : index
    %c0_61 = arith.constant 0 : index
    %50 = vector.load %arg2[%c0_59, %c6, %c0_60, %c0_61] : memref<2x10x5x32xbf16, #tpu.memory_space<vmem>>, vector<1x4x4x32xbf16>
    %51 = vector.shape_cast %50 : vector<1x4x4x32xbf16> to vector<4x4x32xbf16>
    %52 = vector.shape_cast %51 : vector<4x4x32xbf16> to vector<16x32xbf16>
    %c2_62 = arith.constant 2 : index
    %c1_63 = arith.constant 1 : index
    %c0_64 = arith.constant 0 : index
    %c0_65 = arith.constant 0 : index
    %53 = vector.load %arg3[%c2_62, %c1_63, %c0_64, %c0_65] : memref<3x3x32x32xbf16, #tpu.memory_space<vmem>>, vector<1x1x32x32xbf16>
    %54 = vector.shape_cast %53 : vector<1x1x32x32xbf16> to vector<32x32xbf16>
    %cst_66 = arith.constant dense<0.000000e+00> : vector<16x32xf32>
    %55 = tpu.matmul %52, %54, %cst_66 {dimension_numbers = #tpu.dot_dimension_numbers<[1], [0], [0], [1], [0, 0, 1, 1], [], []>} : vector<16x32xbf16>, vector<32x32xbf16>, vector<16x32xf32> -> vector<16x32xf32>
    %56 = arith.addf %49, %55 : vector<16x32xf32>
    %c0_67 = arith.constant 0 : index
    %c1_68 = arith.constant 1 : index
    %c1_69 = arith.constant 1 : index
    %c0_70 = arith.constant 0 : index
    %57 = vector.load %arg2[%c0_67, %c1_68, %c1_69, %c0_70] : memref<2x10x5x32xbf16, #tpu.memory_space<vmem>>, vector<1x4x4x32xbf16>
    %58 = vector.shape_cast %57 : vector<1x4x4x32xbf16> to vector<4x4x32xbf16>
    %59 = vector.shape_cast %58 : vector<4x4x32xbf16> to vector<16x32xbf16>
    %c2_71 = arith.constant 2 : index
    %c2_72 = arith.constant 2 : index
    %c0_73 = arith.constant 0 : index
    %c0_74 = arith.constant 0 : index
    %60 = vector.load %arg3[%c2_71, %c2_72, %c0_73, %c0_74] : memref<3x3x32x32xbf16, #tpu.memory_space<vmem>>, vector<1x1x32x32xbf16>
    %61 = vector.shape_cast %60 : vector<1x1x32x32xbf16> to vector<32x32xbf16>
    %cst_75 = arith.constant dense<0.000000e+00> : vector<16x32xf32>
    %62 = tpu.matmul %59, %61, %cst_75 {dimension_numbers = #tpu.dot_dimension_numbers<[1], [0], [0], [1], [0, 0, 1, 1], [], []>} : vector<16x32xbf16>, vector<32x32xbf16>, vector<16x32xf32> -> vector<16x32xf32>
    %63 = arith.addf %56, %62 : vector<16x32xf32>
    %c0_76 = arith.constant 0 : index
    %c0_77 = arith.constant 0 : index
    %64 = vector.load %arg4[%c0_76, %c0_77] : memref<1x32xf32, #tpu.memory_space<vmem>>, vector<1x32xf32>
    %65 = vector.broadcast %64 : vector<1x32xf32> to vector<16x32xf32>
    %66 = arith.mulf %63, %65 : vector<16x32xf32>
    %c0_78 = arith.constant 0 : index
    %c0_79 = arith.constant 0 : index
    %67 = vector.load %arg5[%c0_78, %c0_79] : memref<1x32xf32, #tpu.memory_space<vmem>>, vector<1x32xf32>
    %68 = vector.broadcast %67 : vector<1x32xf32> to vector<16x32xf32>
    %69 = arith.addf %66, %68 : vector<16x32xf32>
    %cst_80 = arith.constant 0.000000e+00 : f32
    %70 = vector.broadcast %cst_80 : f32 to vector<16x32xf32>
    %71 = arith.cmpf oge, %69, %70 : vector<16x32xf32>
    %cst_81 = arith.constant 2.000000e-01 : f32
    %72 = vector.broadcast %cst_81 : f32 to vector<16x32xf32>
    %73 = arith.mulf %72, %69 : vector<16x32xf32>
    %74 = arith.select %71, %69, %73 : vector<16x32xi1>, vector<16x32xf32>
    %75 = vector.shape_cast %74 : vector<16x32xf32> to vector<4x4x32xf32>
    %76 = arith.truncf %75 : vector<4x4x32xf32> to vector<4x4x32xbf16>
    %c0_82 = arith.constant 0 : index
    %c0_83 = arith.constant 0 : index
    %c0_84 = arith.constant 0 : index
    %c0_85 = arith.constant 0 : index
    %77 = vector.load %arg6[%c0_82, %c0_83, %c0_84, %c0_85] : memref<1x4x4x32xbf16, #tpu.memory_space<vmem>>, vector<1x4x4x32xbf16>
    %78 = vector.shape_cast %77 : vector<1x4x4x32xbf16> to vector<4x4x32xbf16>
    %79 = vector.shape_cast %76 : vector<4x4x32xbf16> to vector<1x4x4x32xbf16>
    tpu.vector_store %arg6[%c0_82, %c0_83, %c0_84, %c0_85], %79 {strides = array<i32>} : memref<1x4x4x32xbf16, #tpu.memory_space<vmem>>, vector<1x4x4x32xbf16>,
    return
  }
  func.func @transform_0(%arg0: i32, %arg1: i32) -> (i32, i32, i32, i32) {
    %c0_i32 = arith.constant 0 : i32
    %c0_i32_0 = arith.constant 0 : i32
    %c0_i32_1 = arith.constant 0 : i32
    %c0_i32_2 = arith.constant 0 : i32
    return %arg0, %c0_i32, %c0_i32_0, %c0_i32_1 : i32, i32, i32, i32
  }
  func.func @transform_1(%arg0: i32, %arg1: i32) -> (i32, i32, i32, i32) {
    %c0_i32 = arith.constant 0 : i32
    %c0_i32_0 = arith.constant 0 : i32
    %c0_i32_1 = arith.constant 0 : i32
    %c0_i32_2 = arith.constant 0 : i32
    return %c0_i32, %c0_i32_0, %c0_i32_1, %arg1 : i32, i32, i32, i32
  }
  func.func @transform_2(%arg0: i32, %arg1: i32) -> (i32, i32) {
    %c0_i32 = arith.constant 0 : i32
    %c0_i32_0 = arith.constant 0 : i32
    return %c0_i32, %arg1 : i32, i32
  }
  func.func @transform_3(%arg0: i32, %arg1: i32) -> (i32, i32) {
    %c0_i32 = arith.constant 0 : i32
    %c0_i32_0 = arith.constant 0 : i32
    return %c0_i32, %arg1 : i32, i32
  }
  func.func @transform_4(%arg0: i32, %arg1: i32) -> (i32, i32, i32, i32) {
    %c0_i32 = arith.constant 0 : i32
    %c0_i32_0 = arith.constant 0 : i32
    %c0_i32_1 = arith.constant 0 : i32
    return %arg0, %c0_i32, %c0_i32_0, %arg1 : i32, i32, i32, i32
  }
}

module attributes {stable_mosaic.version = 11 : i64} {
  func.func @kernel(%arg0: i32, %arg1: i32, %arg2: memref<1x6x6x32xbf16, #tpu.memory_space<vmem>>, %arg3: memref<3x3x32x64xbf16, #tpu.memory_space<vmem>>, %arg4: memref<1x64xf32, #tpu.memory_space<vmem>>, %arg5: memref<1x64xf32, #tpu.memory_space<vmem>>, %arg6: memref<1x4x4x64xbf16, #tpu.memory_space<vmem>>) attributes {dimension_semantics = [#tpu.dimension_semantics<parallel>, #tpu.dimension_semantics<parallel>], iteration_bounds = array<i64: 2, 1>, scalar_prefetch = 0 : i64, scratch_operands = 0 : i64, tpu.core_type = #tpu.core_type<tc>, window_params = [{transform_indices = @transform_0, window_bounds = array<i64: 1, 6, 6, 32>}, {transform_indices = @transform_1, window_bounds = array<i64: 3, 3, 32, 64>}, {transform_indices = @transform_2, window_bounds = array<i64: 1, 64>}, {transform_indices = @transform_3, window_bounds = array<i64: 1, 64>}, {transform_indices = @transform_4, window_bounds = array<i64: 1, 4, 4, 64>}]} {
    %cst = arith.constant 0.000000e+00 : f32
    %0 = vector.broadcast %cst : f32 to vector<16x64xf32>
    %c0 = arith.constant 0 : index
    %c0_0 = arith.constant 0 : index
    %c0_1 = arith.constant 0 : index
    %c0_2 = arith.constant 0 : index
    %1 = vector.load %arg2[%c0, %c0_0, %c0_1, %c0_2] : memref<1x6x6x32xbf16, #tpu.memory_space<vmem>>, vector<1x4x4x32xbf16>
    %2 = vector.shape_cast %1 : vector<1x4x4x32xbf16> to vector<4x4x32xbf16>
    %3 = vector.shape_cast %2 : vector<4x4x32xbf16> to vector<16x32xbf16>
    %c0_3 = arith.constant 0 : index
    %c0_4 = arith.constant 0 : index
    %c0_5 = arith.constant 0 : index
    %c0_6 = arith.constant 0 : index
    %4 = vector.load %arg3[%c0_3, %c0_4, %c0_5, %c0_6] : memref<3x3x32x64xbf16, #tpu.memory_space<vmem>>, vector<1x1x32x64xbf16>
    %5 = vector.shape_cast %4 : vector<1x1x32x64xbf16> to vector<32x64xbf16>
    %cst_7 = arith.constant dense<0.000000e+00> : vector<16x64xf32>
    %6 = tpu.matmul %3, %5, %cst_7 {dimension_numbers = #tpu.dot_dimension_numbers<[1], [0], [0], [1], [0, 0, 1, 1], [], []>} : vector<16x32xbf16>, vector<32x64xbf16>, vector<16x64xf32> -> vector<16x64xf32>
    %7 = arith.addf %0, %6 : vector<16x64xf32>
    %c0_8 = arith.constant 0 : index
    %c0_9 = arith.constant 0 : index
    %c1 = arith.constant 1 : index
    %c0_10 = arith.constant 0 : index
    %8 = vector.load %arg2[%c0_8, %c0_9, %c1, %c0_10] : memref<1x6x6x32xbf16, #tpu.memory_space<vmem>>, vector<1x4x4x32xbf16>
    %9 = vector.shape_cast %8 : vector<1x4x4x32xbf16> to vector<4x4x32xbf16>
    %10 = vector.shape_cast %9 : vector<4x4x32xbf16> to vector<16x32xbf16>
    %c0_11 = arith.constant 0 : index
    %c1_12 = arith.constant 1 : index
    %c0_13 = arith.constant 0 : index
    %c0_14 = arith.constant 0 : index
    %11 = vector.load %arg3[%c0_11, %c1_12, %c0_13, %c0_14] : memref<3x3x32x64xbf16, #tpu.memory_space<vmem>>, vector<1x1x32x64xbf16>
    %12 = vector.shape_cast %11 : vector<1x1x32x64xbf16> to vector<32x64xbf16>
    %cst_15 = arith.constant dense<0.000000e+00> : vector<16x64xf32>
    %13 = tpu.matmul %10, %12, %cst_15 {dimension_numbers = #tpu.dot_dimension_numbers<[1], [0], [0], [1], [0, 0, 1, 1], [], []>} : vector<16x32xbf16>, vector<32x64xbf16>, vector<16x64xf32> -> vector<16x64xf32>
    %14 = arith.addf %7, %13 : vector<16x64xf32>
    %c0_16 = arith.constant 0 : index
    %c0_17 = arith.constant 0 : index
    %c2 = arith.constant 2 : index
    %c0_18 = arith.constant 0 : index
    %15 = vector.load %arg2[%c0_16, %c0_17, %c2, %c0_18] : memref<1x6x6x32xbf16, #tpu.memory_space<vmem>>, vector<1x4x4x32xbf16>
    %16 = vector.shape_cast %15 : vector<1x4x4x32xbf16> to vector<4x4x32xbf16>
    %17 = vector.shape_cast %16 : vector<4x4x32xbf16> to vector<16x32xbf16>
    %c0_19 = arith.constant 0 : index
    %c2_20 = arith.constant 2 : index
    %c0_21 = arith.constant 0 : index
    %c0_22 = arith.constant 0 : index
    %18 = vector.load %arg3[%c0_19, %c2_20, %c0_21, %c0_22] : memref<3x3x32x64xbf16, #tpu.memory_space<vmem>>, vector<1x1x32x64xbf16>
    %19 = vector.shape_cast %18 : vector<1x1x32x64xbf16> to vector<32x64xbf16>
    %cst_23 = arith.constant dense<0.000000e+00> : vector<16x64xf32>
    %20 = tpu.matmul %17, %19, %cst_23 {dimension_numbers = #tpu.dot_dimension_numbers<[1], [0], [0], [1], [0, 0, 1, 1], [], []>} : vector<16x32xbf16>, vector<32x64xbf16>, vector<16x64xf32> -> vector<16x64xf32>
    %21 = arith.addf %14, %20 : vector<16x64xf32>
    %c0_24 = arith.constant 0 : index
    %c1_25 = arith.constant 1 : index
    %c0_26 = arith.constant 0 : index
    %c0_27 = arith.constant 0 : index
    %22 = vector.load %arg2[%c0_24, %c1_25, %c0_26, %c0_27] : memref<1x6x6x32xbf16, #tpu.memory_space<vmem>>, vector<1x4x4x32xbf16>
    %23 = vector.shape_cast %22 : vector<1x4x4x32xbf16> to vector<4x4x32xbf16>
    %24 = vector.shape_cast %23 : vector<4x4x32xbf16> to vector<16x32xbf16>
    %c1_28 = arith.constant 1 : index
    %c0_29 = arith.constant 0 : index
    %c0_30 = arith.constant 0 : index
    %c0_31 = arith.constant 0 : index
    %25 = vector.load %arg3[%c1_28, %c0_29, %c0_30, %c0_31] : memref<3x3x32x64xbf16, #tpu.memory_space<vmem>>, vector<1x1x32x64xbf16>
    %26 = vector.shape_cast %25 : vector<1x1x32x64xbf16> to vector<32x64xbf16>
    %cst_32 = arith.constant dense<0.000000e+00> : vector<16x64xf32>
    %27 = tpu.matmul %24, %26, %cst_32 {dimension_numbers = #tpu.dot_dimension_numbers<[1], [0], [0], [1], [0, 0, 1, 1], [], []>} : vector<16x32xbf16>, vector<32x64xbf16>, vector<16x64xf32> -> vector<16x64xf32>
    %28 = arith.addf %21, %27 : vector<16x64xf32>
    %c0_33 = arith.constant 0 : index
    %c1_34 = arith.constant 1 : index
    %c1_35 = arith.constant 1 : index
    %c0_36 = arith.constant 0 : index
    %29 = vector.load %arg2[%c0_33, %c1_34, %c1_35, %c0_36] : memref<1x6x6x32xbf16, #tpu.memory_space<vmem>>, vector<1x4x4x32xbf16>
    %30 = vector.shape_cast %29 : vector<1x4x4x32xbf16> to vector<4x4x32xbf16>
    %31 = vector.shape_cast %30 : vector<4x4x32xbf16> to vector<16x32xbf16>
    %c1_37 = arith.constant 1 : index
    %c1_38 = arith.constant 1 : index
    %c0_39 = arith.constant 0 : index
    %c0_40 = arith.constant 0 : index
    %32 = vector.load %arg3[%c1_37, %c1_38, %c0_39, %c0_40] : memref<3x3x32x64xbf16, #tpu.memory_space<vmem>>, vector<1x1x32x64xbf16>
    %33 = vector.shape_cast %32 : vector<1x1x32x64xbf16> to vector<32x64xbf16>
    %cst_41 = arith.constant dense<0.000000e+00> : vector<16x64xf32>
    %34 = tpu.matmul %31, %33, %cst_41 {dimension_numbers = #tpu.dot_dimension_numbers<[1], [0], [0], [1], [0, 0, 1, 1], [], []>} : vector<16x32xbf16>, vector<32x64xbf16>, vector<16x64xf32> -> vector<16x64xf32>
    %35 = arith.addf %28, %34 : vector<16x64xf32>
    %c0_42 = arith.constant 0 : index
    %c1_43 = arith.constant 1 : index
    %c2_44 = arith.constant 2 : index
    %c0_45 = arith.constant 0 : index
    %36 = vector.load %arg2[%c0_42, %c1_43, %c2_44, %c0_45] : memref<1x6x6x32xbf16, #tpu.memory_space<vmem>>, vector<1x4x4x32xbf16>
    %37 = vector.shape_cast %36 : vector<1x4x4x32xbf16> to vector<4x4x32xbf16>
    %38 = vector.shape_cast %37 : vector<4x4x32xbf16> to vector<16x32xbf16>
    %c1_46 = arith.constant 1 : index
    %c2_47 = arith.constant 2 : index
    %c0_48 = arith.constant 0 : index
    %c0_49 = arith.constant 0 : index
    %39 = vector.load %arg3[%c1_46, %c2_47, %c0_48, %c0_49] : memref<3x3x32x64xbf16, #tpu.memory_space<vmem>>, vector<1x1x32x64xbf16>
    %40 = vector.shape_cast %39 : vector<1x1x32x64xbf16> to vector<32x64xbf16>
    %cst_50 = arith.constant dense<0.000000e+00> : vector<16x64xf32>
    %41 = tpu.matmul %38, %40, %cst_50 {dimension_numbers = #tpu.dot_dimension_numbers<[1], [0], [0], [1], [0, 0, 1, 1], [], []>} : vector<16x32xbf16>, vector<32x64xbf16>, vector<16x64xf32> -> vector<16x64xf32>
    %42 = arith.addf %35, %41 : vector<16x64xf32>
    %c0_51 = arith.constant 0 : index
    %c2_52 = arith.constant 2 : index
    %c0_53 = arith.constant 0 : index
    %c0_54 = arith.constant 0 : index
    %43 = vector.load %arg2[%c0_51, %c2_52, %c0_53, %c0_54] : memref<1x6x6x32xbf16, #tpu.memory_space<vmem>>, vector<1x4x4x32xbf16>
    %44 = vector.shape_cast %43 : vector<1x4x4x32xbf16> to vector<4x4x32xbf16>
    %45 = vector.shape_cast %44 : vector<4x4x32xbf16> to vector<16x32xbf16>
    %c2_55 = arith.constant 2 : index
    %c0_56 = arith.constant 0 : index
    %c0_57 = arith.constant 0 : index
    %c0_58 = arith.constant 0 : index
    %46 = vector.load %arg3[%c2_55, %c0_56, %c0_57, %c0_58] : memref<3x3x32x64xbf16, #tpu.memory_space<vmem>>, vector<1x1x32x64xbf16>
    %47 = vector.shape_cast %46 : vector<1x1x32x64xbf16> to vector<32x64xbf16>
    %cst_59 = arith.constant dense<0.000000e+00> : vector<16x64xf32>
    %48 = tpu.matmul %45, %47, %cst_59 {dimension_numbers = #tpu.dot_dimension_numbers<[1], [0], [0], [1], [0, 0, 1, 1], [], []>} : vector<16x32xbf16>, vector<32x64xbf16>, vector<16x64xf32> -> vector<16x64xf32>
    %49 = arith.addf %42, %48 : vector<16x64xf32>
    %c0_60 = arith.constant 0 : index
    %c2_61 = arith.constant 2 : index
    %c1_62 = arith.constant 1 : index
    %c0_63 = arith.constant 0 : index
    %50 = vector.load %arg2[%c0_60, %c2_61, %c1_62, %c0_63] : memref<1x6x6x32xbf16, #tpu.memory_space<vmem>>, vector<1x4x4x32xbf16>
    %51 = vector.shape_cast %50 : vector<1x4x4x32xbf16> to vector<4x4x32xbf16>
    %52 = vector.shape_cast %51 : vector<4x4x32xbf16> to vector<16x32xbf16>
    %c2_64 = arith.constant 2 : index
    %c1_65 = arith.constant 1 : index
    %c0_66 = arith.constant 0 : index
    %c0_67 = arith.constant 0 : index
    %53 = vector.load %arg3[%c2_64, %c1_65, %c0_66, %c0_67] : memref<3x3x32x64xbf16, #tpu.memory_space<vmem>>, vector<1x1x32x64xbf16>
    %54 = vector.shape_cast %53 : vector<1x1x32x64xbf16> to vector<32x64xbf16>
    %cst_68 = arith.constant dense<0.000000e+00> : vector<16x64xf32>
    %55 = tpu.matmul %52, %54, %cst_68 {dimension_numbers = #tpu.dot_dimension_numbers<[1], [0], [0], [1], [0, 0, 1, 1], [], []>} : vector<16x32xbf16>, vector<32x64xbf16>, vector<16x64xf32> -> vector<16x64xf32>
    %56 = arith.addf %49, %55 : vector<16x64xf32>
    %c0_69 = arith.constant 0 : index
    %c2_70 = arith.constant 2 : index
    %c2_71 = arith.constant 2 : index
    %c0_72 = arith.constant 0 : index
    %57 = vector.load %arg2[%c0_69, %c2_70, %c2_71, %c0_72] : memref<1x6x6x32xbf16, #tpu.memory_space<vmem>>, vector<1x4x4x32xbf16>
    %58 = vector.shape_cast %57 : vector<1x4x4x32xbf16> to vector<4x4x32xbf16>
    %59 = vector.shape_cast %58 : vector<4x4x32xbf16> to vector<16x32xbf16>
    %c2_73 = arith.constant 2 : index
    %c2_74 = arith.constant 2 : index
    %c0_75 = arith.constant 0 : index
    %c0_76 = arith.constant 0 : index
    %60 = vector.load %arg3[%c2_73, %c2_74, %c0_75, %c0_76] : memref<3x3x32x64xbf16, #tpu.memory_space<vmem>>, vector<1x1x32x64xbf16>
    %61 = vector.shape_cast %60 : vector<1x1x32x64xbf16> to vector<32x64xbf16>
    %cst_77 = arith.constant dense<0.000000e+00> : vector<16x64xf32>
    %62 = tpu.matmul %59, %61, %cst_77 {dimension_numbers = #tpu.dot_dimension_numbers<[1], [0], [0], [1], [0, 0, 1, 1], [], []>} : vector<16x32xbf16>, vector<32x64xbf16>, vector<16x64xf32> -> vector<16x64xf32>
    %63 = arith.addf %56, %62 : vector<16x64xf32>
    %c0_78 = arith.constant 0 : index
    %c0_79 = arith.constant 0 : index
    %64 = vector.load %arg4[%c0_78, %c0_79] : memref<1x64xf32, #tpu.memory_space<vmem>>, vector<1x64xf32>
    %65 = vector.broadcast %64 : vector<1x64xf32> to vector<16x64xf32>
    %66 = arith.mulf %63, %65 : vector<16x64xf32>
    %c0_80 = arith.constant 0 : index
    %c0_81 = arith.constant 0 : index
    %67 = vector.load %arg5[%c0_80, %c0_81] : memref<1x64xf32, #tpu.memory_space<vmem>>, vector<1x64xf32>
    %68 = vector.broadcast %67 : vector<1x64xf32> to vector<16x64xf32>
    %69 = arith.addf %66, %68 : vector<16x64xf32>
    %cst_82 = arith.constant 0.000000e+00 : f32
    %70 = vector.broadcast %cst_82 : f32 to vector<16x64xf32>
    %71 = arith.cmpf oge, %69, %70 : vector<16x64xf32>
    %cst_83 = arith.constant 2.000000e-01 : f32
    %72 = vector.broadcast %cst_83 : f32 to vector<16x64xf32>
    %73 = arith.mulf %72, %69 : vector<16x64xf32>
    %74 = arith.select %71, %69, %73 : vector<16x64xi1>, vector<16x64xf32>
    %75 = vector.shape_cast %74 : vector<16x64xf32> to vector<4x4x64xf32>
    %76 = arith.truncf %75 : vector<4x4x64xf32> to vector<4x4x64xbf16>
    %c0_84 = arith.constant 0 : index
    %c0_85 = arith.constant 0 : index
    %c0_86 = arith.constant 0 : index
    %c0_87 = arith.constant 0 : index
    %77 = vector.load %arg6[%c0_84, %c0_85, %c0_86, %c0_87] : memref<1x4x4x64xbf16, #tpu.memory_space<vmem>>, vector<1x4x4x64xbf16>
    %78 = vector.shape_cast %77 : vector<1x4x4x64xbf16> to vector<4x4x64xbf16>
    %79 = vector.shape_cast %76 : vector<4x4x64xbf16> to vector<1x4x4x64xbf16>
    tpu.vector_store %arg6[%c0_84, %c0_85, %c0_86, %c0_87], %79 {strides = array<i32>} : memref<1x4x4x64xbf16, #tpu.memory_space<vmem>>, vector<1x4x4x64xbf16>,
    return
  }
  func.func @transform_0(%arg0: i32, %arg1: i32) -> (i32, i32, i32, i32) {
    %c0_i32 = arith.constant 0 : i32
    %c0_i32_0 = arith.constant 0 : i32
    %c0_i32_1 = arith.constant 0 : i32
    %c0_i32_2 = arith.constant 0 : i32
    return %arg0, %c0_i32, %c0_i32_0, %c0_i32_1 : i32, i32, i32, i32
  }
  func.func @transform_1(%arg0: i32, %arg1: i32) -> (i32, i32, i32, i32) {
    %c0_i32 = arith.constant 0 : i32
    %c0_i32_0 = arith.constant 0 : i32
    %c0_i32_1 = arith.constant 0 : i32
    %c0_i32_2 = arith.constant 0 : i32
    return %c0_i32, %c0_i32_0, %c0_i32_1, %arg1 : i32, i32, i32, i32
  }
  func.func @transform_2(%arg0: i32, %arg1: i32) -> (i32, i32) {
    %c0_i32 = arith.constant 0 : i32
    %c0_i32_0 = arith.constant 0 : i32
    return %c0_i32, %arg1 : i32, i32
  }
  func.func @transform_3(%arg0: i32, %arg1: i32) -> (i32, i32) {
    %c0_i32 = arith.constant 0 : i32
    %c0_i32_0 = arith.constant 0 : i32
    return %c0_i32, %arg1 : i32, i32
  }
  func.func @transform_4(%arg0: i32, %arg1: i32) -> (i32, i32, i32, i32) {
    %c0_i32 = arith.constant 0 : i32
    %c0_i32_0 = arith.constant 0 : i32
    %c0_i32_1 = arith.constant 0 : i32
    return %arg0, %c0_i32, %c0_i32_0, %arg1 : i32, i32, i32, i32
  }
}

module attributes {stable_mosaic.version = 11 : i64} {
  func.func @kernel(%arg0: i32, %arg1: i32, %arg2: memref<2x6x3x64xbf16, #tpu.memory_space<vmem>>, %arg3: memref<3x3x64x64xbf16, #tpu.memory_space<vmem>>, %arg4: memref<1x64xf32, #tpu.memory_space<vmem>>, %arg5: memref<1x64xf32, #tpu.memory_space<vmem>>, %arg6: memref<1x2x2x64xbf16, #tpu.memory_space<vmem>>) attributes {dimension_semantics = [#tpu.dimension_semantics<parallel>, #tpu.dimension_semantics<parallel>], iteration_bounds = array<i64: 2, 1>, scalar_prefetch = 0 : i64, scratch_operands = 0 : i64, tpu.core_type = #tpu.core_type<tc>, window_params = [{transform_indices = @transform_0, window_bounds = array<i64: 2, 6, 3, 64>}, {transform_indices = @transform_1, window_bounds = array<i64: 3, 3, 64, 64>}, {transform_indices = @transform_2, window_bounds = array<i64: 1, 64>}, {transform_indices = @transform_3, window_bounds = array<i64: 1, 64>}, {transform_indices = @transform_4, window_bounds = array<i64: 1, 2, 2, 64>}]} {
    %cst = arith.constant 0.000000e+00 : f32
    %0 = vector.broadcast %cst : f32 to vector<4x64xf32>
    %c0 = arith.constant 0 : index
    %c0_0 = arith.constant 0 : index
    %c0_1 = arith.constant 0 : index
    %c0_2 = arith.constant 0 : index
    %1 = vector.load %arg2[%c0, %c0_0, %c0_1, %c0_2] : memref<2x6x3x64xbf16, #tpu.memory_space<vmem>>, vector<1x2x2x64xbf16>
    %2 = vector.shape_cast %1 : vector<1x2x2x64xbf16> to vector<2x2x64xbf16>
    %3 = vector.shape_cast %2 : vector<2x2x64xbf16> to vector<4x64xbf16>
    %c0_3 = arith.constant 0 : index
    %c0_4 = arith.constant 0 : index
    %c0_5 = arith.constant 0 : index
    %c0_6 = arith.constant 0 : index
    %4 = vector.load %arg3[%c0_3, %c0_4, %c0_5, %c0_6] : memref<3x3x64x64xbf16, #tpu.memory_space<vmem>>, vector<1x1x64x64xbf16>
    %5 = vector.shape_cast %4 : vector<1x1x64x64xbf16> to vector<64x64xbf16>
    %cst_7 = arith.constant dense<0.000000e+00> : vector<4x64xf32>
    %6 = tpu.matmul %3, %5, %cst_7 {dimension_numbers = #tpu.dot_dimension_numbers<[1], [0], [0], [1], [0, 0, 1, 1], [], []>} : vector<4x64xbf16>, vector<64x64xbf16>, vector<4x64xf32> -> vector<4x64xf32>
    %7 = arith.addf %0, %6 : vector<4x64xf32>
    %c0_8 = arith.constant 0 : index
    %c3 = arith.constant 3 : index
    %c0_9 = arith.constant 0 : index
    %c0_10 = arith.constant 0 : index
    %8 = vector.load %arg2[%c0_8, %c3, %c0_9, %c0_10] : memref<2x6x3x64xbf16, #tpu.memory_space<vmem>>, vector<1x2x2x64xbf16>
    %9 = vector.shape_cast %8 : vector<1x2x2x64xbf16> to vector<2x2x64xbf16>
    %10 = vector.shape_cast %9 : vector<2x2x64xbf16> to vector<4x64xbf16>
    %c0_11 = arith.constant 0 : index
    %c1 = arith.constant 1 : index
    %c0_12 = arith.constant 0 : index
    %c0_13 = arith.constant 0 : index
    %11 = vector.load %arg3[%c0_11, %c1, %c0_12, %c0_13] : memref<3x3x64x64xbf16, #tpu.memory_space<vmem>>, vector<1x1x64x64xbf16>
    %12 = vector.shape_cast %11 : vector<1x1x64x64xbf16> to vector<64x64xbf16>
    %cst_14 = arith.constant dense<0.000000e+00> : vector<4x64xf32>
    %13 = tpu.matmul %10, %12, %cst_14 {dimension_numbers = #tpu.dot_dimension_numbers<[1], [0], [0], [1], [0, 0, 1, 1], [], []>} : vector<4x64xbf16>, vector<64x64xbf16>, vector<4x64xf32> -> vector<4x64xf32>
    %14 = arith.addf %7, %13 : vector<4x64xf32>
    %c0_15 = arith.constant 0 : index
    %c0_16 = arith.constant 0 : index
    %c1_17 = arith.constant 1 : index
    %c0_18 = arith.constant 0 : index
    %15 = vector.load %arg2[%c0_15, %c0_16, %c1_17, %c0_18] : memref<2x6x3x64xbf16, #tpu.memory_space<vmem>>, vector<1x2x2x64xbf16>
    %16 = vector.shape_cast %15 : vector<1x2x2x64xbf16> to vector<2x2x64xbf16>
    %17 = vector.shape_cast %16 : vector<2x2x64xbf16> to vector<4x64xbf16>
    %c0_19 = arith.constant 0 : index
    %c2 = arith.constant 2 : index
    %c0_20 = arith.constant 0 : index
    %c0_21 = arith.constant 0 : index
    %18 = vector.load %arg3[%c0_19, %c2, %c0_20, %c0_21] : memref<3x3x64x64xbf16, #tpu.memory_space<vmem>>, vector<1x1x64x64xbf16>
    %19 = vector.shape_cast %18 : vector<1x1x64x64xbf16> to vector<64x64xbf16>
    %cst_22 = arith.constant dense<0.000000e+00> : vector<4x64xf32>
    %20 = tpu.matmul %17, %19, %cst_22 {dimension_numbers = #tpu.dot_dimension_numbers<[1], [0], [0], [1], [0, 0, 1, 1], [], []>} : vector<4x64xbf16>, vector<64x64xbf16>, vector<4x64xf32> -> vector<4x64xf32>
    %21 = arith.addf %14, %20 : vector<4x64xf32>
    %c1_23 = arith.constant 1 : index
    %c0_24 = arith.constant 0 : index
    %c0_25 = arith.constant 0 : index
    %c0_26 = arith.constant 0 : index
    %22 = vector.load %arg2[%c1_23, %c0_24, %c0_25, %c0_26] : memref<2x6x3x64xbf16, #tpu.memory_space<vmem>>, vector<1x2x2x64xbf16>
    %23 = vector.shape_cast %22 : vector<1x2x2x64xbf16> to vector<2x2x64xbf16>
    %24 = vector.shape_cast %23 : vector<2x2x64xbf16> to vector<4x64xbf16>
    %c1_27 = arith.constant 1 : index
    %c0_28 = arith.constant 0 : index
    %c0_29 = arith.constant 0 : index
    %c0_30 = arith.constant 0 : index
    %25 = vector.load %arg3[%c1_27, %c0_28, %c0_29, %c0_30] : memref<3x3x64x64xbf16, #tpu.memory_space<vmem>>, vector<1x1x64x64xbf16>
    %26 = vector.shape_cast %25 : vector<1x1x64x64xbf16> to vector<64x64xbf16>
    %cst_31 = arith.constant dense<0.000000e+00> : vector<4x64xf32>
    %27 = tpu.matmul %24, %26, %cst_31 {dimension_numbers = #tpu.dot_dimension_numbers<[1], [0], [0], [1], [0, 0, 1, 1], [], []>} : vector<4x64xbf16>, vector<64x64xbf16>, vector<4x64xf32> -> vector<4x64xf32>
    %28 = arith.addf %21, %27 : vector<4x64xf32>
    %c1_32 = arith.constant 1 : index
    %c3_33 = arith.constant 3 : index
    %c0_34 = arith.constant 0 : index
    %c0_35 = arith.constant 0 : index
    %29 = vector.load %arg2[%c1_32, %c3_33, %c0_34, %c0_35] : memref<2x6x3x64xbf16, #tpu.memory_space<vmem>>, vector<1x2x2x64xbf16>
    %30 = vector.shape_cast %29 : vector<1x2x2x64xbf16> to vector<2x2x64xbf16>
    %31 = vector.shape_cast %30 : vector<2x2x64xbf16> to vector<4x64xbf16>
    %c1_36 = arith.constant 1 : index
    %c1_37 = arith.constant 1 : index
    %c0_38 = arith.constant 0 : index
    %c0_39 = arith.constant 0 : index
    %32 = vector.load %arg3[%c1_36, %c1_37, %c0_38, %c0_39] : memref<3x3x64x64xbf16, #tpu.memory_space<vmem>>, vector<1x1x64x64xbf16>
    %33 = vector.shape_cast %32 : vector<1x1x64x64xbf16> to vector<64x64xbf16>
    %cst_40 = arith.constant dense<0.000000e+00> : vector<4x64xf32>
    %34 = tpu.matmul %31, %33, %cst_40 {dimension_numbers = #tpu.dot_dimension_numbers<[1], [0], [0], [1], [0, 0, 1, 1], [], []>} : vector<4x64xbf16>, vector<64x64xbf16>, vector<4x64xf32> -> vector<4x64xf32>
    %35 = arith.addf %28, %34 : vector<4x64xf32>
    %c1_41 = arith.constant 1 : index
    %c0_42 = arith.constant 0 : index
    %c1_43 = arith.constant 1 : index
    %c0_44 = arith.constant 0 : index
    %36 = vector.load %arg2[%c1_41, %c0_42, %c1_43, %c0_44] : memref<2x6x3x64xbf16, #tpu.memory_space<vmem>>, vector<1x2x2x64xbf16>
    %37 = vector.shape_cast %36 : vector<1x2x2x64xbf16> to vector<2x2x64xbf16>
    %38 = vector.shape_cast %37 : vector<2x2x64xbf16> to vector<4x64xbf16>
    %c1_45 = arith.constant 1 : index
    %c2_46 = arith.constant 2 : index
    %c0_47 = arith.constant 0 : index
    %c0_48 = arith.constant 0 : index
    %39 = vector.load %arg3[%c1_45, %c2_46, %c0_47, %c0_48] : memref<3x3x64x64xbf16, #tpu.memory_space<vmem>>, vector<1x1x64x64xbf16>
    %40 = vector.shape_cast %39 : vector<1x1x64x64xbf16> to vector<64x64xbf16>
    %cst_49 = arith.constant dense<0.000000e+00> : vector<4x64xf32>
    %41 = tpu.matmul %38, %40, %cst_49 {dimension_numbers = #tpu.dot_dimension_numbers<[1], [0], [0], [1], [0, 0, 1, 1], [], []>} : vector<4x64xbf16>, vector<64x64xbf16>, vector<4x64xf32> -> vector<4x64xf32>
    %42 = arith.addf %35, %41 : vector<4x64xf32>
    %c0_50 = arith.constant 0 : index
    %c1_51 = arith.constant 1 : index
    %c0_52 = arith.constant 0 : index
    %c0_53 = arith.constant 0 : index
    %43 = vector.load %arg2[%c0_50, %c1_51, %c0_52, %c0_53] : memref<2x6x3x64xbf16, #tpu.memory_space<vmem>>, vector<1x2x2x64xbf16>
    %44 = vector.shape_cast %43 : vector<1x2x2x64xbf16> to vector<2x2x64xbf16>
    %45 = vector.shape_cast %44 : vector<2x2x64xbf16> to vector<4x64xbf16>
    %c2_54 = arith.constant 2 : index
    %c0_55 = arith.constant 0 : index
    %c0_56 = arith.constant 0 : index
    %c0_57 = arith.constant 0 : index
    %46 = vector.load %arg3[%c2_54, %c0_55, %c0_56, %c0_57] : memref<3x3x64x64xbf16, #tpu.memory_space<vmem>>, vector<1x1x64x64xbf16>
    %47 = vector.shape_cast %46 : vector<1x1x64x64xbf16> to vector<64x64xbf16>
    %cst_58 = arith.constant dense<0.000000e+00> : vector<4x64xf32>
    %48 = tpu.matmul %45, %47, %cst_58 {dimension_numbers = #tpu.dot_dimension_numbers<[1], [0], [0], [1], [0, 0, 1, 1], [], []>} : vector<4x64xbf16>, vector<64x64xbf16>, vector<4x64xf32> -> vector<4x64xf32>
    %49 = arith.addf %42, %48 : vector<4x64xf32>
    %c0_59 = arith.constant 0 : index
    %c4 = arith.constant 4 : index
    %c0_60 = arith.constant 0 : index
    %c0_61 = arith.constant 0 : index
    %50 = vector.load %arg2[%c0_59, %c4, %c0_60, %c0_61] : memref<2x6x3x64xbf16, #tpu.memory_space<vmem>>, vector<1x2x2x64xbf16>
    %51 = vector.shape_cast %50 : vector<1x2x2x64xbf16> to vector<2x2x64xbf16>
    %52 = vector.shape_cast %51 : vector<2x2x64xbf16> to vector<4x64xbf16>
    %c2_62 = arith.constant 2 : index
    %c1_63 = arith.constant 1 : index
    %c0_64 = arith.constant 0 : index
    %c0_65 = arith.constant 0 : index
    %53 = vector.load %arg3[%c2_62, %c1_63, %c0_64, %c0_65] : memref<3x3x64x64xbf16, #tpu.memory_space<vmem>>, vector<1x1x64x64xbf16>
    %54 = vector.shape_cast %53 : vector<1x1x64x64xbf16> to vector<64x64xbf16>
    %cst_66 = arith.constant dense<0.000000e+00> : vector<4x64xf32>
    %55 = tpu.matmul %52, %54, %cst_66 {dimension_numbers = #tpu.dot_dimension_numbers<[1], [0], [0], [1], [0, 0, 1, 1], [], []>} : vector<4x64xbf16>, vector<64x64xbf16>, vector<4x64xf32> -> vector<4x64xf32>
    %56 = arith.addf %49, %55 : vector<4x64xf32>
    %c0_67 = arith.constant 0 : index
    %c1_68 = arith.constant 1 : index
    %c1_69 = arith.constant 1 : index
    %c0_70 = arith.constant 0 : index
    %57 = vector.load %arg2[%c0_67, %c1_68, %c1_69, %c0_70] : memref<2x6x3x64xbf16, #tpu.memory_space<vmem>>, vector<1x2x2x64xbf16>
    %58 = vector.shape_cast %57 : vector<1x2x2x64xbf16> to vector<2x2x64xbf16>
    %59 = vector.shape_cast %58 : vector<2x2x64xbf16> to vector<4x64xbf16>
    %c2_71 = arith.constant 2 : index
    %c2_72 = arith.constant 2 : index
    %c0_73 = arith.constant 0 : index
    %c0_74 = arith.constant 0 : index
    %60 = vector.load %arg3[%c2_71, %c2_72, %c0_73, %c0_74] : memref<3x3x64x64xbf16, #tpu.memory_space<vmem>>, vector<1x1x64x64xbf16>
    %61 = vector.shape_cast %60 : vector<1x1x64x64xbf16> to vector<64x64xbf16>
    %cst_75 = arith.constant dense<0.000000e+00> : vector<4x64xf32>
    %62 = tpu.matmul %59, %61, %cst_75 {dimension_numbers = #tpu.dot_dimension_numbers<[1], [0], [0], [1], [0, 0, 1, 1], [], []>} : vector<4x64xbf16>, vector<64x64xbf16>, vector<4x64xf32> -> vector<4x64xf32>
    %63 = arith.addf %56, %62 : vector<4x64xf32>
    %c0_76 = arith.constant 0 : index
    %c0_77 = arith.constant 0 : index
    %64 = vector.load %arg4[%c0_76, %c0_77] : memref<1x64xf32, #tpu.memory_space<vmem>>, vector<1x64xf32>
    %65 = vector.broadcast %64 : vector<1x64xf32> to vector<4x64xf32>
    %66 = arith.mulf %63, %65 : vector<4x64xf32>
    %c0_78 = arith.constant 0 : index
    %c0_79 = arith.constant 0 : index
    %67 = vector.load %arg5[%c0_78, %c0_79] : memref<1x64xf32, #tpu.memory_space<vmem>>, vector<1x64xf32>
    %68 = vector.broadcast %67 : vector<1x64xf32> to vector<4x64xf32>
    %69 = arith.addf %66, %68 : vector<4x64xf32>
    %cst_80 = arith.constant 0.000000e+00 : f32
    %70 = vector.broadcast %cst_80 : f32 to vector<4x64xf32>
    %71 = arith.cmpf oge, %69, %70 : vector<4x64xf32>
    %cst_81 = arith.constant 2.000000e-01 : f32
    %72 = vector.broadcast %cst_81 : f32 to vector<4x64xf32>
    %73 = arith.mulf %72, %69 : vector<4x64xf32>
    %74 = arith.select %71, %69, %73 : vector<4x64xi1>, vector<4x64xf32>
    %75 = vector.shape_cast %74 : vector<4x64xf32> to vector<2x2x64xf32>
    %76 = arith.truncf %75 : vector<2x2x64xf32> to vector<2x2x64xbf16>
    %c0_82 = arith.constant 0 : index
    %c0_83 = arith.constant 0 : index
    %c0_84 = arith.constant 0 : index
    %c0_85 = arith.constant 0 : index
    %77 = vector.load %arg6[%c0_82, %c0_83, %c0_84, %c0_85] : memref<1x2x2x64xbf16, #tpu.memory_space<vmem>>, vector<1x2x2x64xbf16>
    %78 = vector.shape_cast %77 : vector<1x2x2x64xbf16> to vector<2x2x64xbf16>
    %79 = vector.shape_cast %76 : vector<2x2x64xbf16> to vector<1x2x2x64xbf16>
    tpu.vector_store %arg6[%c0_82, %c0_83, %c0_84, %c0_85], %79 {strides = array<i32>} : memref<1x2x2x64xbf16, #tpu.memory_space<vmem>>, vector<1x2x2x64xbf16>,
    return
  }
  func.func @transform_0(%arg0: i32, %arg1: i32) -> (i32, i32, i32, i32) {
    %c0_i32 = arith.constant 0 : i32
    %c0_i32_0 = arith.constant 0 : i32
    %c0_i32_1 = arith.constant 0 : i32
    %c0_i32_2 = arith.constant 0 : i32
    return %arg0, %c0_i32, %c0_i32_0, %c0_i32_1 : i32, i32, i32, i32
  }
  func.func @transform_1(%arg0: i32, %arg1: i32) -> (i32, i32, i32, i32) {
    %c0_i32 = arith.constant 0 : i32
    %c0_i32_0 = arith.constant 0 : i32
    %c0_i32_1 = arith.constant 0 : i32
    %c0_i32_2 = arith.constant 0 : i32
    return %c0_i32, %c0_i32_0, %c0_i32_1, %arg1 : i32, i32, i32, i32
  }
  func.func @transform_2(%arg0: i32, %arg1: i32) -> (i32, i32) {
    %c0_i32 = arith.constant 0 : i32
    %c0_i32_0 = arith.constant 0 : i32
    return %c0_i32, %arg1 : i32, i32
  }
  func.func @transform_3(%arg0: i32, %arg1: i32) -> (i32, i32) {
    %c0_i32 = arith.constant 0 : i32
    %c0_i32_0 = arith.constant 0 : i32
    return %c0_i32, %arg1 : i32, i32
  }
  func.func @transform_4(%arg0: i32, %arg1: i32) -> (i32, i32, i32, i32) {
    %c0_i32 = arith.constant 0 : i32
    %c0_i32_0 = arith.constant 0 : i32
    %c0_i32_1 = arith.constant 0 : i32
    return %arg0, %c0_i32, %c0_i32_0, %arg1 : i32, i32, i32, i32
  }
}

module attributes {stable_mosaic.version = 11 : i64} {
  func.func @kernel(%arg0: i32, %arg1: i32, %arg2: memref<1x4x4x64xbf16, #tpu.memory_space<vmem>>, %arg3: memref<3x3x64x128xbf16, #tpu.memory_space<vmem>>, %arg4: memref<1x128xf32, #tpu.memory_space<vmem>>, %arg5: memref<1x128xf32, #tpu.memory_space<vmem>>, %arg6: memref<1x2x2x128xbf16, #tpu.memory_space<vmem>>) attributes {dimension_semantics = [#tpu.dimension_semantics<parallel>, #tpu.dimension_semantics<parallel>], iteration_bounds = array<i64: 2, 1>, scalar_prefetch = 0 : i64, scratch_operands = 0 : i64, tpu.core_type = #tpu.core_type<tc>, window_params = [{transform_indices = @transform_0, window_bounds = array<i64: 1, 4, 4, 64>}, {transform_indices = @transform_1, window_bounds = array<i64: 3, 3, 64, 128>}, {transform_indices = @transform_2, window_bounds = array<i64: 1, 128>}, {transform_indices = @transform_3, window_bounds = array<i64: 1, 128>}, {transform_indices = @transform_4, window_bounds = array<i64: 1, 2, 2, 128>}]} {
    %cst = arith.constant 0.000000e+00 : f32
    %0 = vector.broadcast %cst : f32 to vector<4x128xf32>
    %c0 = arith.constant 0 : index
    %c0_0 = arith.constant 0 : index
    %c0_1 = arith.constant 0 : index
    %c0_2 = arith.constant 0 : index
    %1 = vector.load %arg2[%c0, %c0_0, %c0_1, %c0_2] : memref<1x4x4x64xbf16, #tpu.memory_space<vmem>>, vector<1x2x2x64xbf16>
    %2 = vector.shape_cast %1 : vector<1x2x2x64xbf16> to vector<2x2x64xbf16>
    %3 = vector.shape_cast %2 : vector<2x2x64xbf16> to vector<4x64xbf16>
    %c0_3 = arith.constant 0 : index
    %c0_4 = arith.constant 0 : index
    %c0_5 = arith.constant 0 : index
    %c0_6 = arith.constant 0 : index
    %4 = vector.load %arg3[%c0_3, %c0_4, %c0_5, %c0_6] : memref<3x3x64x128xbf16, #tpu.memory_space<vmem>>, vector<1x1x64x128xbf16>
    %5 = vector.shape_cast %4 : vector<1x1x64x128xbf16> to vector<64x128xbf16>
    %cst_7 = arith.constant dense<0.000000e+00> : vector<4x128xf32>
    %6 = tpu.matmul %3, %5, %cst_7 {dimension_numbers = #tpu.dot_dimension_numbers<[1], [0], [0], [1], [0, 0, 1, 1], [], []>} : vector<4x64xbf16>, vector<64x128xbf16>, vector<4x128xf32> -> vector<4x128xf32>
    %7 = arith.addf %0, %6 : vector<4x128xf32>
    %c0_8 = arith.constant 0 : index
    %c0_9 = arith.constant 0 : index
    %c1 = arith.constant 1 : index
    %c0_10 = arith.constant 0 : index
    %8 = vector.load %arg2[%c0_8, %c0_9, %c1, %c0_10] : memref<1x4x4x64xbf16, #tpu.memory_space<vmem>>, vector<1x2x2x64xbf16>
    %9 = vector.shape_cast %8 : vector<1x2x2x64xbf16> to vector<2x2x64xbf16>
    %10 = vector.shape_cast %9 : vector<2x2x64xbf16> to vector<4x64xbf16>
    %c0_11 = arith.constant 0 : index
    %c1_12 = arith.constant 1 : index
    %c0_13 = arith.constant 0 : index
    %c0_14 = arith.constant 0 : index
    %11 = vector.load %arg3[%c0_11, %c1_12, %c0_13, %c0_14] : memref<3x3x64x128xbf16, #tpu.memory_space<vmem>>, vector<1x1x64x128xbf16>
    %12 = vector.shape_cast %11 : vector<1x1x64x128xbf16> to vector<64x128xbf16>
    %cst_15 = arith.constant dense<0.000000e+00> : vector<4x128xf32>
    %13 = tpu.matmul %10, %12, %cst_15 {dimension_numbers = #tpu.dot_dimension_numbers<[1], [0], [0], [1], [0, 0, 1, 1], [], []>} : vector<4x64xbf16>, vector<64x128xbf16>, vector<4x128xf32> -> vector<4x128xf32>
    %14 = arith.addf %7, %13 : vector<4x128xf32>
    %c0_16 = arith.constant 0 : index
    %c0_17 = arith.constant 0 : index
    %c2 = arith.constant 2 : index
    %c0_18 = arith.constant 0 : index
    %15 = vector.load %arg2[%c0_16, %c0_17, %c2, %c0_18] : memref<1x4x4x64xbf16, #tpu.memory_space<vmem>>, vector<1x2x2x64xbf16>
    %16 = vector.shape_cast %15 : vector<1x2x2x64xbf16> to vector<2x2x64xbf16>
    %17 = vector.shape_cast %16 : vector<2x2x64xbf16> to vector<4x64xbf16>
    %c0_19 = arith.constant 0 : index
    %c2_20 = arith.constant 2 : index
    %c0_21 = arith.constant 0 : index
    %c0_22 = arith.constant 0 : index
    %18 = vector.load %arg3[%c0_19, %c2_20, %c0_21, %c0_22] : memref<3x3x64x128xbf16, #tpu.memory_space<vmem>>, vector<1x1x64x128xbf16>
    %19 = vector.shape_cast %18 : vector<1x1x64x128xbf16> to vector<64x128xbf16>
    %cst_23 = arith.constant dense<0.000000e+00> : vector<4x128xf32>
    %20 = tpu.matmul %17, %19, %cst_23 {dimension_numbers = #tpu.dot_dimension_numbers<[1], [0], [0], [1], [0, 0, 1, 1], [], []>} : vector<4x64xbf16>, vector<64x128xbf16>, vector<4x128xf32> -> vector<4x128xf32>
    %21 = arith.addf %14, %20 : vector<4x128xf32>
    %c0_24 = arith.constant 0 : index
    %c1_25 = arith.constant 1 : index
    %c0_26 = arith.constant 0 : index
    %c0_27 = arith.constant 0 : index
    %22 = vector.load %arg2[%c0_24, %c1_25, %c0_26, %c0_27] : memref<1x4x4x64xbf16, #tpu.memory_space<vmem>>, vector<1x2x2x64xbf16>
    %23 = vector.shape_cast %22 : vector<1x2x2x64xbf16> to vector<2x2x64xbf16>
    %24 = vector.shape_cast %23 : vector<2x2x64xbf16> to vector<4x64xbf16>
    %c1_28 = arith.constant 1 : index
    %c0_29 = arith.constant 0 : index
    %c0_30 = arith.constant 0 : index
    %c0_31 = arith.constant 0 : index
    %25 = vector.load %arg3[%c1_28, %c0_29, %c0_30, %c0_31] : memref<3x3x64x128xbf16, #tpu.memory_space<vmem>>, vector<1x1x64x128xbf16>
    %26 = vector.shape_cast %25 : vector<1x1x64x128xbf16> to vector<64x128xbf16>
    %cst_32 = arith.constant dense<0.000000e+00> : vector<4x128xf32>
    %27 = tpu.matmul %24, %26, %cst_32 {dimension_numbers = #tpu.dot_dimension_numbers<[1], [0], [0], [1], [0, 0, 1, 1], [], []>} : vector<4x64xbf16>, vector<64x128xbf16>, vector<4x128xf32> -> vector<4x128xf32>
    %28 = arith.addf %21, %27 : vector<4x128xf32>
    %c0_33 = arith.constant 0 : index
    %c1_34 = arith.constant 1 : index
    %c1_35 = arith.constant 1 : index
    %c0_36 = arith.constant 0 : index
    %29 = vector.load %arg2[%c0_33, %c1_34, %c1_35, %c0_36] : memref<1x4x4x64xbf16, #tpu.memory_space<vmem>>, vector<1x2x2x64xbf16>
    %30 = vector.shape_cast %29 : vector<1x2x2x64xbf16> to vector<2x2x64xbf16>
    %31 = vector.shape_cast %30 : vector<2x2x64xbf16> to vector<4x64xbf16>
    %c1_37 = arith.constant 1 : index
    %c1_38 = arith.constant 1 : index
    %c0_39 = arith.constant 0 : index
    %c0_40 = arith.constant 0 : index
    %32 = vector.load %arg3[%c1_37, %c1_38, %c0_39, %c0_40] : memref<3x3x64x128xbf16, #tpu.memory_space<vmem>>, vector<1x1x64x128xbf16>
    %33 = vector.shape_cast %32 : vector<1x1x64x128xbf16> to vector<64x128xbf16>
    %cst_41 = arith.constant dense<0.000000e+00> : vector<4x128xf32>
    %34 = tpu.matmul %31, %33, %cst_41 {dimension_numbers = #tpu.dot_dimension_numbers<[1], [0], [0], [1], [0, 0, 1, 1], [], []>} : vector<4x64xbf16>, vector<64x128xbf16>, vector<4x128xf32> -> vector<4x128xf32>
    %35 = arith.addf %28, %34 : vector<4x128xf32>
    %c0_42 = arith.constant 0 : index
    %c1_43 = arith.constant 1 : index
    %c2_44 = arith.constant 2 : index
    %c0_45 = arith.constant 0 : index
    %36 = vector.load %arg2[%c0_42, %c1_43, %c2_44, %c0_45] : memref<1x4x4x64xbf16, #tpu.memory_space<vmem>>, vector<1x2x2x64xbf16>
    %37 = vector.shape_cast %36 : vector<1x2x2x64xbf16> to vector<2x2x64xbf16>
    %38 = vector.shape_cast %37 : vector<2x2x64xbf16> to vector<4x64xbf16>
    %c1_46 = arith.constant 1 : index
    %c2_47 = arith.constant 2 : index
    %c0_48 = arith.constant 0 : index
    %c0_49 = arith.constant 0 : index
    %39 = vector.load %arg3[%c1_46, %c2_47, %c0_48, %c0_49] : memref<3x3x64x128xbf16, #tpu.memory_space<vmem>>, vector<1x1x64x128xbf16>
    %40 = vector.shape_cast %39 : vector<1x1x64x128xbf16> to vector<64x128xbf16>
    %cst_50 = arith.constant dense<0.000000e+00> : vector<4x128xf32>
    %41 = tpu.matmul %38, %40, %cst_50 {dimension_numbers = #tpu.dot_dimension_numbers<[1], [0], [0], [1], [0, 0, 1, 1], [], []>} : vector<4x64xbf16>, vector<64x128xbf16>, vector<4x128xf32> -> vector<4x128xf32>
    %42 = arith.addf %35, %41 : vector<4x128xf32>
    %c0_51 = arith.constant 0 : index
    %c2_52 = arith.constant 2 : index
    %c0_53 = arith.constant 0 : index
    %c0_54 = arith.constant 0 : index
    %43 = vector.load %arg2[%c0_51, %c2_52, %c0_53, %c0_54] : memref<1x4x4x64xbf16, #tpu.memory_space<vmem>>, vector<1x2x2x64xbf16>
    %44 = vector.shape_cast %43 : vector<1x2x2x64xbf16> to vector<2x2x64xbf16>
    %45 = vector.shape_cast %44 : vector<2x2x64xbf16> to vector<4x64xbf16>
    %c2_55 = arith.constant 2 : index
    %c0_56 = arith.constant 0 : index
    %c0_57 = arith.constant 0 : index
    %c0_58 = arith.constant 0 : index
    %46 = vector.load %arg3[%c2_55, %c0_56, %c0_57, %c0_58] : memref<3x3x64x128xbf16, #tpu.memory_space<vmem>>, vector<1x1x64x128xbf16>
    %47 = vector.shape_cast %46 : vector<1x1x64x128xbf16> to vector<64x128xbf16>
    %cst_59 = arith.constant dense<0.000000e+00> : vector<4x128xf32>
    %48 = tpu.matmul %45, %47, %cst_59 {dimension_numbers = #tpu.dot_dimension_numbers<[1], [0], [0], [1], [0, 0, 1, 1], [], []>} : vector<4x64xbf16>, vector<64x128xbf16>, vector<4x128xf32> -> vector<4x128xf32>
    %49 = arith.addf %42, %48 : vector<4x128xf32>
    %c0_60 = arith.constant 0 : index
    %c2_61 = arith.constant 2 : index
    %c1_62 = arith.constant 1 : index
    %c0_63 = arith.constant 0 : index
    %50 = vector.load %arg2[%c0_60, %c2_61, %c1_62, %c0_63] : memref<1x4x4x64xbf16, #tpu.memory_space<vmem>>, vector<1x2x2x64xbf16>
    %51 = vector.shape_cast %50 : vector<1x2x2x64xbf16> to vector<2x2x64xbf16>
    %52 = vector.shape_cast %51 : vector<2x2x64xbf16> to vector<4x64xbf16>
    %c2_64 = arith.constant 2 : index
    %c1_65 = arith.constant 1 : index
    %c0_66 = arith.constant 0 : index
    %c0_67 = arith.constant 0 : index
    %53 = vector.load %arg3[%c2_64, %c1_65, %c0_66, %c0_67] : memref<3x3x64x128xbf16, #tpu.memory_space<vmem>>, vector<1x1x64x128xbf16>
    %54 = vector.shape_cast %53 : vector<1x1x64x128xbf16> to vector<64x128xbf16>
    %cst_68 = arith.constant dense<0.000000e+00> : vector<4x128xf32>
    %55 = tpu.matmul %52, %54, %cst_68 {dimension_numbers = #tpu.dot_dimension_numbers<[1], [0], [0], [1], [0, 0, 1, 1], [], []>} : vector<4x64xbf16>, vector<64x128xbf16>, vector<4x128xf32> -> vector<4x128xf32>
    %56 = arith.addf %49, %55 : vector<4x128xf32>
    %c0_69 = arith.constant 0 : index
    %c2_70 = arith.constant 2 : index
    %c2_71 = arith.constant 2 : index
    %c0_72 = arith.constant 0 : index
    %57 = vector.load %arg2[%c0_69, %c2_70, %c2_71, %c0_72] : memref<1x4x4x64xbf16, #tpu.memory_space<vmem>>, vector<1x2x2x64xbf16>
    %58 = vector.shape_cast %57 : vector<1x2x2x64xbf16> to vector<2x2x64xbf16>
    %59 = vector.shape_cast %58 : vector<2x2x64xbf16> to vector<4x64xbf16>
    %c2_73 = arith.constant 2 : index
    %c2_74 = arith.constant 2 : index
    %c0_75 = arith.constant 0 : index
    %c0_76 = arith.constant 0 : index
    %60 = vector.load %arg3[%c2_73, %c2_74, %c0_75, %c0_76] : memref<3x3x64x128xbf16, #tpu.memory_space<vmem>>, vector<1x1x64x128xbf16>
    %61 = vector.shape_cast %60 : vector<1x1x64x128xbf16> to vector<64x128xbf16>
    %cst_77 = arith.constant dense<0.000000e+00> : vector<4x128xf32>
    %62 = tpu.matmul %59, %61, %cst_77 {dimension_numbers = #tpu.dot_dimension_numbers<[1], [0], [0], [1], [0, 0, 1, 1], [], []>} : vector<4x64xbf16>, vector<64x128xbf16>, vector<4x128xf32> -> vector<4x128xf32>
    %63 = arith.addf %56, %62 : vector<4x128xf32>
    %c0_78 = arith.constant 0 : index
    %c0_79 = arith.constant 0 : index
    %64 = vector.load %arg4[%c0_78, %c0_79] : memref<1x128xf32, #tpu.memory_space<vmem>>, vector<1x128xf32>
    %65 = vector.broadcast %64 : vector<1x128xf32> to vector<4x128xf32>
    %66 = arith.mulf %63, %65 : vector<4x128xf32>
    %c0_80 = arith.constant 0 : index
    %c0_81 = arith.constant 0 : index
    %67 = vector.load %arg5[%c0_80, %c0_81] : memref<1x128xf32, #tpu.memory_space<vmem>>, vector<1x128xf32>
    %68 = vector.broadcast %67 : vector<1x128xf32> to vector<4x128xf32>
    %69 = arith.addf %66, %68 : vector<4x128xf32>
    %cst_82 = arith.constant 0.000000e+00 : f32
    %70 = vector.broadcast %cst_82 : f32 to vector<4x128xf32>
    %71 = arith.cmpf oge, %69, %70 : vector<4x128xf32>
    %cst_83 = arith.constant 2.000000e-01 : f32
    %72 = vector.broadcast %cst_83 : f32 to vector<4x128xf32>
    %73 = arith.mulf %72, %69 : vector<4x128xf32>
    %74 = arith.select %71, %69, %73 : vector<4x128xi1>, vector<4x128xf32>
    %75 = vector.shape_cast %74 : vector<4x128xf32> to vector<2x2x128xf32>
    %76 = arith.truncf %75 : vector<2x2x128xf32> to vector<2x2x128xbf16>
    %c0_84 = arith.constant 0 : index
    %c0_85 = arith.constant 0 : index
    %c0_86 = arith.constant 0 : index
    %c0_87 = arith.constant 0 : index
    %77 = vector.load %arg6[%c0_84, %c0_85, %c0_86, %c0_87] : memref<1x2x2x128xbf16, #tpu.memory_space<vmem>>, vector<1x2x2x128xbf16>
    %78 = vector.shape_cast %77 : vector<1x2x2x128xbf16> to vector<2x2x128xbf16>
    %79 = vector.shape_cast %76 : vector<2x2x128xbf16> to vector<1x2x2x128xbf16>
    tpu.vector_store %arg6[%c0_84, %c0_85, %c0_86, %c0_87], %79 {strides = array<i32>} : memref<1x2x2x128xbf16, #tpu.memory_space<vmem>>, vector<1x2x2x128xbf16>,
    return
  }
  func.func @transform_0(%arg0: i32, %arg1: i32) -> (i32, i32, i32, i32) {
    %c0_i32 = arith.constant 0 : i32
    %c0_i32_0 = arith.constant 0 : i32
    %c0_i32_1 = arith.constant 0 : i32
    %c0_i32_2 = arith.constant 0 : i32
    return %arg0, %c0_i32, %c0_i32_0, %c0_i32_1 : i32, i32, i32, i32
  }
  func.func @transform_1(%arg0: i32, %arg1: i32) -> (i32, i32, i32, i32) {
    %c0_i32 = arith.constant 0 : i32
    %c0_i32_0 = arith.constant 0 : i32
    %c0_i32_1 = arith.constant 0 : i32
    %c0_i32_2 = arith.constant 0 : i32
    return %c0_i32, %c0_i32_0, %c0_i32_1, %arg1 : i32, i32, i32, i32
  }
  func.func @transform_2(%arg0: i32, %arg1: i32) -> (i32, i32) {
    %c0_i32 = arith.constant 0 : i32
    %c0_i32_0 = arith.constant 0 : i32
    return %c0_i32, %arg1 : i32, i32
  }
  func.func @transform_3(%arg0: i32, %arg1: i32) -> (i32, i32) {
    %c0_i32 = arith.constant 0 : i32
    %c0_i32_0 = arith.constant 0 : i32
    return %c0_i32, %arg1 : i32, i32
  }
  func.func @transform_4(%arg0: i32, %arg1: i32) -> (i32, i32, i32, i32) {
    %c0_i32 = arith.constant 0 : i32
    %c0_i32_0 = arith.constant 0 : i32
    %c0_i32_1 = arith.constant 0 : i32
    return %arg0, %c0_i32, %c0_i32_0, %arg1 : i32, i32, i32, i32
  }
}

module attributes {stable_mosaic.version = 11 : i64} {
  func.func @kernel(%arg0: i32, %arg1: i32, %arg2: memref<2x4x2x128xbf16, #tpu.memory_space<vmem>>, %arg3: memref<3x3x128x128xbf16, #tpu.memory_space<vmem>>, %arg4: memref<1x128xf32, #tpu.memory_space<vmem>>, %arg5: memref<1x128xf32, #tpu.memory_space<vmem>>, %arg6: memref<1x1x1x128xbf16, #tpu.memory_space<vmem>>) attributes {dimension_semantics = [#tpu.dimension_semantics<parallel>, #tpu.dimension_semantics<parallel>], iteration_bounds = array<i64: 2, 1>, scalar_prefetch = 0 : i64, scratch_operands = 0 : i64, tpu.core_type = #tpu.core_type<tc>, window_params = [{transform_indices = @transform_0, window_bounds = array<i64: 2, 4, 2, 128>}, {transform_indices = @transform_1, window_bounds = array<i64: 3, 3, 128, 128>}, {transform_indices = @transform_2, window_bounds = array<i64: 1, 128>}, {transform_indices = @transform_3, window_bounds = array<i64: 1, 128>}, {transform_indices = @transform_4, window_bounds = array<i64: 1, 1, 1, 128>}]} {
    %cst = arith.constant 0.000000e+00 : f32
    %0 = vector.broadcast %cst : f32 to vector<1x128xf32>
    %c0 = arith.constant 0 : index
    %c0_0 = arith.constant 0 : index
    %c0_1 = arith.constant 0 : index
    %c0_2 = arith.constant 0 : index
    %1 = vector.load %arg2[%c0, %c0_0, %c0_1, %c0_2] : memref<2x4x2x128xbf16, #tpu.memory_space<vmem>>, vector<1x1x1x128xbf16>
    %2 = vector.shape_cast %1 : vector<1x1x1x128xbf16> to vector<1x1x128xbf16>
    %3 = vector.shape_cast %2 : vector<1x1x128xbf16> to vector<1x128xbf16>
    %c0_3 = arith.constant 0 : index
    %c0_4 = arith.constant 0 : index
    %c0_5 = arith.constant 0 : index
    %c0_6 = arith.constant 0 : index
    %4 = vector.load %arg3[%c0_3, %c0_4, %c0_5, %c0_6] : memref<3x3x128x128xbf16, #tpu.memory_space<vmem>>, vector<1x1x128x128xbf16>
    %5 = vector.shape_cast %4 : vector<1x1x128x128xbf16> to vector<128x128xbf16>
    %cst_7 = arith.constant dense<0.000000e+00> : vector<1x128xf32>
    %6 = tpu.matmul %3, %5, %cst_7 {dimension_numbers = #tpu.dot_dimension_numbers<[1], [0], [0], [1], [0, 0, 1, 1], [], []>} : vector<1x128xbf16>, vector<128x128xbf16>, vector<1x128xf32> -> vector<1x128xf32>
    %7 = arith.addf %0, %6 : vector<1x128xf32>
    %c0_8 = arith.constant 0 : index
    %c2 = arith.constant 2 : index
    %c0_9 = arith.constant 0 : index
    %c0_10 = arith.constant 0 : index
    %8 = vector.load %arg2[%c0_8, %c2, %c0_9, %c0_10] : memref<2x4x2x128xbf16, #tpu.memory_space<vmem>>, vector<1x1x1x128xbf16>
    %9 = vector.shape_cast %8 : vector<1x1x1x128xbf16> to vector<1x1x128xbf16>
    %10 = vector.shape_cast %9 : vector<1x1x128xbf16> to vector<1x128xbf16>
    %c0_11 = arith.constant 0 : index
    %c1 = arith.constant 1 : index
    %c0_12 = arith.constant 0 : index
    %c0_13 = arith.constant 0 : index
    %11 = vector.load %arg3[%c0_11, %c1, %c0_12, %c0_13] : memref<3x3x128x128xbf16, #tpu.memory_space<vmem>>, vector<1x1x128x128xbf16>
    %12 = vector.shape_cast %11 : vector<1x1x128x128xbf16> to vector<128x128xbf16>
    %cst_14 = arith.constant dense<0.000000e+00> : vector<1x128xf32>
    %13 = tpu.matmul %10, %12, %cst_14 {dimension_numbers = #tpu.dot_dimension_numbers<[1], [0], [0], [1], [0, 0, 1, 1], [], []>} : vector<1x128xbf16>, vector<128x128xbf16>, vector<1x128xf32> -> vector<1x128xf32>
    %14 = arith.addf %7, %13 : vector<1x128xf32>
    %c0_15 = arith.constant 0 : index
    %c0_16 = arith.constant 0 : index
    %c1_17 = arith.constant 1 : index
    %c0_18 = arith.constant 0 : index
    %15 = vector.load %arg2[%c0_15, %c0_16, %c1_17, %c0_18] : memref<2x4x2x128xbf16, #tpu.memory_space<vmem>>, vector<1x1x1x128xbf16>
    %16 = vector.shape_cast %15 : vector<1x1x1x128xbf16> to vector<1x1x128xbf16>
    %17 = vector.shape_cast %16 : vector<1x1x128xbf16> to vector<1x128xbf16>
    %c0_19 = arith.constant 0 : index
    %c2_20 = arith.constant 2 : index
    %c0_21 = arith.constant 0 : index
    %c0_22 = arith.constant 0 : index
    %18 = vector.load %arg3[%c0_19, %c2_20, %c0_21, %c0_22] : memref<3x3x128x128xbf16, #tpu.memory_space<vmem>>, vector<1x1x128x128xbf16>
    %19 = vector.shape_cast %18 : vector<1x1x128x128xbf16> to vector<128x128xbf16>
    %cst_23 = arith.constant dense<0.000000e+00> : vector<1x128xf32>
    %20 = tpu.matmul %17, %19, %cst_23 {dimension_numbers = #tpu.dot_dimension_numbers<[1], [0], [0], [1], [0, 0, 1, 1], [], []>} : vector<1x128xbf16>, vector<128x128xbf16>, vector<1x128xf32> -> vector<1x128xf32>
    %21 = arith.addf %14, %20 : vector<1x128xf32>
    %c1_24 = arith.constant 1 : index
    %c0_25 = arith.constant 0 : index
    %c0_26 = arith.constant 0 : index
    %c0_27 = arith.constant 0 : index
    %22 = vector.load %arg2[%c1_24, %c0_25, %c0_26, %c0_27] : memref<2x4x2x128xbf16, #tpu.memory_space<vmem>>, vector<1x1x1x128xbf16>
    %23 = vector.shape_cast %22 : vector<1x1x1x128xbf16> to vector<1x1x128xbf16>
    %24 = vector.shape_cast %23 : vector<1x1x128xbf16> to vector<1x128xbf16>
    %c1_28 = arith.constant 1 : index
    %c0_29 = arith.constant 0 : index
    %c0_30 = arith.constant 0 : index
    %c0_31 = arith.constant 0 : index
    %25 = vector.load %arg3[%c1_28, %c0_29, %c0_30, %c0_31] : memref<3x3x128x128xbf16, #tpu.memory_space<vmem>>, vector<1x1x128x128xbf16>
    %26 = vector.shape_cast %25 : vector<1x1x128x128xbf16> to vector<128x128xbf16>
    %cst_32 = arith.constant dense<0.000000e+00> : vector<1x128xf32>
    %27 = tpu.matmul %24, %26, %cst_32 {dimension_numbers = #tpu.dot_dimension_numbers<[1], [0], [0], [1], [0, 0, 1, 1], [], []>} : vector<1x128xbf16>, vector<128x128xbf16>, vector<1x128xf32> -> vector<1x128xf32>
    %28 = arith.addf %21, %27 : vector<1x128xf32>
    %c1_33 = arith.constant 1 : index
    %c2_34 = arith.constant 2 : index
    %c0_35 = arith.constant 0 : index
    %c0_36 = arith.constant 0 : index
    %29 = vector.load %arg2[%c1_33, %c2_34, %c0_35, %c0_36] : memref<2x4x2x128xbf16, #tpu.memory_space<vmem>>, vector<1x1x1x128xbf16>
    %30 = vector.shape_cast %29 : vector<1x1x1x128xbf16> to vector<1x1x128xbf16>
    %31 = vector.shape_cast %30 : vector<1x1x128xbf16> to vector<1x128xbf16>
    %c1_37 = arith.constant 1 : index
    %c1_38 = arith.constant 1 : index
    %c0_39 = arith.constant 0 : index
    %c0_40 = arith.constant 0 : index
    %32 = vector.load %arg3[%c1_37, %c1_38, %c0_39, %c0_40] : memref<3x3x128x128xbf16, #tpu.memory_space<vmem>>, vector<1x1x128x128xbf16>
    %33 = vector.shape_cast %32 : vector<1x1x128x128xbf16> to vector<128x128xbf16>
    %cst_41 = arith.constant dense<0.000000e+00> : vector<1x128xf32>
    %34 = tpu.matmul %31, %33, %cst_41 {dimension_numbers = #tpu.dot_dimension_numbers<[1], [0], [0], [1], [0, 0, 1, 1], [], []>} : vector<1x128xbf16>, vector<128x128xbf16>, vector<1x128xf32> -> vector<1x128xf32>
    %35 = arith.addf %28, %34 : vector<1x128xf32>
    %c1_42 = arith.constant 1 : index
    %c0_43 = arith.constant 0 : index
    %c1_44 = arith.constant 1 : index
    %c0_45 = arith.constant 0 : index
    %36 = vector.load %arg2[%c1_42, %c0_43, %c1_44, %c0_45] : memref<2x4x2x128xbf16, #tpu.memory_space<vmem>>, vector<1x1x1x128xbf16>
    %37 = vector.shape_cast %36 : vector<1x1x1x128xbf16> to vector<1x1x128xbf16>
    %38 = vector.shape_cast %37 : vector<1x1x128xbf16> to vector<1x128xbf16>
    %c1_46 = arith.constant 1 : index
    %c2_47 = arith.constant 2 : index
    %c0_48 = arith.constant 0 : index
    %c0_49 = arith.constant 0 : index
    %39 = vector.load %arg3[%c1_46, %c2_47, %c0_48, %c0_49] : memref<3x3x128x128xbf16, #tpu.memory_space<vmem>>, vector<1x1x128x128xbf16>
    %40 = vector.shape_cast %39 : vector<1x1x128x128xbf16> to vector<128x128xbf16>
    %cst_50 = arith.constant dense<0.000000e+00> : vector<1x128xf32>
    %41 = tpu.matmul %38, %40, %cst_50 {dimension_numbers = #tpu.dot_dimension_numbers<[1], [0], [0], [1], [0, 0, 1, 1], [], []>} : vector<1x128xbf16>, vector<128x128xbf16>, vector<1x128xf32> -> vector<1x128xf32>
    %42 = arith.addf %35, %41 : vector<1x128xf32>
    %c0_51 = arith.constant 0 : index
    %c1_52 = arith.constant 1 : index
    %c0_53 = arith.constant 0 : index
    %c0_54 = arith.constant 0 : index
    %43 = vector.load %arg2[%c0_51, %c1_52, %c0_53, %c0_54] : memref<2x4x2x128xbf16, #tpu.memory_space<vmem>>, vector<1x1x1x128xbf16>
    %44 = vector.shape_cast %43 : vector<1x1x1x128xbf16> to vector<1x1x128xbf16>
    %45 = vector.shape_cast %44 : vector<1x1x128xbf16> to vector<1x128xbf16>
    %c2_55 = arith.constant 2 : index
    %c0_56 = arith.constant 0 : index
    %c0_57 = arith.constant 0 : index
    %c0_58 = arith.constant 0 : index
    %46 = vector.load %arg3[%c2_55, %c0_56, %c0_57, %c0_58] : memref<3x3x128x128xbf16, #tpu.memory_space<vmem>>, vector<1x1x128x128xbf16>
    %47 = vector.shape_cast %46 : vector<1x1x128x128xbf16> to vector<128x128xbf16>
    %cst_59 = arith.constant dense<0.000000e+00> : vector<1x128xf32>
    %48 = tpu.matmul %45, %47, %cst_59 {dimension_numbers = #tpu.dot_dimension_numbers<[1], [0], [0], [1], [0, 0, 1, 1], [], []>} : vector<1x128xbf16>, vector<128x128xbf16>, vector<1x128xf32> -> vector<1x128xf32>
    %49 = arith.addf %42, %48 : vector<1x128xf32>
    %c0_60 = arith.constant 0 : index
    %c3 = arith.constant 3 : index
    %c0_61 = arith.constant 0 : index
    %c0_62 = arith.constant 0 : index
    %50 = vector.load %arg2[%c0_60, %c3, %c0_61, %c0_62] : memref<2x4x2x128xbf16, #tpu.memory_space<vmem>>, vector<1x1x1x128xbf16>
    %51 = vector.shape_cast %50 : vector<1x1x1x128xbf16> to vector<1x1x128xbf16>
    %52 = vector.shape_cast %51 : vector<1x1x128xbf16> to vector<1x128xbf16>
    %c2_63 = arith.constant 2 : index
    %c1_64 = arith.constant 1 : index
    %c0_65 = arith.constant 0 : index
    %c0_66 = arith.constant 0 : index
    %53 = vector.load %arg3[%c2_63, %c1_64, %c0_65, %c0_66] : memref<3x3x128x128xbf16, #tpu.memory_space<vmem>>, vector<1x1x128x128xbf16>
    %54 = vector.shape_cast %53 : vector<1x1x128x128xbf16> to vector<128x128xbf16>
    %cst_67 = arith.constant dense<0.000000e+00> : vector<1x128xf32>
    %55 = tpu.matmul %52, %54, %cst_67 {dimension_numbers = #tpu.dot_dimension_numbers<[1], [0], [0], [1], [0, 0, 1, 1], [], []>} : vector<1x128xbf16>, vector<128x128xbf16>, vector<1x128xf32> -> vector<1x128xf32>
    %56 = arith.addf %49, %55 : vector<1x128xf32>
    %c0_68 = arith.constant 0 : index
    %c1_69 = arith.constant 1 : index
    %c1_70 = arith.constant 1 : index
    %c0_71 = arith.constant 0 : index
    %57 = vector.load %arg2[%c0_68, %c1_69, %c1_70, %c0_71] : memref<2x4x2x128xbf16, #tpu.memory_space<vmem>>, vector<1x1x1x128xbf16>
    %58 = vector.shape_cast %57 : vector<1x1x1x128xbf16> to vector<1x1x128xbf16>
    %59 = vector.shape_cast %58 : vector<1x1x128xbf16> to vector<1x128xbf16>
    %c2_72 = arith.constant 2 : index
    %c2_73 = arith.constant 2 : index
    %c0_74 = arith.constant 0 : index
    %c0_75 = arith.constant 0 : index
    %60 = vector.load %arg3[%c2_72, %c2_73, %c0_74, %c0_75] : memref<3x3x128x128xbf16, #tpu.memory_space<vmem>>, vector<1x1x128x128xbf16>
    %61 = vector.shape_cast %60 : vector<1x1x128x128xbf16> to vector<128x128xbf16>
    %cst_76 = arith.constant dense<0.000000e+00> : vector<1x128xf32>
    %62 = tpu.matmul %59, %61, %cst_76 {dimension_numbers = #tpu.dot_dimension_numbers<[1], [0], [0], [1], [0, 0, 1, 1], [], []>} : vector<1x128xbf16>, vector<128x128xbf16>, vector<1x128xf32> -> vector<1x128xf32>
    %63 = arith.addf %56, %62 : vector<1x128xf32>
    %c0_77 = arith.constant 0 : index
    %c0_78 = arith.constant 0 : index
    %64 = vector.load %arg4[%c0_77, %c0_78] : memref<1x128xf32, #tpu.memory_space<vmem>>, vector<1x128xf32>
    %65 = arith.mulf %63, %64 : vector<1x128xf32>
    %c0_79 = arith.constant 0 : index
    %c0_80 = arith.constant 0 : index
    %66 = vector.load %arg5[%c0_79, %c0_80] : memref<1x128xf32, #tpu.memory_space<vmem>>, vector<1x128xf32>
    %67 = arith.addf %65, %66 : vector<1x128xf32>
    %cst_81 = arith.constant 0.000000e+00 : f32
    %68 = vector.broadcast %cst_81 : f32 to vector<1x128xf32>
    %69 = arith.cmpf oge, %67, %68 : vector<1x128xf32>
    %cst_82 = arith.constant 2.000000e-01 : f32
    %70 = vector.broadcast %cst_82 : f32 to vector<1x128xf32>
    %71 = arith.mulf %70, %67 : vector<1x128xf32>
    %72 = arith.select %69, %67, %71 : vector<1x128xi1>, vector<1x128xf32>
    %73 = vector.shape_cast %72 : vector<1x128xf32> to vector<1x1x128xf32>
    %74 = arith.truncf %73 : vector<1x1x128xf32> to vector<1x1x128xbf16>
    %c0_83 = arith.constant 0 : index
    %c0_84 = arith.constant 0 : index
    %c0_85 = arith.constant 0 : index
    %c0_86 = arith.constant 0 : index
    %75 = vector.load %arg6[%c0_83, %c0_84, %c0_85, %c0_86] : memref<1x1x1x128xbf16, #tpu.memory_space<vmem>>, vector<1x1x1x128xbf16>
    %76 = vector.shape_cast %75 : vector<1x1x1x128xbf16> to vector<1x1x128xbf16>
    %77 = vector.shape_cast %74 : vector<1x1x128xbf16> to vector<1x1x1x128xbf16>
    tpu.vector_store %arg6[%c0_83, %c0_84, %c0_85, %c0_86], %77 {strides = array<i32>} : memref<1x1x1x128xbf16, #tpu.memory_space<vmem>>, vector<1x1x1x128xbf16>,
    return
  }
  func.func @transform_0(%arg0: i32, %arg1: i32) -> (i32, i32, i32, i32) {
    %c0_i32 = arith.constant 0 : i32
    %c0_i32_0 = arith.constant 0 : i32
    %c0_i32_1 = arith.constant 0 : i32
    %c0_i32_2 = arith.constant 0 : i32
    return %arg0, %c0_i32, %c0_i32_0, %c0_i32_1 : i32, i32, i32, i32
  }
  func.func @transform_1(%arg0: i32, %arg1: i32) -> (i32, i32, i32, i32) {
    %c0_i32 = arith.constant 0 : i32
    %c0_i32_0 = arith.constant 0 : i32
    %c0_i32_1 = arith.constant 0 : i32
    %c0_i32_2 = arith.constant 0 : i32
    return %c0_i32, %c0_i32_0, %c0_i32_1, %arg1 : i32, i32, i32, i32
  }
  func.func @transform_2(%arg0: i32, %arg1: i32) -> (i32, i32) {
    %c0_i32 = arith.constant 0 : i32
    %c0_i32_0 = arith.constant 0 : i32
    return %c0_i32, %arg1 : i32, i32
  }
  func.func @transform_3(%arg0: i32, %arg1: i32) -> (i32, i32) {
    %c0_i32 = arith.constant 0 : i32
    %c0_i32_0 = arith.constant 0 : i32
    return %c0_i32, %arg1 : i32, i32
  }
  func.func @transform_4(%arg0: i32, %arg1: i32) -> (i32, i32, i32, i32) {
    %c0_i32 = arith.constant 0 : i32
    %c0_i32_0 = arith.constant 0 : i32
    %c0_i32_1 = arith.constant 0 : i32
    return %arg0, %c0_i32, %c0_i32_0, %arg1 : i32, i32, i32, i32
  }
}

module attributes {stable_mosaic.version = 11 : i64} {
  func.func @_tail_kernel(%arg0: memref<2x1x128xbf16, #tpu.memory_space<vmem>>, %arg1: memref<128x256xf32, #tpu.memory_space<vmem>>, %arg2: memref<1x256xf32, #tpu.memory_space<vmem>>, %arg3: memref<256x1xf32, #tpu.memory_space<vmem>>, %arg4: memref<1x1xf32, #tpu.memory_space<vmem>>, %arg5: memref<2x1xf32, #tpu.memory_space<vmem>>) attributes {dimension_semantics = [], scalar_prefetch = 0 : i64, scratch_operands = 0 : i64, tpu.core_type = #tpu.core_type<tc>} {
    %c0 = arith.constant 0 : index
    %c0_0 = arith.constant 0 : index
    %c0_1 = arith.constant 0 : index
    %0 = vector.load %arg0[%c0, %c0_0, %c0_1] : memref<2x1x128xbf16, #tpu.memory_space<vmem>>, vector<2x1x128xbf16>
    %1 = arith.extf %0 : vector<2x1x128xbf16> to vector<2x1x128xf32>
    %cst = arith.constant dense<0.000000e+00> : vector<2x128xf32>
    %2 = vector.multi_reduction <add>, %1, %cst [1] : vector<2x1x128xf32> to vector<2x128xf32>
    %cst_2 = arith.constant 1.000000e+00 : f32
    %3 = vector.broadcast %cst_2 : f32 to vector<2x128xf32>
    %4 = arith.divf %2, %3 : vector<2x128xf32>
    %c0_3 = arith.constant 0 : index
    %c0_4 = arith.constant 0 : index
    %5 = vector.load %arg1[%c0_3, %c0_4] : memref<128x256xf32, #tpu.memory_space<vmem>>, vector<128x256xf32>
    %cst_5 = arith.constant dense<0.000000e+00> : vector<2x256xf32>
    %6 = tpu.matmul %4, %5, %cst_5 {dimension_numbers = #tpu.dot_dimension_numbers<[1], [0], [0], [1], [0, 0, 1, 1], [], []>} : vector<2x128xf32>, vector<128x256xf32>, vector<2x256xf32> -> vector<2x256xf32>
    %c0_6 = arith.constant 0 : index
    %c0_7 = arith.constant 0 : index
    %7 = vector.load %arg2[%c0_6, %c0_7] : memref<1x256xf32, #tpu.memory_space<vmem>>, vector<1x256xf32>
    %8 = vector.broadcast %7 : vector<1x256xf32> to vector<2x256xf32>
    %9 = arith.addf %6, %8 : vector<2x256xf32>
    %cst_8 = arith.constant 0.000000e+00 : f32
    %10 = vector.broadcast %cst_8 : f32 to vector<2x256xf32>
    %11 = arith.cmpf oge, %9, %10 : vector<2x256xf32>
    %cst_9 = arith.constant 2.000000e-01 : f32
    %12 = vector.broadcast %cst_9 : f32 to vector<2x256xf32>
    %13 = arith.mulf %12, %9 : vector<2x256xf32>
    %14 = arith.select %11, %9, %13 : vector<2x256xi1>, vector<2x256xf32>
    %c0_10 = arith.constant 0 : index
    %c0_11 = arith.constant 0 : index
    %15 = vector.load %arg3[%c0_10, %c0_11] : memref<256x1xf32, #tpu.memory_space<vmem>>, vector<256x1xf32>
    %cst_12 = arith.constant dense<0.000000e+00> : vector<2x1xf32>
    %16 = tpu.matmul %14, %15, %cst_12 {dimension_numbers = #tpu.dot_dimension_numbers<[1], [0], [0], [1], [0, 0, 1, 1], [], []>} : vector<2x256xf32>, vector<256x1xf32>, vector<2x1xf32> -> vector<2x1xf32>
    %c0_13 = arith.constant 0 : index
    %c0_14 = arith.constant 0 : index
    %17 = vector.load %arg4[%c0_13, %c0_14] : memref<1x1xf32, #tpu.memory_space<vmem>>, vector<1x1xf32>
    %18 = vector.broadcast %17 : vector<1x1xf32> to vector<2x1xf32>
    %19 = arith.addf %16, %18 : vector<2x1xf32>
    %20 = arith.negf %19 : vector<2x1xf32>
    %21 = math.exp %20 : vector<2x1xf32>
    %cst_15 = arith.constant 1.000000e+00 : f32
    %22 = vector.broadcast %cst_15 : f32 to vector<2x1xf32>
    %23 = arith.addf %22, %21 : vector<2x1xf32>
    %24 = arith.divf %22, %23 : vector<2x1xf32>
    %c0_16 = arith.constant 0 : index
    %c0_17 = arith.constant 0 : index
    %25 = vector.load %arg5[%c0_16, %c0_17] : memref<2x1xf32, #tpu.memory_space<vmem>>, vector<2x1xf32>
    tpu.vector_store %arg5[%c0_16, %c0_17], %24 {strides = array<i32>} : memref<2x1xf32, #tpu.memory_space<vmem>>, vector<2x1xf32>,
    return
  }
}

</mosaic_0001>

<bundles_post_ra>
// kernel: discriminator_forward.10
= control target key start
LH: loop header
LB: loop body
LE: loop exit
PB: predicated region body
PF: predicated region fallthrough
CT: control target
= control target key end

     0   :  { %s2313_s15 = smov 0   ;;  %s2315_s16 = smov 0   ;;  %s2632_s0 = inlined_call_operand.vmem [shape: bf16[4,18,9,16], index: 0, kind: input, shape index: {}]   ;;  %s2633_s1 = inlined_call_operand.vmem [shape: bf16[3,3,16,16], index: 1, kind: input, shape index: {}]   ;;  %s2634_s2 = inlined_call_operand.vmem [shape: f32[1,16], index: 2, kind: input, shape index: {}]   ;;  %s2635_s3 = inlined_call_operand.vmem [shape: f32[1,16], index: 3, kind: input, shape index: {}]   ;;  %s2636_s4 = inlined_call_operand.vmem [shape: bf16[2,8,8,16], index: 4, kind: output, shape index: {}]  }
   0x1   :  { %s2317_s17 = smov 0  }
   0x2 LB: > { %s26_s18 = sadd.s32 1, %s2282_s16  ;;  %p1890_p0 = scmp.ge.s32.totalorder %s2286_s17, 1  ;;  %s2286_s17 = sphi %s2317_s17, %s14_s17   ;;  %s2282_s16 = sphi %s2315_s16, %s2640_s16   ;;  %s2278_s15 = sphi %s2313_s15, %s2639_s15  }
   0x3   : > { %p28_p1 = scmp.ge.s32.totalorder %s26_s18, 2  ;;  %p203_p2 = scmp.lt.s32.totalorder %s2286_s17, 3 }
   0x5   : > { %s2642_s18 = smov (%p28_p1, %s26_s18), 0  ;;  %p204_p3 = pnand %p1890_p0, %p203_p2 }
   0x6   : > { %s1891_s21 = sshll.u32 (!%p204_p3), %s2278_s15, 1  ;;  %p260_p5 = scmp.lt.s32.totalorder (!%p204_p3), %s2278_s15, 1 }
   0x7   : > { %207 = sbr.rel (%p204_p3) target bundleno = 304 (0x130), region = 36  ;;  %p244_p4 = scmp.lt.s32.totalorder (!%p204_p3), %s1891_s21, 3 }
   0xc   : > { %v2231_v0 = vld [vmem:[%s2633_s1 + $0x8] sm:$0xff]   ;;  %v2234_v1 = vld [vmem:[%s2633_s1] sm:$0xff]   ;;  %s2644_s21 = smov (!%p244_p4, %s1891_s21), 3  ;;  %v2237_v2 = vld [vmem:[%s2633_s1 + $0x10] sm:$0xff]   ;;  %vm317_vm0 = vcmask 130048   ;;  %s2646_s15 = smov (!%p260_p5, %s2278_s15), 1 }
   0xd   : > { %2204 = vmatprep.subr.bf16.mxu1 %v2231_v0  ;;  %2114 = vmatprep.subr.bf16.mxu0 %v2231_v0  ;;  %s2206_s26 = smul.u32 144, %s2644_s21  ;;  %v2239_v5 = vld [vmem:[%s2633_s1 + $0x18] sm:$0xff]   ;;  %vm514_vm1 = vsmask.f32 3328  ;;  %v2356_v6 = vld [vmem:[%s2633_s1 + $0x20] sm:$0xff]   ;;  %v2379_v37 = vld [vmem:[%s2633_s1 + $0x28] sm:$0xff]  }
   0xe   : > { %2205 = vmatpush3.bf16.msra.mxu1 %v2231_v0  ;;  %2115 = vmatpush3.bf16.msra.mxu0 %v2231_v0  ;;  %vm515_vm2 = vsmask.f32 7440  ;;  %s2068_s24 = sshll.u32 %s2646_s15, 5  ;;  %vm1757_vm5 = vcmask 125952  }
   0xf   : > { %2124 = vmatprep.subr.bf16.mxu1 %v2234_v1  ;;  %2134 = vmatprep.subr.bf16.mxu0 %v2237_v2  ;;  %s2346_s29 = scalar_lea.vmem %s2632_s0, %s2206_s26  ;;  %vm2383_vm3 = vmor %vm514_vm1, %vm515_vm2  ;;  %s2594_s27 = scalar_lea.vmem %s2636_s4, %s2068_s24 }
  0x10   : > { %v2232_v3 = vld [vmem:[%s2346_s29 + $0x48] ss:$8 sps:$4 sm:$0xff]   ;;  %v2235_v7 = vld [vmem:[%s2346_s29 + $0x58] ss:$8 sps:$4 sm:$0xff]   ;;  %v499_v11 = vld [vmem:[%s2346_s29 + $0x4] sm:$0x1] }
  0x11   : > { %v2233_v4 = vld [vmem:[%s2346_s29 + $0x68] ss:$8 sps:$4 sm:$0xff]   ;;  %2116 = vmatprep.mubr.msk.bf16.mxu0 %vm317_vm0, %v2232_v3  ;;  %v2236_v8 = vld [vmem:[%s2346_s29 + $0x78] ss:$8 sps:$4 sm:$0xff]   ;;  %v501_v14 = vld [vmem:[%s2346_s29 + $0xc] sm:$0x1] }
  0x12   : > { %2120 = vmatprep.mubr.msk.bf16.mxu1 %vm317_vm0, %v2233_v4  ;;  %2117 = vmatmul.mubr.msk.bf16.vlgmr.msra.gmra.mxu0 %vm317_vm0, %v2235_v7  ;;  %v2238_v9 = vld [vmem:[%s2346_s29] ss:$8 sps:$4 sm:$0xff]   ;;  %v2240_v13 = vld [vmem:[%s2346_s29 + $0x10] ss:$8 sps:$4 sm:$0xff]   ;;  %v527_v17 = vshll.u32 %v499_v11, 16  ;;  %v541_v20 = vshll.u32 %v501_v14, 16 }
  0x13   : > { %2121 = vmatmul.mubr.msk.bf16.vlgmr.msra.gmra.mxu1 %vm317_vm0, %v2236_v8  ;;  %2135 = vmatpush3.bf16.msra.mxu0 %v2237_v2  ;;  %v498_v10 = vld [vmem:[%s2346_s29] sm:$0xf]  ;;  %v500_v12 = vld [vmem:[%s2346_s29 + $0x8] sm:$0xf]  ;;  %v502_v21 = vld [vmem:[%s2346_s29 + $0x10] sm:$0xf] }
  0x14   : > { %2125 = vmatpush3.bf16.msra.mxu1 %v2234_v1  ;;  %2126 = vmatprep.mubr.msk.bf16.mxu1 %vm317_vm0, %v2238_v9  ;;  %v518_v15 = vshrl.u32 %v498_v10, 16  ;;  %v521_v16 = vshll.u32 %v498_v10, 16  ;;  %v532_v18 = vshrl.u32 %v500_v12, 16  ;;  %v535_v19 = vshll.u32 %v500_v12, 16  ;;  %v503_v22 = vld [vmem:[%s2346_s29 + $0x14] sm:$0x1] }
  0x15   : > { %2144 = vmatprep.subr.bf16.mxu1 %v2239_v5  ;;  %2154 = vmatprep.subr.bf16.mxu0 %v2356_v6  ;;  %v529_v25 = vrot.slane %v527_v17, 5  ;;  %v504_v27 = vld [vmem:[%s2346_s29 + $0x18] sm:$0xf]  ;;  %v543_v29 = vrot.slane %v541_v20, 5  ;;  %v505_v30 = vld [vmem:[%s2346_s29 + $0x1c] sm:$0x1] }
  0x16   : > { %v520_v23 = vrot.slane %v518_v15, 4  ;;  %v523_v24 = vrot.slane %v521_v16, 5  ;;  %v534_v26 = vrot.slane %v532_v18, 4  ;;  %v537_v28 = vrot.slane %v535_v19, 5  ;;  %v2242_v47 = vld [vmem:[%s2346_s29 + $0x20] ss:$8 sps:$4 sm:$0xff]  }
  0x17   : > { %v546_v31 = vshrl.u32 %v502_v21, 16  ;;  %v549_v32 = vshll.u32 %v502_v21, 16  ;;  %v555_v34 = vshll.u32 %v503_v22, 16  ;;  %v560_v35 = vshrl.u32 %v504_v27, 16  ;;  %v2243_v53 = vld [vmem:[%s2346_s29 + $0x30] ss:$8 sps:$4 sm:$0xff]  }
  0x18   : > { %v524_v33 = vor.u32 %v523_v24, %v520_v23  ;;  %v563_v36 = vshll.u32 %v504_v27, 16  ;;  %v538_v39 = vor.u32 %v537_v28, %v534_v26  ;;  %v569_v42 = vshll.u32 %v505_v30, 16  ;;  %v506_v54 = vld [vmem:[%s2346_s29 + $0x20] sm:$0xf]  ;;  %v507_v55 = vld [vmem:[%s2346_s29 + $0x24] sm:$0x1] }
  0x19   : > { %v548_v40 = vrot.slane %v546_v31, 4  ;;  %v551_v41 = vrot.slane %v549_v32, 5  ;;  %v557_v44 = vrot.slane %v555_v34, 5  ;;  %v562_v45 = vrot.slane %v560_v35, 4  ;;  %v508_v58 = vld [vmem:[%s2346_s29 + $0x28] sm:$0xf] }
  0x1a   : > { %v525_v43 = vrot.slane %v524_v33, 4  ;;  %v565_v46 = vrot.slane %v563_v36, 5  ;;  %v539_v48 = vrot.slane %v538_v39, 4  ;;  %v571_v50 = vrot.slane %v569_v42, 5  ;;  %v509_v59 = vld [vmem:[%s2346_s29 + $0x2c] sm:$0x1] }
  0x1b   : > { %2127 = vmatmul.mubr.msk.bf16.vlgmr.msra.gmra.mxu1 %vm317_vm0, %v2240_v13  ;;  %v552_v49 = vor.u32 %v551_v41, %v548_v40  ;;  %v574_v60 = vshrl.u32 %v506_v54, 16  ;;  %v577_v63 = vshll.u32 %v506_v54, 16  ;;  %v583_v0 = vshll.u32 %v507_v55, 16  ;;  %v510_v1 = vld [vmem:[%s2346_s29 + $0x30] sm:$0xf] }
  0x1c   : > { %2145 = vmatpush3.bf16.msra.mxu1 %v2239_v5  ;;  %v530_v51 = vsel %vm2383_vm3, %v525_v43, %v529_v25  ;;  %v566_v52 = vor.u32 %v565_v46, %v562_v45  ;;  %2130 = vmatprep.mubr.msk.bf16.mxu1 %vm317_vm0, %v2242_v47  ;;  %v544_v56 = vsel %vm2383_vm3, %v539_v48, %v543_v29  ;;  %v588_v4 = vshrl.u32 %v508_v58, 16  ;;  %v511_v7 = vld [vmem:[%s2346_s29 + $0x34] sm:$0x1]  ;;  %v512_v12 = vld [vmem:[%s2346_s29 + $0x38] sm:$0xf] }
  0x1d   : > { %2164 = vmatprep.subr.bf16.mxu1 %v2379_v37  ;;  %v553_v57 = vrot.slane %v552_v49, 4  ;;  %v1925_v61 = vcombine.low %v530_v51, %v544_v56  ;;  %v576_v3 = vrot.slane %v574_v60, 4  ;;  %v591_v5 = vshll.u32 %v508_v58, 16  ;;  %v513_v16 = vld [vmem:[%s2346_s29 + $0x3c] sm:$0x1]  ;;  %v2412_v18 = vld [vmem:[%s2633_s1 + $0x30] sm:$0xff]  }
  0x1e   : > { %v567_v62 = vrot.slane %v566_v52, 4  ;;  %v579_v9 = vrot.slane %v577_v63, 5  ;;  %v585_v10 = vrot.slane %v583_v0, 5  ;;  %v597_v11 = vshll.u32 %v509_v59, 16  ;;  %v2244_v30 = vld [vmem:[%s2346_s29 + $0x90] ss:$8 sps:$4 sm:$0xff]  }
  0x1f   : > { %v558_v2 = vsel %vm2383_vm3, %v553_v57, %v557_v44  ;;  %2136 = vmatprep.mubr.msk.bf16.mxu0 %vm317_vm0, %v1925_v61  ;;  %v590_v14 = vrot.slane %v588_v4, 4  ;;  %v593_v15 = vrot.slane %v591_v5, 5  ;;  %v602_v17 = vshrl.u32 %v510_v1, 16  ;;  %v2246_v39 = vld [vmem:[%s2346_s29 + $0xa0] ss:$8 sps:$4 sm:$0xff]   ;;  %v2428_v44 = vld [vmem:[%s2633_s1 + $0x38] sm:$0xff]  }
  0x20   : > { %v572_v8 = vsel %vm2383_vm3, %v567_v62, %v571_v50  ;;  %v580_v19 = vor.u32 %v579_v9, %v576_v3  ;;  %v599_v20 = vrot.slane %v597_v11, 5  ;;  %v605_v21 = vshll.u32 %v510_v1, 16  ;;  %v2250_v47 = vld [vmem:[%s2346_s29 + $0xb0] ss:$8 sps:$4 sm:$0xff]   ;;  %v2251_v51 = vld [vmem:[%s2346_s29 + $0xc0] ss:$8 sps:$4 sm:$0xff]  }
  0x21   : > { %v1926_v13 = vcombine.low %v558_v2, %v572_v8  ;;  %v611_v22 = vshll.u32 %v511_v7, 16  ;;  %v594_v23 = vor.u32 %v593_v15, %v590_v14  ;;  %v604_v24 = vrot.slane %v602_v17, 4  ;;  %v2247_v49 = vld [vmem:[%s2346_s29 + $0xd8] ss:$8 sps:$4 sm:$0xff]   ;;  %v1972_v52 = vld [vmem:[%s2346_s29 + $0x90] sm:$0xf] }
  0x22   : > { %v616_v25 = vshrl.u32 %v512_v12, 16  ;;  %v619_v26 = vshll.u32 %v512_v12, 16  ;;  %v581_v27 = vrot.slane %v580_v19, 4  ;;  %v607_v28 = vrot.slane %v605_v21, 5  ;;  %v1974_v54 = vld [vmem:[%s2346_s29 + $0x98] sm:$0xf] }
  0x23   : > { %2131 = vmatmul.mubr.msk.bf16.gmra.mxu1 %vm317_vm0, %v2243_v53  ;;  %2137 = vmatmul.mubr.msk.bf16.vlgmr.msra.gmra.mxu0 %vm317_vm0, %v1926_v13  ;;  %v625_v29 = vshll.u32 %v513_v16, 16  ;;  %v595_v31 = vrot.slane %v594_v23, 4  ;;  %v613_v36 = vrot.slane %v611_v22, 5  ;;  %v1973_v53 = vld [vmem:[%s2346_s29 + $0x94] sm:$0x1]  ;;  %v998_v56 = vshrl.u32 %v1972_v52, 16 }
  0x24   : > { %2155 = vmatpush3.bf16.msra.mxu0 %v2356_v6  ;;  %v618_v32 = vrot.slane %v616_v25, 4  ;;  %v621_v33 = vrot.slane %v619_v26, 5  ;;  %v586_v34 = vsel %vm2383_vm3, %v581_v27, %v585_v10  ;;  %v608_v35 = vor.u32 %v607_v28, %v604_v24  ;;  %2146 = vmatprep.mubr.msk.bf16.mxu1 %vm317_vm0, %v2244_v30  ;;  %v1975_v55 = vld [vmem:[%s2346_s29 + $0x9c] sm:$0x1]  ;;  %v2248_v59 = vld [vmem:[%s2346_s29 + $0xe8] ss:$8 sps:$4 sm:$0xff]  }
  0x25   : > { %2174 = vmatprep.subr.bf16.mxu0 %v2412_v18  ;;  %v600_v6 = vsel %vm2383_vm3, %v595_v31, %v599_v20  ;;  %v627_v41 = vrot.slane %v625_v29, 5  ;;  %v1001_v57 = vshll.u32 %v1972_v52, 16  ;;  %v1012_v58 = vshrl.u32 %v1974_v54, 16  ;;  %v1976_v62 = vld [vmem:[%s2346_s29 + $0xa0] sm:$0xf] }
  0x26   : > { %v622_v40 = vor.u32 %v621_v33, %v618_v32  ;;  %v1927_v42 = vcombine.low %v586_v34, %v600_v6  ;;  %v609_v43 = vrot.slane %v608_v35, 4  ;;  %v1015_v60 = vshll.u32 %v1974_v54, 16  ;;  %v2252_v63 = vld [vmem:[%s2346_s29 + $0xf8] ss:$8 sps:$4 sm:$0xff]   ;;  %v1977_v4 = vld [vmem:[%s2346_s29 + $0xa4] sm:$0x1] }
  0x27   : > { %v1021_v61 = vshll.u32 %v1975_v55, 16  ;;  %v1000_v0 = vrot.slane %v998_v56, 4  ;;  %v1003_v1 = vrot.slane %v1001_v57, 5  ;;  %v1014_v3 = vrot.slane %v1012_v58, 4  ;;  %v1978_v8 = vld [vmem:[%s2346_s29 + $0xa8] sm:$0xf] }
  0x28   : > { %v623_v45 = vrot.slane %v622_v40, 4  ;;  %2140 = vmatprep.mubr.msk.bf16.mxu0 %vm317_vm0, %v1927_v42  ;;  %v614_v46 = vsel %vm2383_vm3, %v609_v43, %v613_v36  ;;  %v1017_v5 = vrot.slane %v1015_v60, 5  ;;  %v1979_v9 = vld [vmem:[%s2346_s29 + $0xac] sm:$0x1]  ;;  %v1026_v11 = vshrl.u32 %v1976_v62, 16  ;;  %v2458_v19 = vld [vmem:[%s2633_s1 + $0x40] sm:$0xff]  }
  0x29   : > { %v1023_v7 = vrot.slane %v1021_v61, 5  ;;  %v1004_v10 = vor.u32 %v1003_v1, %v1000_v0  ;;  %v1029_v12 = vshll.u32 %v1976_v62, 16  ;;  %v1035_v13 = vshll.u32 %v1977_v4, 16  ;;  %v2253_v30 = vld [vmem:[%s2346_s29 + $0x108] ss:$8 sps:$4 sm:$0xff]  }
  0x2a   : > { %v628_v48 = vsel %vm2383_vm3, %v623_v45, %v627_v41  ;;  %v1018_v14 = vor.u32 %v1017_v5, %v1014_v3  ;;  %v1040_v15 = vshrl.u32 %v1978_v8, 16  ;;  %v1043_v16 = vshll.u32 %v1978_v8, 16  ;;  %v1980_v33 = vld [vmem:[%s2346_s29 + $0xb0] sm:$0xf]  ;;  %v1981_v34 = vld [vmem:[%s2346_s29 + $0xb4] sm:$0x1] }
  0x2b   : > { %2147 = vmatmul.mubr.msk.bf16.vlgmr.msra.gmra.mxu1 %vm317_vm0, %v2246_v39  ;;  %v1928_v50 = vcombine.low %v614_v46, %v628_v48  ;;  %v1049_v17 = vshll.u32 %v1979_v9, 16  ;;  %v1005_v20 = vrot.slane %v1004_v10, 4  ;;  %v1028_v21 = vrot.slane %v1026_v11, 4  ;;  %v2255_v36 = vld [vmem:[%s2346_s29 + $0x8] ss:$8 sps:$4 sm:$0xff]  }
  0x2c   : > { %2165 = vmatpush3.bf16.msra.mxu1 %v2379_v37  ;;  %2150 = vmatprep.mubr.msk.bf16.mxu1 %vm317_vm0, %v2250_v47  ;;  %v1007_v37 = vshll.u32 %v1973_v53, 16  ;;  %v1031_v22 = vrot.slane %v1029_v12, 5  ;;  %v1019_v23 = vrot.slane %v1018_v14, 4  ;;  %v1042_v24 = vrot.slane %v1040_v15, 4  ;;  %v1982_v39 = vld [vmem:[%s2346_s29 + $0xb8] sm:$0xf] }
  0x2d   : > { %2184 = vmatprep.subr.bf16.mxu1 %v2428_v44  ;;  %2141 = vmatmul.mubr.msk.bf16.gmra.mxu0 %vm317_vm0, %v1928_v50  ;;  %v1045_v25 = vrot.slane %v1043_v16, 5  ;;  %v1037_v28 = vrot.slane %v1035_v13, 5  ;;  %v1051_v29 = vrot.slane %v1049_v17, 5  ;;  %v1983_v6 = vld [vmem:[%s2346_s29 + $0xbc] sm:$0x1]  ;;  %v1054_v40 = vshrl.u32 %v1980_v33, 16 }
  0x2e   : > { %2156 = vmatprep.mubr.msk.bf16.mxu0 %vm317_vm0, %v2247_v49  ;;  %v1009_v2 = vrot.slane %v1007_v37, 5  ;;  %v1032_v27 = vor.u32 %v1031_v22, %v1028_v21  ;;  %v1024_v31 = vsel %vm2383_vm3, %v1019_v23, %v1023_v7  ;;  %v1057_v42 = vshll.u32 %v1980_v33, 16  ;;  %v1984_v46 = vld [vmem:[%s2346_s29 + $0xc0] sm:$0xf]  ;;  %v1986_v56 = vld [vmem:[%s2346_s29 + $0xc8] sm:$0xf] }
  0x2f   : > { %v1046_v32 = vor.u32 %v1045_v25, %v1042_v24  ;;  %v1063_v43 = vshll.u32 %v1981_v34, 16  ;;  %v1068_v45 = vshrl.u32 %v1982_v39, 16  ;;  %v1056_v48 = vrot.slane %v1054_v40, 4  ;;  %v2256_v5 = vld [vmem:[%s2346_s29 + $0x18] ss:$8 sps:$4 sm:$0xff]  }
  0x30   : > { %v1010_v26 = vsel %vm2383_vm3, %v1005_v20, %v1009_v2  ;;  %v1033_v35 = vrot.slane %v1032_v27, 4  ;;  %v1071_v49 = vshll.u32 %v1982_v39, 16  ;;  %v1077_v50 = vshll.u32 %v1983_v6, 16  ;;  %v2258_v15 = vld [vmem:[%s2346_s29 + $0x28] ss:$8 sps:$4 sm:$0xff]  }
  0x31   : > { %v1047_v41 = vrot.slane %v1046_v32, 4  ;;  %v1059_v53 = vrot.slane %v1057_v42, 5  ;;  %v1065_v54 = vrot.slane %v1063_v43, 5  ;;  %v1070_v55 = vrot.slane %v1068_v45, 4  ;;  %v2260_v23 = vld [vmem:[%s2346_s29 + $0x50] ss:$8 sps:$4 sm:$0xff]  }
  0x32   : > { %v1038_v47 = vsel %vm2383_vm3, %v1033_v35, %v1037_v28  ;;  %v1073_v37 = vrot.slane %v1071_v49, 5  ;;  %v1079_v58 = vrot.slane %v1077_v50, 5  ;;  %v1082_v60 = vshrl.u32 %v1984_v46, 16  ;;  %v2037_v24 = vld [vmem:[%s2346_s29 + $0x8] sm:$0xf] }
  0x33   : > { %2151 = vmatmul.mubr.msk.bf16.gmra.mxu1 %vm317_vm0, %v2251_v51  ;;  %v1985_v51 = vld [vmem:[%s2346_s29 + $0xc4] sm:$0x1]  ;;  %v1052_v52 = vsel %vm2383_vm3, %v1047_v41, %v1051_v29  ;;  %v1060_v61 = vor.u32 %v1059_v53, %v1056_v48  ;;  %v1085_v62 = vshll.u32 %v1984_v46, 16  ;;  %v1096_v0 = vshrl.u32 %v1986_v56, 16  ;;  %v2038_v25 = vld [vmem:[%s2346_s29 + $0xc] sm:$0x1] }
  0x34   : > { %v1991_v57 = vcombine.low %v1038_v47, %v1052_v52  ;;  %v1074_v1 = vor.u32 %v1073_v37, %v1070_v55  ;;  %v1084_v2 = vrot.slane %v1082_v60, 4  ;;  %v1099_v3 = vshll.u32 %v1986_v56, 16  ;;  %v2039_v27 = vld [vmem:[%s2346_s29 + $0x10] sm:$0xf]  ;;  %v2040_v28 = vld [vmem:[%s2346_s29 + $0x14] sm:$0x1] }
  0x35   : > { %2157 = vmatmul.mubr.msk.bf16.vlgmr.msra.gmra.mxu0 %vm317_vm0, %v2248_v59  ;;  %v1987_v59 = vld [vmem:[%s2346_s29 + $0xcc] sm:$0x1]  ;;  %v1061_v7 = vrot.slane %v1060_v61, 4  ;;  %v1087_v8 = vrot.slane %v1085_v62, 5  ;;  %v1098_v9 = vrot.slane %v1096_v0, 4  ;;  %v1478_v29 = vshrl.u32 %v2037_v24, 16 }
  0x36   : > { %2175 = vmatpush3.bf16.msra.mxu0 %v2412_v18  ;;  %2160 = vmatprep.mubr.msk.bf16.mxu0 %vm317_vm0, %v2252_v63  ;;  %v1990_v18 = vcombine.low %v1010_v26, %v1024_v31  ;;  %v1091_v63 = vshll.u32 %v1985_v51, 16  ;;  %v1105_v4 = vshll.u32 %v1987_v59, 16  ;;  %v1075_v10 = vrot.slane %v1074_v1, 4  ;;  %v2042_v41 = vld [vmem:[%s2346_s29 + $0x1c] sm:$0x1] }
  0x37   : > { %2194 = vmatprep.subr.bf16.mxu0 %v2458_v19  ;;  %v1101_v12 = vrot.slane %v1099_v3, 5  ;;  %v1066_v13 = vsel %vm2383_vm3, %v1061_v7, %v1065_v54  ;;  %v1088_v14 = vor.u32 %v1087_v8, %v1084_v2  ;;  %v1487_v32 = vshll.u32 %v2038_v25, 16  ;;  %v2043_v45 = vld [vmem:[%s2346_s29 + $0x20] sm:$0xf]  ;;  %v2044_v49 = vld [vmem:[%s2346_s29 + $0x24] sm:$0x1] }
  0x38   : > { %2166 = vmatprep.mubr.msk.bf16.mxu1 %vm317_vm0, %v1990_v18  ;;  %v1093_v11 = vrot.slane %v1091_v63, 5  ;;  %v1107_v17 = vrot.slane %v1105_v4, 5  ;;  %v1492_v33 = vshrl.u32 %v2039_v27, 16  ;;  %v1495_v34 = vshll.u32 %v2039_v27, 16  ;;  %v2041_v18 = vld [vmem:[%s2346_s29 + $0x18] sm:$0xf] }
  0x39   : > { %v1102_v16 = vor.u32 %v1101_v12, %v1098_v9  ;;  %v1089_v21 = vrot.slane %v1088_v14, 4  ;;  %v1480_v39 = vrot.slane %v1478_v29, 4  ;;  %v1501_v40 = vshll.u32 %v2040_v28, 16  ;;  %v2262_v1 = vld [vmem:[%s2346_s29 + $0x70] ss:$8 sps:$4 sm:$0xff]  }
  0x3a   : > { %v1489_v42 = vrot.slane %v1487_v32, 5  ;;  %v1494_v43 = vrot.slane %v1492_v33, 4  ;;  %v1506_v46 = vshrl.u32 %v2041_v18, 16  ;;  %v1509_v50 = vshll.u32 %v2041_v18, 16  ;;  %v2046_v7 = vld [vmem:[%s2346_s29 + $0x2c] sm:$0x1] }
  0x3b   : > { %2167 = vmatmul.mubr.msk.bf16.vlgmr.msra.gmra.mxu1 %vm317_vm0, %v1991_v57  ;;  %v1103_v22 = vrot.slane %v1102_v16, 4  ;;  %v1094_v26 = vsel %vm2383_vm3, %v1089_v21, %v1093_v11  ;;  %v1503_v48 = vrot.slane %v1501_v40, 5  ;;  %v1515_v51 = vshll.u32 %v2042_v41, 16  ;;  %v2048_v11 = vld [vmem:[%s2346_s29 + $0x34] sm:$0x1] }
  0x3c   : > { %2185 = vmatpush3.bf16.msra.mxu1 %v2428_v44  ;;  %v1080_v44 = vsel %vm2383_vm3, %v1075_v10, %v1079_v58  ;;  %v1508_v53 = vrot.slane %v1506_v46, 4  ;;  %v1520_v54 = vshrl.u32 %v2043_v45, 16  ;;  %v1523_v55 = vshll.u32 %v2043_v45, 16  ;;  %v2261_v58 = vld [vmem:[%s2346_s29 + $0x60] ss:$8 sps:$4 sm:$0xff]  }
  0x3d   : > { %2161 = vmatmul.mubr.msk.bf16.gmra.mxu0 %vm317_vm0, %v2253_v30  ;;  %v1992_v20 = vcombine.low %v1066_v13, %v1080_v44  ;;  %v1481_v30 = vshll.u32 %v2037_v24, 16  ;;  %v1108_v31 = vsel %vm2383_vm3, %v1103_v22, %v1107_v17  ;;  %v1511_v57 = vrot.slane %v1509_v50, 5  ;;  %v2047_v10 = vld [vmem:[%s2346_s29 + $0x30] sm:$0xf]  ;;  %v2049_v16 = vld [vmem:[%s2346_s29 + $0x38] sm:$0xf] }
  0x3e   : > { %2176 = vmatprep.mubr.msk.bf16.mxu0 %vm317_vm0, %v2255_v36  ;;  %v1993_v35 = vcombine.low %v1094_v26, %v1108_v31  ;;  %v2259_v36 = vld [vmem:[%s2346_s29 + $0x38] ss:$8 sps:$4 sm:$0xff]   ;;  %v1529_v37 = vshll.u32 %v2044_v49, 16  ;;  %v1517_v60 = vrot.slane %v1515_v51, 5  ;;  %v1522_v61 = vrot.slane %v1520_v54, 4 }
  0x3f   : > { %2170 = vmatprep.mubr.msk.bf16.mxu1 %vm317_vm0, %v1992_v20  ;;  %v1483_v6 = vrot.slane %v1481_v30, 5  ;;  %v1525_v62 = vrot.slane %v1523_v55, 5  ;;  %v1512_v0 = vor.u32 %v1511_v57, %v1508_v53  ;;  %v1548_v44 = vshrl.u32 %v2047_v10, 16  ;;  %v2051_v28 = vld [vmem:[%s2346_s29 + $0x40] sm:$0xf] }
  0x40   : > { %v1531_v4 = vrot.slane %v1529_v37, 5  ;;  %v1551_v21 = vshll.u32 %v2047_v10, 16  ;;  %v1557_v22 = vshll.u32 %v2048_v11, 16  ;;  %v2052_v32 = vld [vmem:[%s2346_s29 + $0x44] sm:$0x1]  ;;  %v1562_v33 = vshrl.u32 %v2049_v16, 16 }
  0x41   : > { %v1484_v47 = vor.u32 %v1483_v6, %v1480_v39  ;;  %v1526_v3 = vor.u32 %v1525_v62, %v1522_v61  ;;  %v1513_v9 = vrot.slane %v1512_v0, 4  ;;  %v1550_v27 = vrot.slane %v1548_v44, 4  ;;  %v2263_v39 = vld [vmem:[%s2346_s29 + $0x80] ss:$8 sps:$4 sm:$0xff]  }
  0x42   : > { %v1553_v30 = vrot.slane %v1551_v21, 5  ;;  %v1559_v31 = vrot.slane %v1557_v22, 5  ;;  %v1565_v18 = vshll.u32 %v2049_v16, 16  ;;  %v1564_v40 = vrot.slane %v1562_v33, 4 }
  0x43   : > { %2171 = vmatmul.mubr.msk.bf16.gmra.mxu1 %vm317_vm0, %v1993_v35  ;;  %v1485_v56 = vrot.slane %v1484_v47, 4  ;;  %v1527_v13 = vrot.slane %v1526_v3, 4  ;;  %v1518_v17 = vsel %vm2383_vm3, %v1513_v9, %v1517_v60  ;;  %v1579_v41 = vshll.u32 %v2051_v28, 16 }
  0x44   : > { %2186 = vmatprep.mubr.msk.bf16.mxu1 %vm317_vm0, %v2260_v23  ;;  %v2050_v23 = vld [vmem:[%s2346_s29 + $0x3c] sm:$0x1]  ;;  %v1554_v6 = vor.u32 %v1553_v30, %v1550_v27 }
  0x45   : > { %2177 = vmatmul.mubr.msk.bf16.vlgmr.msra.gmra.mxu0 %vm317_vm0, %v2256_v5  ;;  %v1490_v63 = vsel %vm2383_vm3, %v1485_v56, %v1489_v42  ;;  %v2045_v5 = vld [vmem:[%s2346_s29 + $0x28] sm:$0xf]  ;;  %v1532_v24 = vsel %vm2383_vm3, %v1527_v13, %v1531_v4  ;;  %v1571_v35 = vshll.u32 %v2050_v23, 16  ;;  %v1585_v42 = vshll.u32 %v2052_v32, 16 }
  0x46   : > { %2195 = vmatpush3.bf16.msra.mxu0 %v2458_v19  ;;  %2180 = vmatprep.mubr.msk.bf16.mxu0 %vm317_vm0, %v2258_v15  ;;  %v1497_v19 = vrot.slane %v1495_v34, 5  ;;  %v1534_v12 = vshrl.u32 %v2045_v5, 16  ;;  %v1537_v14 = vshll.u32 %v2045_v5, 16  ;;  %v1543_v15 = vshll.u32 %v2046_v7, 16 }
  0x47   : > { %v2056_v29 = vcombine.low %v1518_v17, %v1532_v24  ;;  %v1555_v46 = vrot.slane %v1554_v6, 4  ;;  %v1581_v47 = vrot.slane %v1579_v41, 5  ;;  %v1573_v50 = vrot.slane %v1571_v35, 5 }
  0x48   : > { %v1498_v52 = vor.u32 %v1497_v19, %v1494_v43  ;;  %v1536_v20 = vrot.slane %v1534_v12, 4  ;;  %v1539_v25 = vrot.slane %v1537_v14, 5  ;;  %v1545_v26 = vrot.slane %v1543_v15, 5 }
  0x49   : > { %v1567_v19 = vrot.slane %v1565_v18, 5  ;;  %v1560_v51 = vsel %vm2383_vm3, %v1555_v46, %v1559_v31  ;;  %v1587_v53 = vrot.slane %v1585_v42, 5 }
  0x4a   : > { %v1499_v59 = vrot.slane %v1498_v52, 4  ;;  %v1540_v34 = vor.u32 %v1539_v25, %v1536_v20 }
  0x4b   : > { %2187 = vmatmul.mubr.msk.bf16.vlgmr.msra.gmra.mxu1 %vm317_vm0, %v2261_v58  ;;  %v1568_v49 = vor.u32 %v1567_v19, %v1564_v40 }
  0x4c   : > { %v1504_v2 = vsel %vm2383_vm3, %v1499_v59, %v1503_v48  ;;  %2190 = vmatprep.mubr.msk.bf16.mxu1 %vm317_vm0, %v2262_v1  ;;  %v1541_v43 = vrot.slane %v1540_v34, 4 }
  0x4d   : > { %2181 = vmatmul.mubr.msk.bf16.gmra.mxu0 %vm317_vm0, %v2259_v36  ;;  %v2055_v8 = vcombine.low %v1490_v63, %v1504_v2  ;;  %v1576_v36 = vshrl.u32 %v2051_v28, 16  ;;  %v1569_v55 = vrot.slane %v1568_v49, 4 }
  0x4e   : > { %v1546_v48 = vsel %vm2383_vm3, %v1541_v43, %v1545_v26 }
  0x4f   : > { %2196 = vmatprep.mubr.msk.bf16.mxu0 %vm317_vm0, %v2055_v8  ;;  %v1578_v45 = vrot.slane %v1576_v36, 4  ;;  %v2057_v54 = vcombine.low %v1546_v48, %v1560_v51  ;;  %v1574_v57 = vsel %vm2383_vm3, %v1569_v55, %v1573_v50 }
  0x51   : > { %v1582_v52 = vor.u32 %v1581_v47, %v1578_v45 }
  0x53   : > { %2191 = vmatmul.mubr.msk.bf16.gmra.mxu1 %vm317_vm0, %v2263_v39  ;;  %v1583_v56 = vrot.slane %v1582_v52, 4 }
  0x55   : > { %2197 = vmatmul.mubr.msk.bf16.vlgmr.msra.gmra.mxu0 %vm317_vm0, %v2056_v29  ;;  %v1588_v37 = vsel %vm2383_vm3, %v1583_v56, %v1587_v53 }
  0x56   : > { %2200 = vmatprep.mubr.msk.bf16.mxu0 %vm317_vm0, %v2057_v54  ;;  %v2058_v58 = vcombine.low %v1574_v57, %v1588_v37 }
  0x5d   : > { %2201 = vmatmul.mubr.msk.bf16.gmra.mxu0 %vm317_vm0, %v2058_v58 }
  0xd2   : > { %v2118_v61 = vpop.f32.mrf.mxu0 }
  0xd3   : > { %v2122_v59 = vpop.f32.mrf.mxu1 }
  0xd4   : > { %v364_v0 = vpop.f32.mrf.mxu0 }
  0xd5   : > { %v2548_v60 = vpop.f32.mrf.mxu1 }
  0xd6   : > { %v2119_v3 = vpop.f32.mrf.mxu0 }
  0xd7   : > { %v2550_v62 = vpop.f32.mrf.mxu1 }
  0xd8   : > { %v367_v7 = vpop.f32.mrf.mxu0 }
  0xd9   : > { %v2552_v63 = vpop.f32.mrf.mxu1 }
  0xdb   : > { %v2128_v1 = vpop.f32.mrf.mxu1 }
  0xdc   : > { %v476_v18 = vadd.f32 %v2128_v1, %v2118_v61 }
  0xdd   : > { %v467_v2 = vpop.f32.mrf.mxu1 }
  0xde   : > { %v468_v39 = vadd.f32 %v467_v2, %v364_v0 }
  0xdf   : > { %v2129_v4 = vpop.f32.mrf.mxu1 }
  0xe0   : > { %v479_v42 = vadd.f32 %v2129_v4, %v2119_v3 }
  0xe1   : > { %v470_v5 = vpop.f32.mrf.mxu1 }
  0xe2   : > { %v471_v47 = vadd.f32 %v470_v5, %v367_v7 }
  0xe3   : > { %v2132_v38 = vpop.f32.mrf.mxu1  ;;  %v2138_v8 = vpop.f32.mrf.mxu0 }
  0xe4   : > { %v729_v41 = vadd.f32 %v2138_v8, %v476_v18  ;;  %v492_v56 = vadd.f32 %v2132_v38, %v2122_v59 }
  0xe5   : > { %v483_v9 = vpop.f32.mrf.mxu1  ;;  %v696_v10 = vpop.f32.mrf.mxu0 }
  0xe6   : > { %v727_v45 = vadd.f32 %v696_v10, %v468_v39  ;;  %v484_v0 = vadd.f32 %v483_v9, %v2548_v60 }
  0xe7   : > { %v2133_v11 = vpop.f32.mrf.mxu1  ;;  %v2139_v12 = vpop.f32.mrf.mxu0 }
  0xe8   : > { %v730_v49 = vadd.f32 %v2139_v12, %v479_v42  ;;  %v495_v8 = vadd.f32 %v2133_v11, %v2550_v62 }
  0xe9   : > { %v486_v13 = vpop.f32.mrf.mxu1  ;;  %v699_v14 = vpop.f32.mrf.mxu0 }
  0xea   : > { %v728_v55 = vadd.f32 %v699_v14, %v471_v47  ;;  %v487_v10 = vadd.f32 %v486_v13, %v2552_v63 }
  0xeb   : > { %v2148_v15 = vpop.f32.mrf.mxu1 }
  0xec   : > { %v852_v46 = vadd.f32 %v2148_v15, %v729_v41 }
  0xed   : > { %v819_v44 = vpop.f32.mrf.mxu1  ;;  %v2142_v16 = vpop.f32.mrf.mxu0 }
  0xee   : > { %v850_v50 = vadd.f32 %v819_v44, %v727_v45  ;;  %v733_v7 = vadd.f32 %v2142_v16, %v492_v56 }
  0xef   : > { %v2149_v17 = vpop.f32.mrf.mxu1  ;;  %v712_v20 = vpop.f32.mrf.mxu0 }
  0xf0   : > { %v853_v54 = vadd.f32 %v2149_v17, %v730_v49  ;;  %v731_v15 = vadd.f32 %v712_v20, %v484_v0 }
  0xf1   : > { %v822_v21 = vpop.f32.mrf.mxu1  ;;  %v2143_v22 = vpop.f32.mrf.mxu0 }
  0xf2   : > { %v851_v1 = vadd.f32 %v822_v21, %v728_v55 }
  0xf3   : > { %v2152_v23 = vpop.f32.mrf.mxu1  ;;  %v715_v24 = vpop.f32.mrf.mxu0 }
  0xf4   : > { %v856_v17 = vadd.f32 %v2152_v23, %v733_v7 }
  0xf5   : > { %v835_v25 = vpop.f32.mrf.mxu1  ;;  %v2158_v26 = vpop.f32.mrf.mxu0 }
  0xf6   : > { %v975_v53 = vadd.f32 %v2158_v26, %v852_v46 }
  0xf7   : > { %v2554_v27 = vpop.f32.mrf.mxu1  ;;  %v942_v28 = vpop.f32.mrf.mxu0 }
  0xf8   : > { %v973_v58 = vadd.f32 %v942_v28, %v850_v50  ;;  %v734_v28 = vadd.f32 %v2143_v22, %v495_v8 }
  0xf9   : > { %v2159_v29 = vpop.f32.mrf.mxu0  ;;  %v838_v30 = vpop.f32.mrf.mxu1 }
  0xfa   : > { %v976_v4 = vadd.f32 %v2159_v29, %v853_v54  ;;  %v732_v29 = vadd.f32 %v715_v24, %v487_v10  ;;  %v857_v20 = vadd.f32 %v2554_v27, %v734_v28  ;;  %v2581_v27 = vld [vmem:[%s2635_s3] ss:$0 sm:$0xff] }
  0xfb   : > { %v945_v31 = vpop.f32.mrf.mxu0  ;;  %v2168_v33 = vpop.f32.mrf.mxu1 }
  0xfc   : > { %v1209_v61 = vadd.f32 %v2168_v33, %v975_v53  ;;  %v974_v44 = vadd.f32 %v945_v31, %v851_v1  ;;  %v854_v33 = vadd.f32 %v835_v25, %v731_v15  ;;  %v855_v31 = vadd.f32 %v838_v30, %v732_v29 }
  0xfd   : > { %v2162_v32 = vpop.f32.mrf.mxu0  ;;  %v1176_v35 = vpop.f32.mrf.mxu1 }
  0xfe   : > { %v1207_v5 = vadd.f32 %v1176_v35, %v973_v58  ;;  %v979_v13 = vadd.f32 %v2162_v32, %v856_v17  ;;  %v2570_v35 = vld [vmem:[%s2634_s2] ss:$0 sm:$0xff] }
  0xff   : > { %v2556_v34 = vpop.f32.mrf.mxu0  ;;  %v2169_v6 = vpop.f32.mrf.mxu1 }
 0x100   : > { %v1210_v38 = vadd.f32 %v2169_v6, %v976_v4  ;;  %v977_v39 = vadd.f32 %v2556_v34, %v854_v33 }
 0x101   : > { %v2558_v36 = vpop.f32.mrf.mxu0  ;;  %v1179_v19 = vpop.f32.mrf.mxu1 }
 0x102   : > { %v1208_v16 = vadd.f32 %v1179_v19, %v974_v44  ;;  %v980_v19 = vadd.f32 %v2558_v36, %v857_v20 }
 0x103   : > { %v2560_v40 = vpop.f32.mrf.mxu0  ;;  %v2172_v52 = vpop.f32.mrf.mxu1 }
 0x104   : > { %v1213_v41 = vadd.f32 %v2172_v52, %v979_v13  ;;  %v978_v34 = vadd.f32 %v2560_v40, %v855_v31 }
 0x105   : > { %v2178_v43 = vpop.f32.mrf.mxu0  ;;  %v1192_v37 = vpop.f32.mrf.mxu1 }
 0x106   : > { %v1332_v59 = vadd.f32 %v2178_v43, %v1209_v61  ;;  %v1211_v45 = vadd.f32 %v1192_v37, %v977_v39 }
 0x107   : > { %v1299_v48 = vpop.f32.mrf.mxu0  ;;  %v2173_v3 = vpop.f32.mrf.mxu1 }
 0x108   : > { %v1330_v9 = vadd.f32 %v1299_v48, %v1207_v5  ;;  %v1214_v53 = vadd.f32 %v2173_v3, %v980_v19 }
 0x109   : > { %v2179_v51 = vpop.f32.mrf.mxu0  ;;  %v1195_v14 = vpop.f32.mrf.mxu1 }
 0x10a   : > { %v1333_v63 = vadd.f32 %v2179_v51, %v1210_v38  ;;  %v1212_v54 = vadd.f32 %v1195_v14, %v978_v34 }
 0x10b   : > { %v1302_v57 = vpop.f32.mrf.mxu0  ;;  %v2188_v60 = vpop.f32.mrf.mxu1 }
 0x10c   : > { %v1455_v21 = vadd.f32 %v2188_v60, %v1332_v59  ;;  %v1331_v6 = vadd.f32 %v1302_v57, %v1208_v16 }
 0x10d   : > { %v2182_v2 = vpop.f32.mrf.mxu0  ;;  %v1422_v62 = vpop.f32.mrf.mxu1 }
 0x10e   : > { %v1453_v11 = vadd.f32 %v1422_v62, %v1330_v9  ;;  %v1336_v52 = vadd.f32 %v2182_v2, %v1213_v41 }
 0x10f   : > { %v1315_v12 = vpop.f32.mrf.mxu0  ;;  %v2189_v22 = vpop.f32.mrf.mxu1 }
 0x110   : > { %v1456_v25 = vadd.f32 %v2189_v22, %v1333_v63  ;;  %v1334_v37 = vadd.f32 %v1315_v12, %v1211_v45 }
 0x111   : > { %v2183_v26 = vpop.f32.mrf.mxu0  ;;  %v1425_v32 = vpop.f32.mrf.mxu1 }
 0x112   : > { %v1454_v47 = vadd.f32 %v1425_v32, %v1331_v6  ;;  %v1337_v4 = vadd.f32 %v2183_v26, %v1214_v53 }
 0x113   : > { %v1318_v18 = vpop.f32.mrf.mxu0  ;;  %v2192_v48 = vpop.f32.mrf.mxu1 }
 0x114   : > { %v1459_v61 = vadd.f32 %v2192_v48, %v1336_v52  ;;  %v1335_v5 = vadd.f32 %v1318_v18, %v1212_v54 }
 0x115   : > { %v2198_v23 = vpop.f32.mrf.mxu0  ;;  %v1438_v56 = vpop.f32.mrf.mxu1 }
 0x116   : > { %v1689_v24 = vadd.f32 %v2198_v23, %v1455_v21  ;;  %v1457_v38 = vadd.f32 %v1438_v56, %v1334_v37 }
 0x117   : > { %v1656_v30 = vpop.f32.mrf.mxu0  ;;  %v2193_v0 = vpop.f32.mrf.mxu1 }
 0x118   : > { %v1704_v42 = vmul.f32 %v2570_v35, %v1689_v24  ;;  %v1687_v43 = vadd.f32 %v1656_v30, %v1453_v11  ;;  %v1460_v60 = vadd.f32 %v2193_v0, %v1337_v4 }
 0x119   : > { %v2199_v46 = vpop.f32.mrf.mxu0  ;;  %v1441_v10 = vpop.f32.mrf.mxu1 }
 0x11a   : > { %v1719_v49 = vadd.f32 %v2581_v27, %v1704_v42  ;;  %v1702_v50 = vmul.f32 %v2570_v35, %v1687_v43  ;;  %v1690_v51 = vadd.f32 %v2199_v46, %v1456_v25  ;;  %v1458_v21 = vadd.f32 %v1441_v10, %v1335_v5 }
 0x11b   : > { %v1659_v55 = vpop.f32.mrf.mxu0 }
 0x11c   : > { %vm1727_vm4 = vcmp.ge.f32.partialorder %v1719_v49, 0.0  ;;  %v1735_v57 = vmul.f32 0.2, %v1719_v49  ;;  %v1717_v36 = vadd.f32 %v2581_v27, %v1702_v50  ;;  %v1705_v40 = vmul.f32 %v2570_v35, %v1690_v51 }
 0x11d   : > { %v1688_v58 = vadd.f32 %v1659_v55, %v1454_v47  ;;  %v2202_v59 = vpop.f32.mrf.mxu0 }
 0x11e   : > { %v1743_v1 = vsel %vm1727_vm4, %v1719_v49, %v1735_v57  ;;  %vm1725_vm6 = vcmp.ge.f32.partialorder %v1717_v36, 0.0  ;;  %v1733_v2 = vmul.f32 0.2, %v1717_v36  ;;  %v1720_v3 = vadd.f32 %v2581_v27, %v1705_v40 }
 0x11f   : > { %v1751_v7 = vpack.c.bf16 %v1743_v1, %v1743_v1  ;;  %v1703_v8 = vmul.f32 %v2570_v35, %v1688_v58  ;;  %v1693_v17 = vadd.f32 %v2202_v59, %v1459_v61  ;;  %v1672_v9 = vpop.f32.mrf.mxu0 }
 0x120   : > { %v1741_v12 = vsel %vm1725_vm6, %v1717_v36, %v1733_v2  ;;  %vm1728_vm7 = vcmp.ge.f32.partialorder %v1720_v3, 0.0  ;;  %v1736_v14 = vmul.f32 0.2, %v1720_v3  ;;  %v1691_v16 = vadd.f32 %v1672_v9, %v1457_v38 }
 0x121   : > { %1760 = vst.msk [vmem:[%s2594_s27 + $0x8] sm:$0xf] %vm1757_vm5, %v1751_v7  ;;  %v1749_v15 = vpack.c.bf16 %v1741_v12, %v1741_v12  ;;  %v1718_v44 = vadd.f32 %v2581_v27, %v1703_v8  ;;  %v1708_v33 = vmul.f32 %v2570_v35, %v1693_v17  ;;  %v2203_v18 = vpop.f32.mrf.mxu0 }
 0x122   : > { %v1744_v26 = vsel %vm1728_vm7, %v1720_v3, %v1736_v14  ;;  %v1694_v11 = vadd.f32 %v2203_v18, %v1460_v60  ;;  %v1706_v20 = vmul.f32 %v2570_v35, %v1691_v16 }
 0x123   : > { %1758 = vst.msk [vmem:[%s2594_s27] sm:$0xf] %vm1757_vm5, %v1749_v15  ;;  %v1752_v28 = vpack.c.bf16 %v1744_v26, %v1744_v26  ;;  %vm1726_vm8 = vcmp.ge.f32.partialorder %v1718_v44, 0.0  ;;  %v1734_v29 = vmul.f32 0.2, %v1718_v44  ;;  %v1723_v63 = vadd.f32 %v2581_v27, %v1708_v33  ;;  %v1675_v31 = vpop.f32.mrf.mxu0 }
 0x124   : > { %v1709_v22 = vmul.f32 %v2570_v35, %v1694_v11  ;;  %v1692_v24 = vadd.f32 %v1675_v31, %v1458_v21  ;;  %v1721_v25 = vadd.f32 %v2581_v27, %v1706_v20 }
 0x125   : > { %1761 = vst.msk [vmem:[%s2594_s27 + $0xc] sm:$0xf] %vm1757_vm5, %v1752_v28  ;;  %v1742_v62 = vsel %vm1726_vm8, %v1718_v44, %v1734_v29  ;;  %vm1731_vm9 = vcmp.ge.f32.partialorder %v1723_v63, 0.0  ;;  %v1739_v23 = vmul.f32 0.2, %v1723_v63 }
 0x126   : > { %v1750_v13 = vpack.c.bf16 %v1742_v62, %v1742_v62  ;;  %v1724_v6 = vadd.f32 %v2581_v27, %v1709_v22  ;;  %v1707_v41 = vmul.f32 %v2570_v35, %v1692_v24  ;;  %vm1729_vm10 = vcmp.ge.f32.partialorder %v1721_v25, 0.0 }
 0x127   : > { %v1747_v39 = vsel %vm1731_vm9, %v1723_v63, %v1739_v23  ;;  %v1737_v32 = vmul.f32 0.2, %v1721_v25 }
 0x128   : > { %1759 = vst.msk [vmem:[%s2594_s27 + $0x4] sm:$0xf] %vm1757_vm5, %v1750_v13  ;;  %v1755_v30 = vpack.c.bf16 %v1747_v39, %v1747_v39  ;;  %vm1732_vm11 = vcmp.ge.f32.partialorder %v1724_v6, 0.0  ;;  %v1740_v42 = vmul.f32 0.2, %v1724_v6  ;;  %v1722_v43 = vadd.f32 %v2581_v27, %v1707_v41 }
 0x129   : > { %v1745_v19 = vsel %vm1729_vm10, %v1721_v25, %v1737_v32 }
 0x12a   : > { %1764 = vst.msk [vmem:[%s2594_s27 + $0x18] sm:$0xf] %vm1757_vm5, %v1755_v30  ;;  %v1753_v34 = vpack.c.bf16 %v1745_v19, %v1745_v19  ;;  %v1748_v45 = vsel %vm1732_vm11, %v1724_v6, %v1740_v42  ;;  %vm1730_vm12 = vcmp.ge.f32.partialorder %v1722_v43, 0.0  ;;  %v1738_v46 = vmul.f32 0.2, %v1722_v43 }
 0x12b   : > { %v1756_v47 = vpack.c.bf16 %v1748_v45, %v1748_v45 }
 0x12c   : > { %1762 = vst.msk [vmem:[%s2594_s27 + $0x10] sm:$0xf] %vm1757_vm5, %v1753_v34  ;;  %v1746_v35 = vsel %vm1730_vm12, %v1722_v43, %v1738_v46 }
 0x12d   : > { %1765 = vst.msk [vmem:[%s2594_s27 + $0x1c] sm:$0xf] %vm1757_vm5, %v1756_v47  ;;  %v1754_v48 = vpack.c.bf16 %v1746_v35, %v1746_v35 }
 0x12f   : > { %1763 = vst.msk [vmem:[%s2594_s27 + $0x14] sm:$0xf] %vm1757_vm5, %v1754_v48 }
 0x130 PF: > { %s14_s17 = sadd.s32 1, %s2286_s17   ;;  %s2639_s15 = smov %s2282_s16 }
 0x131   : > { %p11_p6 = scmp.ge.s32.totalorder %s14_s17, 4   ;;  %s2640_s16 = smov %s2642_s18 }
 0x133   :  { %13 = sbr.rel (!%p11_p6) target bundleno = 2 (0x2), region = 88 }

// kernel: discriminator_forward.11
= control target key start
LH: loop header
LB: loop body
LE: loop exit
PB: predicated region body
PF: predicated region fallthrough
CT: control target
= control target key end

     0   :  { %s2423_s15 = smov 0   ;;  %s2425_s16 = smov 0   ;;  %s2975_s0 = inlined_call_operand.vmem [shape: bf16[2,10,10,16], index: 0, kind: input, shape index: {}]   ;;  %s2976_s1 = inlined_call_operand.vmem [shape: bf16[3,3,16,32], index: 1, kind: input, shape index: {}]   ;;  %s2977_s2 = inlined_call_operand.vmem [shape: f32[1,32], index: 2, kind: input, shape index: {}]   ;;  %s2978_s3 = inlined_call_operand.vmem [shape: f32[1,32], index: 3, kind: input, shape index: {}]   ;;  %s2979_s4 = inlined_call_operand.vmem [shape: bf16[2,8,8,32], index: 4, kind: output, shape index: {}]  }
   0x1   :  { %s2427_s17 = smov 0  }
   0x2 LB: > { %s26_s18 = sadd.s32 1, %s2392_s16  ;;  %p1997_p0 = scmp.ge.s32.totalorder %s2396_s17, 1  ;;  %s2396_s17 = sphi %s2427_s17, %s14_s17   ;;  %s2392_s16 = sphi %s2425_s16, %s2985_s16   ;;  %s2388_s15 = sphi %s2423_s15, %s2984_s15  }
   0x3   : > { %p28_p1 = scmp.ge.s32.totalorder %s26_s18, 2  ;;  %p201_p2 = scmp.lt.s32.totalorder %s2396_s17, 3 }
   0x5   : > { %s2987_s18 = smov (%p28_p1, %s26_s18), 0  ;;  %p202_p3 = pnand %p1997_p0, %p201_p2 }
   0x6   : > { %p240_p4 = scmp.lt.s32.totalorder (!%p202_p3), %s2388_s15, 1 }
   0x7   : > { %205 = sbr.rel (%p202_p3) target bundleno = 322 (0x142), region = 36 }
   0xc   : > { %v2353_v0 = vld [vmem:[%s2976_s1 + $0x8] sm:$0xff]   ;;  %v2447_v1 = vld [vmem:[%s2976_s1] sm:$0xff]   ;;  %s2989_s15 = smov (!%p240_p4, %s2388_s15), 1  ;;  %v2454_v2 = vld [vmem:[%s2976_s1 + $0x10] sm:$0xff]   ;;  %vm282_vm0 = vsmask.f32 3328 }
   0xd   : > { %2326 = vmatprep.subr.bf16.mxu1 %v2353_v0  ;;  %2236 = vmatprep.subr.bf16.mxu0 %v2353_v0  ;;  %s2328_s25 = smul.u32 80, %s2989_s15  ;;  %vm283_vm1 = vsmask.f32 7440  ;;  %vm418_vm2 = vcmask 130048   ;;  %vm623_vm4 = vcmask 1042432   ;;  %vm624_vm5 = vcmask 1046532  }
   0xe   : > { %2327 = vmatpush3.bf16.msra.mxu1 %v2353_v0  ;;  %2237 = vmatpush3.bf16.msra.mxu0 %v2353_v0  ;;  %vm2505_vm3 = vmor %vm282_vm0, %vm283_vm1  ;;  %s2190_s23 = sshll.u32 %s2989_s15, 5  ;;  %vm1864_vm7 = vcmask 257024  }
   0xf   : > { %2246 = vmatprep.subr.bf16.mxu1 %v2447_v1  ;;  %2256 = vmatprep.subr.bf16.mxu0 %v2454_v2  ;;  %s2462_s28 = scalar_lea.vmem %s2975_s0, %s2328_s25  ;;  %vm2571_vm6 = vmor %vm623_vm4, %vm624_vm5  ;;  %s2937_s15 = scalar_lea.vmem %s2979_s4, %s2190_s23 }
  0x10   : > { %v2465_v3 = vld [vmem:[%s2462_s28] sm:$0xf]  ;;  %v2468_v4 = vld [vmem:[%s2462_s28 + $0x8] sm:$0xf]  ;;  %v2471_v5 = vld [vmem:[%s2462_s28 + $0x4] sm:$0x1] }
  0x11   : > { %v2474_v6 = vld [vmem:[%s2462_s28 + $0xc] sm:$0x1]  ;;  %v286_v7 = vshrl.u32 %v2465_v3, 16  ;;  %v289_v8 = vshll.u32 %v2465_v3, 16  ;;  %v295_v9 = vshll.u32 %v2471_v5, 16  ;;  %v300_v10 = vshrl.u32 %v2468_v4, 16 }
  0x12   : > { %v303_v11 = vshll.u32 %v2468_v4, 16  ;;  %v309_v12 = vshll.u32 %v2474_v6, 16  ;;  %v628_v13 = vrot.slane %v2471_v5, 5  ;;  %v632_v14 = vrot.slane %v2474_v6, 5  ;;  %v2485_v15 = vld [vmem:[%s2462_s28 + $0x20] sm:$0xf] }
  0x13   : > { %v288_v16 = vrot.slane %v286_v7, 4  ;;  %v291_v17 = vrot.slane %v289_v8, 5  ;;  %v297_v18 = vrot.slane %v295_v9, 5  ;;  %v302_v19 = vrot.slane %v300_v10, 4  ;;  %v2488_v20 = vld [vmem:[%s2462_s28 + $0x28] sm:$0xf] }
  0x14   : > { %v305_v21 = vrot.slane %v303_v11, 5  ;;  %v311_v22 = vrot.slane %v309_v12, 5  ;;  %v2491_v23 = vld [vmem:[%s2462_s28 + $0x24] sm:$0x1]  ;;  %v2494_v24 = vld [vmem:[%s2462_s28 + $0x2c] sm:$0x1]  ;;  %v2012_v25 = vcombine.low %v2465_v3, %v2468_v4  ;;  %v2014_v26 = vcombine.low %v2485_v15, %v2488_v20 }
  0x15   : > { %v292_v27 = vor.u32 %v291_v17, %v288_v16  ;;  %v342_v28 = vshrl.u32 %v2485_v15, 16  ;;  %v345_v29 = vshll.u32 %v2485_v15, 16  ;;  %v351_v30 = vshll.u32 %v2491_v23, 16  ;;  %v2513_v36 = vld [vmem:[%s2462_s28 + $0x10] sm:$0xf] }
  0x16   : > { %v306_v32 = vor.u32 %v305_v21, %v302_v19  ;;  %v356_v33 = vshrl.u32 %v2488_v20, 16  ;;  %v359_v34 = vshll.u32 %v2488_v20, 16  ;;  %v365_v35 = vshll.u32 %v2494_v24, 16  ;;  %v2516_v41 = vld [vmem:[%s2462_s28 + $0x18] sm:$0xf] }
  0x17   : > { %v293_v37 = vrot.slane %v292_v27, 4  ;;  %v344_v38 = vrot.slane %v342_v28, 4  ;;  %v347_v39 = vrot.slane %v345_v29, 5  ;;  %v353_v40 = vrot.slane %v351_v30, 5  ;;  %v2519_v46 = vld [vmem:[%s2462_s28 + $0x14] sm:$0x1] }
  0x18   : > { %v307_v42 = vrot.slane %v306_v32, 4  ;;  %v358_v43 = vrot.slane %v356_v33, 4  ;;  %v361_v44 = vrot.slane %v359_v34, 5  ;;  %v367_v45 = vrot.slane %v365_v35, 5  ;;  %v2528_v53 = vld [vmem:[%s2462_s28 + $0x1c] sm:$0x1] }
  0x19   : > { %v298_v47 = vsel %vm2505_vm3, %v293_v37, %v297_v18  ;;  %v348_v48 = vor.u32 %v347_v39, %v344_v38  ;;  %v644_v49 = vrot.slane %v2491_v23, 5  ;;  %v648_v50 = vrot.slane %v2494_v24, 5  ;;  %v2535_v60 = vld [vmem:[%s2462_s28 + $0x30] sm:$0xf]  ;;  %v2539_v7 = vld [vmem:[%s2462_s28 + $0x38] sm:$0xf] }
  0x1a   : > { %v312_v51 = vsel %vm2505_vm3, %v307_v42, %v311_v22  ;;  %v362_v52 = vor.u32 %v361_v44, %v358_v43  ;;  %v314_v54 = vshrl.u32 %v2513_v36, 16  ;;  %v317_v55 = vshll.u32 %v2513_v36, 16  ;;  %v2546_v12 = vld [vmem:[%s2462_s28 + $0x34] sm:$0x1]  ;;  %v2552_v21 = vld [vmem:[%s2462_s28 + $0x3c] sm:$0x1] }
  0x1b   : > { %v2003_v56 = vcombine.low %v298_v47, %v312_v51  ;;  %v349_v57 = vrot.slane %v348_v48, 4  ;;  %v323_v58 = vshll.u32 %v2519_v46, 16  ;;  %v328_v59 = vshrl.u32 %v2516_v41, 16  ;;  %v599_v22 = vld [vmem:[%s2462_s28] sm:$0xe] }
  0x1c   : > { %v363_v61 = vrot.slane %v362_v52, 4  ;;  %v316_v62 = vrot.slane %v314_v54, 4  ;;  %v319_v63 = vrot.slane %v317_v55, 5  ;;  %v331_v0 = vshll.u32 %v2516_v41, 16  ;;  %v600_v32 = vld [vmem:[%s2462_s28 + $0x8] sm:$0xe] }
  0x1d   : > { %2238 = vmatprep.mubr.msk.bf16.mxu0 %vm418_vm2, %v2003_v56  ;;  %v354_v8 = vsel %vm2505_vm3, %v349_v57, %v353_v40  ;;  %v325_v9 = vrot.slane %v323_v58, 5  ;;  %v330_v10 = vrot.slane %v328_v59, 4  ;;  %v337_v11 = vshll.u32 %v2528_v53, 16  ;;  %v601_v38 = vld [vmem:[%s2462_s28 + $0x10] sm:$0xe] }
  0x1e   : > { %v368_v16 = vsel %vm2505_vm3, %v363_v61, %v367_v45  ;;  %v320_v17 = vor.u32 %v319_v63, %v316_v62  ;;  %v333_v18 = vrot.slane %v331_v0, 5  ;;  %v636_v19 = vrot.slane %v2519_v46, 5  ;;  %v602_v44 = vld [vmem:[%s2462_s28 + $0x18] sm:$0xe]  ;;  %v603_v45 = vld [vmem:[%s2462_s28 + $0x20] sm:$0xe] }
  0x1f   : > { %v2005_v27 = vcombine.low %v354_v8, %v368_v16  ;;  %v339_v28 = vrot.slane %v337_v11, 5  ;;  %v640_v29 = vrot.slane %v2528_v53, 5  ;;  %v370_v30 = vshrl.u32 %v2535_v60, 16  ;;  %v604_v62 = vld [vmem:[%s2462_s28 + $0x28] sm:$0xe] }
  0x20   : > { %v321_v33 = vrot.slane %v320_v17, 4  ;;  %v334_v34 = vor.u32 %v333_v18, %v330_v10  ;;  %v373_v35 = vshll.u32 %v2535_v60, 16  ;;  %v379_v37 = vshll.u32 %v2546_v12, 16  ;;  %v2359_v10 = vld [vmem:[%s2976_s1 + $0x20] sm:$0xff]   ;;  %v605_v11 = vld [vmem:[%s2462_s28 + $0x30] sm:$0xe] }
  0x21   : > { %2242 = vmatprep.mubr.msk.bf16.mxu1 %vm418_vm2, %v2005_v27  ;;  %v372_v39 = vrot.slane %v370_v30, 4  ;;  %v384_v40 = vshrl.u32 %v2539_v7, 16  ;;  %v387_v42 = vshll.u32 %v2539_v7, 16  ;;  %v393_v43 = vshll.u32 %v2552_v21, 16  ;;  %v606_v5 = vld [vmem:[%s2462_s28 + $0x38] sm:$0xe] }
  0x22   : > { %v326_v46 = vsel %vm2505_vm3, %v321_v33, %v325_v9  ;;  %v335_v47 = vrot.slane %v334_v34, 4  ;;  %v375_v48 = vrot.slane %v373_v35, 5  ;;  %v381_v51 = vrot.slane %v379_v37, 5  ;;  %v2609_v34 = vld [vmem:[%s2462_s28 + $0xc] sm:$0x1] }
  0x23   : > { %v386_v53 = vrot.slane %v384_v40, 4  ;;  %v389_v54 = vrot.slane %v387_v42, 5  ;;  %v395_v55 = vrot.slane %v393_v43, 5  ;;  %v2021_v56 = vrot.slane %v599_v22, 9  ;;  %v2061_v37 = vld [vmem:[%s2462_s28 + $0x10] sm:$0xf] }
  0x24   : > { %v340_v57 = vsel %vm2505_vm3, %v335_v47, %v339_v28  ;;  %v376_v58 = vor.u32 %v375_v48, %v372_v39  ;;  %v2022_v59 = vrot.slane %v600_v32, 9  ;;  %v2013_v61 = vcombine.low %v2513_v36, %v2516_v41  ;;  %v2362_v15 = vld [vmem:[%s2462_s28 + $0x8] ss:$8 sps:$4 sm:$0xff]  }
  0x25   : > { %v2004_v63 = vcombine.low %v326_v46, %v340_v57  ;;  %v390_v0 = vor.u32 %v389_v54, %v386_v53  ;;  %v629_v8 = vsel %vm2571_vm6, %v2021_v56, %v628_v13  ;;  %v2023_v9 = vrot.slane %v601_v38, 9  ;;  %v2625_v38 = vld [vmem:[%s2462_s28 + $0x14] sm:$0x1] }
  0x26   : > { %v377_v16 = vrot.slane %v376_v58, 4  ;;  %v633_v17 = vsel %vm2571_vm6, %v2022_v59, %v632_v14  ;;  %v2024_v18 = vrot.slane %v602_v44, 9  ;;  %v2025_v22 = vrot.slane %v603_v45, 9  ;;  %v2063_v44 = vld [vmem:[%s2462_s28 + $0x18] sm:$0xf]  ;;  %v2654_v59 = vld [vmem:[%s2976_s1 + $0x30] sm:$0xff]  }
  0x27   : > { %2239 = vmatmul.mubr.msk.bf16.vlgmr.msra.gmra.mxu0 %vm418_vm2, %v2004_v63  ;;  %v391_v13 = vrot.slane %v390_v0, 4  ;;  %v2031_v27 = vcombine.low %v629_v8, %v633_v17  ;;  %v637_v28 = vsel %vm2571_vm6, %v2023_v9, %v636_v19  ;;  %v2026_v30 = vrot.slane %v604_v62, 9  ;;  %v2059_v19 = vld [vmem:[%s2462_s28 + $0x8] sm:$0xf]  ;;  %v2630_v45 = vld [vmem:[%s2462_s28 + $0x1c] sm:$0x1] }
  0x28   : > { %v382_v6 = vsel %vm2505_vm3, %v377_v16, %v381_v51  ;;  %2257 = vmatpush3.bf16.msra.mxu0 %v2454_v2  ;;  %v641_v14 = vsel %vm2571_vm6, %v2024_v18, %v640_v29  ;;  %v645_v32 = vsel %vm2571_vm6, %v2025_v22, %v644_v49  ;;  %v2015_v33 = vcombine.low %v2535_v60, %v2539_v7  ;;  %v2617_v2 = vld [vmem:[%s2976_s1 + $0x18] sm:$0xff]   ;;  %v2649_v58 = vld [vmem:[%s2462_s28 + $0x24] sm:$0x1]  ;;  %v2067_v9 = vld [vmem:[%s2462_s28 + $0x28] sm:$0xf] }
  0x29   : > { %v396_v35 = vsel %vm2505_vm3, %v391_v13, %v395_v55  ;;  %2258 = vmatprep.mubr.msk.bf16.mxu0 %vm418_vm2, %v2031_v27  ;;  %v2032_v23 = vcombine.low %v637_v28, %v641_v14  ;;  %2276 = vmatprep.subr.bf16.mxu0 %v2359_v10  ;;  %v649_v49 = vsel %vm2571_vm6, %v2026_v30, %v648_v50  ;;  %v2027_v29 = vrot.slane %v605_v11, 9  ;;  %v2065_v50 = vld [vmem:[%s2462_s28 + $0x20] sm:$0xf]  ;;  %v2665_v16 = vld [vmem:[%s2976_s1 + $0x28] sm:$0xff]   ;;  %v2088_v7 = vld [vmem:[%s2462_s28 + $0x18] sm:$0xe] }
  0x2a   : > { %v2006_v39 = vcombine.low %v382_v6, %v396_v35  ;;  %v2033_v40 = vcombine.low %v645_v32, %v649_v49  ;;  %v652_v42 = vrot.slane %v2546_v12, 5  ;;  %v2028_v43 = vrot.slane %v606_v5, 9  ;;  %v2669_v5 = vld [vmem:[%s2462_s28 + $0x2c] sm:$0x1] }
  0x2b   : > { %v656_v46 = vrot.slane %v2552_v21, 5  ;;  %v904_v47 = vshrl.u32 %v2059_v19, 16  ;;  %v907_v24 = vshll.u32 %v2059_v19, 16  ;;  %v913_v48 = vshll.u32 %v2609_v34, 16 }
  0x2c   : > { %2243 = vmatmul.mubr.msk.bf16.vlgmr.msra.gmra.mxu1 %vm418_vm2, %v2006_v39  ;;  %v2638_v51 = vsel %vm2571_vm6, %v2027_v29, %v652_v42  ;;  %v918_v53 = vshrl.u32 %v2061_v37, 16  ;;  %v921_v12 = vshll.u32 %v2061_v37, 16  ;;  %v927_v54 = vshll.u32 %v2625_v38, 16 }
  0x2d   : > { %2247 = vmatpush3.bf16.msra.mxu1 %v2447_v1  ;;  %2248 = vmatprep.mubr.msk.bf16.mxu1 %vm418_vm2, %v2012_v25  ;;  %v657_v21 = vsel %vm2571_vm6, %v2028_v43, %v656_v46  ;;  %v906_v55 = vrot.slane %v904_v47, 4  ;;  %v909_v56 = vrot.slane %v907_v24, 5  ;;  %v915_v57 = vrot.slane %v913_v48, 5  ;;  %v2692_v47 = vld [vmem:[%s2462_s28 + $0x3c] sm:$0x1] }
  0x2e   : > { %2266 = vmatprep.subr.bf16.mxu1 %v2617_v2  ;;  %v2034_v1 = vcombine.low %v2638_v51, %v657_v21  ;;  %v920_v3 = vrot.slane %v918_v53, 4  ;;  %v923_v4 = vrot.slane %v921_v12, 5  ;;  %v929_v25 = vrot.slane %v927_v54, 5  ;;  %v2073_v53 = vld [vmem:[%s2462_s28 + $0x40] sm:$0xf] }
  0x2f   : > { %2259 = vmatmul.mubr.msk.bf16.vlgmr.msra.gmra.mxu0 %vm418_vm2, %v2032_v23  ;;  %v910_v62 = vor.u32 %v909_v56, %v906_v55  ;;  %v932_v63 = vshrl.u32 %v2063_v44, 16  ;;  %v935_v0 = vshll.u32 %v2063_v44, 16  ;;  %v941_v8 = vshll.u32 %v2630_v45, 16  ;;  %v2071_v44 = vld [vmem:[%s2462_s28 + $0x38] sm:$0xf] }
  0x30   : > { %2277 = vmatpush3.bf16.msra.mxu0 %v2359_v10  ;;  %2262 = vmatprep.mubr.msk.bf16.mxu0 %vm418_vm2, %v2033_v40  ;;  %v924_v11 = vor.u32 %v923_v4, %v920_v3  ;;  %v946_v17 = vshrl.u32 %v2065_v50, 16  ;;  %v949_v18 = vshll.u32 %v2065_v50, 16  ;;  %v955_v22 = vshll.u32 %v2649_v58, 16  ;;  %v2069_v10 = vld [vmem:[%s2462_s28 + $0x30] sm:$0xf] }
  0x31   : > { %v911_v13 = vrot.slane %v910_v62, 4  ;;  %v934_v27 = vrot.slane %v932_v63, 4  ;;  %v937_v28 = vrot.slane %v935_v0, 5  ;;  %v943_v30 = vrot.slane %v941_v8, 5  ;;  %2296 = vmatprep.subr.bf16.mxu0 %v2654_v59  ;;  %v2682_v40 = vld [vmem:[%s2462_s28 + $0x34] sm:$0x1] }
  0x32   : > { %v925_v6 = vrot.slane %v924_v11, 4  ;;  %v948_v14 = vrot.slane %v946_v17, 4  ;;  %v951_v32 = vrot.slane %v949_v18, 5  ;;  %v957_v19 = vrot.slane %v955_v22, 5  ;;  %v2702_v12 = vld [vmem:[%s2462_s28 + $0x44] sm:$0x1] }
  0x33   : > { %v916_v35 = vsel %vm2505_vm3, %v911_v13, %v915_v57  ;;  %v938_v23 = vor.u32 %v937_v28, %v934_v27  ;;  %v960_v49 = vshrl.u32 %v2067_v9, 16  ;;  %v963_v29 = vshll.u32 %v2067_v9, 16  ;;  %v2087_v9 = vld [vmem:[%s2462_s28 + $0x10] sm:$0xe] }
  0x34   : > { %2249 = vmatmul.mubr.msk.bf16.vlgmr.msra.gmra.mxu1 %vm418_vm2, %v2013_v61  ;;  %v930_v37 = vsel %vm2505_vm3, %v925_v6, %v929_v25  ;;  %v952_v39 = vor.u32 %v951_v32, %v948_v14  ;;  %v969_v42 = vshll.u32 %v2669_v5, 16  ;;  %v974_v43 = vshrl.u32 %v2069_v10, 16  ;;  %v2086_v25 = vld [vmem:[%s2462_s28 + $0x8] sm:$0xe] }
  0x35   : > { %2267 = vmatpush3.bf16.msra.mxu1 %v2617_v2  ;;  %2252 = vmatprep.mubr.msk.bf16.mxu1 %vm418_vm2, %v2014_v26  ;;  %v2077_v36 = vcombine.low %v916_v35, %v930_v37  ;;  %v939_v41 = vrot.slane %v938_v23, 4  ;;  %v962_v61 = vrot.slane %v960_v49, 4  ;;  %v965_v46 = vrot.slane %v963_v29, 5  ;;  %v2089_v23 = vld [vmem:[%s2462_s28 + $0x20] sm:$0xe] }
  0x36   : > { %2286 = vmatprep.subr.bf16.mxu1 %v2665_v16  ;;  %v953_v24 = vrot.slane %v952_v39, 4  ;;  %v971_v48 = vrot.slane %v969_v42, 5  ;;  %v976_v50 = vrot.slane %v974_v43, 4  ;;  %v977_v51 = vshll.u32 %v2069_v10, 16  ;;  %v2720_v10 = vld [vmem:[%s2976_s1 + $0x40] sm:$0xff]  }
  0x37   : > { %2263 = vmatmul.mubr.msk.bf16.gmra.mxu0 %vm418_vm2, %v2034_v1  ;;  %v944_v20 = vsel %vm2505_vm3, %v939_v41, %v943_v30  ;;  %v966_v26 = vor.u32 %v965_v46, %v962_v61  ;;  %v983_v2 = vshll.u32 %v2682_v40, 16  ;;  %v988_v54 = vshrl.u32 %v2071_v44, 16  ;;  %v2366_v29 = vld [vmem:[%s2462_s28 + $0x28] ss:$8 sps:$4 sm:$0xff]  }
  0x38   : > { %2278 = vmatprep.mubr.msk.bf16.mxu0 %vm418_vm2, %v2077_v36  ;;  %v958_v21 = vsel %vm2505_vm3, %v953_v24, %v957_v19  ;;  %v979_v55 = vrot.slane %v977_v51, 5  ;;  %v991_v56 = vshll.u32 %v2071_v44, 16  ;;  %v997_v57 = vshll.u32 %v2692_v47, 16  ;;  %v2368_v46 = vld [vmem:[%s2462_s28 + $0x10] ss:$8 sps:$4 sm:$0xff]  }
  0x39   : > { %v2078_v1 = vcombine.low %v944_v20, %v958_v21  ;;  %v967_v3 = vrot.slane %v966_v26, 4  ;;  %v990_v4 = vrot.slane %v988_v54, 4  ;;  %v985_v63 = vrot.slane %v983_v2, 5  ;;  %v2092_v2 = vld [vmem:[%s2462_s28 + $0x38] sm:$0xe] }
  0x3a   : > { %v980_v62 = vor.u32 %v979_v55, %v976_v50  ;;  %v993_v0 = vrot.slane %v991_v56, 5  ;;  %v1002_v8 = vshrl.u32 %v2073_v53, 16  ;;  %v999_v17 = vrot.slane %v997_v57, 5  ;;  %v2093_v54 = vld [vmem:[%s2462_s28 + $0x40] sm:$0xe] }
  0x3b   : > { %v972_v11 = vsel %vm2505_vm3, %v967_v3, %v971_v48  ;;  %v1005_v18 = vshll.u32 %v2073_v53, 16  ;;  %v1011_v22 = vshll.u32 %v2702_v12, 16  ;;  %v2094_v30 = vrot.slane %v2086_v25, 9  ;;  %v2132_v3 = vld [vmem:[%s2462_s28 + $0x10] sm:$0xf] }
  0x3c   : > { %2253 = vmatmul.mubr.msk.bf16.gmra.mxu1 %vm418_vm2, %v2015_v33  ;;  %v981_v13 = vrot.slane %v980_v62, 4  ;;  %v994_v27 = vor.u32 %v993_v0, %v990_v4  ;;  %v1004_v28 = vrot.slane %v1002_v8, 4  ;;  %v1147_v14 = vrot.slane %v2609_v34, 5  ;;  %v2364_v33 = vld [vmem:[%s2462_s28 + $0x18] ss:$8 sps:$4 sm:$0xff]  }
  0x3d   : > { %2268 = vmatprep.mubr.msk.bf16.mxu1 %vm418_vm2, %v2362_v15  ;;  %v1007_v6 = vrot.slane %v1005_v18, 5  ;;  %v2095_v32 = vrot.slane %v2087_v9, 9  ;;  %v1151_v60 = vrot.slane %v2625_v38, 5  ;;  %v2096_v49 = vrot.slane %v2088_v7, 9  ;;  %v2134_v25 = vld [vmem:[%s2462_s28 + $0x18] sm:$0xf] }
  0x3e   : > { %v986_v19 = vsel %vm2505_vm3, %v981_v13, %v985_v63  ;;  %v995_v35 = vrot.slane %v994_v27, 4  ;;  %v1013_v34 = vrot.slane %v1011_v22, 5  ;;  %v1155_v42 = vrot.slane %v2630_v45, 5  ;;  %v2745_v45 = vld [vmem:[%s2976_s1 + $0x38] sm:$0xff]   ;;  %v2159_v18 = vld [vmem:[%s2462_s28 + $0x10] sm:$0xe] }
  0x3f   : > { %2279 = vmatmul.mubr.msk.bf16.vlgmr.msra.gmra.mxu0 %vm418_vm2, %v2078_v1  ;;  %v2079_v37 = vcombine.low %v972_v11, %v986_v19  ;;  %v1008_v39 = vor.u32 %v1007_v6, %v1004_v28  ;;  %v2097_v38 = vrot.slane %v2089_v23, 9  ;;  %v1159_v43 = vrot.slane %v2649_v58, 5  ;;  %v2090_v58 = vld [vmem:[%s2462_s28 + $0x28] sm:$0xe]  ;;  %v2135_v62 = vld [vmem:[%s2462_s28 + $0x1c] sm:$0x1] }
  0x40   : > { %2297 = vmatpush3.bf16.msra.mxu0 %v2654_v59  ;;  %v1000_v44 = vsel %vm2505_vm3, %v995_v35, %v999_v17  ;;  %v2740_v41 = vsel %vm2571_vm6, %v2094_v30, %v1147_v14  ;;  %v2091_v59 = vld [vmem:[%s2462_s28 + $0x30] sm:$0xe]  ;;  %v2752_v61 = vsel %vm2571_vm6, %v2095_v32, %v1151_v60  ;;  %v2757_v24 = vsel %vm2571_vm6, %v2096_v49, %v1155_v42  ;;  %v2370_v22 = vld [vmem:[%s2462_s28 + $0x20] ss:$8 sps:$4 sm:$0xff]   ;;  %v2160_v30 = vld [vmem:[%s2462_s28 + $0x18] sm:$0xe] }
  0x41   : > { %2282 = vmatprep.mubr.msk.bf16.mxu0 %vm418_vm2, %v2079_v37  ;;  %v1009_v36 = vrot.slane %v1008_v39, 4  ;;  %2316 = vmatprep.subr.bf16.mxu0 %v2720_v10  ;;  %v2098_v48 = vrot.slane %v2090_v58, 9  ;;  %v1163_v50 = vrot.slane %v2669_v5, 5  ;;  %v2764_v15 = vsel %vm2571_vm6, %v2097_v38, %v1159_v43  ;;  %v2372_v14 = vld [vmem:[%s2462_s28 + $0x30] ss:$8 sps:$4 sm:$0xff]  }
  0x42   : > { %v2099_v20 = vrot.slane %v2091_v59, 9  ;;  %v1167_v26 = vrot.slane %v2682_v40, 5  ;;  %v2100_v21 = vrot.slane %v2092_v2, 9  ;;  %v1171_v5 = vrot.slane %v2692_v47, 5  ;;  %v2367_v40 = vld [vmem:[%s2462_s28 + $0x38] ss:$8 sps:$4 sm:$0xff]  }
  0x43   : > { %v1014_v51 = vsel %vm2505_vm3, %v1009_v36, %v1013_v34  ;;  %v2101_v55 = vrot.slane %v2093_v54, 9  ;;  %v1175_v56 = vrot.slane %v2702_v12, 5  ;;  %v2104_v57 = vcombine.low %v2740_v41, %v2752_v61  ;;  %v2133_v47 = vld [vmem:[%s2462_s28 + $0x14] sm:$0x1]  ;;  %v2136_v19 = vld [vmem:[%s2462_s28 + $0x20] sm:$0xf] }
  0x44   : > { %2269 = vmatmul.mubr.msk.bf16.vlgmr.msra.gmra.mxu1 %vm418_vm2, %v2364_v33  ;;  %v2080_v53 = vcombine.low %v1000_v44, %v1014_v51  ;;  %v2105_v1 = vcombine.low %v2757_v24, %v2764_v15  ;;  %v2789_v12 = vsel %vm2571_vm6, %v2099_v20, %v1167_v26  ;;  %v2793_v4 = vsel %vm2571_vm6, %v2100_v21, %v1171_v5  ;;  %v2137_v37 = vld [vmem:[%s2462_s28 + $0x24] sm:$0x1]  ;;  %v2138_v42 = vld [vmem:[%s2462_s28 + $0x28] sm:$0xf]  ;;  %v2139_v38 = vld [vmem:[%s2462_s28 + $0x2c] sm:$0x1] }
  0x45   : > { %2287 = vmatpush3.bf16.msra.mxu1 %v2665_v16  ;;  %2272 = vmatprep.mubr.msk.bf16.mxu1 %vm418_vm2, %v2366_v29  ;;  %v2782_v16 = vsel %vm2571_vm6, %v2098_v48, %v1163_v50  ;;  %v1423_v63 = vshrl.u32 %v2132_v3, 16  ;;  %v1426_v0 = vshll.u32 %v2132_v3, 16  ;;  %v2800_v8 = vsel %vm2571_vm6, %v2101_v55, %v1175_v56  ;;  %v2161_v61 = vld [vmem:[%s2462_s28 + $0x20] sm:$0xe]  ;;  %v2162_v20 = vld [vmem:[%s2462_s28 + $0x28] sm:$0xe] }
  0x46   : > { %2306 = vmatprep.subr.bf16.mxu1 %v2745_v45  ;;  %v1432_v9 = vshll.u32 %v2133_v47, 16  ;;  %v1437_v11 = vshrl.u32 %v2134_v25, 16  ;;  %v1440_v17 = vshll.u32 %v2134_v25, 16  ;;  %v1446_v28 = vshll.u32 %v2135_v62, 16  ;;  %v2140_v21 = vld [vmem:[%s2462_s28 + $0x30] sm:$0xf] }
  0x47   : > { %2283 = vmatmul.mubr.msk.bf16.gmra.mxu0 %vm418_vm2, %v2080_v53  ;;  %v1425_v13 = vrot.slane %v1423_v63, 4  ;;  %v1428_v27 = vrot.slane %v1426_v0, 5  ;;  %v2167_v6 = vrot.slane %v2159_v18, 9  ;;  %v1666_v33 = vrot.slane %v2133_v47, 5  ;;  %v2142_v25 = vld [vmem:[%s2462_s28 + $0x38] sm:$0xf] }
  0x48   : > { %2298 = vmatprep.mubr.msk.bf16.mxu0 %vm418_vm2, %v2368_v46  ;;  %v1434_v32 = vrot.slane %v1432_v9, 5  ;;  %v1439_v60 = vrot.slane %v1437_v11, 4  ;;  %v1442_v7 = vrot.slane %v1440_v17, 5  ;;  %v1448_v23 = vrot.slane %v1446_v28, 5  ;;  %v2143_v18 = vld [vmem:[%s2462_s28 + $0x3c] sm:$0x1] }
  0x49   : > { %v1429_v35 = vor.u32 %v1428_v27, %v1425_v13  ;;  %v2168_v49 = vrot.slane %v2160_v30, 9  ;;  %v1670_v29 = vrot.slane %v2135_v62, 5  ;;  %v2106_v39 = vcombine.low %v2782_v16, %v2789_v12  ;;  %v2373_v62 = vld [vmem:[%s2462_s28 + $0x40] ss:$8 sps:$4 sm:$0xff]   ;;  %v2163_v27 = vld [vmem:[%s2462_s28 + $0x30] sm:$0xe] }
  0x4a   : > { %v1443_v34 = vor.u32 %v1442_v7, %v1439_v60  ;;  %v1451_v43 = vshrl.u32 %v2136_v19, 16  ;;  %v1454_v44 = vshll.u32 %v2136_v19, 16  ;;  %v2107_v36 = vcombine.low %v2793_v4, %v2800_v8 }
  0x4b   : > { %v1430_v41 = vrot.slane %v1429_v35, 4  ;;  %v1460_v58 = vshll.u32 %v2137_v37, 16  ;;  %v1465_v59 = vshrl.u32 %v2138_v42, 16  ;;  %v1667_v48 = vsel %vm2571_vm6, %v2167_v6, %v1666_v33 }
  0x4c   : > { %2273 = vmatmul.mubr.msk.bf16.gmra.mxu1 %vm418_vm2, %v2367_v40  ;;  %v1444_v46 = vrot.slane %v1443_v34, 4  ;;  %v1453_v50 = vrot.slane %v1451_v43, 4  ;;  %v1456_v51 = vrot.slane %v1454_v44, 5  ;;  %v1671_v2 = vsel %vm2571_vm6, %v2168_v49, %v1670_v29  ;;  %v2145_v44 = vld [vmem:[%s2462_s28 + $0x44] sm:$0x1] }
  0x4d   : > { %2288 = vmatprep.mubr.msk.bf16.mxu1 %vm418_vm2, %v2104_v57  ;;  %v1435_v26 = vsel %vm2505_vm3, %v1430_v41, %v1434_v32  ;;  %v1467_v53 = vrot.slane %v1465_v59, 4  ;;  %v1468_v54 = vshll.u32 %v2138_v42, 16  ;;  %v1474_v56 = vshll.u32 %v2139_v38, 16  ;;  %v2141_v57 = vld [vmem:[%s2462_s28 + $0x34] sm:$0x1] }
  0x4e   : > { %v1449_v5 = vsel %vm2505_vm3, %v1444_v46, %v1448_v23  ;;  %v1457_v55 = vor.u32 %v1456_v51, %v1453_v50  ;;  %v2169_v40 = vrot.slane %v2161_v61, 9  ;;  %v2831_v16 = vrot.slane %v1460_v58, 5  ;;  %v2164_v32 = vld [vmem:[%s2462_s28 + $0x38] sm:$0xe]  ;;  %v2144_v23 = vld [vmem:[%s2462_s28 + $0x40] sm:$0xf] }
  0x4f   : > { %2299 = vmatmul.mubr.msk.bf16.vlgmr.msra.gmra.mxu0 %vm418_vm2, %v2370_v22  ;;  %v1470_v3 = vrot.slane %v1468_v54, 5  ;;  %v1674_v47 = vrot.slane %v2137_v37, 5  ;;  %v2170_v12 = vrot.slane %v2162_v20, 9  ;;  %v1678_v0 = vrot.slane %v2139_v38, 5  ;;  %v2147_v51 = vld [vmem:[%s2462_s28 + $0x4c] sm:$0x1] }
  0x50   : > { %2317 = vmatpush3.bf16.msra.mxu0 %v2720_v10  ;;  %2302 = vmatprep.mubr.msk.bf16.mxu0 %vm418_vm2, %v2372_v14  ;;  %v2177_v10 = vcombine.low %v1667_v48, %v1671_v2  ;;  %v2835_v63 = vrot.slane %v1457_v55, 4  ;;  %v1479_v9 = vshrl.u32 %v2140_v21, 16  ;;  %v2150_v11 = vcombine.low %v1435_v26, %v1449_v5  ;;  %v2165_v26 = vld [vmem:[%s2462_s28 + $0x40] sm:$0xe]  ;;  %v2166_v5 = vld [vmem:[%s2462_s28 + $0x48] sm:$0xe] }
  0x51   : > { %v1471_v17 = vor.u32 %v1470_v3, %v1467_v53  ;;  %v1482_v22 = vshll.u32 %v2140_v21, 16  ;;  %v1488_v13 = vshll.u32 %v2141_v57, 16  ;;  %v1476_v28 = vrot.slane %v1474_v56, 5 }
  0x52   : > { %v1675_v30 = vsel %vm2571_vm6, %v2169_v40, %v1674_v47  ;;  %v1481_v6 = vrot.slane %v1479_v9, 4  ;;  %v1493_v14 = vshrl.u32 %v2142_v25, 16  ;;  %v1463_v24 = vsel %vm2505_vm3, %v2835_v63, %v2831_v16 }
  0x53   : > { %v1472_v15 = vrot.slane %v1471_v17, 4  ;;  %v1484_v60 = vrot.slane %v1482_v22, 5  ;;  %v1496_v33 = vshll.u32 %v2142_v25, 16  ;;  %v1502_v19 = vshll.u32 %v2143_v18, 16 }
  0x54   : > { %2289 = vmatmul.mubr.msk.bf16.vlgmr.msra.gmra.mxu1 %vm418_vm2, %v2105_v1  ;;  %v1679_v1 = vsel %vm2571_vm6, %v2170_v12, %v1678_v0  ;;  %v1495_v7 = vrot.slane %v1493_v14, 4  ;;  %v2171_v35 = vrot.slane %v2163_v27, 9  ;;  %v1490_v49 = vrot.slane %v1488_v13, 5 }
  0x55   : > { %2307 = vmatpush3.bf16.msra.mxu1 %v2745_v45  ;;  %2292 = vmatprep.mubr.msk.bf16.mxu1 %vm418_vm2, %v2106_v39  ;;  %v1485_v45 = vor.u32 %v1484_v60, %v1481_v6  ;;  %v1682_v29 = vrot.slane %v2141_v57, 5  ;;  %v2172_v37 = vrot.slane %v2164_v32, 9  ;;  %v2146_v39 = vld [vmem:[%s2462_s28 + $0x48] sm:$0xf]  ;;  %v1477_v34 = vsel %vm2505_vm3, %v1472_v15, %v1476_v28 }
  0x56   : > { %v2178_v42 = vcombine.low %v1675_v30, %v1679_v1  ;;  %v1498_v38 = vrot.slane %v1496_v33, 5  ;;  %v1686_v43 = vrot.slane %v2143_v18, 5  ;;  %v1507_v59 = vshrl.u32 %v2144_v23, 16 }
  0x57   : > { %2303 = vmatmul.mubr.msk.bf16.gmra.mxu0 %vm418_vm2, %v2373_v62  ;;  %v1486_v41 = vrot.slane %v1485_v45, 4  ;;  %v1683_v58 = vsel %vm2571_vm6, %v2171_v35, %v1682_v29  ;;  %v1510_v61 = vshll.u32 %v2144_v23, 16  ;;  %v1504_v48 = vrot.slane %v1502_v19, 5 }
  0x58   : > { %2318 = vmatprep.mubr.msk.bf16.mxu0 %vm418_vm2, %v2177_v10  ;;  %v1499_v46 = vor.u32 %v1498_v38, %v1495_v7  ;;  %v1687_v50 = vsel %vm2571_vm6, %v2172_v37, %v1686_v43  ;;  %v1521_v20 = vshrl.u32 %v2146_v39, 16  ;;  %v1509_v53 = vrot.slane %v1507_v59, 4 }
  0x59   : > { %v1491_v2 = vsel %vm2505_vm3, %v1486_v41, %v1490_v49  ;;  %v1512_v54 = vrot.slane %v1510_v61, 5  ;;  %v1516_v21 = vshll.u32 %v2145_v44, 16  ;;  %v2179_v56 = vcombine.low %v1683_v58, %v1687_v50 }
  0x5a   : > { %v1500_v55 = vrot.slane %v1499_v46, 4  ;;  %v1523_v40 = vrot.slane %v1521_v20, 4  ;;  %v1524_v57 = vshll.u32 %v2146_v39, 16  ;;  %v1530_v3 = vshll.u32 %v2147_v51, 16 }
  0x5b   : > { %v1513_v16 = vor.u32 %v1512_v54, %v1509_v53  ;;  %v2173_v47 = vrot.slane %v2165_v26, 9  ;;  %v1690_v12 = vrot.slane %v2145_v44, 5  ;;  %v2174_v10 = vrot.slane %v2166_v5, 9 }
  0x5c   : > { %2293 = vmatmul.mubr.msk.bf16.gmra.mxu1 %vm418_vm2, %v2107_v36  ;;  %v1505_v25 = vsel %vm2505_vm3, %v1500_v55, %v1504_v48  ;;  %v1526_v62 = vrot.slane %v1524_v57, 5  ;;  %v1694_v63 = vrot.slane %v2147_v51, 5  ;;  %v2151_v4 = vcombine.low %v1463_v24, %v1477_v34 }
  0x5d   : > { %2308 = vmatprep.mubr.msk.bf16.mxu1 %vm418_vm2, %v2150_v11  ;;  %v1691_v36 = vsel %vm2571_vm6, %v2173_v47, %v1690_v12  ;;  %v2152_v9 = vcombine.low %v1491_v2, %v1505_v25  ;;  %v1514_v11 = vrot.slane %v1513_v16, 4  ;;  %v1518_v17 = vrot.slane %v1516_v21, 5 }
  0x5e   : > { %v1527_v8 = vor.u32 %v1526_v62, %v1523_v40  ;;  %v1695_v0 = vsel %vm2571_vm6, %v2174_v10, %v1694_v63  ;;  %v1532_v18 = vrot.slane %v1530_v3, 5 }
  0x5f   : > { %2319 = vmatmul.mubr.msk.bf16.vlgmr.msra.gmra.mxu0 %vm418_vm2, %v2178_v42  ;;  %v2180_v13 = vcombine.low %v1691_v36, %v1695_v0  ;;  %v1519_v27 = vsel %vm2505_vm3, %v1514_v11, %v1518_v17 }
  0x60   : > { %2322 = vmatprep.mubr.msk.bf16.mxu0 %vm418_vm2, %v2179_v56  ;;  %v1528_v22 = vrot.slane %v1527_v8, 4 }
  0x62   : > { %v1533_v28 = vsel %vm2505_vm3, %v1528_v22, %v1532_v18 }
  0x63   : > { %v2153_v52 = vcombine.low %v1519_v27, %v1533_v28 }
  0x64   : > { %2309 = vmatmul.mubr.msk.bf16.vlgmr.msra.gmra.mxu1 %vm418_vm2, %v2151_v4 }
  0x65   : > { %2312 = vmatprep.mubr.msk.bf16.mxu1 %vm418_vm2, %v2152_v9 }
  0x67   : > { %2323 = vmatmul.mubr.msk.bf16.gmra.mxu0 %vm418_vm2, %v2180_v13 }
  0x6c   : > { %2313 = vmatmul.mubr.msk.bf16.gmra.mxu1 %vm418_vm2, %v2153_v52 }
  0xe7   : > { %v2240_v30 = vpop.f32.mrf.mxu0 }
  0xe9   : > { %v465_v6 = vpop.f32.mrf.mxu0 }
  0xeb   : > { %v2241_v14 = vpop.f32.mrf.mxu0 }
  0xec   : > { %v2244_v32 = vpop.f32.mrf.mxu1 }
  0xed   : > { %v468_v24 = vpop.f32.mrf.mxu0 }
  0xee   : > { %v481_v15 = vpop.f32.mrf.mxu1 }
  0xef   : > { %v2260_v1 = vpop.f32.mrf.mxu0 }
  0xf0   : > { %v2245_v60 = vpop.f32.mrf.mxu1 }
  0xf1   : > { %v725_v7 = vpop.f32.mrf.mxu0 }
  0xf2   : > { %v484_v33 = vpop.f32.mrf.mxu1 }
  0xf3   : > { %v2261_v19 = vpop.f32.mrf.mxu0 }
  0xf4   : > { %v2250_v35 = vpop.f32.mrf.mxu1 }
  0xf5   : > { %v728_v23 = vpop.f32.mrf.mxu0  ;;  %v577_v57 = vadd.f32 %v2250_v35, %v2240_v30 }
  0xf6   : > { %v568_v31 = vpop.f32.mrf.mxu1 }
  0xf7   : > { %v2264_v45 = vpop.f32.mrf.mxu0  ;;  %v569_v47 = vadd.f32 %v568_v31, %v465_v6  ;;  %v758_v62 = vadd.f32 %v2260_v1, %v577_v57 }
  0xf8   : > { %v2251_v49 = vpop.f32.mrf.mxu1 }
  0xf9   : > { %v741_v29 = vpop.f32.mrf.mxu0  ;;  %v580_v10 = vadd.f32 %v2251_v49, %v2241_v14  ;;  %v756_v8 = vadd.f32 %v725_v7, %v569_v47 }
  0xfa   : > { %v571_v37 = vpop.f32.mrf.mxu1 }
  0xfb   : > { %v2265_v39 = vpop.f32.mrf.mxu0  ;;  %v572_v36 = vadd.f32 %v571_v37, %v468_v24  ;;  %v759_v17 = vadd.f32 %v2261_v19, %v580_v10 }
  0xfc   : > { %v2254_v34 = vpop.f32.mrf.mxu1 }
  0xfd   : > { %v744_v42 = vpop.f32.mrf.mxu0  ;;  %v593_v13 = vadd.f32 %v2254_v34, %v2244_v32  ;;  %v757_v52 = vadd.f32 %v728_v23, %v572_v36 }
  0xfe   : > { %v584_v38 = vpop.f32.mrf.mxu1 }
  0xff   : > { %v2280_v43 = vpop.f32.mrf.mxu0  ;;  %v585_v27 = vadd.f32 %v584_v38, %v481_v15 }
 0x100   : > { %v2255_v44 = vpop.f32.mrf.mxu1 }
 0x101   : > { %v1082_v41 = vpop.f32.mrf.mxu0  ;;  %v596_v1 = vadd.f32 %v2255_v44, %v2245_v60  ;;  %v760_v19 = vadd.f32 %v741_v29, %v585_v27 }
 0x102   : > { %v587_v58 = vpop.f32.mrf.mxu1 }
 0x103   : > { %v2281_v59 = vpop.f32.mrf.mxu0  ;;  %v588_v35 = vadd.f32 %v587_v58, %v484_v33  ;;  %v763_v15 = vadd.f32 %v2265_v39, %v596_v1  ;;  %v2914_v39 = vld [vmem:[%s2977_s2] ss:$0 sm:$0xff] }
 0x104   : > { %v2270_v61 = vpop.f32.mrf.mxu1 }
 0x105   : > { %v1085_v46 = vpop.f32.mrf.mxu0  ;;  %v881_v0 = vadd.f32 %v2270_v61, %v758_v62  ;;  %v762_v61 = vadd.f32 %v2264_v45, %v593_v13  ;;  %v761_v34 = vadd.f32 %v744_v42, %v588_v35 }
 0x106   : > { %v848_v48 = vpop.f32.mrf.mxu1 }
 0x107   : > { %v2891_v50 = vpop.f32.mrf.mxu0  ;;  %v879_v18 = vadd.f32 %v848_v48, %v756_v8  ;;  %v1115_v30 = vadd.f32 %v2280_v43, %v881_v0 }
 0x108   : > { %v2271_v51 = vpop.f32.mrf.mxu1 }
 0x109   : > { %v2893_v20 = vpop.f32.mrf.mxu0  ;;  %v882_v6 = vadd.f32 %v2271_v51, %v759_v17  ;;  %v1113_v24 = vadd.f32 %v1082_v41, %v879_v18 }
 0x10a   : > { %v851_v26 = vpop.f32.mrf.mxu1 }
 0x10b   : > { %v2895_v2 = vpop.f32.mrf.mxu0  ;;  %v880_v31 = vadd.f32 %v851_v26, %v757_v52  ;;  %v1116_v57 = vadd.f32 %v2281_v59, %v882_v6 }
 0x10c   : > { %v2274_v53 = vpop.f32.mrf.mxu1 }
 0x10d   : > { %v2897_v54 = vpop.f32.mrf.mxu0  ;;  %v885_v23 = vadd.f32 %v2274_v53, %v762_v61  ;;  %v1114_v51 = vadd.f32 %v1085_v46, %v880_v31 }
 0x10e   : > { %v864_v21 = vpop.f32.mrf.mxu1 }
 0x10f   : > { %v2300_v5 = vpop.f32.mrf.mxu0  ;;  %v883_v38 = vadd.f32 %v864_v21, %v760_v19  ;;  %v1119_v59 = vadd.f32 %v2891_v50, %v885_v23  ;;  %v2921_v50 = vld [vmem:[%s2978_s3] ss:$0 sm:$0xff] }
 0x110   : > { %v2275_v55 = vpop.f32.mrf.mxu1 }
 0x111   : > { %v1367_v56 = vpop.f32.mrf.mxu0  ;;  %v886_v44 = vadd.f32 %v2275_v55, %v763_v15 }
 0x112   : > { %v867_v40 = vpop.f32.mrf.mxu1 }
 0x113   : > { %v2301_v16 = vpop.f32.mrf.mxu0  ;;  %v884_v41 = vadd.f32 %v867_v40, %v761_v34 }
 0x114   : > { %v2290_v3 = vpop.f32.mrf.mxu1 }
 0x115   : > { %v2899_v12 = vpop.f32.mrf.mxu0  ;;  %v1277_v49 = vadd.f32 %v2290_v3, %v1115_v30  ;;  %v1118_v55 = vadd.f32 %v2897_v54, %v884_v41 }
 0x116   : > { %v1244_v25 = vpop.f32.mrf.mxu1 }
 0x117   : > { %v2901_v63 = vpop.f32.mrf.mxu0  ;;  %v1275_v47 = vadd.f32 %v1244_v25, %v1113_v24  ;;  %v1400_v62 = vadd.f32 %v2300_v5, %v1277_v49  ;;  %v1117_v25 = vadd.f32 %v2893_v20, %v883_v38  ;;  %v1120_v5 = vadd.f32 %v2895_v2, %v886_v44 }
 0x118   : > { %v2291_v4 = vpop.f32.mrf.mxu1 }
 0x119   : > { %v2903_v9 = vpop.f32.mrf.mxu0  ;;  %v1278_v60 = vadd.f32 %v2291_v4, %v1116_v57  ;;  %v1398_v26 = vadd.f32 %v1367_v56, %v1275_v47 }
 0x11a   : > { %v1247_v11 = vpop.f32.mrf.mxu1 }
 0x11b   : > { %v2905_v22 = vpop.f32.mrf.mxu0  ;;  %v1276_v3 = vadd.f32 %v1247_v11, %v1114_v51  ;;  %v1401_v46 = vadd.f32 %v2301_v16, %v1278_v60 }
 0x11c   : > { %v2294_v28 = vpop.f32.mrf.mxu1 }
 0x11d   : > { %v2907_v14 = vpop.f32.mrf.mxu0  ;;  %v1281_v56 = vadd.f32 %v2294_v28, %v1119_v59  ;;  %v1399_v4 = vadd.f32 %v2899_v12, %v1276_v3 }
 0x11e   : > { %v1260_v7 = vpop.f32.mrf.mxu1 }
 0x11f   : > { %v2320_v37 = vpop.f32.mrf.mxu0  ;;  %v1279_v40 = vadd.f32 %v1260_v7, %v1117_v25  ;;  %v1404_v27 = vadd.f32 %v2901_v63, %v1281_v56 }
 0x120   : > { %v2295_v48 = vpop.f32.mrf.mxu1 }
 0x121   : > { %v1763_v32 = vpop.f32.mrf.mxu0  ;;  %v1282_v0 = vadd.f32 %v2295_v48, %v1120_v5  ;;  %v1402_v28 = vadd.f32 %v2903_v9, %v1279_v40 }
 0x122   : > { %v1263_v43 = vpop.f32.mrf.mxu1 }
 0x123   : > { %v2321_v33 = vpop.f32.mrf.mxu0  ;;  %v1280_v2 = vadd.f32 %v1263_v43, %v1118_v55  ;;  %v1405_v35 = vadd.f32 %v2905_v22, %v1282_v0 }
 0x124   : > { %v2310_v58 = vpop.f32.mrf.mxu1 }
 0x125   : > { %v1634_v45 = vadd.f32 %v2310_v58, %v1400_v62  ;;  %v1766_v29 = vpop.f32.mrf.mxu0  ;;  %v1403_v7 = vadd.f32 %v2907_v14, %v1280_v2 }
 0x126   : > { %v1601_v42 = vpop.f32.mrf.mxu1 }
 0x127   : > { %v1796_v53 = vadd.f32 %v2320_v37, %v1634_v45  ;;  %v1632_v21 = vadd.f32 %v1601_v42, %v1398_v26  ;;  %v2324_v10 = vpop.f32.mrf.mxu0 }
 0x128   : > { %v2311_v20 = vpop.f32.mrf.mxu1 }
 0x129   : > { %v1811_v16 = vmul.f32 %v2914_v39, %v1796_v53  ;;  %v1794_v8 = vadd.f32 %v1763_v32, %v1632_v21  ;;  %v1635_v36 = vadd.f32 %v2311_v20, %v1401_v46  ;;  %v1779_v52 = vpop.f32.mrf.mxu0 }
 0x12a   : > { %v1604_v11 = vpop.f32.mrf.mxu1 }
 0x12b   : > { %v1826_v54 = vadd.f32 %v2921_v50, %v1811_v16  ;;  %v1809_v17 = vmul.f32 %v2914_v39, %v1794_v8  ;;  %v1797_v18 = vadd.f32 %v2321_v33, %v1635_v36  ;;  %v1633_v13 = vadd.f32 %v1604_v11, %v1399_v4  ;;  %v2325_v57 = vpop.f32.mrf.mxu0 }
 0x12c   : > { %v2314_v12 = vpop.f32.mrf.mxu1 }
 0x12d   : > { %vm1834_vm8 = vcmp.ge.f32.partialorder %v1826_v54, 0.0  ;;  %v1842_v30 = vmul.f32 0.2, %v1826_v54  ;;  %v1824_v6 = vadd.f32 %v2921_v50, %v1809_v17  ;;  %v1812_v1 = vmul.f32 %v2914_v39, %v1797_v18  ;;  %v1782_v26 = vpop.f32.mrf.mxu0 }
 0x12e   : > { %v1795_v24 = vadd.f32 %v1766_v29, %v1633_v13  ;;  %v1638_v31 = vadd.f32 %v2314_v12, %v1404_v27  ;;  %v1617_v49 = vpop.f32.mrf.mxu1 }
 0x12f   : > { %v1850_v63 = vsel %vm1834_vm8, %v1826_v54, %v1842_v30  ;;  %vm1832_vm9 = vcmp.ge.f32.partialorder %v1824_v6, 0.0  ;;  %v1840_v9 = vmul.f32 0.2, %v1824_v6  ;;  %v1827_v37 = vadd.f32 %v2921_v50, %v1812_v1 }
 0x130   : > { %v1858_v61 = vpack.c.bf16 %v1850_v63, %v1850_v63  ;;  %v1810_v19 = vmul.f32 %v2914_v39, %v1795_v24  ;;  %v1800_v22 = vadd.f32 %v2324_v10, %v1638_v31  ;;  %v1636_v48 = vadd.f32 %v1617_v49, %v1402_v28  ;;  %v2315_v14 = vpop.f32.mrf.mxu1 }
 0x131   : > { %v1848_v47 = vsel %vm1832_vm9, %v1824_v6, %v1840_v9  ;;  %vm1835_vm10 = vcmp.ge.f32.partialorder %v1827_v37, 0.0  ;;  %v1843_v32 = vmul.f32 0.2, %v1827_v37  ;;  %v1639_v15 = vadd.f32 %v2315_v14, %v1405_v35 }
 0x132   : > { %1867 = vst.msk [vmem:[%s2937_s15 + $0x8] sm:$0xf] %vm1864_vm7, %v1858_v61  ;;  %v1856_v34 = vpack.c.bf16 %v1848_v47, %v1848_v47  ;;  %v1825_v23 = vadd.f32 %v2921_v50, %v1810_v19  ;;  %v1815_v38 = vmul.f32 %v2914_v39, %v1800_v22  ;;  %v1798_v43 = vadd.f32 %v1779_v52, %v1636_v48  ;;  %v1620_v51 = vpop.f32.mrf.mxu1 }
 0x133   : > { %v1851_v62 = vsel %vm1835_vm10, %v1827_v37, %v1843_v32  ;;  %v1801_v60 = vadd.f32 %v2325_v57, %v1639_v15  ;;  %v1637_v33 = vadd.f32 %v1620_v51, %v1403_v7 }
 0x134   : > { %1865 = vst.msk [vmem:[%s2937_s15] sm:$0xf] %vm1864_vm7, %v1856_v34  ;;  %v1859_v44 = vpack.c.bf16 %v1851_v62, %v1851_v62  ;;  %vm1833_vm11 = vcmp.ge.f32.partialorder %v1825_v23, 0.0  ;;  %v1841_v41 = vmul.f32 0.2, %v1825_v23  ;;  %v1830_v58 = vadd.f32 %v2921_v50, %v1815_v38 }
 0x135   : > { %v1813_v3 = vmul.f32 %v2914_v39, %v1798_v43  ;;  %v1816_v45 = vmul.f32 %v2914_v39, %v1801_v60  ;;  %v1799_v29 = vadd.f32 %v1782_v26, %v1637_v33 }
 0x136   : > { %1868 = vst.msk [vmem:[%s2937_s15 + $0xc] sm:$0xf] %vm1864_vm7, %v1859_v44  ;;  %v1849_v59 = vsel %vm1833_vm11, %v1825_v23, %v1841_v41  ;;  %vm1838_vm12 = vcmp.ge.f32.partialorder %v1830_v58, 0.0  ;;  %v1846_v25 = vmul.f32 0.2, %v1830_v58 }
 0x137   : > { %v1857_v42 = vpack.c.bf16 %v1849_v59, %v1849_v59  ;;  %v1828_v46 = vadd.f32 %v2921_v50, %v1813_v3  ;;  %v1831_v53 = vadd.f32 %v2921_v50, %v1816_v45  ;;  %v1814_v21 = vmul.f32 %v2914_v39, %v1799_v29 }
 0x138   : > { %v1854_v5 = vsel %vm1838_vm12, %v1830_v58, %v1846_v25 }
 0x139   : > { %1866 = vst.msk [vmem:[%s2937_s15 + $0x4] sm:$0xf] %vm1864_vm7, %v1857_v42  ;;  %v1862_v55 = vpack.c.bf16 %v1854_v5, %v1854_v5  ;;  %vm1836_vm13 = vcmp.ge.f32.partialorder %v1828_v46, 0.0  ;;  %v1844_v56 = vmul.f32 0.2, %v1828_v46  ;;  %vm1839_vm14 = vcmp.ge.f32.partialorder %v1831_v53, 0.0 }
 0x13a   : > { %v1847_v40 = vmul.f32 0.2, %v1831_v53  ;;  %v1829_v20 = vadd.f32 %v2921_v50, %v1814_v21 }
 0x13b   : > { %1871 = vst.msk [vmem:[%s2937_s15 + $0x18] sm:$0xf] %vm1864_vm7, %v1862_v55  ;;  %v1852_v10 = vsel %vm1836_vm13, %v1828_v46, %v1844_v56 }
 0x13c   : > { %v1860_v4 = vpack.c.bf16 %v1852_v10, %v1852_v10  ;;  %v1855_v16 = vsel %vm1839_vm14, %v1831_v53, %v1847_v40  ;;  %vm1837_vm15 = vcmp.ge.f32.partialorder %v1829_v20, 0.0  ;;  %v1845_v39 = vmul.f32 0.2, %v1829_v20 }
 0x13d   : > { %v1863_v8 = vpack.c.bf16 %v1855_v16, %v1855_v16 }
 0x13e   : > { %1869 = vst.msk [vmem:[%s2937_s15 + $0x10] sm:$0xf] %vm1864_vm7, %v1860_v4  ;;  %v1853_v36 = vsel %vm1837_vm15, %v1829_v20, %v1845_v39 }
 0x13f   : > { %1872 = vst.msk [vmem:[%s2937_s15 + $0x1c] sm:$0xf] %vm1864_vm7, %v1863_v8  ;;  %v1861_v0 = vpack.c.bf16 %v1853_v36, %v1853_v36 }
 0x141   : > { %1870 = vst.msk [vmem:[%s2937_s15 + $0x14] sm:$0xf] %vm1864_vm7, %v1861_v0 }
 0x142 PF: > { %s14_s17 = sadd.s32 1, %s2396_s17   ;;  %s2984_s15 = smov %s2392_s16 }
 0x143   : > { %p11_p5 = scmp.ge.s32.totalorder %s14_s17, 4   ;;  %s2985_s16 = smov %s2987_s18 }
 0x145   :  { %13 = sbr.rel (!%p11_p5) target bundleno = 2 (0x2), region = 85 }

// kernel: discriminator_forward.12
= control target key start
LH: loop header
LB: loop body
LE: loop exit
PB: predicated region body
PF: predicated region fallthrough
CT: control target
= control target key end

     0   :  { %s1826_s15 = smov 0   ;;  %s1828_s16 = smov 0   ;;  %s2054_s0 = inlined_call_operand.vmem [shape: bf16[4,10,5,32], index: 0, kind: input, shape index: {}]   ;;  %s2055_s1 = inlined_call_operand.vmem [shape: bf16[3,3,32,32], index: 1, kind: input, shape index: {}]   ;;  %s2056_s2 = inlined_call_operand.vmem [shape: f32[1,32], index: 2, kind: input, shape index: {}]   ;;  %s2057_s3 = inlined_call_operand.vmem [shape: f32[1,32], index: 3, kind: input, shape index: {}]   ;;  %s2058_s4 = inlined_call_operand.vmem [shape: bf16[2,4,4,32], index: 4, kind: output, shape index: {}]  }
   0x1   :  { %s1830_s17 = smov 0  }
   0x2 LB: > { %s26_s18 = sadd.s32 1, %s1792_s16  ;;  %p1496_p0 = scmp.ge.s32.totalorder %s1796_s17, 1  ;;  %s1796_s17 = sphi %s1830_s17, %s14_s17   ;;  %s1792_s16 = sphi %s1828_s16, %s2066_s16   ;;  %s1788_s15 = sphi %s1826_s15, %s2065_s15  }
   0x3   : > { %p28_p1 = scmp.ge.s32.totalorder %s26_s18, 2  ;;  %p203_p2 = scmp.lt.s32.totalorder %s1796_s17, 3 }
   0x5   : > { %s2068_s18 = smov (%p28_p1, %s26_s18), 0  ;;  %p204_p3 = pnand %p1496_p0, %p203_p2 }
   0x6   : > { %s1497_s25 = sshll.u32 (!%p204_p3), %s1788_s15, 1  ;;  %p260_p5 = scmp.lt.s32.totalorder (!%p204_p3), %s1788_s15, 1 }
   0x7   : > { %207 = sbr.rel (%p204_p3) target bundleno = 277 (0x115), region = 36  ;;  %p244_p4 = scmp.lt.s32.totalorder (!%p204_p3), %s1497_s25, 3 }
   0xc   : > { %v1732_v0 = vld [vmem:[%s2055_s1 + $0x18] sm:$0xff]   ;;  %v1798_v1 = vmov 0.0   ;;  %v1733_v2 = vld [vmem:[%s2055_s1 + $0x8] sm:$0xff]   ;;  %v296_v3 = vlaneseq  ;;  %v1734_v4 = vld [vmem:[%s2055_s1 + $0x10] sm:$0xff]   ;;  %vm1799_vm0 = vmmov 0   ;;  %s2070_s25 = smov (!%p244_p4, %s1497_s25), 3 }
   0xd   : > { %1632 = vmatprep.subr.bf16.mxu0 %v1798_v1  ;;  %1640 = vmatprep.subr.bf16.mxu1 %v1798_v1  ;;  %v1735_v5 = vld [vmem:[%s2055_s1] sm:$0xff]   ;;  %v1800_v6 = vmov 1983009808   ;;  %s1704_s28 = smul.u32 40, %s2070_s25  ;;  %vm320_vm1 = vcmask 261120   ;;  %v1740_v13 = vld [vmem:[%s2055_s1 + $0x28] sm:$0xff]  }
   0xe   : > { %1633 = vmatpush3.bf16.msra.mxu0 %v1732_v0  ;;  %1636 = vmatprep.mubr.msk.bf16.mxu0 %vm1799_vm0, %v1798_v1  ;;  %v294_v7 = vunpack.c.l.s4 %v1800_v6  ;;  %v297_v8 = vshrl.u32 %v296_v3, 7  ;;  %vm482_vm2 = vsmask.f32 1280  ;;  %vm483_vm3 = vsmask.f32 3336  ;;  %v1741_v16 = vld [vmem:[%s2055_s1 + $0x38] sm:$0xff]  }
   0xf   : > { %1641 = vmatpush3.bf16.msra.mxu1 %v1733_v2  ;;  %1634 = vmatprep.subr.bf16.mxu0 %v1798_v1  ;;  %s1872_s5 = scalar_lea.vmem %s2054_s0, %s1704_s28  ;;  %vm485_vm4 = vsmask.f32 5392  ;;  %vm487_vm5 = vsmask.f32 7448  ;;  %vm1888_vm6 = vmor %vm482_vm2, %vm483_vm3  ;;  %v1742_v31 = vld [vmem:[%s2055_s1 + $0x20] sm:$0xff]   ;;  %v1743_v41 = vld [vmem:[%s2055_s1 + $0x30] sm:$0xff]  }
  0x10   : > { %1642 = vmatprep.subr.bf16.mxu1 %v1798_v1  ;;  %1644 = vmatprep.mubr.msk.bf16.mxu1 %vm1799_vm0, %v1798_v1  ;;  %v295_v9 = vunpack.c.0.s8 %v294_v7  ;;  %v1762_v11 = vld.sshfl [vmem:[%s1872_s5 + $0x14] sm:$0xf pattern:$0x76325410]  ;;  %vm1903_vm7 = vmor %vm1888_vm6, %vm485_vm4  ;;  %s2072_s15 = smov (!%p260_p5, %s1788_s15), 1  ;;  %vm1367_vm10 = vcmask 254976  }
  0x11   : > { %v1763_v12 = vld.sshfl [vmem:[%s1872_s5 + $0x1c] sm:$0xf pattern:$0x76325410]  ;;  %vm1919_vm8 = vmor %vm1903_vm7, %vm487_vm5  ;;  %s1604_s20 = sshll.u32 %s2072_s15, 3 }
  0x12   : > { %1635 = vmatpush3.bf16.msra.mxu0 %v1734_v4  ;;  %v1874_v10 = vsub.s32 %v295_v9, %v297_v8  ;;  %v1764_v14 = vld.sshfl [vmem:[%s1872_s5] sm:$0xf pattern:$0x76325410]  ;;  %v307_v18 = vcombine.low %v1762_v11, %v1763_v12  ;;  %v1747_v2 = vld [vmem:[%s2055_s1 + $0x58] sm:$0xff]   ;;  %v1749_v8 = vld [vmem:[%s2055_s1 + $0x50] sm:$0xff]   ;;  %s267_s23 = scalar_lea.vmem %s2058_s4, %s1604_s20 }
  0x13   : > { %1643 = vmatpush3.bf16.msra.mxu1 %v1735_v5  ;;  %1648 = vmatprep.subr.bf16.mxu0 %v1798_v1  ;;  %v1765_v15 = vld.sshfl [vmem:[%s1872_s5 + $0x8] sm:$0xf pattern:$0x76325410] }
  0x14   : > { %1656 = vmatprep.subr.bf16.mxu1 %v1798_v1  ;;  %v1515_v17 = vld.sshfl [vmem:[%s1872_s5] sm:$0x13 pattern:$0x76325410]  ;;  %v385_v26 = vcombine.low %v1764_v14, %v1765_v15 }
  0x15   : > { %v1516_v19 = vld.sshfl [vmem:[%s1872_s5 + $0x4] sm:$0x13 pattern:$0x76325410]  ;;  %v457_v20 = vcombine.high %v1515_v17, %v1515_v17  ;;  %v490_v24 = vshrl.u32 %v1515_v17, 16  ;;  %v493_v25 = vshll.u32 %v1515_v17, 16  ;;  %1637 = vmatmul.mubr.msk.bf16.vlgmr.msra.gmra.mxu0 %vm320_vm1, %v307_v18 }
  0x16   : > { %v1517_v22 = vld.sshfl [vmem:[%s1872_s5 + $0x8] sm:$0x13 pattern:$0x76325410]  ;;  %v465_v23 = vcombine.high %v1516_v19, %v1516_v19  ;;  %v504_v30 = vshrl.u32 %v1516_v19, 16  ;;  %1649 = vmatpush3.bf16.msra.mxu0 %v1740_v13  ;;  %1652 = vmatprep.mubr.msk.bf16.mxu0 %vm1799_vm0, %v1798_v1  ;;  %v507_v36 = vshll.u32 %v1516_v19, 16 }
  0x17   : > { %v1518_v27 = vld.sshfl [vmem:[%s1872_s5 + $0xc] sm:$0x13 pattern:$0x76325410]  ;;  %v473_v28 = vcombine.high %v1517_v22, %v1517_v22  ;;  %v499_v29 = vshll.u32 %v457_v20, 16  ;;  %v492_v34 = vrot.slane %v490_v24, 6  ;;  %1645 = vmatmul.mubr.msk.bf16.vlgmr.msra.gmra.mxu1 %vm320_vm1, %v385_v26  ;;  %1650 = vmatprep.subr.bf16.mxu0 %v1798_v1 }
  0x18   : > { %v481_v32 = vcombine.high %v1518_v27, %v1518_v27  ;;  %v495_v35 = vrot.slane %v493_v25, 7  ;;  %v506_v38 = vrot.slane %v504_v30, 6  ;;  %v513_v39 = vshll.u32 %v465_v23, 16  ;;  %1657 = vmatpush3.bf16.msra.mxu1 %v1741_v16  ;;  %1660 = vmatprep.mubr.msk.bf16.mxu1 %vm1799_vm0, %v1798_v1  ;;  %v1746_v20 = vld [vmem:[%s2055_s1 + $0x48] sm:$0xff]  }
  0x19   : > { %v501_v37 = vrot.slane %v499_v29, 7  ;;  %v518_v40 = vshrl.u32 %v1517_v22, 16  ;;  %v509_v43 = vrot.slane %v507_v36, 7  ;;  %v521_v44 = vshll.u32 %v1517_v22, 16  ;;  %1658 = vmatprep.subr.bf16.mxu1 %v1798_v1 }
  0x1a   : > { %v496_v42 = vor.u32 %v495_v35, %v492_v34  ;;  %v527_v45 = vshll.u32 %v473_v28, 16  ;;  %v1766_v46 = vld.sshfl [vmem:[%s1872_s5 + $0x28] sm:$0xf pattern:$0x76325410]  ;;  %v515_v48 = vrot.slane %v513_v39, 7  ;;  %1651 = vmatpush3.bf16.msra.mxu0 %v1742_v31 }
  0x1b   : > { %v520_v49 = vrot.slane %v518_v40, 6  ;;  %v532_v50 = vshrl.u32 %v1518_v27, 16  ;;  %v535_v51 = vshll.u32 %v1518_v27, 16  ;;  %v510_v54 = vor.u32 %v509_v43, %v506_v38  ;;  %1664 = vmatprep.subr.bf16.mxu0 %v1798_v1 }
  0x1c   : > { %v1767_v52 = vld.sshfl [vmem:[%s1872_s5 + $0x30] sm:$0xf pattern:$0x76325410]  ;;  %v497_v53 = vrot.slane %v496_v42, 2  ;;  %v523_v55 = vrot.slane %v521_v44, 7  ;;  %1659 = vmatpush3.bf16.msra.mxu1 %v1743_v41 }
  0x1d   : > { %v529_v56 = vrot.slane %v527_v45, 7  ;;  %v534_v57 = vrot.slane %v532_v50, 6  ;;  %v537_v58 = vrot.slane %v535_v51, 7  ;;  %v541_v59 = vshll.u32 %v481_v32, 16  ;;  %1672 = vmatprep.subr.bf16.mxu1 %v1798_v1 }
  0x1e   : > { %v502_v60 = vsel %vm1919_vm8, %v497_v53, %v501_v37  ;;  %v511_v61 = vrot.slane %v510_v54, 2  ;;  %v524_v62 = vor.u32 %v523_v55, %v520_v49  ;;  %v655_v5 = vcombine.low %v1766_v46, %v1767_v52  ;;  %v1945_v11 = vld.sshfl [vmem:[%s1872_s5 + $0x3c] sm:$0xf pattern:$0x76325410] }
  0x1f   : > { %v538_v63 = vor.u32 %v537_v58, %v534_v57  ;;  %v543_v0 = vrot.slane %v541_v59, 7  ;;  %v1954_v13 = vld.sshfl [vmem:[%s1872_s5 + $0x44] sm:$0xf pattern:$0x76325410] }
  0x20   : > { %v1933_v3 = vsel %vm1919_vm8, %v511_v61, %v515_v48  ;;  %v525_v4 = vrot.slane %v524_v62, 2  ;;  %1661 = vmatmul.mubr.msk.bf16.vlgmr.msra.gmra.mxu1 %vm320_vm1, %v655_v5  ;;  %v1552_v14 = vld.sshfl [vmem:[%s1872_s5 + $0x28] sm:$0x13 pattern:$0x76325410]  ;;  %v1748_v37 = vld [vmem:[%s2055_s1 + $0x40] sm:$0xff]   ;;  %v744_v55 = vcombine.low %v1945_v11, %v1954_v13 }
  0x21   : > { %v539_v6 = vrot.slane %v538_v63, 2  ;;  %v550_v7 = vcombine.low %v502_v60, %v1933_v3  ;;  %1673 = vmatpush3.bf16.msra.mxu1 %v1747_v2  ;;  %1676 = vmatprep.mubr.msk.bf16.mxu1 %vm1799_vm0, %v1798_v1  ;;  %v1553_v17 = vld.sshfl [vmem:[%s1872_s5 + $0x2c] sm:$0x13 pattern:$0x76325410]  ;;  %v818_v18 = vcombine.high %v1552_v14, %v1552_v14  ;;  %v844_v19 = vshrl.u32 %v1552_v14, 16 }
  0x22   : > { %v1941_v9 = vsel %vm1919_vm8, %v525_v4, %v529_v56  ;;  %1674 = vmatprep.subr.bf16.mxu1 %v1798_v1  ;;  %v1554_v21 = vld.sshfl [vmem:[%s1872_s5 + $0x30] sm:$0x13 pattern:$0x76325410]  ;;  %v826_v22 = vcombine.high %v1553_v17, %v1553_v17  ;;  %v847_v23 = vshll.u32 %v1552_v14, 16  ;;  %v858_v24 = vshrl.u32 %v1553_v17, 16 }
  0x23   : > { %v1949_v12 = vsel %vm1919_vm8, %v539_v6, %v543_v0  ;;  %v558_v16 = vrot.slane %v550_v7, %v1874_v10  ;;  %v1555_v26 = vld.sshfl [vmem:[%s1872_s5 + $0x34] sm:$0x13 pattern:$0x76325410]  ;;  %v834_v27 = vcombine.high %v1554_v21, %v1554_v21  ;;  %v846_v28 = vrot.slane %v844_v19, 6  ;;  %v1752_v62 = vld [vmem:[%s2055_s1 + $0x68] sm:$0xff]  }
  0x24   : > { %v551_v15 = vcombine.low %v1941_v9, %v1949_v12  ;;  %v853_v29 = vshll.u32 %v818_v18, 16  ;;  %v842_v30 = vcombine.high %v1555_v26, %v1555_v26  ;;  %v849_v31 = vrot.slane %v847_v23, 7  ;;  %v1770_v63 = vld.sshfl [vmem:[%s1872_s5 + $0x4] sm:$0xf pattern:$0x76325410] }
  0x25   : > { %1675 = vmatpush3.bf16.msra.mxu1 %v1749_v8  ;;  %v860_v32 = vrot.slane %v858_v24, 6  ;;  %v861_v35 = vshll.u32 %v1553_v17, 16  ;;  %v867_v36 = vshll.u32 %v826_v22, 16  ;;  %v872_v39 = vshrl.u32 %v1554_v21, 16  ;;  %v1754_v13 = vld [vmem:[%s2055_s1 + $0x60] sm:$0xff]  }
  0x26   : > { %v565_v25 = vrot.slane %v551_v15, %v1874_v10  ;;  %v855_v34 = vrot.slane %v853_v29, 7  ;;  %1688 = vmatprep.subr.bf16.mxu1 %v1798_v1  ;;  %v850_v38 = vor.u32 %v849_v31, %v846_v28  ;;  %v875_v40 = vshll.u32 %v1554_v21, 16  ;;  %v1771_v0 = vld.sshfl [vmem:[%s1872_s5 + $0xc] sm:$0xf pattern:$0x76325410] }
  0x27   : > { %v881_v41 = vshll.u32 %v834_v27, 16  ;;  %v863_v42 = vrot.slane %v861_v35, 7  ;;  %v869_v43 = vrot.slane %v867_v36, 7  ;;  %v886_v44 = vshrl.u32 %v1555_v26, 16  ;;  %v1753_v21 = vld [vmem:[%s2055_s1 + $0x78] sm:$0xff]   ;;  %v1760_v27 = vld [vmem:[%s2055_s1 + $0x88] sm:$0xff]  }
  0x28   : > { %v566_v33 = vcombine.low %v558_v16, %v565_v25  ;;  %v889_v45 = vshll.u32 %v1555_v26, 16  ;;  %v851_v46 = vrot.slane %v850_v38, 2  ;;  %v874_v48 = vrot.slane %v872_v39, 6 }
  0x29   : > { %v877_v49 = vrot.slane %v875_v40, 7  ;;  %v883_v50 = vrot.slane %v881_v41, 7  ;;  %v864_v51 = vor.u32 %v863_v42, %v860_v32  ;;  %v888_v52 = vrot.slane %v886_v44, 6 }
  0x2a   : > { %1653 = vmatmul.mubr.msk.bf16.vlgmr.msra.gmra.mxu0 %vm320_vm1, %v566_v33  ;;  %v891_v53 = vrot.slane %v889_v45, 7  ;;  %v895_v54 = vshll.u32 %v842_v30, 16  ;;  %v856_v57 = vsel %vm1919_vm8, %v851_v46, %v855_v34  ;;  %v1592_v14 = vld.sshfl [vmem:[%s1872_s5 + $0x10] sm:$0x13 pattern:$0x76325410]  ;;  %v1009_v22 = vcombine.low %v1770_v63, %v1771_v0 }
  0x2b   : > { %1665 = vmatpush3.bf16.msra.mxu0 %v1746_v20  ;;  %1668 = vmatprep.mubr.msk.bf16.mxu0 %vm1799_vm0, %v1798_v1  ;;  %v878_v56 = vor.u32 %v877_v49, %v874_v48  ;;  %v865_v58 = vrot.slane %v864_v51, 2  ;;  %v1772_v16 = vld.sshfl [vmem:[%s1872_s5 + $0x18] sm:$0xf pattern:$0x76325410]  ;;  %v1196_v18 = vcombine.high %v1592_v14, %v1592_v14  ;;  %v1240_v19 = vshrl.u32 %v1592_v14, 16 }
  0x2c   : > { %1666 = vmatprep.subr.bf16.mxu0 %v1798_v1  ;;  %v892_v59 = vor.u32 %v891_v53, %v888_v52  ;;  %v897_v60 = vrot.slane %v895_v54, 7  ;;  %v1773_v17 = vld.sshfl [vmem:[%s1872_s5 + $0x20] sm:$0xf pattern:$0x76325410]  ;;  %v1243_v20 = vshll.u32 %v1592_v14, 16  ;;  %v1258_v31 = vcombine.low %v1933_v3, %v1941_v9 }
  0x2d   : > { %v879_v61 = vrot.slane %v878_v56, 2  ;;  %v870_v2 = vsel %vm1919_vm8, %v865_v58, %v869_v43  ;;  %v1242_v24 = vrot.slane %v1240_v19, 6  ;;  %v1249_v26 = vshll.u32 %v1196_v18, 16  ;;  %v1755_v30 = vld [vmem:[%s2055_s1 + $0x70] sm:$0xff]   ;;  %v1761_v33 = vld [vmem:[%s2055_s1 + $0x80] sm:$0xff]  }
  0x2e   : > { %v893_v4 = vrot.slane %v892_v59, 2  ;;  %v904_v6 = vcombine.low %v856_v57, %v870_v2  ;;  %v1245_v25 = vrot.slane %v1243_v20, 7  ;;  %v1098_v34 = vcombine.low %v1772_v16, %v1773_v17  ;;  %v1600_v20 = vld [vmem:[%s2056_s2] ss:$0 sm:$0xff] }
  0x2f   : > { %1667 = vmatpush3.bf16.msra.mxu0 %v1748_v37  ;;  %v884_v5 = vsel %vm1919_vm8, %v879_v61, %v883_v50  ;;  %v1251_v29 = vrot.slane %v1249_v26, 7  ;;  %v1266_v9 = vrot.slane %v1258_v31, %v1874_v10 }
  0x30   : > { %1680 = vmatprep.subr.bf16.mxu0 %v1798_v1  ;;  %v898_v7 = vsel %vm1919_vm8, %v893_v4, %v897_v60  ;;  %v912_v11 = vrot.slane %v904_v6, %v1874_v10  ;;  %v1246_v28 = vor.u32 %v1245_v25, %v1242_v24 }
  0x31   : > { %v905_v8 = vcombine.low %v884_v5, %v898_v7 }
  0x32   : > { %1669 = vmatmul.mubr.msk.bf16.vlgmr.msra.gmra.mxu0 %vm320_vm1, %v744_v55  ;;  %v1247_v32 = vrot.slane %v1246_v28, 2 }
  0x33   : > { %1681 = vmatpush3.bf16.msra.mxu0 %v1752_v62  ;;  %1684 = vmatprep.mubr.msk.bf16.mxu0 %vm1799_vm0, %v1798_v1  ;;  %v919_v15 = vrot.slane %v905_v8, %v1874_v10 }
  0x34   : > { %1682 = vmatprep.subr.bf16.mxu0 %v1798_v1  ;;  %v1252_v35 = vsel %vm1919_vm8, %v1247_v32, %v1251_v29 }
  0x35   : > { %v920_v23 = vcombine.low %v912_v11, %v919_v15  ;;  %v1259_v3 = vcombine.low %v1949_v12, %v1252_v35 }
  0x37   : > { %1683 = vmatpush3.bf16.msra.mxu0 %v1754_v13  ;;  %1677 = vmatmul.mubr.msk.bf16.vlgmr.msra.gmra.mxu1 %vm320_vm1, %v920_v23  ;;  %v1273_v36 = vrot.slane %v1259_v3, %v1874_v10  ;;  %v1601_v23 = vld [vmem:[%s2057_s3] ss:$0 sm:$0xff] }
  0x38   : > { %1696 = vmatprep.subr.bf16.mxu0 %v1798_v1  ;;  %1689 = vmatpush3.bf16.msra.mxu1 %v1753_v21 }
  0x39   : > { %1692 = vmatprep.mubr.msk.bf16.mxu1 %vm1799_vm0, %v1798_v1  ;;  %1690 = vmatprep.subr.bf16.mxu1 %v1798_v1  ;;  %v1274_v37 = vcombine.low %v1266_v9, %v1273_v36 }
  0x3a   : > { %1685 = vmatmul.mubr.msk.bf16.vlgmr.msra.gmra.mxu0 %vm320_vm1, %v1009_v22 }
  0x3b   : > { %1697 = vmatpush3.bf16.msra.mxu0 %v1760_v27  ;;  %1700 = vmatprep.mubr.msk.bf16.mxu0 %vm1799_vm0, %v1798_v1 }
  0x3c   : > { %1698 = vmatprep.subr.bf16.mxu0 %v1798_v1  ;;  %1691 = vmatpush3.bf16.msra.mxu1 %v1755_v30 }
  0x3f   : > { %1699 = vmatpush3.bf16.msra.mxu0 %v1761_v33  ;;  %1693 = vmatmul.mubr.msk.bf16.vlgmr.msra.gmra.mxu1 %vm320_vm1, %v1098_v34 }
  0x42   : > { %1701 = vmatmul.mubr.msk.bf16.vlgmr.msra.gmra.mxu0 %vm320_vm1, %v1274_v37 }
  0xd5   : > { %v358_v38 = vpop.f32.mrf.mxu0 }
  0xd7   : > { %v435_v39 = vpop.f32.mrf.mxu1  ;;  %v1638_v40 = vpop.f32.mrf.mxu0 }
  0xd8   : > { %v436_v51 = vadd.f32 %v435_v39, %v358_v38 }
  0xd9   : > { %v1646_v1 = vpop.f32.mrf.mxu1  ;;  %v361_v41 = vpop.f32.mrf.mxu0 }
  0xdb   : > { %v438_v47 = vpop.f32.mrf.mxu1  ;;  %v1639_v42 = vpop.f32.mrf.mxu0 }
  0xdc   : > { %v439_v55 = vadd.f32 %v438_v47, %v361_v41 }
  0xdd   : > { %v1647_v43 = vpop.f32.mrf.mxu1 }
  0xe0   : > { %v705_v44 = vpop.f32.mrf.mxu1 }
  0xe2   : > { %v1662_v12 = vpop.f32.mrf.mxu1 }
  0xe4   : > { %v708_v45 = vpop.f32.mrf.mxu1 }
  0xe6   : > { %v1663_v46 = vpop.f32.mrf.mxu1 }
  0xea   : > { %v616_v48 = vpop.f32.mrf.mxu0 }
  0xeb   : > { %v623_v53 = vadd.f32 %v616_v48, %v436_v51 }
  0xec   : > { %v1654_v49 = vpop.f32.mrf.mxu0 }
  0xed   : > { %v712_v57 = vadd.f32 %v705_v44, %v623_v53 }
  0xee   : > { %v619_v10 = vpop.f32.mrf.mxu0 }
  0xef   : > { %v624_v58 = vadd.f32 %v619_v10, %v439_v55 }
  0xf0   : > { %v1655_v50 = vpop.f32.mrf.mxu0 }
  0xf1   : > { %v713_v62 = vadd.f32 %v708_v45, %v624_v58 }
  0xf2   : > { %v794_v52 = vpop.f32.mrf.mxu0 }
  0xf3   : > { %v801_v60 = vadd.f32 %v794_v52, %v712_v57 }
  0xf4   : > { %v1670_v54 = vpop.f32.mrf.mxu0 }
  0xf6   : > { %v797_v56 = vpop.f32.mrf.mxu0 }
  0xf7   : > { %v970_v61 = vpop.f32.mrf.mxu1  ;;  %v802_v4 = vadd.f32 %v797_v56, %v713_v62 }
  0xf8   : > { %v1671_v59 = vpop.f32.mrf.mxu0  ;;  %v977_v2 = vadd.f32 %v970_v61, %v801_v60 }
  0xf9   : > { %v1678_v63 = vpop.f32.mrf.mxu1 }
  0xfa   : > { %v1059_v0 = vpop.f32.mrf.mxu0 }
  0xfb   : > { %v973_v5 = vpop.f32.mrf.mxu1  ;;  %v1066_v8 = vadd.f32 %v1059_v0, %v977_v2 }
  0xfc   : > { %v1686_v6 = vpop.f32.mrf.mxu0  ;;  %v978_v13 = vadd.f32 %v973_v5, %v802_v4 }
  0xfd   : > { %v1679_v7 = vpop.f32.mrf.mxu1 }
  0xfe   : > { %v1062_v11 = vpop.f32.mrf.mxu0 }
  0xff   : > { %v1148_v14 = vpop.f32.mrf.mxu1  ;;  %v1067_v18 = vadd.f32 %v1062_v11, %v978_v13 }
 0x100   : > { %v1687_v15 = vpop.f32.mrf.mxu0  ;;  %v1155_v16 = vadd.f32 %v1148_v14, %v1066_v8 }
 0x101   : > { %v1694_v17 = vpop.f32.mrf.mxu1 }
 0x102   : > { %v1324_v19 = vpop.f32.mrf.mxu0 }
 0x103   : > { %v1151_v21 = vpop.f32.mrf.mxu1  ;;  %v1331_v22 = vadd.f32 %v1324_v19, %v1155_v16 }
 0x104   : > { %v1702_v24 = vpop.f32.mrf.mxu0  ;;  %v1156_v25 = vadd.f32 %v1151_v21, %v1067_v18 }
 0x105   : > { %v1695_v26 = vpop.f32.mrf.mxu1  ;;  %v1340_v27 = vmul.f32 %v1600_v20, %v1331_v22 }
 0x106   : > { %v1327_v28 = vpop.f32.mrf.mxu0 }
 0x107   : > { %v1349_v29 = vadd.f32 %v1601_v23, %v1340_v27  ;;  %v1332_v30 = vadd.f32 %v1327_v28, %v1156_v25 }
 0x108   : > { %v1703_v31 = vpop.f32.mrf.mxu0 }
 0x109   : > { %vm1351_vm9 = vcmp.ge.f32.partialorder %v1349_v29, 0.0  ;;  %v1353_v32 = vmul.f32 0.2, %v1349_v29  ;;  %v1341_v33 = vmul.f32 %v1600_v20, %v1332_v30 }
 0x10b   : > { %v1355_v34 = vsel %vm1351_vm9, %v1349_v29, %v1353_v32  ;;  %v1350_v35 = vadd.f32 %v1601_v23, %v1341_v33 }
 0x10c   : > { %v1359_v3 = vcombine.high %v1355_v34, %v1355_v34  ;;  %v1363_v9 = vpack.c.bf16 %v1355_v34, %v1355_v34 }
 0x10d   : > { %vm1352_vm11 = vcmp.ge.f32.partialorder %v1350_v35, 0.0  ;;  %v1354_v36 = vmul.f32 0.2, %v1350_v35 }
 0x10e   : > { %v1364_v37 = vpack.c.bf16 %v1359_v3, %v1359_v3  ;;  %1368 = vst.msk [vmem:[%s267_s23] sm:$0x3] %vm1367_vm10, %v1363_v9 }
 0x10f   : > { %v1356_v38 = vsel %vm1352_vm11, %v1350_v35, %v1354_v36 }
 0x110   : > { %1369 = vst.msk [vmem:[%s267_s23 + $0x2] sm:$0x3] %vm1367_vm10, %v1364_v37  ;;  %v1360_v39 = vcombine.high %v1356_v38, %v1356_v38  ;;  %v1365_v40 = vpack.c.bf16 %v1356_v38, %v1356_v38 }
 0x112   : > { %v1366_v1 = vpack.c.bf16 %v1360_v39, %v1360_v39  ;;  %1370 = vst.msk [vmem:[%s267_s23 + $0x4] sm:$0x3] %vm1367_vm10, %v1365_v40 }
 0x114   : > { %1371 = vst.msk [vmem:[%s267_s23 + $0x6] sm:$0x3] %vm1367_vm10, %v1366_v1 }
 0x115 PF: > { %s14_s17 = sadd.s32 1, %s1796_s17   ;;  %s2065_s15 = smov %s1792_s16 }
 0x116   : > { %p11_p6 = scmp.ge.s32.totalorder %s14_s17, 4   ;;  %s2066_s16 = smov %s2068_s18 }
 0x118   :  { %13 = sbr.rel (!%p11_p6) target bundleno = 2 (0x2), region = 88 }

// kernel: discriminator_forward.9
= control target key start
LH: loop header
LB: loop body
LE: loop exit
PB: predicated region body
PF: predicated region fallthrough
CT: control target
= control target key end

     0   :  { %s6484_s15 = smov 0   ;;  %s6486_s16 = smov 0   ;;  %s9235_s0 = inlined_call_operand.vmem [shape: bf16[2,18,18,3], index: 0, kind: input, shape index: {}]   ;;  %s9236_s1 = inlined_call_operand.vmem [shape: bf16[3,3,3,16], index: 1, kind: input, shape index: {}]   ;;  %s9237_s2 = inlined_call_operand.vmem [shape: f32[1,16], index: 2, kind: input, shape index: {}]   ;;  %s9238_s3 = inlined_call_operand.vmem [shape: f32[1,16], index: 3, kind: input, shape index: {}]   ;;  %s9239_s4 = inlined_call_operand.vmem [shape: bf16[2,16,16,16], index: 4, kind: output, shape index: {}]  }
   0x1   :  { %s6488_s17 = smov 0  }
   0x2 LB: > { %s26_s18 = sadd.s32 1, %s6452_s16  ;;  %p5285_p0 = scmp.ge.s32.totalorder %s6456_s17, 1  ;;  %s6456_s17 = sphi %s6488_s17, %s14_s17   ;;  %s6452_s16 = sphi %s6486_s16, %s9483_s16   ;;  %s6448_s15 = sphi %s6484_s15, %s9482_s15  }
   0x3   : > { %p28_p1 = scmp.ge.s32.totalorder %s26_s18, 2  ;;  %p201_p2 = scmp.lt.s32.totalorder %s6456_s17, 3 }
   0x5   : > { %s9485_s18 = smov (%p28_p1, %s26_s18), 0  ;;  %p202_p3 = pnand %p5285_p0, %p201_p2 }
   0x7   : > { %205 = sbr.rel (%p202_p3) target bundleno = 567 (0x237), region = 36 }
   0xc   : > { %v5289_v0 = vld [vmem:[%s9236_s1 + $0x2] sm:$0x3]  ;;  %vm799_vm0 = vcmask 1040384   ;;  %vm800_vm1 = vcmask 1041408   ;;  %p240_p4 = scmp.lt.s32.totalorder %s6448_s15, 1  ;;  %v6458_v1 = vmov 65535  }
   0xd   : > { %v801_v2 = vsel %vm799_vm0, 4294967295, %v6458_v1  ;;  %v296_v4 = vld [vmem:[%s9236_s1] sm:$0x3]  ;;  %v5370_v5 = vld [vmem:[%s9236_s1 + $0x4] sm:$0x3]  ;;  %vm750_vm4 = vcmask 23552  }
   0xe   : > { %v6505_v3 = vsel %vm800_vm1, %v801_v2, 0  ;;  %s9487_s15 = smov (!%p240_p4, %s6448_s15), 1  ;;  %vm313_vm2 = vsmask.f32 3328  ;;  %vm314_vm3 = vsmask.f32 7440 }
   0xf   : > { %9269 = vst [vmem:[#allocation2_spill] sm:$0xff] %v6505_v3  ;;  %v804_v6 = vand.u32 %v5289_v0, %v6505_v3  ;;  %v6517_v7 = vand.u32 %v6505_v3, %v296_v4  ;;  %v6520_v8 = vand.u32 %v5370_v5, %v6505_v3  ;;  %s6355_s25 = smul.u32 216, %s9487_s15  ;;  %v5435_v9 = vld [vmem:[%s9236_s1 + $0x6] sm:$0x3]  ;;  %v5516_v10 = vld [vmem:[%s9236_s1 + $0x8] sm:$0x3]  ;;  %vm6578_vm5 = vmor %vm313_vm2, %vm314_vm3 }
  0x10   : > { %v6560_v22 = vand.u32 %v5435_v9, %v6505_v3  ;;  %v6563_v23 = vand.u32 %v5516_v10, %v6505_v3  ;;  %vm1307_vm6 = vcmask 1042432   ;;  %vm1308_vm7 = vcmask 1046532   ;;  %s5861_s23 = sshll.u32 %s9487_s15, 7 }
  0x11   : > { %6353 = vmatprep.subr.bf16.mxu1 %v804_v6  ;;  %6047 = vmatprep.subr.bf16.mxu0 %v804_v6  ;;  %s6526_s28 = scalar_lea.vmem %s9235_s0, %s6355_s25  ;;  %vm6844_vm8 = vmor %vm1307_vm6, %vm1308_vm7  ;;  %vm5128_vm9 = vcmask 125952   ;;  %s9054_s25 = scalar_lea.vmem %s9239_s4, %s5861_s23 }
  0x12   : > { %6354 = vmatpush3.bf16.msra.mxu1 %v804_v6  ;;  %6048 = vmatpush3.bf16.msra.mxu0 %v804_v6  ;;  %v6535_v11 = vld [vmem:[%s6526_s28] sm:$0xf]  ;;  %v6538_v12 = vld [vmem:[%s6526_s28 + $0x4] sm:$0xf]  ;;  %v6541_v13 = vld [vmem:[%s6526_s28 + $0x8] sm:$0x1] }
  0x13   : > { %6081 = vmatprep.subr.bf16.mxu1 %v6517_v7  ;;  %6115 = vmatprep.subr.bf16.mxu0 %v6520_v8  ;;  %v317_v14 = vshrl.u32 %v6535_v11, 16  ;;  %v320_v15 = vshll.u32 %v6535_v11, 16  ;;  %v326_v16 = vshll.u32 %v6538_v12, 16  ;;  %v330_v17 = vshrl.u32 %v6538_v12, 16  ;;  %v6550_v18 = vld [vmem:[%s6526_s28 + $0x60] sm:$0xf] }
  0x14   : > { %v336_v19 = vshll.u32 %v6541_v13, 16  ;;  %v6554_v20 = vld [vmem:[%s6526_s28 + $0x64] sm:$0xf]  ;;  %v6557_v21 = vld [vmem:[%s6526_s28 + $0x68] sm:$0x1]  ;;  %v509_v29 = vshrl.u32 %v6550_v18, 16 }
  0x15   : > { %v319_v24 = vrot.slane %v317_v14, 4  ;;  %v322_v25 = vrot.slane %v320_v15, 5  ;;  %v328_v26 = vrot.slane %v326_v16, 5  ;;  %v332_v27 = vrot.slane %v330_v17, 4  ;;  %v6571_v36 = vld [vmem:[%s6526_s28 + $0xc] sm:$0xf] }
  0x16   : > { %v338_v28 = vrot.slane %v336_v19, 5  ;;  %v512_v30 = vshll.u32 %v6550_v18, 16  ;;  %v518_v31 = vshll.u32 %v6554_v20, 16  ;;  %v522_v34 = vshrl.u32 %v6554_v20, 16  ;;  %v6574_v37 = vld [vmem:[%s6526_s28 + $0x10] sm:$0xf] }
  0x17   : > { %v323_v32 = vor.u32 %v322_v25, %v319_v24  ;;  %v333_v33 = vor.u32 %v332_v27, %v328_v26  ;;  %v528_v35 = vshll.u32 %v6557_v21, 16  ;;  %v511_v40 = vrot.slane %v509_v29, 4  ;;  %v6584_v48 = vld [vmem:[%s6526_s28 + $0x14] sm:$0x1]  ;;  %v282_v60 = vld [vmem:[%s6526_s28 + $0x6c] sm:$0xf] }
  0x18   : > { %v514_v41 = vrot.slane %v512_v30, 5  ;;  %v520_v42 = vrot.slane %v518_v31, 5  ;;  %v524_v45 = vrot.slane %v522_v34, 4  ;;  %v341_v49 = vshrl.u32 %v6571_v36, 16  ;;  %v6597_v1 = vld [vmem:[%s6526_s28 + $0x70] sm:$0xf] }
  0x19   : > { %v324_v43 = vrot.slane %v323_v32, 4  ;;  %v334_v44 = vrot.slane %v333_v33, 4  ;;  %v530_v46 = vrot.slane %v528_v35, 5  ;;  %v344_v50 = vshll.u32 %v6571_v36, 16  ;;  %v6605_v9 = vld [vmem:[%s6526_s28 + $0x74] sm:$0x1] }
  0x1a   : > { %v515_v47 = vor.u32 %v514_v41, %v511_v40  ;;  %v350_v51 = vshll.u32 %v6574_v37, 16  ;;  %v525_v54 = vor.u32 %v524_v45, %v520_v42  ;;  %v354_v55 = vshrl.u32 %v6574_v37, 16  ;;  %v6610_v17 = vld [vmem:[%s6526_s28 + $0x18] sm:$0xf]  ;;  %v6616_v31 = vld [vmem:[%s6526_s28 + $0x1c] sm:$0xf] }
  0x1b   : > { %v329_v52 = vsel %vm6578_vm5, %v324_v43, %v328_v26  ;;  %v339_v53 = vsel %vm6578_vm5, %v334_v44, %v338_v28  ;;  %v343_v58 = vrot.slane %v341_v49, 4  ;;  %v346_v59 = vrot.slane %v344_v50, 5  ;;  %v6622_v35 = vld [vmem:[%s6526_s28 + $0x20] sm:$0x1]  ;;  %v284_v45 = vld [vmem:[%s6526_s28 + $0x78] sm:$0xf] }
  0x1c   : > { %v5290_v56 = vcombine.low %v329_v52, %v339_v53  ;;  %v516_v57 = vrot.slane %v515_v47, 4  ;;  %v526_v61 = vrot.slane %v525_v54, 4  ;;  %v352_v62 = vrot.slane %v350_v51, 5 }
  0x1d   : > { %v356_v63 = vrot.slane %v354_v55, 4  ;;  %v360_v0 = vshll.u32 %v6584_v48, 16  ;;  %v347_v4 = vor.u32 %v346_v59, %v343_v58  ;;  %v533_v16 = vshrl.u32 %v282_v60, 16  ;;  %v6633_v55 = vld [vmem:[%s6526_s28 + $0x7c] sm:$0xf] }
  0x1e   : > { %6049 = vmatprep.mubr.msk.bf16.mxu0 %vm750_vm4, %v5290_v56  ;;  %v521_v2 = vsel %vm6578_vm5, %v516_v57, %v520_v42  ;;  %v531_v10 = vsel %vm6578_vm5, %v526_v61, %v530_v46  ;;  %v536_v25 = vshll.u32 %v282_v60, 16  ;;  %v542_v26 = vshll.u32 %v6597_v1, 16  ;;  %9272 = vst [vmem:[#allocation3_spill] sm:$0xff] %v6633_v55 }
  0x1f   : > { %v357_v14 = vor.u32 %v356_v63, %v352_v62  ;;  %v362_v15 = vrot.slane %v360_v0, 5  ;;  %v5298_v19 = vcombine.low %v521_v2, %v531_v10  ;;  %v348_v24 = vrot.slane %v347_v4, 4  ;;  %v6638_v0 = vld [vmem:[%s6526_s28 + $0x80] sm:$0x1] }
  0x20   : > { %v535_v28 = vrot.slane %v533_v16, 4  ;;  %v546_v29 = vshrl.u32 %v6597_v1, 16  ;;  %v552_v30 = vshll.u32 %v6605_v9, 16  ;;  %v538_v33 = vrot.slane %v536_v25, 5  ;;  %9273 = vst [vmem:[#allocation4_spill] sm:$0xff] %v6638_v0 }
  0x21   : > { %v358_v27 = vrot.slane %v357_v14, 4  ;;  %6065 = vmatprep.mubr.msk.bf16.mxu1 %vm750_vm4, %v5298_v19  ;;  %v353_v32 = vsel %vm6578_vm5, %v348_v24, %v352_v62  ;;  %v544_v34 = vrot.slane %v542_v26, 5  ;;  %v365_v40 = vshrl.u32 %v6610_v17, 16  ;;  %v6651_v25 = vld [vmem:[%s6526_s28 + $0x28] sm:$0xf] }
  0x22   : > { %v548_v42 = vrot.slane %v546_v29, 4  ;;  %v554_v43 = vrot.slane %v552_v30, 5  ;;  %v368_v44 = vshll.u32 %v6610_v17, 16  ;;  %v539_v47 = vor.u32 %v538_v33, %v535_v28 }
  0x23   : > { %v363_v41 = vsel %vm6578_vm5, %v358_v27, %v362_v15  ;;  %v367_v49 = vrot.slane %v365_v40, 4  ;;  %v374_v50 = vshll.u32 %v6616_v31, 16  ;;  %v378_v53 = vshrl.u32 %v6616_v31, 16  ;;  %v6644_v15 = vld [vmem:[%s6526_s28 + $0x24] sm:$0xf] }
  0x24   : > { %v5291_v46 = vcombine.low %v353_v32, %v363_v41  ;;  %v549_v51 = vor.u32 %v548_v42, %v544_v34  ;;  %v370_v52 = vrot.slane %v368_v44, 5  ;;  %v384_v54 = vshll.u32 %v6622_v35, 16 }
  0x25   : > { %v540_v56 = vrot.slane %v539_v47, 4  ;;  %v376_v57 = vrot.slane %v374_v50, 5  ;;  %v557_v58 = vshrl.u32 %v284_v45, 16  ;;  %v560_v59 = vshll.u32 %v284_v45, 16  ;;  %v6664_v45 = vld [vmem:[%s6526_s28 + $0x84] sm:$0xf] }
  0x26   : > { %6050 = vmatmul.mubr.msk.bf16.vlgmr.msra.gmra.mxu0 %vm750_vm4, %v5291_v46  ;;  %v550_v60 = vrot.slane %v549_v51, 4  ;;  %v371_v61 = vor.u32 %v370_v52, %v367_v49  ;;  %v380_v62 = vrot.slane %v378_v53, 4  ;;  %v386_v63 = vrot.slane %v384_v54, 5  ;;  %v6671_v51 = vld [vmem:[%s6526_s28 + $0x88] sm:$0xf] }
  0x27   : > { %6116 = vmatpush3.bf16.msra.mxu0 %v6520_v8  ;;  %v545_v2 = vsel %vm6578_vm5, %v540_v56, %v544_v34  ;;  %v559_v4 = vrot.slane %v557_v58, 4  ;;  %v562_v10 = vrot.slane %v560_v59, 5  ;;  %v566_v14 = vshll.u32 %v6633_v55, 16  ;;  %v6657_v34 = vld [vmem:[%s6526_s28 + $0x2c] sm:$0x1] }
  0x28   : > { %6183 = vmatprep.subr.bf16.mxu0 %v6563_v23  ;;  %v555_v8 = vsel %vm6578_vm5, %v550_v60, %v554_v43  ;;  %v372_v16 = vrot.slane %v371_v61, 4  ;;  %v381_v19 = vor.u32 %v380_v62, %v376_v57  ;;  %v570_v24 = vshrl.u32 %v6633_v55, 16  ;;  %v6678_v59 = vld [vmem:[%s6526_s28 + $0x8c] sm:$0x1] }
  0x29   : > { %v5299_v26 = vcombine.low %v545_v2, %v555_v8  ;;  %v563_v27 = vor.u32 %v562_v10, %v559_v4  ;;  %v568_v28 = vrot.slane %v566_v14, 5  ;;  %v576_v29 = vshll.u32 %v6638_v0, 16  ;;  %v6686_v4 = vld [vmem:[%s6526_s28 + $0x30] sm:$0xf] }
  0x2a   : > { %v377_v30 = vsel %vm6578_vm5, %v372_v16, %v376_v57  ;;  %v382_v32 = vrot.slane %v381_v19, 4  ;;  %v572_v33 = vrot.slane %v570_v24, 4  ;;  %v389_v40 = vshrl.u32 %v6644_v15, 16  ;;  %v6691_v19 = vld [vmem:[%s6526_s28 + $0x34] sm:$0xf] }
  0x2b   : > { %6066 = vmatmul.mubr.msk.bf16.vlgmr.msra.gmra.mxu1 %vm750_vm4, %v5299_v26  ;;  %v564_v41 = vrot.slane %v563_v27, 4  ;;  %v578_v42 = vrot.slane %v576_v29, 5  ;;  %v392_v43 = vshll.u32 %v6644_v15, 16  ;;  %v398_v44 = vshll.u32 %v6651_v25, 16 }
  0x2c   : > { %6082 = vmatpush3.bf16.msra.mxu1 %v6517_v7  ;;  %v387_v46 = vsel %vm6578_vm5, %v382_v32, %v386_v63  ;;  %v573_v47 = vor.u32 %v572_v33, %v568_v28  ;;  %v391_v49 = vrot.slane %v389_v40, 4  ;;  %v402_v50 = vshrl.u32 %v6651_v25, 16 }
  0x2d   : > { %v5292_v52 = vcombine.low %v377_v30, %v387_v46  ;;  %v569_v53 = vsel %vm6578_vm5, %v564_v41, %v568_v28  ;;  %v394_v54 = vrot.slane %v392_v43, 5  ;;  %v400_v56 = vrot.slane %v398_v44, 5  ;;  %6149 = vmatprep.subr.bf16.mxu1 %v6560_v22  ;;  %v6704_v46 = vld [vmem:[%s6526_s28 + $0x90] sm:$0xf] }
  0x2e   : > { %v574_v7 = vrot.slane %v573_v47, 4  ;;  %v404_v57 = vrot.slane %v402_v50, 4  ;;  %v408_v58 = vshll.u32 %v6657_v34, 16  ;;  %v581_v60 = vshrl.u32 %v6664_v45, 16 }
  0x2f   : > { %6053 = vmatprep.mubr.msk.bf16.mxu0 %vm750_vm4, %v5292_v52  ;;  %v395_v61 = vor.u32 %v394_v54, %v391_v49  ;;  %v584_v62 = vshll.u32 %v6664_v45, 16  ;;  %v590_v63 = vshll.u32 %v6671_v51, 16  ;;  %v594_v2 = vshrl.u32 %v6671_v51, 16 }
  0x30   : > { %v579_v10 = vsel %vm6578_vm5, %v574_v7, %v578_v42  ;;  %v405_v14 = vor.u32 %v404_v57, %v400_v56  ;;  %v410_v8 = vrot.slane %v408_v58, 5  ;;  %v583_v16 = vrot.slane %v581_v60, 4  ;;  %v6699_v42 = vld [vmem:[%s6526_s28 + $0x38] sm:$0x1] }
  0x31   : > { %v5300_v24 = vcombine.low %v569_v53, %v579_v10  ;;  %v396_v26 = vrot.slane %v395_v61, 4  ;;  %v586_v27 = vrot.slane %v584_v62, 5  ;;  %v592_v28 = vrot.slane %v590_v63, 5  ;;  %v6709_v53 = vld [vmem:[%s6526_s28 + $0x94] sm:$0xf] }
  0x32   : > { %v406_v29 = vrot.slane %v405_v14, 4  ;;  %v596_v30 = vrot.slane %v594_v2, 4  ;;  %v600_v32 = vshll.u32 %v6678_v59, 16  ;;  %v413_v33 = vshrl.u32 %v6686_v4, 16  ;;  %v6718_v10 = vld [vmem:[%s6526_s28 + $0x98] sm:$0x1] }
  0x33   : > { %6069 = vmatprep.mubr.msk.bf16.mxu1 %vm750_vm4, %v5300_v24  ;;  %v401_v40 = vsel %vm6578_vm5, %v396_v26, %v400_v56  ;;  %v587_v41 = vor.u32 %v586_v27, %v583_v16  ;;  %v416_v43 = vshll.u32 %v6686_v4, 16  ;;  %v422_v44 = vshll.u32 %v6691_v19, 16  ;;  %9274 = vst [vmem:[#allocation5_spill] sm:$0xff] %v6718_v10  ;;  %v6723_v16 = vld [vmem:[%s6526_s28 + $0x3c] sm:$0xf] }
  0x34   : > { %v411_v47 = vsel %vm6578_vm5, %v406_v29, %v410_v8  ;;  %v597_v49 = vor.u32 %v596_v30, %v592_v28  ;;  %v602_v50 = vrot.slane %v600_v32, 5  ;;  %v415_v52 = vrot.slane %v413_v33, 4  ;;  %v6728_v30 = vld [vmem:[%s6526_s28 + $0x40] sm:$0xf] }
  0x35   : > { %v5293_v54 = vcombine.low %v401_v40, %v411_v47  ;;  %v588_v56 = vrot.slane %v587_v41, 4  ;;  %v418_v7 = vrot.slane %v416_v43, 5  ;;  %v424_v57 = vrot.slane %v422_v44, 5 }
  0x36   : > { %v598_v58 = vrot.slane %v597_v49, 4  ;;  %v426_v60 = vshrl.u32 %v6691_v19, 16  ;;  %v432_v61 = vshll.u32 %v6699_v42, 16  ;;  %v605_v62 = vshrl.u32 %v6704_v46, 16 }
  0x37   : > { %6054 = vmatmul.mubr.msk.bf16.gmra.mxu0 %vm750_vm4, %v5293_v54  ;;  %v593_v63 = vsel %vm6578_vm5, %v588_v56, %v592_v28  ;;  %v419_v2 = vor.u32 %v418_v7, %v415_v52  ;;  %v608_v14 = vshll.u32 %v6704_v46, 16  ;;  %v614_v8 = vshll.u32 %v6709_v53, 16  ;;  %v6737_v52 = vld [vmem:[%s6526_s28 + $0x44] sm:$0x1]  ;;  %v6742_v7 = vld [vmem:[%s6526_s28 + $0x9c] sm:$0xf] }
  0x38   : > { %v603_v24 = vsel %vm6578_vm5, %v598_v58, %v602_v50  ;;  %v428_v26 = vrot.slane %v426_v60, 4  ;;  %v434_v27 = vrot.slane %v432_v61, 5  ;;  %v607_v29 = vrot.slane %v605_v62, 4  ;;  %9275 = vst [vmem:[#allocation6_spill] sm:$0xff] %v6742_v7 }
  0x39   : > { %v5301_v28 = vcombine.low %v593_v63, %v603_v24  ;;  %v420_v32 = vrot.slane %v419_v2, 4  ;;  %v610_v33 = vrot.slane %v608_v14, 5  ;;  %v616_v40 = vrot.slane %v614_v8, 5  ;;  %v6746_v8 = vld [vmem:[%s6526_s28 + $0xa0] sm:$0xf] }
  0x3a   : > { %v429_v41 = vor.u32 %v428_v26, %v424_v57  ;;  %v618_v43 = vshrl.u32 %v6709_v53, 16  ;;  %v624_v44 = vshll.u32 %v6718_v10, 16  ;;  %v437_v47 = vshrl.u32 %v6723_v16, 16  ;;  %9276 = vst [vmem:[#allocation7_spill] sm:$0xff] %v6746_v8  ;;  %v1260_v10 = vld [vmem:[%s6526_s28 + $0xc] sm:$0xe] }
  0x3b   : > { %6070 = vmatmul.mubr.msk.bf16.gmra.mxu1 %vm750_vm4, %v5301_v28  ;;  %v425_v49 = vsel %vm6578_vm5, %v420_v32, %v424_v57  ;;  %v611_v50 = vor.u32 %v610_v33, %v607_v29  ;;  %v440_v54 = vshll.u32 %v6723_v16, 16  ;;  %v446_v56 = vshll.u32 %v6728_v30, 16  ;;  %v6752_v28 = vld [vmem:[%s6526_s28 + $0xa4] sm:$0x1]  ;;  %v6756_v33 = vld [vmem:[%s6526_s28 + $0x48] sm:$0xf] }
  0x3c   : > { %v430_v58 = vrot.slane %v429_v41, 4  ;;  %v620_v60 = vrot.slane %v618_v43, 4  ;;  %v626_v61 = vrot.slane %v624_v44, 5  ;;  %v439_v62 = vrot.slane %v437_v47, 4  ;;  %9277 = vst [vmem:[#allocation8_spill] sm:$0xff] %v6752_v28 }
  0x3d   : > { %v612_v63 = vrot.slane %v611_v50, 4  ;;  %v442_v2 = vrot.slane %v440_v54, 5  ;;  %v448_v14 = vrot.slane %v446_v56, 5  ;;  %v450_v57 = vshrl.u32 %v6728_v30, 16 }
  0x3e   : > { %v435_v24 = vsel %vm6578_vm5, %v430_v58, %v434_v27  ;;  %v621_v26 = vor.u32 %v620_v60, %v616_v40  ;;  %v456_v29 = vshll.u32 %v6737_v52, 16  ;;  %v629_v32 = vshrl.u32 %v6742_v7, 16 }
  0x3f   : > { %v5294_v41 = vcombine.low %v425_v49, %v435_v24  ;;  %v617_v43 = vsel %vm6578_vm5, %v612_v63, %v616_v40  ;;  %v443_v44 = vor.u32 %v442_v2, %v439_v62  ;;  %v452_v47 = vrot.slane %v450_v57, 4  ;;  %v6765_v24 = vld [vmem:[%s6526_s28 + $0x4c] sm:$0xf]  ;;  %v6771_v2 = vld [vmem:[%s6526_s28 + $0x50] sm:$0x1] }
  0x40   : > { %v622_v50 = vrot.slane %v621_v26, 4  ;;  %v458_v54 = vrot.slane %v456_v29, 5  ;;  %v631_v27 = vrot.slane %v629_v32, 4  ;;  %v632_v56 = vshll.u32 %v6742_v7, 16 }
  0x41   : > { %6057 = vmatprep.mubr.msk.bf16.mxu0 %vm750_vm4, %v5294_v41  ;;  %v444_v58 = vrot.slane %v443_v44, 4  ;;  %v453_v60 = vor.u32 %v452_v47, %v448_v14  ;;  %v638_v6 = vshll.u32 %v6746_v8, 16  ;;  %v642_v49 = vshrl.u32 %v6746_v8, 16  ;;  %v6777_v44 = vld [vmem:[%s6526_s28 + $0xa8] sm:$0xf] }
  0x42   : > { %v627_v40 = vsel %vm6578_vm5, %v622_v50, %v626_v61  ;;  %v634_v62 = vrot.slane %v632_v56, 5  ;;  %v648_v63 = vshll.u32 %v6752_v28, 16  ;;  %v461_v57 = vshrl.u32 %v6756_v33, 16  ;;  %9278 = vst [vmem:[#allocation9_spill] sm:$0xff] %v6777_v44 }
  0x43   : > { %v5302_v26 = vcombine.low %v617_v43, %v627_v40  ;;  %v449_v29 = vsel %vm6578_vm5, %v444_v58, %v448_v14  ;;  %v454_v32 = vrot.slane %v453_v60, 4  ;;  %v640_v41 = vrot.slane %v638_v6, 5 }
  0x44   : > { %v635_v47 = vor.u32 %v634_v62, %v631_v27  ;;  %v644_v39 = vrot.slane %v642_v49, 4  ;;  %v650_v61 = vrot.slane %v648_v63, 5  ;;  %v463_v50 = vrot.slane %v461_v57, 4  ;;  %v6787_v49 = vld [vmem:[%s6526_s28 + $0xac] sm:$0xf] }
  0x45   : > { %6073 = vmatprep.mubr.msk.bf16.mxu1 %vm750_vm4, %v5302_v26  ;;  %v459_v56 = vsel %vm6578_vm5, %v454_v32, %v458_v54  ;;  %v464_v43 = vshll.u32 %v6756_v33, 16  ;;  %v470_v40 = vshll.u32 %v6765_v24, 16  ;;  %v474_v14 = vshrl.u32 %v6765_v24, 16  ;;  %9279 = vst [vmem:[#allocation10_spill] sm:$0xff] %v6787_v49  ;;  %v6790_v26 = vld [vmem:[%s6526_s28 + $0xb0] sm:$0x1] }
  0x46   : > { %v5295_v58 = vcombine.low %v449_v29, %v459_v56  ;;  %v636_v6 = vrot.slane %v635_v47, 4  ;;  %v645_v60 = vor.u32 %v644_v39, %v640_v41  ;;  %v480_v27 = vshll.u32 %v6771_v2, 16  ;;  %9280 = vst [vmem:[#allocation11_spill] sm:$0xff] %v6790_v26 }
  0x47   : > { %v466_v62 = vrot.slane %v464_v43, 5  ;;  %v472_v63 = vrot.slane %v470_v40, 5  ;;  %v476_v57 = vrot.slane %v474_v14, 4  ;;  %v653_v54 = vshrl.u32 %v6777_v44, 16  ;;  %v6799_v14 = vld [vmem:[%s6526_s28 + $0x54] sm:$0xf] }
  0x48   : > { %6058 = vmatmul.mubr.msk.bf16.gmra.mxu0 %vm750_vm4, %v5295_v58  ;;  %v641_v29 = vsel %vm6578_vm5, %v636_v6, %v640_v41  ;;  %v646_v32 = vrot.slane %v645_v60, 4  ;;  %v482_v39 = vrot.slane %v480_v27, 5  ;;  %v656_v47 = vshll.u32 %v6777_v44, 16  ;;  %v6806_v60 = vld [vmem:[%s6526_s28 + $0x58] sm:$0xf] }
  0x49   : > { %v467_v56 = vor.u32 %v466_v62, %v463_v50  ;;  %v477_v5 = vor.u32 %v476_v57, %v472_v63  ;;  %v655_v43 = vrot.slane %v653_v54, 4  ;;  %v662_v40 = vshll.u32 %v6787_v49, 16  ;;  %v6809_v54 = vld [vmem:[%s6526_s28 + $0x5c] sm:$0x1] }
  0x4a   : > { %v651_v58 = vsel %vm6578_vm5, %v646_v32, %v650_v61  ;;  %v658_v3 = vrot.slane %v656_v47, 5  ;;  %v666_v41 = vshrl.u32 %v6787_v49, 16  ;;  %v672_v6 = vshll.u32 %v6790_v26, 16  ;;  %v1259_v26 = vld [vmem:[%s6526_s28] sm:$0xe] }
  0x4b   : > { %v5303_v50 = vcombine.low %v641_v29, %v651_v58  ;;  %v468_v27 = vrot.slane %v467_v56, 4  ;;  %v478_v62 = vrot.slane %v477_v5, 4  ;;  %v664_v57 = vrot.slane %v662_v40, 5  ;;  %v6820_v56 = vld [vmem:[%s6526_s28 + $0xb4] sm:$0xf] }
  0x4c   : > { %v659_v0 = vor.u32 %v658_v3, %v655_v43  ;;  %v668_v44 = vrot.slane %v666_v41, 4  ;;  %v674_v28 = vrot.slane %v672_v6, 5  ;;  %v485_v61 = vshrl.u32 %v6799_v14, 16  ;;  %9281 = vst [vmem:[#allocation12_spill] sm:$0xff] %v6820_v56  ;;  %v6823_v41 = vld [vmem:[%s6526_s28 + $0xb8] sm:$0xf] }
  0x4d   : > { %6074 = vmatmul.mubr.msk.bf16.gmra.mxu1 %vm750_vm4, %v5303_v50  ;;  %v473_v32 = vsel %vm6578_vm5, %v468_v27, %v472_v63  ;;  %v483_v29 = vsel %vm6578_vm5, %v478_v62, %v482_v39  ;;  %v488_v5 = vshll.u32 %v6799_v14, 16  ;;  %v494_v47 = vshll.u32 %v6806_v60, 16  ;;  %v6828_v39 = vld [vmem:[%s6526_s28 + $0xbc] sm:$0x1] }
  0x4e   : > { %v5296_v3 = vcombine.low %v473_v32, %v483_v29  ;;  %v660_v43 = vrot.slane %v659_v0, 4  ;;  %v669_v40 = vor.u32 %v668_v44, %v664_v57  ;;  %v487_v58 = vrot.slane %v485_v61, 4 }
  0x4f   : > { %v490_v6 = vrot.slane %v488_v5, 5  ;;  %v496_v50 = vrot.slane %v494_v47, 5  ;;  %v498_v63 = vshrl.u32 %v6806_v60, 16  ;;  %v504_v27 = vshll.u32 %v6809_v54, 16 }
  0x50   : > { %6061 = vmatprep.mubr.msk.bf16.mxu0 %vm750_vm4, %v5296_v3  ;;  %v665_v62 = vsel %vm6578_vm5, %v660_v43, %v664_v57  ;;  %v670_v32 = vrot.slane %v669_v40, 4  ;;  %v677_v0 = vshrl.u32 %v6820_v56, 16  ;;  %v680_v44 = vshll.u32 %v6820_v56, 16 }
  0x51   : > { %v491_v61 = vor.u32 %v490_v6, %v487_v58  ;;  %v500_v29 = vrot.slane %v498_v63, 4  ;;  %v506_v5 = vrot.slane %v504_v27, 5  ;;  %v686_v47 = vshll.u32 %v6823_v41, 16 }
  0x52   : > { %v675_v49 = vsel %vm6578_vm5, %v670_v32, %v674_v28  ;;  %v679_v55 = vrot.slane %v677_v0, 4  ;;  %v682_v3 = vrot.slane %v680_v44, 5  ;;  %v690_v7 = vshrl.u32 %v6823_v41, 16 }
  0x53   : > { %v5304_v57 = vcombine.low %v665_v62, %v675_v49  ;;  %v492_v43 = vrot.slane %v491_v61, 4  ;;  %v501_v40 = vor.u32 %v500_v29, %v496_v50  ;;  %v688_v8 = vrot.slane %v686_v47, 5  ;;  %v1261_v61 = vld [vmem:[%s6526_s28 + $0x18] sm:$0xe] }
  0x54   : > { %v683_v56 = vor.u32 %v682_v3, %v679_v55  ;;  %v692_v58 = vrot.slane %v690_v7, 4  ;;  %v696_v6 = vshll.u32 %v6828_v39, 16  ;;  %v5354_v28 = vrot.slane %v1259_v26, 9 }
  0x55   : > { %6077 = vmatprep.mubr.msk.bf16.mxu1 %vm750_vm4, %v5304_v57  ;;  %v497_v49 = vsel %vm6578_vm5, %v492_v43, %v496_v50  ;;  %v502_v27 = vrot.slane %v501_v40, 4  ;;  %v1312_v62 = vrot.slane %v6538_v12, 5  ;;  %v5323_v55 = vcombine.low %v6571_v36, %v6574_v37 }
  0x56   : > { %v684_v7 = vrot.slane %v683_v56, 4  ;;  %v693_v32 = vor.u32 %v692_v58, %v688_v8  ;;  %v698_v0 = vrot.slane %v696_v6, 5  ;;  %v5355_v44 = vrot.slane %v1260_v10, 9  ;;  %v1262_v6 = vld [vmem:[%s6526_s28 + $0x24] sm:$0xe] }
  0x57   : > { %v507_v26 = vsel %vm6578_vm5, %v502_v27, %v506_v5  ;;  %v1313_v29 = vsel %vm6844_vm8, %v5354_v28, %v1312_v62  ;;  %v1314_v47 = vrot.slane %v1312_v62, 4  ;;  %v9284_v50 = vrot.slane %v6574_v37, 5 }
  0x58   : > { %v5297_v57 = vcombine.low %v497_v49, %v507_v26  ;;  %v689_v43 = vsel %vm6578_vm5, %v684_v7, %v688_v8  ;;  %v694_v56 = vrot.slane %v693_v32, 4  ;;  %v9285_v40 = vrot.slane %v6541_v13, 5 }
  0x59   : > { %v1321_v3 = vrot.slane %v9284_v50, 4  ;;  %v5324_v5 = vcombine.low %v6610_v17, %v6616_v31  ;;  %v5356_v58 = vrot.slane %v1261_v61, 9  ;;  %v5322_v49 = vcombine.low %v6535_v11, %v6538_v12  ;;  %v1263_v61 = vld [vmem:[%s6526_s28 + $0x30] sm:$0xe] }
  0x5a   : > { %v1316_v10 = vsel %vm6844_vm8, %v1314_v47, %v9285_v40  ;;  %6062 = vmatmul.mubr.msk.bf16.gmra.mxu0 %vm750_vm4, %v5297_v57  ;;  %v699_v28 = vsel %vm6578_vm5, %v694_v56, %v698_v0  ;;  %v1326_v13 = vrot.slane %v6616_v31, 5  ;;  %v9286_v62 = vmov %v9284_v50 }
  0x5b   : > { %v5371_v8 = vcombine.low %v1313_v29, %v1316_v10  ;;  %v5305_v27 = vcombine.low %v689_v43, %v699_v28  ;;  %v1320_v17 = vsel %vm6844_vm8, %v5355_v44, %v9286_v62  ;;  %v9287_v7 = vrot.slane %v6584_v48, 5  ;;  %v1264_v29 = vld [vmem:[%s6526_s28 + $0x3c] sm:$0xe] }
  0x5c   : > { %v1329_v0 = vrot.slane %v6622_v35, 5  ;;  %v1327_v11 = vsel %vm6844_vm8, %v5356_v58, %v1326_v13  ;;  %v1328_v12 = vrot.slane %v1326_v13, 4  ;;  %v5357_v31 = vrot.slane %v1262_v6, 9  ;;  %v1266_v13 = vld [vmem:[%s6526_s28 + $0x54] sm:$0xe] }
  0x5d   : > { %v1323_v32 = vsel %vm6844_vm8, %v1321_v3, %v9287_v7  ;;  %6117 = vmatprep.mubr.msk.bf16.mxu0 %vm750_vm4, %v5371_v8  ;;  %v1333_v26 = vrot.slane %v6651_v25, 5  ;;  %6078 = vmatmul.mubr.msk.bf16.gmra.mxu1 %vm750_vm4, %v5305_v27  ;;  %v1336_v48 = vrot.slane %v6657_v34, 5  ;;  %v1340_v44 = vrot.slane %v6691_v19, 5  ;;  %v1265_v3 = vld [vmem:[%s6526_s28 + $0x48] sm:$0xe] }
  0x5e   : > { %6083 = vmatprep.mubr.msk.bf16.mxu1 %vm750_vm4, %v5322_v49  ;;  %v5372_v35 = vcombine.low %v1320_v17, %v1323_v32  ;;  %v1330_v47 = vsel %vm6844_vm8, %v1328_v12, %v1329_v0  ;;  %v5358_v43 = vrot.slane %v1263_v61, 9  ;;  %v1343_v56 = vrot.slane %v6699_v42, 5 }
  0x5f   : > { %v1335_v50 = vrot.slane %v1333_v26, 4  ;;  %v5373_v57 = vcombine.low %v1327_v11, %v1330_v47  ;;  %v1334_v40 = vsel %vm6844_vm8, %v5357_v31, %v1333_v26  ;;  %v1342_v34 = vrot.slane %v1340_v44, 4 }
  0x60   : > { %v5359_v10 = vrot.slane %v1264_v29, 9  ;;  %v1347_v58 = vrot.slane %v6728_v30, 5  ;;  %v1350_v28 = vrot.slane %v6737_v52, 5  ;;  %v5360_v49 = vrot.slane %v1265_v3, 9  ;;  %v1267_v52 = vld [vmem:[%s6526_s28 + $0x60] sm:$0xe] }
  0x61   : > { %v1337_v6 = vsel %vm6844_vm8, %v1335_v50, %v1336_v48  ;;  %v1354_v8 = vrot.slane %v6765_v24, 5  ;;  %v1357_v27 = vrot.slane %v6771_v2, 5  ;;  %v1371_v62 = vrot.slane %v6557_v21, 5  ;;  %v6947_v48 = vld [vmem:[%s6526_s28 + $0x6c] sm:$0xe] }
  0x62   : > { %6118 = vmatmul.mubr.msk.bf16.vlgmr.msra.gmra.mxu0 %vm750_vm4, %v5372_v35  ;;  %v1349_v42 = vrot.slane %v1347_v58, 4  ;;  %v1341_v17 = vsel %vm6844_vm8, %v5358_v43, %v1340_v44  ;;  %v5374_v32 = vcombine.low %v1334_v40, %v1337_v6  ;;  %v1344_v0 = vsel %vm6844_vm8, %v1342_v34, %v1343_v56  ;;  %v6968_v3 = vld [vmem:[%s6526_s28 + $0x78] sm:$0xe] }
  0x63   : > { %6184 = vmatpush3.bf16.msra.mxu0 %v6563_v23  ;;  %6121 = vmatprep.mubr.msk.bf16.mxu0 %vm750_vm4, %v5373_v57  ;;  %v1356_v7 = vrot.slane %v1354_v8, 4  ;;  %v6919_v61 = vsel %vm6844_vm8, %v5359_v10, %v1347_v58  ;;  %v1361_v2 = vrot.slane %v6806_v60, 5  ;;  %v6928_v21 = vsel %vm6844_vm8, %v5360_v49, %v1354_v8  ;;  %v1271_v57 = vld [vmem:[%s6526_s28 + $0x90] sm:$0xe]  ;;  %v1272_v49 = vld [vmem:[%s6526_s28 + $0x9c] sm:$0xe] }
  0x64   : > { %v5361_v23 = vrot.slane %v1266_v13, 9  ;;  %v1364_v11 = vrot.slane %v6809_v54, 5  ;;  %v1368_v12 = vrot.slane %v6554_v20, 5  ;;  %v1351_v36 = vsel %vm6844_vm8, %v1349_v42, %v1350_v28 }
  0x65   : > { %6084 = vmatmul.mubr.msk.bf16.vlgmr.msra.gmra.mxu1 %vm750_vm4, %v5323_v55  ;;  %v6938_v37 = vsel %vm6844_vm8, %v1356_v7, %v1357_v27  ;;  %v1363_v55 = vrot.slane %v1361_v2, 4  ;;  %v5362_v31 = vrot.slane %v1267_v52, 9  ;;  %v5325_v54 = vcombine.low %v6644_v15, %v6651_v25  ;;  %v1270_v15 = vld [vmem:[%s6526_s28 + $0x84] sm:$0xe]  ;;  %v1273_v27 = vld [vmem:[%s6526_s28 + $0xa8] sm:$0xe] }
  0x66   : > { %6150 = vmatpush3.bf16.msra.mxu1 %v6560_v22  ;;  %6087 = vmatprep.mubr.msk.bf16.mxu1 %vm750_vm4, %v5324_v5  ;;  %v5326_v26 = vcombine.low %v6686_v4, %v6691_v19  ;;  %v5375_v22 = vcombine.low %v1341_v17, %v1344_v0  ;;  %v5327_v5 = vcombine.low %v6723_v16, %v6728_v30  ;;  %v1370_v47 = vrot.slane %v1368_v12, 4  ;;  %v9288_v52 = vld [vmem:[#allocation5_spill] sm:$0xff]  ;;  %v9289_v0 = vld [vmem:[#allocation7_spill] sm:$0xff] }
  0x67   : > { %v5328_v44 = vcombine.low %v6756_v33, %v6765_v24  ;;  %v5329_v29 = vcombine.low %v6799_v14, %v6806_v60  ;;  %v5330_v35 = vcombine.low %v6550_v18, %v6554_v20  ;;  %v5376_v25 = vcombine.low %v6919_v61, %v1351_v36  ;;  %v9290_v61 = vld [vmem:[#allocation6_spill] sm:$0xff] }
  0x68   : > { %v5377_v4 = vcombine.low %v6928_v21, %v6938_v37  ;;  %v6961_v19 = vsel %vm6844_vm8, %v5361_v23, %v1361_v2  ;;  %v6965_v50 = vsel %vm6844_vm8, %v1363_v55, %v1364_v11  ;;  %v6974_v43 = vsel %vm6844_vm8, %v5362_v31, %v1368_v12  ;;  %v9291_v23 = vld [vmem:[#allocation3_spill] sm:$0xff]  ;;  %v5474_v2 = vld [vmem:[%s6526_s28 + $0x24] sm:$0xf] }
  0x69   : > { %v5363_v56 = vrot.slane %v6947_v48, 9  ;;  %v1375_v40 = vrot.slane %v6597_v1, 5  ;;  %v5333_v34 = vcombine.low %v6664_v45, %v6671_v51  ;;  %v1378_v10 = vrot.slane %v6605_v9, 5  ;;  %v9294_v48 = vld [vmem:[#allocation9_spill] sm:$0xff] }
  0x6a   : > { %6122 = vmatmul.mubr.msk.bf16.gmra.mxu0 %vm750_vm4, %v5374_v32  ;;  %v5365_v58 = vrot.slane %v1270_v15, 9  ;;  %v1389_v6 = vrot.slane %v6671_v51, 5  ;;  %v1392_v28 = vrot.slane %v6678_v59, 5  ;;  %v5378_v8 = vcombine.low %v6961_v19, %v6965_v50 }
  0x6b   : > { %6125 = vmatprep.mubr.msk.bf16.mxu0 %vm750_vm4, %v5375_v22  ;;  %v6989_v13 = vsel %vm6844_vm8, %v1370_v47, %v1371_v62  ;;  %v5364_v1 = vrot.slane %v6968_v3, 9  ;;  %v5366_v17 = vrot.slane %v1271_v57, 9  ;;  %v1396_v7 = vrot.slane %v6709_v53, 5  ;;  %v9293_v22 = vld [vmem:[#allocation10_spill] sm:$0xff]  ;;  %v7044_v47 = vld [vmem:[%s6526_s28 + $0x10] sm:$0xf] }
  0x6c   : > { %v6998_v9 = vsel %vm6844_vm8, %v5365_v58, %v1389_v6  ;;  %v1391_v59 = vrot.slane %v1389_v6, 4  ;;  %v1377_v62 = vrot.slane %v1375_v40, 4  ;;  %v1399_v32 = vrot.slane %v9288_v52, 5  ;;  %v9295_v58 = vld [vmem:[#allocation11_spill] sm:$0xff] }
  0x6d   : > { %6088 = vmatmul.mubr.msk.bf16.gmra.mxu1 %vm750_vm4, %v5325_v54  ;;  %v5367_v21 = vrot.slane %v1272_v49, 9  ;;  %v1382_v11 = vrot.slane %v9291_v23, 5  ;;  %v7012_v36 = vsel %vm6844_vm8, %v5366_v17, %v1396_v7  ;;  %v1398_v37 = vrot.slane %v1396_v7, 4  ;;  %v9292_v54 = vld [vmem:[#allocation8_spill] sm:$0xff] }
  0x6e   : > { %6091 = vmatprep.mubr.msk.bf16.mxu1 %vm750_vm4, %v5326_v26  ;;  %v7008_v12 = vsel %vm6844_vm8, %v1391_v59, %v1392_v28  ;;  %v1403_v31 = vrot.slane %v9289_v0, 5  ;;  %v1406_v26 = vrot.slane %v9292_v54, 5  ;;  %v5368_v3 = vrot.slane %v1273_v27, 9  ;;  %v5468_v28 = vld [vmem:[%s6526_s28 + $0xc] sm:$0xf]  ;;  %v9296_v7 = vld [vmem:[#allocation12_spill] sm:$0xff] }
  0x6f   : > { %v5382_v55 = vcombine.low %v6998_v9, %v7008_v12  ;;  %v7022_v15 = vsel %vm6844_vm8, %v1398_v37, %v1399_v32  ;;  %v1410_v57 = vrot.slane %v9293_v22, 5  ;;  %v1413_v6 = vrot.slane %v9295_v58, 5  ;;  %v1274_v32 = vld [vmem:[%s6526_s28 + $0xb4] sm:$0xe] }
  0x70   : > { %v5383_v49 = vcombine.low %v7012_v36, %v7022_v15  ;;  %v7032_v59 = vsel %vm6844_vm8, %v5367_v21, %v1403_v31  ;;  %v1405_v17 = vrot.slane %v1403_v31, 4  ;;  %v1384_v27 = vrot.slane %v1382_v11, 4  ;;  %v9297_v37 = vld [vmem:[#allocation4_spill] sm:$0xff] }
  0x71   : > { %v1385_v54 = vrot.slane %v9297_v37, 5  ;;  %v1412_v58 = vrot.slane %v1410_v57, 4  ;;  %v7048_v21 = vsel %vm6844_vm8, %v5363_v56, %v1375_v40  ;;  %v2127_v52 = vshll.u32 %v5468_v28, 16  ;;  %v5581_v37 = vld [vmem:[%s9236_s1 + $0xa] sm:$0x3] }
  0x72   : > { %6126 = vmatmul.mubr.msk.bf16.gmra.mxu0 %vm750_vm4, %v5376_v25  ;;  %v7041_v25 = vsel %vm6844_vm8, %v5368_v3, %v1410_v57  ;;  %v7052_v31 = vsel %vm6844_vm8, %v1405_v17, %v1406_v26  ;;  %v5379_v56 = vcombine.low %v6974_v43, %v6989_v13  ;;  %v7065_v40 = vsel %vm6844_vm8, %v1377_v62, %v1378_v10  ;;  %v7074_v57 = vld [vmem:[%s6526_s28 + $0x14] sm:$0x1]  ;;  %v5472_v10 = vld [vmem:[%s6526_s28 + $0x1c] sm:$0xf]  ;;  %v5646_v13 = vld [vmem:[%s9236_s1 + $0xc] sm:$0x3] }
  0x73   : > { %6129 = vmatprep.mubr.msk.bf16.mxu0 %vm750_vm4, %v5377_v4  ;;  %v2124_v4 = vshrl.u32 %v5468_v28, 16  ;;  %v7071_v3 = vsel %vm6844_vm8, %v1412_v58, %v1413_v6  ;;  %v5471_v28 = vld [vmem:[%s6526_s28 + $0x18] sm:$0xf]  ;;  %v7083_v16 = vsel %vm6844_vm8, %v5364_v1, %v1382_v11  ;;  %v2133_v43 = vshll.u32 %v7044_v47, 16  ;;  %v9298_v1 = vld [vmem:[#allocation2_spill] sm:$0xff] }
  0x74   : > { %v7095_v33 = vsel %vm6844_vm8, %v1384_v27, %v1385_v54  ;;  %v5369_v24 = vrot.slane %v1274_v32, 9  ;;  %v7099_v62 = vand.u32 %v5581_v37, %v9298_v1  ;;  %v2129_v6 = vrot.slane %v2127_v52, 5 }
  0x75   : > { %6092 = vmatmul.mubr.msk.bf16.gmra.mxu1 %vm750_vm4, %v5327_v5  ;;  %v1417_v5 = vrot.slane %v6823_v41, 5  ;;  %v2126_v11 = vrot.slane %v2124_v4, 4  ;;  %v7101_v17 = vrot.slane %v2133_v43, 5  ;;  %v2148_v58 = vshrl.u32 %v5471_v28, 16  ;;  %v5473_v43 = vld [vmem:[%s6526_s28 + $0x20] sm:$0x1] }
  0x76   : > { %6095 = vmatprep.mubr.msk.bf16.mxu1 %vm750_vm4, %v5328_v44  ;;  %v2137_v44 = vshrl.u32 %v7044_v47, 16  ;;  %v1420_v30 = vrot.slane %v6828_v39, 5  ;;  %6217 = vmatprep.subr.bf16.mxu1 %v7099_v62  ;;  %v2151_v27 = vshll.u32 %v5471_v28, 16  ;;  %v2157_v32 = vshll.u32 %v5472_v10, 16 }
  0x77   : > { %v1419_v54 = vrot.slane %v1417_v5, 4  ;;  %v2143_v52 = vshll.u32 %v7074_v57, 16  ;;  %v2150_v4 = vrot.slane %v2148_v58, 4  ;;  %v2161_v37 = vshrl.u32 %v5472_v10, 16  ;;  %v7122_v10 = vld [vmem:[%s6526_s28 + $0x28] sm:$0xf] }
  0x78   : > { %v2139_v26 = vrot.slane %v2137_v44, 4  ;;  %v5380_v39 = vcombine.low %v7048_v21, %v7065_v40  ;;  %v2153_v28 = vrot.slane %v2151_v27, 5  ;;  %v7115_v44 = vrot.slane %v2157_v32, 5  ;;  %v6429_v32 = vld [vmem:[%s6526_s28 + $0x6c] sm:$0xf] }
  0x79   : > { %v7118_v19 = vand.u32 %v5646_v13, %v9298_v1  ;;  %v2130_v50 = vor.u32 %v2129_v6, %v2126_v11  ;;  %v2163_v42 = vrot.slane %v2161_v37, 4  ;;  %v5381_v21 = vcombine.low %v7083_v16, %v7095_v33  ;;  %v5477_v6 = vld [vmem:[%s6526_s28 + $0x30] sm:$0xf] }
  0x7a   : > { %6130 = vmatmul.mubr.msk.bf16.gmra.mxu0 %vm750_vm4, %v5378_v8  ;;  %v2140_v8 = vor.u32 %v2139_v26, %v7101_v17  ;;  %v7132_v40 = vsel %vm6844_vm8, %v5369_v24, %v1417_v5  ;;  %v2154_v13 = vor.u32 %v2153_v28, %v2150_v4  ;;  %v7136_v26 = vld [vmem:[%s6526_s28 + $0x2c] sm:$0x1]  ;;  %v2175_v11 = vshll.u32 %v5474_v2, 16  ;;  %v7149_v5 = vld [vmem:[%s6526_s28 + $0x34] sm:$0xf] }
  0x7b   : > { %6133 = vmatprep.mubr.msk.bf16.mxu0 %vm750_vm4, %v5379_v56  ;;  %v2172_v56 = vshrl.u32 %v5474_v2, 16  ;;  %6251 = vmatprep.subr.bf16.mxu0 %v7118_v19  ;;  %v7145_v14 = vsel %vm6844_vm8, %v1419_v54, %v1420_v30  ;;  %v2145_v60 = vrot.slane %v2143_v52, 5  ;;  %v2167_v16 = vshll.u32 %v5473_v43, 16  ;;  %v5480_v30 = vld [vmem:[%s6526_s28 + $0x3c] sm:$0xf] }
  0x7c   : > { %v2177_v33 = vrot.slane %v2175_v11, 5  ;;  %v2181_v24 = vshll.u32 %v7122_v10, 16  ;;  %v2185_v18 = vshrl.u32 %v7122_v10, 16  ;;  %v2131_v20 = vrot.slane %v2130_v50, 4  ;;  %v6430_v54 = vld [vmem:[%s6526_s28 + $0x70] sm:$0xf] }
  0x7d   : > { %6096 = vmatmul.mubr.msk.bf16.gmra.mxu1 %vm750_vm4, %v5329_v29  ;;  %v2164_v29 = vor.u32 %v2163_v42, %v7115_v44  ;;  %v2174_v2 = vrot.slane %v2172_v56, 4  ;;  %v2155_v58 = vrot.slane %v2154_v13, 4  ;;  %v2191_v27 = vshll.u32 %v7136_v26, 16  ;;  %v6431_v42 = vld [vmem:[%s6526_s28 + $0x78] sm:$0xf] }
  0x7e   : > { %6099 = vmatprep.mubr.msk.bf16.mxu1 %vm750_vm4, %v5330_v35  ;;  %v2141_v35 = vrot.slane %v2140_v8, 4  ;;  %v5331_v52 = vcombine.low %v6429_v32, %v6430_v54  ;;  %v5332_v4 = vcombine.low %v6431_v42, %v9291_v23  ;;  %v2196_v37 = vshrl.u32 %v5477_v6, 16  ;;  %v5483_v42 = vld [vmem:[%s6526_s28 + $0x48] sm:$0xf]  ;;  %v7186_v13 = vld [vmem:[%s6526_s28 + $0x4c] sm:$0xf] }
  0x7f   : > { %v2199_v43 = vshll.u32 %v5477_v6, 16  ;;  %v2165_v28 = vrot.slane %v2164_v29, 4  ;;  %v2169_v50 = vrot.slane %v2167_v16, 5  ;;  %v2205_v8 = vshll.u32 %v7149_v5, 16  ;;  %v7168_v6 = vld [vmem:[%s6526_s28 + $0x38] sm:$0x1] }
  0x80   : > { %v2209_v56 = vshrl.u32 %v7149_v5, 16  ;;  %v2178_v11 = vor.u32 %v2177_v33, %v2174_v2  ;;  %v7165_v32 = vrot.slane %v2181_v24, 5  ;;  %v2187_v23 = vrot.slane %v2185_v18, 4 }
  0x81   : > { %v2136_v29 = vsel %vm6578_vm5, %v2131_v20, %v7101_v17  ;;  %v7176_v16 = vrot.slane %v2191_v27, 5  ;;  %v2198_v54 = vrot.slane %v2196_v37, 4  ;;  %v2146_v2 = vsel %vm6578_vm5, %v2141_v35, %v2145_v60  ;;  %v7199_v37 = vld [vmem:[%s6526_s28 + $0x44] sm:$0x1] }
  0x82   : > { %6134 = vmatmul.mubr.msk.bf16.gmra.mxu0 %vm750_vm4, %v5380_v39  ;;  %v7171_v39 = vld [vmem:[%s6526_s28 + $0x40] sm:$0xf]  ;;  %v2160_v33 = vsel %vm6578_vm5, %v2155_v58, %v7115_v44  ;;  %v2220_v24 = vshrl.u32 %v5480_v30, 16  ;;  %v2223_v18 = vshll.u32 %v5480_v30, 16  ;;  %v2170_v17 = vsel %vm6578_vm5, %v2165_v28, %v2169_v50 }
  0x83   : > { %6137 = vmatprep.mubr.msk.bf16.mxu0 %vm750_vm4, %v5381_v21  ;;  %v2201_v21 = vrot.slane %v2199_v43, 5  ;;  %v7191_v20 = vrot.slane %v2205_v8, 5  ;;  %v2211_v27 = vrot.slane %v2209_v56, 4  ;;  %v7194_v60 = vrot.slane %v2178_v11, 4 }
  0x84   : > { %v2188_v35 = vor.u32 %v2187_v23, %v7165_v32  ;;  %v2222_v44 = vrot.slane %v2220_v24, 4  ;;  %v2225_v58 = vrot.slane %v2223_v18, 5  ;;  %v2233_v28 = vshrl.u32 %v7171_v39, 16  ;;  %v7214_v24 = vld [vmem:[%s6526_s28 + $0x50] sm:$0x1] }
  0x85   : > { %6100 = vmatmul.mubr.msk.bf16.gmra.mxu1 %vm750_vm4, %v5331_v52  ;;  %v2229_v52 = vshll.u32 %v7171_v39, 16  ;;  %v2202_v30 = vor.u32 %v2201_v21, %v2198_v54  ;;  %v7204_v50 = vcombine.low %v2136_v29, %v2146_v2  ;;  %v7206_v8 = vcombine.low %v2160_v33, %v2170_v17  ;;  %v7219_v29 = vld [vmem:[%s6526_s28 + $0x58] sm:$0xf] }
  0x86   : > { %6103 = vmatprep.mubr.msk.bf16.mxu1 %vm750_vm4, %v5332_v4  ;;  %v2215_v4 = vshll.u32 %v7168_v6, 16  ;;  %v2244_v56 = vshrl.u32 %v5483_v42, 16  ;;  %v2247_v11 = vshll.u32 %v5483_v42, 16  ;;  %v2212_v23 = vor.u32 %v2211_v27, %v7191_v20 }
  0x87   : > { %v7201_v43 = vrot.slane %v2229_v52, 5  ;;  %v2226_v54 = vor.u32 %v2225_v58, %v2222_v44  ;;  %v2235_v21 = vrot.slane %v2233_v28, 4  ;;  %v2253_v18 = vshll.u32 %v7186_v13, 16  ;;  %v5486_v52 = vld [vmem:[%s6526_s28 + $0x54] sm:$0xf] }
  0x88   : > { %v2189_v9 = vrot.slane %v2188_v35, 4  ;;  %v2239_v12 = vshll.u32 %v7199_v37, 16  ;;  %v2249_v42 = vrot.slane %v2247_v11, 5  ;;  %v2184_v2 = vsel %vm6578_vm5, %v7194_v60, %v7165_v32  ;;  %v5489_v44 = vld [vmem:[%s6526_s28 + $0x60] sm:$0xf] }
  0x89   : > { %v2203_v33 = vrot.slane %v2202_v30, 4  ;;  %v2217_v17 = vrot.slane %v2215_v4, 5  ;;  %v2257_v27 = vshrl.u32 %v7186_v13, 16  ;;  %v2236_v36 = vor.u32 %v2235_v21, %v7201_v43  ;;  %v7246_v28 = vld [vmem:[%s6526_s28 + $0x5c] sm:$0x1] }
  0x8a   : > { %6138 = vmatmul.mubr.msk.bf16.gmra.mxu0 %vm750_vm4, %v5382_v55  ;;  %v2246_v55 = vrot.slane %v2244_v56, 4  ;;  %v7236_v15 = vrot.slane %v2253_v18, 5  ;;  %v2271_v35 = vshll.u32 %v5486_v52, 16  ;;  %v9299_v32 = vcombine.low %v6704_v46, %v6709_v53  ;;  %v7250_v11 = vld [vmem:[%s6526_s28 + $0x64] sm:$0xf] }
  0x8b   : > { %6141 = vmatprep.mubr.msk.bf16.mxu0 %vm750_vm4, %v5383_v49  ;;  %v2268_v49 = vshrl.u32 %v5486_v52, 16  ;;  %v2213_v60 = vrot.slane %v2212_v23, 4  ;;  %v2227_v58 = vrot.slane %v2226_v54, 4  ;;  %v2259_v30 = vrot.slane %v2257_v27, 4  ;;  %v7272_v27 = vld [vmem:[%s6526_s28 + $0x70] sm:$0xf] }
  0x8c   : > { %v2277_v45 = vshll.u32 %v7219_v29, 16  ;;  %v2241_v51 = vrot.slane %v2239_v12, 5  ;;  %v2263_v4 = vshll.u32 %v7214_v24, 16  ;;  %v2281_v56 = vshrl.u32 %v7219_v29, 16 }
  0x8d   : > { %6104 = vmatmul.mubr.msk.bf16.gmra.mxu1 %vm750_vm4, %v5333_v34  ;;  %v2250_v34 = vor.u32 %v2249_v42, %v2246_v55  ;;  %v2194_v46 = vsel %vm6578_vm5, %v2189_v9, %v7176_v16  ;;  %v2208_v53 = vsel %vm6578_vm5, %v2203_v33, %v7191_v20  ;;  %v2270_v23 = vrot.slane %v2268_v49, 4  ;;  %v5492_v55 = vld [vmem:[%s6526_s28 + $0x6c] sm:$0xf] }
  0x8e   : > { %6107 = vmatprep.mubr.msk.bf16.mxu1 %vm750_vm4, %v9299_v32  ;;  %v2273_v54 = vrot.slane %v2271_v35, 5  ;;  %v2237_v21 = vrot.slane %v2236_v36, 4  ;;  %v2260_v18 = vor.u32 %v2259_v30, %v7236_v15  ;;  %v7259_v52 = vrot.slane %v2277_v45, 5 }
  0x8f   : > { %v2283_v12 = vrot.slane %v2281_v56, 4  ;;  %v9300_v42 = vcombine.low %v7032_v59, %v7052_v31  ;;  %v2218_v16 = vsel %vm6578_vm5, %v2213_v60, %v2217_v17  ;;  %v2232_v20 = vsel %vm6578_vm5, %v2227_v58, %v7201_v43 }
  0x90   : > { %v2292_v9 = vshrl.u32 %v5489_v44, 16  ;;  %v2295_v33 = vshll.u32 %v5489_v44, 16  ;;  %v9301_v36 = vcombine.low %v7041_v25, %v7071_v3  ;;  %v2251_v49 = vrot.slane %v2250_v34, 4 }
  0x91   : > { %v2265_v59 = vrot.slane %v2263_v4, 5  ;;  %v2301_v31 = vshll.u32 %v7250_v11, 16  ;;  %v2305_v17 = vshrl.u32 %v7250_v11, 16  ;;  %v2274_v35 = vor.u32 %v2273_v54, %v2270_v23 }
  0x92   : > { %6142 = vmatmul.mubr.msk.bf16.gmra.mxu0 %vm750_vm4, %v9300_v42  ;;  %v2287_v32 = vshll.u32 %v7246_v28, 16  ;;  %v2294_v43 = vrot.slane %v2292_v9, 4  ;;  %v2297_v60 = vrot.slane %v2295_v33, 5  ;;  %v9302_v44 = vcombine.low %v9290_v61, %v9289_v0  ;;  %v7299_v61 = vld [vmem:[%s6526_s28 + $0x68] sm:$0x1]  ;;  %v6397_v9 = vld [vmem:[%s6526_s28 + $0xc] sm:$0xff]  }
  0x93   : > { %6145 = vmatprep.mubr.msk.bf16.mxu0 %vm750_vm4, %v9301_v36  ;;  %v2242_v25 = vsel %vm6578_vm5, %v2237_v21, %v2241_v51  ;;  %v2261_v3 = vrot.slane %v2260_v18, 4  ;;  %v2284_v58 = vor.u32 %v2283_v12, %v7259_v52  ;;  %v7288_v30 = vrot.slane %v2301_v31, 5  ;;  %v7314_v18 = vld [vmem:[%s6526_s28 + $0x7c] sm:$0xf] }
  0x94   : > { %v9303_v45 = vcombine.low %v9294_v48, %v9293_v22  ;;  %v7294_v34 = vcombine.low %v2184_v2, %v2194_v46  ;;  %v7296_v0 = vcombine.low %v2208_v53, %v2218_v16  ;;  %v2307_v4 = vrot.slane %v2305_v17, 4  ;;  %v5495_v22 = vld [vmem:[%s6526_s28 + $0x78] sm:$0xf]  ;;  %9304 = vst [vmem:[#allocation5_spill] sm:$0xff] %v7314_v18 }
  0x95   : > { %6108 = vmatmul.mubr.msk.bf16.gmra.mxu1 %vm750_vm4, %v9302_v44  ;;  %v2316_v51 = vshrl.u32 %v5492_v55, 16  ;;  %v2298_v56 = vor.u32 %v2297_v60, %v2294_v43  ;;  %v2319_v23 = vshll.u32 %v5492_v55, 16  ;;  %v2325_v54 = vshll.u32 %v7272_v27, 16 }
  0x96   : > { %6111 = vmatprep.mubr.msk.bf16.mxu1 %vm750_vm4, %v9303_v45  ;;  %v2329_v21 = vshrl.u32 %v7272_v27, 16  ;;  %v7304_v48 = vcombine.low %v2232_v20, %v2242_v25  ;;  %v2256_v2 = vsel %vm6578_vm5, %v2251_v49, %v7236_v15  ;;  %v7309_v46 = vrot.slane %v2274_v35, 4  ;;  %v7323_v20 = vld [vmem:[%s6526_s28 + $0x74] sm:$0x1]  ;;  %v7341_v25 = vld [vmem:[%s6526_s28 + $0x88] sm:$0xf] }
  0x97   : > { %v7311_v53 = vrot.slane %v2287_v32, 5  ;;  %v2266_v12 = vsel %vm6578_vm5, %v2261_v3, %v2265_v59  ;;  %v7318_v55 = vrot.slane %v2284_v58, 4  ;;  %v2308_v42 = vor.u32 %v2307_v4, %v7288_v30  ;;  %9306 = vst [vmem:[#allocation7_spill] sm:$0xff] %v7341_v25 }
  0x98   : > { %v2311_v16 = vshll.u32 %v7299_v61, 16  ;;  %v9305_v15 = vcombine.low %v7132_v40, %v7145_v14  ;;  %v2318_v33 = vrot.slane %v2316_v51, 4  ;;  %v2321_v36 = vrot.slane %v2319_v23, 5  ;;  %v5498_v40 = vld [vmem:[%s6526_s28 + $0x84] sm:$0xf] }
  0x99   : > { %v2340_v49 = vshrl.u32 %v5495_v22, 16  ;;  %v2343_v59 = vshll.u32 %v5495_v22, 16  ;;  %v7332_v31 = vrot.slane %v2298_v56, 4  ;;  %v7334_v17 = vrot.slane %v2325_v54, 5  ;;  %v7354_v51 = vld [vmem:[%s6526_s28 + $0x80] sm:$0x1] }
  0x9a   : > { %6146 = vmatmul.mubr.msk.bf16.gmra.mxu0 %vm750_vm4, %v9305_v15  ;;  %v2331_v35 = vrot.slane %v2329_v21, 4  ;;  %v2349_v32 = vshll.u32 %v7314_v18, 16  ;;  %v2335_v14 = vshll.u32 %v7323_v20, 16  ;;  %v2353_v44 = vshrl.u32 %v7314_v18, 16  ;;  %9308 = vst [vmem:[#allocation6_spill] sm:$0xff] %v7354_v51 }
  0x9b   : > { %6185 = vmatprep.mubr.msk.bf16.mxu0 %vm750_vm4, %v7204_v50  ;;  %v2342_v43 = vrot.slane %v2340_v49, 4  ;;  %v2345_v60 = vrot.slane %v2343_v59, 5  ;;  %v9307_v50 = vcombine.low %v9296_v7, %v6823_v41  ;;  %v7347_v3 = vcombine.low %v2256_v2, %v2266_v12  ;;  %v5501_v2 = vld [vmem:[%s6526_s28 + $0x90] sm:$0xf]  ;;  %v6399_v49 = vld [vmem:[%s6526_s28 + $0x24] sm:$0xff]  }
  0x9c   : > { %v2280_v58 = vsel %vm6578_vm5, %v7309_v46, %v7259_v52  ;;  %v2309_v45 = vrot.slane %v2308_v42, 4  ;;  %v2313_v4 = vrot.slane %v2311_v16, 5  ;;  %v2322_v41 = vor.u32 %v2321_v36, %v2318_v33  ;;  %v6398_v46 = vld [vmem:[%s6526_s28 + $0x18] sm:$0xff]  }
  0x9d   : > { %6112 = vmatmul.mubr.msk.bf16.gmra.mxu1 %vm750_vm4, %v9307_v50  ;;  %v7357_v7 = vrot.slane %v2349_v32, 5  ;;  %v2355_v56 = vrot.slane %v2353_v44, 4  ;;  %v2364_v23 = vshrl.u32 %v5498_v40, 16  ;;  %v2290_v54 = vsel %vm6578_vm5, %v7318_v55, %v7311_v53  ;;  %v7378_v53 = vld [vmem:[%s6526_s28 + $0x8c] sm:$0x1] }
  0x9e   : > { %6151 = vmatprep.mubr.msk.bf16.mxu1 %vm750_vm4, %v6397_v9  ;;  %v2304_v52 = vsel %vm6578_vm5, %v7332_v31, %v7288_v30  ;;  %v2367_v21 = vshll.u32 %v5498_v40, 16  ;;  %v2373_v22 = vshll.u32 %v7341_v25, 16  ;;  %v2332_v12 = vor.u32 %v2331_v35, %v7334_v17  ;;  %v7375_v9 = vld [vmem:[%s6526_s28 + $0x94] sm:$0xf]  ;;  %9310 = vst [vmem:[#allocation8_spill] sm:$0xff] %v7378_v53 }
  0x9f   : > { %v7371_v42 = vrot.slane %v2335_v14, 5  ;;  %v2346_v16 = vor.u32 %v2345_v60, %v2342_v43  ;;  %v2359_v15 = vshll.u32 %v7354_v51, 16  ;;  %9309 = vst [vmem:[#allocation3_spill] sm:$0xff] %v7375_v9  ;;  %v2366_v55 = vrot.slane %v2364_v23, 4  ;;  %v7407_v23 = vld [vmem:[%s6526_s28 + $0xa0] sm:$0xf] }
  0xa0   : > { %v2369_v33 = vrot.slane %v2367_v21, 5  ;;  %v7380_v30 = vrot.slane %v2373_v22, 5  ;;  %v2377_v36 = vshrl.u32 %v7341_v25, 16  ;;  %v2314_v59 = vsel %vm6578_vm5, %v2309_v45, %v2313_v4  ;;  %v5504_v4 = vld [vmem:[%s6526_s28 + $0x9c] sm:$0xf]  ;;  %9311 = vst [vmem:[#allocation10_spill] sm:$0xff] %v7407_v23 }
  0xa1   : > { %v7388_v31 = vrot.slane %v2322_v41, 4  ;;  %v2356_v35 = vor.u32 %v2355_v56, %v7357_v7  ;;  %v2388_v32 = vshrl.u32 %v5501_v2, 16  ;;  %v2391_v43 = vshll.u32 %v5501_v2, 16  ;;  %v7416_v2 = vld [vmem:[%s6526_s28 + $0x98] sm:$0x1] }
  0xa2   : > { %6186 = vmatmul.mubr.msk.bf16.vlgmr.msra.gmra.mxu0 %vm750_vm4, %v7206_v8  ;;  %v2370_v40 = vor.u32 %v2369_v33, %v2366_v55  ;;  %v2379_v14 = vrot.slane %v2377_v36, 4  ;;  %v2397_v8 = vshll.u32 %v7375_v9, 16  ;;  %v7395_v60 = vrot.slane %v2332_v12, 4  ;;  %9312 = vst [vmem:[#allocation9_spill] sm:$0xff] %v7416_v2 }
  0xa3   : > { %6252 = vmatpush3.bf16.msra.mxu0 %v7118_v19  ;;  %6189 = vmatprep.mubr.msk.bf16.mxu0 %vm750_vm4, %v7294_v34  ;;  %v2383_v44 = vshll.u32 %v7378_v53, 16  ;;  %v2390_v50 = vrot.slane %v2388_v32, 4  ;;  %v2401_v45 = vshrl.u32 %v7375_v9, 16  ;;  %v7401_v19 = vrot.slane %v2346_v16, 4  ;;  %v5507_v32 = vld [vmem:[%s6526_s28 + $0xa8] sm:$0xf] }
  0xa4   : > { %v7403_v41 = vrot.slane %v2359_v15, 5  ;;  %v2380_v34 = vor.u32 %v2379_v14, %v7380_v30  ;;  %v2393_v56 = vrot.slane %v2391_v43, 5  ;;  %v7411_v21 = vrot.slane %v2356_v35, 4  ;;  %v7439_v14 = vld [vmem:[%s6526_s28 + $0xac] sm:$0xf]  ;;  %v6401_v43 = vld [vmem:[%s6526_s28 + $0x3c] sm:$0xff]  }
  0xa5   : > { %6152 = vmatmul.mubr.msk.bf16.vlgmr.msra.gmra.mxu1 %vm750_vm4, %v6398_v46  ;;  %v7413_v22 = vrot.slane %v2370_v40, 4  ;;  %v7418_v46 = vrot.slane %v2397_v8, 5  ;;  %v2403_v12 = vrot.slane %v2401_v45, 4  ;;  %v7420_v16 = vcombine.low %v2280_v58, %v2290_v54  ;;  %v6400_v40 = vld [vmem:[%s6526_s28 + $0x30] sm:$0xff]   ;;  %9313 = vst [vmem:[#allocation11_spill] sm:$0xff] %v7439_v14  ;;  %v6402_v9 = vld [vmem:[%s6526_s28 + $0x48] sm:$0xff]  }
  0xa6   : > { %6218 = vmatpush3.bf16.msra.mxu1 %v7099_v62  ;;  %6155 = vmatprep.mubr.msk.bf16.mxu1 %vm750_vm4, %v6399_v49  ;;  %v2394_v15 = vor.u32 %v2393_v56, %v2390_v50  ;;  %v2412_v55 = vshrl.u32 %v5504_v4, 16  ;;  %v2415_v33 = vshll.u32 %v5504_v4, 16  ;;  %v7422_v62 = vcombine.low %v2304_v52, %v2314_v59  ;;  %v7461_v45 = vld [vmem:[%s6526_s28 + $0xa4] sm:$0x1] }
  0xa7   : > { %v7428_v49 = vrot.slane %v2383_v44, 5  ;;  %v2421_v35 = vshll.u32 %v7407_v23, 16  ;;  %v7433_v58 = vrot.slane %v2380_v34, 4  ;;  %v2404_v54 = vor.u32 %v2403_v12, %v7418_v46  ;;  %9314 = vst [vmem:[#allocation12_spill] sm:$0xff] %v7461_v45  ;;  %v7468_v12 = vld [vmem:[%s6526_s28 + $0xb0] sm:$0x1] }
  0xa8   : > { %v2407_v52 = vshll.u32 %v7416_v2, 16  ;;  %v2425_v59 = vshrl.u32 %v7407_v23, 16  ;;  %v7465_v4 = vrot.slane %v2394_v15, 4  ;;  %v2414_v34 = vrot.slane %v2412_v55, 4  ;;  %9315 = vst [vmem:[#allocation4_spill] sm:$0xff] %v7468_v12 }
  0xa9   : > { %v2417_v56 = vrot.slane %v2415_v33, 5  ;;  %v2436_v44 = vshrl.u32 %v5507_v32, 16  ;;  %v7470_v36 = vrot.slane %v2421_v35, 5  ;;  %v2439_v8 = vshll.u32 %v5507_v32, 16  ;;  %v5510_v23 = vld [vmem:[%s6526_s28 + $0xb4] sm:$0xf] }
  0xaa   : > { %6190 = vmatmul.mubr.msk.bf16.gmra.mxu0 %vm750_vm4, %v7296_v0  ;;  %v2427_v50 = vrot.slane %v2425_v59, 4  ;;  %v2445_v0 = vshll.u32 %v7439_v14, 16  ;;  %v7479_v15 = vrot.slane %v2404_v54, 4  ;;  %v2409_v55 = vrot.slane %v2407_v52, 5  ;;  %v7482_v35 = vld [vmem:[%s6526_s28 + $0xb8] sm:$0xf] }
  0xab   : > { %6193 = vmatprep.mubr.msk.bf16.mxu0 %vm750_vm4, %v7304_v48  ;;  %v2386_v48 = vsel %vm6578_vm5, %v7433_v58, %v7428_v49  ;;  %v2438_v33 = vrot.slane %v2436_v44, 4  ;;  %9316 = vst [vmem:[#allocation2_spill] sm:$0xff] %v7482_v35  ;;  %v2431_v32 = vshll.u32 %v7461_v45, 16  ;;  %v2441_v59 = vrot.slane %v2439_v8, 5  ;;  %v7494_v54 = vld [vmem:[%s6526_s28 + $0xbc] sm:$0x1] }
  0xac   : > { %v7486_v2 = vrot.slane %v2445_v0, 5  ;;  %v2400_v49 = vsel %vm6578_vm5, %v7465_v4, %v7418_v46  ;;  %v2418_v58 = vor.u32 %v2417_v56, %v2414_v34  ;;  %v2460_v52 = vshrl.u32 %v5510_v23, 16  ;;  %v7503_v4 = vld [vmem:[%s6526_s28 + $0xc4] sm:$0xf] }
  0xad   : > { %6156 = vmatmul.mubr.msk.bf16.gmra.mxu1 %vm750_vm4, %v6400_v40  ;;  %v2449_v40 = vshrl.u32 %v7439_v14, 16  ;;  %v2463_v44 = vshll.u32 %v5510_v23, 16  ;;  %v2455_v8 = vshll.u32 %v7468_v12, 16  ;;  %v2469_v0 = vshll.u32 %v7482_v35, 16  ;;  %v5513_v14 = vld [vmem:[%s6526_s28 + $0xc0] sm:$0xf] }
  0xae   : > { %6159 = vmatprep.mubr.msk.bf16.mxu1 %vm750_vm4, %v6401_v43  ;;  %v2428_v43 = vor.u32 %v2427_v50, %v7470_v36  ;;  %v2442_v53 = vor.u32 %v2441_v59, %v2438_v33  ;;  %v2462_v25 = vrot.slane %v2460_v52, 4  ;;  %v2473_v46 = vshrl.u32 %v7482_v35, 16  ;;  %v6403_v23 = vld [vmem:[%s6526_s28 + $0x54] sm:$0xff]  }
  0xaf   : > { %v2451_v45 = vrot.slane %v2449_v40, 4  ;;  %v2465_v51 = vrot.slane %v2463_v44, 5  ;;  %v2410_v50 = vsel %vm6578_vm5, %v7479_v15, %v2409_v55  ;;  %v2433_v34 = vrot.slane %v2431_v32, 5  ;;  %v7521_v32 = vld [vmem:[%s6526_s28 + $0xc8] sm:$0x1] }
  0xb0   : > { %v7512_v40 = vrot.slane %v2469_v0, 5  ;;  %v2475_v59 = vrot.slane %v2473_v46, 4  ;;  %v2479_v52 = vshll.u32 %v7494_v54, 16  ;;  %v2484_v44 = vshrl.u32 %v5513_v14, 16 }
  0xb1   : > { %v2452_v56 = vor.u32 %v2451_v45, %v7486_v2  ;;  %v2466_v33 = vor.u32 %v2465_v51, %v2462_v25  ;;  %v2429_v35 = vrot.slane %v2428_v43, 4  ;;  %v2487_v12 = vshll.u32 %v5513_v14, 16 }
  0xb2   : > { %6194 = vmatmul.mubr.msk.bf16.gmra.mxu0 %vm750_vm4, %v7347_v3  ;;  %v2419_v3 = vrot.slane %v2418_v58, 4  ;;  %v2493_v18 = vshll.u32 %v7503_v4, 16  ;;  %v2443_v15 = vrot.slane %v2442_v53, 4  ;;  %v2457_v55 = vrot.slane %v2455_v8, 5 }
  0xb3   : > { %6197 = vmatprep.mubr.msk.bf16.mxu0 %vm750_vm4, %v7420_v16  ;;  %v2476_v45 = vor.u32 %v2475_v59, %v7512_v40  ;;  %v2486_v16 = vrot.slane %v2484_v44, 4  ;;  %v2453_v25 = vrot.slane %v2452_v56, 4  ;;  %v2489_v51 = vrot.slane %v2487_v12, 5  ;;  %v5552_v44 = vld [vmem:[%s6526_s28 + $0x30] sm:$0xe] }
  0xb4   : > { %v7524_v0 = vrot.slane %v2493_v18, 5  ;;  %v2497_v14 = vshrl.u32 %v7503_v4, 16  ;;  %v9317_v53 = vsel %vm6578_vm5, %v7395_v60, %v7371_v42  ;;  %v9318_v58 = vsel %vm6578_vm5, %v7388_v31, %v7334_v17  ;;  %v6404_v31 = vld [vmem:[%s6526_s28 + $0x60] sm:$0xff]  }
  0xb5   : > { %6160 = vmatmul.mubr.msk.bf16.gmra.mxu1 %vm750_vm4, %v6402_v9  ;;  %v5727_v9 = vld [vmem:[%s9236_s1 + $0xe] sm:$0x3]  ;;  %v5525_v12 = vcombine.low %v9318_v58, %v9317_v53  ;;  %v2467_v18 = vrot.slane %v2466_v33, 4  ;;  %v2477_v43 = vrot.slane %v2476_v45, 4  ;;  %v2481_v8 = vrot.slane %v2479_v52, 5 }
  0xb6   : > { %6163 = vmatprep.mubr.msk.bf16.mxu1 %vm750_vm4, %v6403_v23  ;;  %v9319_v46 = vsel %vm6578_vm5, %v7411_v21, %v7403_v41  ;;  %v9320_v42 = vsel %vm6578_vm5, %v7401_v19, %v7357_v7  ;;  %v2490_v23 = vor.u32 %v2489_v51, %v2486_v16  ;;  %v2499_v56 = vrot.slane %v2497_v14, 4  ;;  %v5792_v19 = vld [vmem:[%s9236_s1 + $0x10] sm:$0x3]  ;;  %v5551_v21 = vld [vmem:[%s6526_s28 + $0x24] sm:$0xe] }
  0xb7   : > { %v5526_v60 = vcombine.low %v9320_v42, %v9319_v46  ;;  %v2503_v17 = vshll.u32 %v7521_v32, 16  ;;  %v9321_v33 = vsel %vm6578_vm5, %v7413_v22, %v7380_v30  ;;  %v7557_v52 = vcombine.low %v2400_v49, %v2410_v50  ;;  %v6405_v30 = vld [vmem:[%s6526_s28 + $0x6c] sm:$0xff]   ;;  %v5553_v14 = vld [vmem:[%s6526_s28 + $0x3c] sm:$0xe] }
  0xb8   : > { %v5527_v59 = vcombine.low %v9321_v33, %v2386_v48  ;;  %v2424_v41 = vsel %vm6578_vm5, %v2419_v3, %v7470_v36  ;;  %v7563_v7 = vand.u32 %v5727_v9, %v9298_v1  ;;  %v2434_v22 = vsel %vm6578_vm5, %v2429_v35, %v2433_v34  ;;  %v7581_v50 = vld [vmem:[%s6526_s28 + $0xc] sm:$0xe] }
  0xb9   : > { %v2448_v36 = vsel %vm6578_vm5, %v2443_v15, %v7486_v2  ;;  %v2458_v48 = vsel %vm6578_vm5, %v2453_v25, %v2457_v55  ;;  %v2500_v49 = vor.u32 %v2499_v56, %v7524_v0  ;;  %v2482_v35 = vsel %vm6578_vm5, %v2477_v43, %v2481_v8  ;;  %v5555_v56 = vld [vmem:[%s6526_s28 + $0x54] sm:$0xe] }
  0xba   : > { %6198 = vmatmul.mubr.msk.bf16.gmra.mxu0 %vm750_vm4, %v7422_v62  ;;  %v2472_v62 = vsel %vm6578_vm5, %v2467_v18, %v7512_v40  ;;  %v7589_v34 = vrot.slane %v2490_v23, 4  ;;  %v2867_v2 = vrot.slane %v7044_v47, 5  ;;  %6285 = vmatprep.subr.bf16.mxu1 %v7563_v7  ;;  %v7596_v15 = vrot.slane %v2503_v17, 5  ;;  %v6406_v17 = vld [vmem:[%s6526_s28 + $0x78] sm:$0xff]  }
  0xbb   : > { %6201 = vmatprep.mubr.msk.bf16.mxu0 %vm750_vm4, %v5525_v12  ;;  %v7594_v3 = vrot.slane %v2500_v49, 4  ;;  %v7599_v55 = vand.u32 %v5792_v19, %v9298_v1  ;;  %v5567_v45 = vrot.slane %v5551_v21, 9  ;;  %v7602_v40 = vcombine.low %v2424_v41, %v2434_v22  ;;  %v5554_v12 = vld [vmem:[%s6526_s28 + $0x48] sm:$0xe]  ;;  %v6413_v47 = vld [vmem:[%s6526_s28 + $0x18] sm:$0xff]  }
  0xbc   : > { %v7604_v16 = vcombine.low %v2448_v36, %v2458_v48  ;;  %v5565_v25 = vrot.slane %v7581_v50, 9  ;;  %v2881_v51 = vrot.slane %v7122_v10, 5  ;;  %v7610_v9 = vcombine.low %v2472_v62, %v2482_v35  ;;  %v6407_v21 = vld [vmem:[%s6526_s28 + $0x84] sm:$0xff]   ;;  %v5556_v36 = vld [vmem:[%s6526_s28 + $0x60] sm:$0xe] }
  0xbd   : > { %6164 = vmatmul.mubr.msk.bf16.gmra.mxu1 %vm750_vm4, %v6404_v31  ;;  %v2870_v1 = vrot.slane %v7074_v57, 5  ;;  %6319 = vmatprep.subr.bf16.mxu0 %v7599_v55  ;;  %v2884_v53 = vrot.slane %v7136_v26, 5  ;;  %v5568_v58 = vrot.slane %v5552_v44, 9  ;;  %v2496_v10 = vsel %vm6578_vm5, %v7589_v34, %v7524_v0 }
  0xbe   : > { %6167 = vmatprep.mubr.msk.bf16.mxu1 %vm750_vm4, %v6405_v30  ;;  %v7622_v18 = vrot.slane %v2867_v2, 4  ;;  %v7626_v43 = vsel %vm6844_vm8, %v5567_v45, %v2881_v51  ;;  %v2883_v8 = vrot.slane %v2881_v51, 4  ;;  %v2506_v26 = vsel %vm6578_vm5, %v7594_v3, %v7596_v15  ;;  %v6412_v15 = vld [vmem:[%s6526_s28 + $0xc0] sm:$0xff]  }
  0xbf   : > { %v2888_v46 = vrot.slane %v7149_v5, 5  ;;  %v2891_v42 = vrot.slane %v7168_v6, 5  ;;  %v5569_v23 = vrot.slane %v5553_v14, 9  ;;  %v2895_v33 = vrot.slane %v7171_v39, 5  ;;  %v5558_v14 = vld [vmem:[%s6526_s28 + $0x78] sm:$0xe] }
  0xc0   : > { %v7638_v31 = vsel %vm6844_vm8, %v2883_v8, %v2884_v53  ;;  %v2898_v41 = vrot.slane %v7199_v37, 5  ;;  %v5570_v19 = vrot.slane %v5554_v12, 9  ;;  %v2902_v22 = vrot.slane %v7186_v13, 5 }
  0xc1   : > { %v5584_v5 = vcombine.low %v7626_v43, %v7638_v31  ;;  %v7648_v6 = vsel %vm6844_vm8, %v5568_v58, %v2888_v46  ;;  %v2890_v30 = vrot.slane %v2888_v46, 4  ;;  %v7655_v39 = vsel %vm6844_vm8, %v5569_v23, %v2895_v33  ;;  %v5559_v23 = vld [vmem:[%s6526_s28 + $0x84] sm:$0xe] }
  0xc2   : > { %6202 = vmatmul.mubr.msk.bf16.gmra.mxu0 %vm750_vm4, %v5526_v60  ;;  %v2897_v37 = vrot.slane %v2895_v33, 4  ;;  %v2905_v60 = vrot.slane %v7214_v24, 5  ;;  %v5571_v48 = vrot.slane %v5555_v56, 9  ;;  %v7664_v62 = vsel %vm6844_vm8, %v5570_v19, %v2902_v22  ;;  %v6408_v19 = vld [vmem:[%s6526_s28 + $0x90] sm:$0xff]  }
  0xc3   : > { %6205 = vmatprep.mubr.msk.bf16.mxu0 %vm750_vm4, %v5527_v59  ;;  %v7660_v49 = vsel %vm6844_vm8, %v2890_v30, %v2891_v42  ;;  %v2904_v13 = vrot.slane %v2902_v22, 4  ;;  %v2909_v35 = vrot.slane %v7219_v29, 5  ;;  %v5557_v59 = vld [vmem:[%s6526_s28 + $0x6c] sm:$0xe]  ;;  %v2912_v45 = vrot.slane %v7246_v28, 5  ;;  %v9322_v30 = vld [vmem:[#allocation5_spill] sm:$0xff] }
  0xc4   : > { %v5585_v44 = vcombine.low %v7648_v6, %v7660_v49  ;;  %v7673_v24 = vsel %vm6844_vm8, %v2897_v37, %v2898_v41  ;;  %v5572_v51 = vrot.slane %v5556_v36, 9  ;;  %v2916_v8 = vrot.slane %v7250_v11, 5  ;;  %v5560_v36 = vld [vmem:[%s6526_s28 + $0x90] sm:$0xe]  ;;  %v9332_v28 = vld [vmem:[#allocation2_spill] sm:$0xff] }
  0xc5   : > { %6168 = vmatmul.mubr.msk.bf16.gmra.mxu1 %vm750_vm4, %v6406_v17  ;;  %v5586_v29 = vcombine.low %v7655_v39, %v7673_v24  ;;  %v7682_v53 = vsel %vm6844_vm8, %v2904_v13, %v2905_v60  ;;  %v7686_v58 = vsel %vm6844_vm8, %v5571_v48, %v2909_v35  ;;  %v2911_v12 = vrot.slane %v2909_v35, 4  ;;  %v9323_v60 = vld [vmem:[#allocation6_spill] sm:$0xff] }
  0xc6   : > { %6171 = vmatprep.mubr.msk.bf16.mxu1 %vm750_vm4, %v6407_v21  ;;  %v2919_v46 = vrot.slane %v7299_v61, 5  ;;  %v5573_v42 = vrot.slane %v5557_v59, 9  ;;  %v2923_v17 = vrot.slane %v7272_v27, 5  ;;  %v2926_v33 = vrot.slane %v7323_v20, 5  ;;  %v6409_v27 = vld [vmem:[%s6526_s28 + $0x9c] sm:$0xff]   ;;  %v6410_v21 = vld [vmem:[%s6526_s28 + $0xa8] sm:$0xff]  }
  0xc7   : > { %v7695_v56 = vsel %vm6844_vm8, %v2911_v12, %v2912_v45  ;;  %v5574_v41 = vrot.slane %v5558_v14, 9  ;;  %v7704_v11 = vsel %vm6844_vm8, %v5572_v51, %v2916_v8  ;;  %v2918_v61 = vrot.slane %v2916_v8, 4  ;;  %v9324_v45 = vld [vmem:[#allocation7_spill] sm:$0xff]  ;;  %v5561_v14 = vld [vmem:[%s6526_s28 + $0x9c] sm:$0xe] }
  0xc8   : > { %v2930_v22 = vrot.slane %v9322_v30, 5  ;;  %v7713_v20 = vsel %vm6844_vm8, %v5573_v42, %v2923_v17  ;;  %v2925_v37 = vrot.slane %v2923_v17, 4  ;;  %v2933_v48 = vrot.slane %v9323_v60, 5  ;;  %v5564_v12 = vld [vmem:[%s6526_s28 + $0xc0] sm:$0xe] }
  0xc9   : > { %v5575_v13 = vrot.slane %v5559_v23, 9  ;;  %v7720_v35 = vsel %vm6844_vm8, %v2918_v61, %v2919_v46  ;;  %v2937_v51 = vrot.slane %v9324_v45, 5  ;;  %v5576_v46 = vrot.slane %v5560_v36, 9  ;;  %v5562_v23 = vld [vmem:[%s6526_s28 + $0xa8] sm:$0xe]  ;;  %v9327_v36 = vld [vmem:[#allocation9_spill] sm:$0xff] }
  0xca   : > { %6206 = vmatmul.mubr.msk.bf16.gmra.mxu0 %vm750_vm4, %v7557_v52  ;;  %v7724_v52 = vsel %vm6844_vm8, %v5574_v41, %v2930_v22  ;;  %v2932_v59 = vrot.slane %v2930_v22, 4  ;;  %v7732_v8 = vsel %vm6844_vm8, %v2925_v37, %v2926_v33  ;;  %v2947_v37 = vrot.slane %v9327_v36, 5  ;;  %v5563_v45 = vld [vmem:[%s6526_s28 + $0xb4] sm:$0xe] }
  0xcb   : > { %6209 = vmatprep.mubr.msk.bf16.mxu0 %vm750_vm4, %v7602_v40  ;;  %v9325_v40 = vld [vmem:[#allocation8_spill] sm:$0xff]  ;;  %v7745_v61 = vsel %vm6844_vm8, %v5575_v13, %v2937_v51  ;;  %v2939_v33 = vrot.slane %v2937_v51, 4  ;;  %v5577_v60 = vrot.slane %v5561_v14, 9  ;;  %v9328_v13 = vld [vmem:[#allocation10_spill] sm:$0xff]  ;;  %v5578_v17 = vrot.slane %v5562_v23, 9  ;;  %v9330_v14 = vld [vmem:[#allocation11_spill] sm:$0xff] }
  0xcc   : > { %v2940_v42 = vrot.slane %v9325_v40, 5  ;;  %v7741_v41 = vsel %vm6844_vm8, %v2932_v59, %v2933_v48  ;;  %v2951_v59 = vrot.slane %v9328_v13, 5  ;;  %v9329_v51 = vld [vmem:[#allocation12_spill] sm:$0xff]  ;;  %v2958_v30 = vrot.slane %v9330_v14, 5 }
  0xcd   : > { %6172 = vmatmul.mubr.msk.bf16.gmra.mxu1 %vm750_vm4, %v6408_v19  ;;  %v9326_v19 = vld [vmem:[#allocation3_spill] sm:$0xff]  ;;  %v2954_v40 = vrot.slane %v9329_v51, 5  ;;  %v9331_v13 = vld [vmem:[#allocation4_spill] sm:$0xff]  ;;  %v5579_v23 = vrot.slane %v5563_v45, 9  ;;  %v2871_v0 = vsel %vm6844_vm8, %v7622_v18, %v2870_v1  ;;  %v6433_v18 = vld [vmem:[%s6526_s28 + $0x20] sm:$0x1] }
  0xce   : > { %6175 = vmatprep.mubr.msk.bf16.mxu1 %vm750_vm4, %v6409_v27  ;;  %v2944_v22 = vrot.slane %v9326_v19, 5  ;;  %v7755_v48 = vsel %vm6844_vm8, %v2939_v33, %v2940_v42  ;;  %v7770_v42 = vsel %vm6844_vm8, %v5577_v60, %v2951_v59  ;;  %v2953_v33 = vrot.slane %v2951_v59, 4  ;;  %v6411_v27 = vld [vmem:[%s6526_s28 + $0xb4] sm:$0xff]  }
  0xcf   : > { %v2961_v51 = vrot.slane %v9331_v13, 5  ;;  %v2960_v14 = vrot.slane %v2958_v30, 4  ;;  %v2965_v60 = vrot.slane %v9332_v28, 5  ;;  %v5580_v59 = vrot.slane %v5564_v12, 9 }
  0xd0   : > { %v7763_v19 = vsel %vm6844_vm8, %v5576_v46, %v2944_v22  ;;  %v2946_v36 = vrot.slane %v2944_v22, 4  ;;  %v7782_v22 = vsel %vm6844_vm8, %v5578_v17, %v2958_v30  ;;  %v2972_v12 = vrot.slane %v7503_v4, 5 }
  0xd1   : > { %v7798_v28 = vsel %vm6844_vm8, %v2960_v14, %v2961_v51  ;;  %v2967_v30 = vrot.slane %v2965_v60, 4  ;;  %v2868_v4 = vsel %vm6844_vm8, %v5565_v25, %v2867_v2  ;;  %v6415_v14 = vld [vmem:[%s6526_s28 + $0x30] sm:$0xff]  }
  0xd2   : > { %6210 = vmatmul.mubr.msk.bf16.gmra.mxu0 %vm750_vm4, %v7604_v16  ;;  %v7778_v46 = vsel %vm6844_vm8, %v2946_v36, %v2947_v37  ;;  %v7791_v16 = vsel %vm6844_vm8, %v2953_v33, %v2954_v40  ;;  %v2968_v37 = vrot.slane %v7494_v54, 5  ;;  %v2975_v40 = vrot.slane %v7521_v32, 5  ;;  %v5550_v32 = vld [vmem:[%s6526_s28 + $0x18] sm:$0xe] }
  0xd3   : > { %6213 = vmatprep.mubr.msk.bf16.mxu0 %vm750_vm4, %v7610_v9  ;;  %v7802_v9 = vsel %vm6844_vm8, %v5579_v23, %v2965_v60  ;;  %v7842_v34 = vsel %vm6844_vm8, %v5580_v59, %v2972_v12  ;;  %v2974_v2 = vrot.slane %v2972_v12, 4  ;;  %v5566_v25 = vrot.slane %v5550_v32, 9  ;;  %v6414_v23 = vld [vmem:[%s6526_s28 + $0x24] sm:$0xff]   ;;  %v5679_v60 = vld [vmem:[%s6526_s28 + $0x18] sm:$0xf] }
  0xd4   : > { %v7830_v3 = vsel %vm6844_vm8, %v2967_v30, %v2968_v37  ;;  %v5582_v1 = vcombine.low %v2868_v4, %v2871_v0  ;;  %v5680_v59 = vld [vmem:[%s6526_s28 + $0x1c] sm:$0xf]  ;;  %v5682_v30 = vld [vmem:[%s6526_s28 + $0x24] sm:$0xf]  ;;  %v3679_v12 = vshrl.u32 %v5679_v60, 16 }
  0xd5   : > { %6176 = vmatmul.mubr.msk.bf16.gmra.mxu1 %vm750_vm4, %v6410_v21  ;;  %v5532_v21 = vcombine.low %v2496_v10, %v2506_v26  ;;  %v7847_v57 = vsel %vm6844_vm8, %v2974_v2, %v2975_v40  ;;  %v2877_v26 = vrot.slane %v6433_v18, 5  ;;  %v3682_v40 = vshll.u32 %v5679_v60, 16  ;;  %v6417_v2 = vld [vmem:[%s6526_s28 + $0x48] sm:$0xff]  }
  0xd6   : > { %6179 = vmatprep.mubr.msk.bf16.mxu1 %vm750_vm4, %v6411_v27  ;;  %v6432_v27 = vld [vmem:[%s6526_s28 + $0x1c] sm:$0xf]  ;;  %v3688_v4 = vshll.u32 %v5680_v59, 16  ;;  %v3692_v32 = vshrl.u32 %v5680_v59, 16 }
  0xd7   : > { %v2874_v36 = vrot.slane %v6432_v27, 5  ;;  %v3703_v27 = vshrl.u32 %v5682_v30, 16 }
  0xd8   : > { %v3694_v18 = vrot.slane %v3692_v32, 4 }
  0xd9   : > { %v2876_v10 = vrot.slane %v2874_v36, 4  ;;  %v2875_v13 = vsel %vm6844_vm8, %v5566_v25, %v2874_v36  ;;  %v3706_v36 = vshll.u32 %v5682_v30, 16  ;;  %v3681_v25 = vrot.slane %v3679_v12, 4 }
  0xda   : > { %6214 = vmatmul.mubr.msk.bf16.gmra.mxu0 %vm750_vm4, %v5532_v21  ;;  %v7869_v21 = vld [vmem:[%s6526_s28 + $0x28] sm:$0xf]  ;;  %v3705_v43 = vrot.slane %v3703_v27, 4 }
  0xdb   : > { %6253 = vmatprep.mubr.msk.bf16.mxu0 %vm750_vm4, %v6413_v47  ;;  %v2878_v51 = vsel %vm6844_vm8, %v2876_v10, %v2877_v26  ;;  %v3712_v0 = vshll.u32 %v7869_v21, 16  ;;  %v3716_v47 = vshrl.u32 %v7869_v21, 16  ;;  %v7882_v10 = vrot.slane %v3688_v4, 5 }
  0xdc   : > { %v5583_v37 = vcombine.low %v2875_v13, %v2878_v51  ;;  %v4422_v26 = vrot.slane %v5680_v59, 5  ;;  %v7886_v13 = vld [vmem:[%s6526_s28 + $0x2c] sm:$0x1]  ;;  %v3708_v31 = vrot.slane %v3706_v36, 5  ;;  %v7896_v59 = vld [vmem:[%s6526_s28 + $0x34] sm:$0xf] }
  0xdd   : > { %6180 = vmatmul.mubr.msk.bf16.gmra.mxu1 %vm750_vm4, %v6412_v15  ;;  %v5681_v15 = vld [vmem:[%s6526_s28 + $0x20] sm:$0x1]  ;;  %v7891_v51 = vrot.slane %v3712_v0, 5  ;;  %v3695_v12 = vor.u32 %v3694_v18, %v7882_v10  ;;  %v3722_v32 = vshll.u32 %v7886_v13, 16  ;;  %v4429_v0 = vrot.slane %v7869_v21, 5 }
  0xde   : > { %6219 = vmatprep.mubr.msk.bf16.mxu1 %vm750_vm4, %v5582_v1  ;;  %v3684_v1 = vrot.slane %v3682_v40, 5  ;;  %v4424_v40 = vrot.slane %v4422_v26, 4  ;;  %v4425_v4 = vrot.slane %v5681_v15, 5  ;;  %v3709_v36 = vor.u32 %v3708_v31, %v3705_v43  ;;  %v5688_v31 = vld [vmem:[%s6526_s28 + $0x3c] sm:$0xf] }
  0xdf   : > { %v3696_v24 = vrot.slane %v3695_v12, 4  ;;  %v4431_v33 = vrot.slane %v4429_v0, 4  ;;  %v7935_v12 = vld [vmem:[%s6526_s28 + $0x38] sm:$0x1] }
  0xe0   : > { %v3685_v60 = vor.u32 %v3684_v1, %v3681_v25  ;;  %v3740_v25 = vshrl.u32 %v7896_v59, 16  ;;  %v6419_v1 = vld [vmem:[%s6526_s28 + $0x60] sm:$0xff]  }
  0xe2   : > { %6254 = vmatmul.mubr.msk.bf16.vlgmr.msra.gmra.mxu0 %vm750_vm4, %v6414_v23  ;;  %v3718_v23 = vrot.slane %v3716_v47, 4  ;;  %v3686_v18 = vrot.slane %v3685_v60, 4  ;;  %v4432_v60 = vrot.slane %v7886_v13, 5 }
  0xe3   : > { %6320 = vmatpush3.bf16.msra.mxu0 %v7599_v55  ;;  %6257 = vmatprep.mubr.msk.bf16.mxu0 %vm750_vm4, %v6415_v14  ;;  %v6416_v55 = vld [vmem:[%s6526_s28 + $0x3c] sm:$0xff]   ;;  %v5685_v14 = vld [vmem:[%s6526_s28 + $0x30] sm:$0xf] }
  0xe4   : > { %v3727_v47 = vshrl.u32 %v5685_v14, 16  ;;  %v3719_v6 = vor.u32 %v3718_v23, %v7891_v51  ;;  %v3730_v49 = vshll.u32 %v5685_v14, 16  ;;  %v3710_v14 = vrot.slane %v3709_v36, 4 }
  0xe5   : > { %6220 = vmatmul.mubr.msk.bf16.vlgmr.msra.gmra.mxu1 %vm750_vm4, %v5583_v37  ;;  %v3698_v37 = vshll.u32 %v5681_v15, 16  ;;  %v3751_v36 = vshrl.u32 %v5688_v31, 16  ;;  %v3691_v13 = vsel %vm6578_vm5, %v3686_v18, %v7882_v10  ;;  %v3746_v18 = vshll.u32 %v7935_v12, 16 }
  0xe6   : > { %6286 = vmatpush3.bf16.msra.mxu1 %v7563_v7  ;;  %6223 = vmatprep.mubr.msk.bf16.mxu1 %vm750_vm4, %v5584_v5  ;;  %v5760_v7 = vld [vmem:[%s6526_s28 + $0x18] sm:$0xe]  ;;  %v7889_v5 = vpop.f32.mrf.mxu0  ;;  %v3715_v10 = vsel %vm6578_vm5, %v3710_v14, %v7891_v51  ;;  %v4436_v14 = vrot.slane %v7896_v59, 5 }
  0xe7   : > { %v5776_v30 = vrot.slane %v5760_v7, 9  ;;  %v3700_v21 = vrot.slane %v3698_v37, 5  ;;  %v3724_v7 = vrot.slane %v3722_v32, 5  ;;  %v3729_v37 = vrot.slane %v3727_v47, 4 }
  0xe8   : > { %v7913_v15 = vpop.f32.mrf.mxu0  ;;  %v3742_v32 = vrot.slane %v3740_v25, 4  ;;  %v8003_v17 = vrot.slane %v3746_v18, 5  ;;  %v4438_v45 = vrot.slane %v4436_v14, 4 }
  0xe9   : > { %v7921_v39 = vsel %vm6844_vm8, %v5776_v30, %v4422_v26  ;;  %v3720_v30 = vrot.slane %v3719_v6, 4  ;;  %v3701_v47 = vsel %vm6578_vm5, %v3696_v24, %v3700_v21  ;;  %v7948_v6 = vld [vmem:[%s6526_s28 + $0x40] sm:$0xf]  ;;  %v9337_v21 = vcombine.low %v7686_v58, %v7695_v56  ;;  %v6420_v24 = vld [vmem:[%s6526_s28 + $0x6c] sm:$0xff]  }
  0xea   : > { %6258 = vmatmul.mubr.msk.bf16.gmra.mxu0 %vm750_vm4, %v6416_v55  ;;  %v5761_v55 = vld [vmem:[%s6526_s28 + $0x24] sm:$0xe]  ;;  %v7932_v26 = vpop.f32.mrf.mxu0  ;;  %v3760_v58 = vshll.u32 %v7948_v6, 16  ;;  %v3764_v56 = vshrl.u32 %v7948_v6, 16 }
  0xeb   : > { %6261 = vmatprep.mubr.msk.bf16.mxu0 %vm750_vm4, %v6417_v2  ;;  %v7904_v27 = vpop.f32.mrf.mxu1  ;;  %v6418_v2 = vld [vmem:[%s6526_s28 + $0x54] sm:$0xff]   ;;  %v5777_v43 = vrot.slane %v5761_v55, 9  ;;  %v3754_v55 = vshll.u32 %v5688_v31, 16  ;;  %v5762_v31 = vld [vmem:[%s6526_s28 + $0x30] sm:$0xe] }
  0xec   : > { %9333 = vst [vmem:[#allocation5_spill] sm:$0xff] %v7904_v27  ;;  %v7977_v51 = vpop.f32.mrf.mxu0 }
  0xed   : > { %6224 = vmatmul.mubr.msk.bf16.gmra.mxu1 %vm750_vm4, %v5585_v44  ;;  %v3736_v44 = vshll.u32 %v7896_v59, 16  ;;  %v7928_v23 = vpop.f32.mrf.mxu1  ;;  %v7961_v25 = vsel %vm6844_vm8, %v5777_v43, %v4429_v0  ;;  %v3725_v0 = vsel %vm6578_vm5, %v3720_v30, %v3724_v7  ;;  %v7991_v30 = vcombine.low %v3691_v13, %v3701_v47  ;;  %v8007_v47 = vld [vmem:[%s6526_s28 + $0x58] sm:$0xf] }
  0xee   : > { %6227 = vmatprep.mubr.msk.bf16.mxu1 %vm750_vm4, %v5586_v29  ;;  %v7925_v29 = vsel %vm6844_vm8, %v4424_v40, %v4425_v4  ;;  %9334 = vst [vmem:[#allocation6_spill] sm:$0xff] %v7928_v23  ;;  %v3732_v40 = vrot.slane %v3730_v49, 5  ;;  %v9335_v49 = vcombine.low %v7664_v62, %v7682_v53  ;;  %v5691_v62 = vld [vmem:[%s6526_s28 + $0x48] sm:$0xf]  ;;  %v7970_v53 = vld [vmem:[%s6526_s28 + $0x4c] sm:$0xf]  ;;  %v7993_v59 = vcombine.low %v3715_v10, %v3725_v0 }
  0xef   : > { %v7937_v4 = vrot.slane %v3736_v44, 5  ;;  %v7954_v44 = vpop.f32.mrf.mxu1  ;;  %v3778_v50 = vshll.u32 %v5691_v62, 16  ;;  %v3784_v54 = vshll.u32 %v7970_v53, 16  ;;  %v3788_v7 = vshrl.u32 %v7970_v53, 16  ;;  %v8013_v0 = vld [vmem:[%s6526_s28 + $0x44] sm:$0x1] }
  0xf0   : > { %9336 = vst [vmem:[#allocation7_spill] sm:$0xff] %v7954_v44  ;;  %v3733_v43 = vor.u32 %v3732_v40, %v3729_v37  ;;  %v4439_v13 = vrot.slane %v7935_v12, 5  ;;  %v5763_v40 = vld [vmem:[%s6526_s28 + $0x3c] sm:$0xe]  ;;  %v9340_v23 = vcombine.low %v7704_v11, %v7720_v35 }
  0xf1   : > { %v7989_v37 = vpop.f32.mrf.mxu1  ;;  %v8018_v44 = vrot.slane %v3784_v54, 5  ;;  %v3790_v12 = vrot.slane %v3788_v7, 4  ;;  %v9342_v54 = vcombine.low %v7713_v20, %v7732_v8  ;;  %v4443_v20 = vrot.slane %v7948_v6, 5  ;;  %v6423_v8 = vld [vmem:[%s6526_s28 + $0x90] sm:$0xff]   ;;  %v5697_v6 = vld [vmem:[%s6526_s28 + $0x60] sm:$0xf] }
  0xf2   : > { %6262 = vmatmul.mubr.msk.bf16.gmra.mxu0 %vm750_vm4, %v6418_v2  ;;  %v3756_v2 = vrot.slane %v3754_v55, 5  ;;  %9338 = vst [vmem:[#allocation8_spill] sm:$0xff] %v7989_v37  ;;  %v3780_v37 = vrot.slane %v3778_v50, 5  ;;  %v6422_v50 = vld [vmem:[%s6526_s28 + $0x84] sm:$0xff]   ;;  %v5779_v35 = vrot.slane %v5763_v40, 9 }
  0xf3   : > { %6265 = vmatprep.mubr.msk.bf16.mxu0 %vm750_vm4, %v6419_v1  ;;  %v7965_v1 = vsel %vm6844_vm8, %v4431_v33, %v4432_v60  ;;  %v3743_v33 = vor.u32 %v3742_v32, %v7937_v4  ;;  %v6421_v60 = vld [vmem:[%s6526_s28 + $0x78] sm:$0xff]   ;;  %v5778_v32 = vrot.slane %v5762_v31, 9 }
  0xf5   : > { %6228 = vmatmul.mubr.msk.bf16.gmra.mxu1 %vm750_vm4, %v9335_v49  ;;  %v3753_v49 = vrot.slane %v3751_v36, 4  ;;  %v5694_v36 = vld [vmem:[%s6526_s28 + $0x54] sm:$0xf]  ;;  %v8010_v10 = vrot.slane %v3743_v33, 4 }
  0xf6   : > { %6231 = vmatprep.mubr.msk.bf16.mxu1 %vm750_vm4, %v9337_v21  ;;  %v3775_v21 = vshrl.u32 %v5691_v62, 16  ;;  %v8001_v62 = vrot.slane %v3733_v43, 4  ;;  %v3766_v43 = vrot.slane %v3764_v56, 4  ;;  %v3812_v56 = vshrl.u32 %v8007_v47, 16 }
  0xf7   : > { %v7999_v55 = vpop.f32.mrf.mxu0  ;;  %v3757_v31 = vor.u32 %v3756_v2, %v3753_v49  ;;  %v3799_v2 = vshrl.u32 %v5694_v36, 16  ;;  %v3802_v49 = vshll.u32 %v5694_v36, 16 }
  0xf8   : > { %9339 = vst [vmem:[#allocation3_spill] sm:$0xff] %v7999_v55  ;;  %v3777_v18 = vrot.slane %v3775_v21, 4  ;;  %v8048_v21 = vsel %vm6844_vm8, %v4438_v45, %v4439_v13  ;;  %v3791_v45 = vor.u32 %v3790_v12, %v8018_v44  ;;  %v4450_v12 = vrot.slane %v7970_v53, 5  ;;  %v8075_v55 = vld [vmem:[%s6526_s28 + $0x5c] sm:$0x1] }
  0xf9   : > { %v8036_v11 = vpop.f32.mrf.mxu0  ;;  %v3801_v27 = vrot.slane %v3799_v2, 4  ;;  %v9346_v53 = vcombine.low %v7724_v52, %v7741_v41  ;;  %v9348_v52 = vcombine.low %v7745_v61, %v7755_v48  ;;  %v6424_v41 = vld [vmem:[%s6526_s28 + $0x9c] sm:$0xff]   ;;  %v4457_v61 = vrot.slane %v8007_v47, 5 }
  0xfa   : > { %6266 = vmatmul.mubr.msk.bf16.gmra.mxu0 %vm750_vm4, %v6420_v24  ;;  %v8015_v24 = vrot.slane %v3760_v58, 5  ;;  %v3808_v58 = vshll.u32 %v8007_v47, 16  ;;  %9343 = vst [vmem:[#allocation10_spill] sm:$0xff] %v8036_v11  ;;  %v3804_v11 = vrot.slane %v3802_v49, 5 }
  0xfb   : > { %6269 = vmatprep.mubr.msk.bf16.mxu0 %vm750_vm4, %v6421_v60  ;;  %v8024_v33 = vpop.f32.mrf.mxu1  ;;  %v8027_v60 = vld [vmem:[%s6526_s28 + $0x50] sm:$0x1]  ;;  %v8068_v40 = vpop.f32.mrf.mxu0 }
  0xfc   : > { %9341 = vst [vmem:[#allocation9_spill] sm:$0xff] %v8024_v33  ;;  %v3767_v36 = vor.u32 %v3766_v43, %v8015_v24  ;;  %v8058_v33 = vrot.slane %v3757_v31, 4  ;;  %v8065_v7 = vrot.slane %v3808_v58, 5  ;;  %v3814_v43 = vrot.slane %v3812_v56, 4  ;;  %9345 = vst [vmem:[#allocation11_spill] sm:$0xff] %v8068_v40 }
  0xfd   : > { %6232 = vmatmul.mubr.msk.bf16.gmra.mxu1 %vm750_vm4, %v9340_v23  ;;  %v8044_v23 = vsel %vm6844_vm8, %v5778_v32, %v4436_v14  ;;  %v3781_v14 = vor.u32 %v3780_v37, %v3777_v18  ;;  %v3794_v32 = vshll.u32 %v8027_v60, 16  ;;  %v8063_v13 = vpop.f32.mrf.mxu1  ;;  %v4445_v31 = vrot.slane %v4443_v20, 4  ;;  %v5764_v58 = vld [vmem:[%s6526_s28 + $0x48] sm:$0xe] }
  0xfe   : > { %6235 = vmatprep.mubr.msk.bf16.mxu1 %vm750_vm4, %v9342_v54  ;;  %v3770_v54 = vshll.u32 %v8013_v0, 16  ;;  %9344 = vst [vmem:[#allocation12_spill] sm:$0xff] %v8063_v13  ;;  %v4446_v18 = vrot.slane %v8013_v0, 5  ;;  %v3768_v2 = vrot.slane %v3767_v36, 4  ;;  %v3823_v56 = vshrl.u32 %v5697_v6, 16 }
  0xff   : > { %v8081_v13 = vsel %vm6844_vm8, %v5779_v35, %v4443_v20  ;;  %v3782_v37 = vrot.slane %v3781_v14, 4  ;;  %v3792_v40 = vrot.slane %v3791_v45, 4  ;;  %v3796_v0 = vrot.slane %v3794_v32, 5  ;;  %v8096_v14 = vld [vmem:[%s6526_s28 + $0x64] sm:$0xf]  ;;  %v8103_v45 = vpop.f32.mrf.mxu0 }
 0x100   : > { %v3772_v49 = vrot.slane %v3770_v54, 5  ;;  %v3763_v36 = vsel %vm6578_vm5, %v8058_v33, %v8015_v24  ;;  %v3805_v54 = vor.u32 %v3804_v11, %v3801_v27  ;;  %v3815_v35 = vor.u32 %v3814_v43, %v8065_v7  ;;  %9349 = vst [vmem:[#allocation2_spill] sm:$0xff] %v8103_v45  ;;  %v5765_v11 = vld [vmem:[%s6526_s28 + $0x54] sm:$0xe]  ;;  %v6428_v45 = vld [vmem:[%s6526_s28 + $0xcc] sm:$0xff]  }
 0x101   : > { %v3818_v20 = vshll.u32 %v8075_v55, 16  ;;  %v8107_v32 = vsel %vm6844_vm8, %v4445_v31, %v4446_v18  ;;  %v5780_v24 = vrot.slane %v5764_v58, 9  ;;  %v4452_v27 = vrot.slane %v4450_v12, 4 }
 0x102   : > { %6270 = vmatmul.mubr.msk.bf16.gmra.mxu0 %vm750_vm4, %v6422_v50  ;;  %v3826_v50 = vshll.u32 %v5697_v6, 16  ;;  %v4453_v33 = vrot.slane %v8027_v60, 5  ;;  %v6425_v6 = vld [vmem:[%s6526_s28 + $0xa8] sm:$0xff]   ;;  %v3773_v43 = vsel %vm6578_vm5, %v3768_v2, %v3772_v49  ;;  %v3825_v48 = vrot.slane %v3823_v56, 4 }
 0x103   : > { %6273 = vmatprep.mubr.msk.bf16.mxu0 %vm750_vm4, %v6423_v8  ;;  %v8087_v8 = vpop.f32.mrf.mxu1  ;;  %v3797_v31 = vsel %vm6578_vm5, %v3792_v40, %v3796_v0  ;;  %v3832_v18 = vshll.u32 %v8096_v14, 16  ;;  %v3836_v60 = vshrl.u32 %v8096_v14, 16  ;;  %v3816_v2 = vrot.slane %v3815_v35, 4  ;;  %v8125_v56 = vld [vmem:[%s6526_s28 + $0x68] sm:$0x1] }
 0x104   : > { %9347 = vst [vmem:[#allocation4_spill] sm:$0xff] %v8087_v8  ;;  %v3806_v8 = vrot.slane %v3805_v54, 4  ;;  %v3820_v47 = vrot.slane %v3818_v20, 5  ;;  %v5781_v49 = vrot.slane %v5765_v11, 9  ;;  %v9352_v40 = vsel %vm6578_vm5, %v8010_v10, %v8003_v17  ;;  %v5700_v20 = vld [vmem:[%s6526_s28 + $0x6c] sm:$0xf] }
 0x105   : > { %6236 = vmatmul.mubr.msk.bf16.gmra.mxu1 %vm750_vm4, %v9346_v53  ;;  %v3828_v53 = vrot.slane %v3826_v50, 5  ;;  %v8122_v58 = vpop.f32.mrf.mxu1  ;;  %v8146_v54 = vsel %vm6844_vm8, %v5780_v24, %v4450_v12  ;;  %v8150_v35 = vsel %vm6844_vm8, %v4452_v27, %v4453_v33  ;;  %v8153_v17 = vcombine.low %v3763_v36, %v3773_v43  ;;  %v5766_v33 = vld [vmem:[%s6526_s28 + $0x60] sm:$0xe]  ;;  %v5706_v43 = vld [vmem:[%s6526_s28 + $0x84] sm:$0xf] }
 0x106   : > { %6239 = vmatprep.mubr.msk.bf16.mxu1 %vm750_vm4, %v9348_v52  ;;  %v3787_v52 = vsel %vm6578_vm5, %v3782_v37, %v8018_v44  ;;  %9350 = vst [vmem:[#allocation13_spill] sm:$0xff] %v8122_v58  ;;  %v9353_v37 = vsel %vm6578_vm5, %v8001_v62, %v7937_v4  ;;  %v4459_v4 = vrot.slane %v4457_v61, 4  ;;  %v4460_v62 = vrot.slane %v8075_v55, 5 }
 0x107   : > { %v8140_v50 = vcombine.low %v9353_v37, %v9352_v40  ;;  %9354 = vst [vmem:[#allocation15_spill] sm:$0xff] %v8153_v17  ;;  %v3829_v10 = vor.u32 %v3828_v53, %v3825_v48  ;;  %v8160_v11 = vcombine.low %v3787_v52, %v3797_v31  ;;  %v8162_v12 = vrot.slane %v3832_v18, 5 }
 0x108   : > { %v8128_v44 = vpop.f32.mrf.mxu0  ;;  %v8164_v24 = vrot.slane %v3836_v60, 4  ;;  %v3842_v27 = vshll.u32 %v8125_v56, 16  ;;  %v9356_v36 = vcombine.low %v7763_v19, %v7778_v46  ;;  %v3811_v48 = vsel %vm6578_vm5, %v3806_v8, %v8065_v7  ;;  %v5703_v19 = vld [vmem:[%s6526_s28 + $0x78] sm:$0xf] }
 0x109   : > { %9351 = vst [vmem:[#allocation14_spill] sm:$0xff] %v8128_v44  ;;  %9355 = vst [vmem:[#allocation16_spill] sm:$0xff] %v8160_v11  ;;  %v3821_v53 = vsel %vm6578_vm5, %v3816_v2, %v3820_v47  ;;  %v8184_v52 = vsel %vm6844_vm8, %v5781_v49, %v4457_v61  ;;  %v9358_v46 = vcombine.low %v7770_v42, %v7791_v16  ;;  %v3847_v18 = vshrl.u32 %v5700_v20, 16  ;;  %v8196_v2 = vld [vmem:[%s6526_s28 + $0x7c] sm:$0xf]  ;;  %v6427_v61 = vld [vmem:[%s6526_s28 + $0xc0] sm:$0xff]  }
 0x10a   : > { %6274 = vmatmul.mubr.msk.bf16.gmra.mxu0 %vm750_vm4, %v6424_v41  ;;  %v8158_v41 = vld [vmem:[%s6526_s28 + $0x70] sm:$0xf]  ;;  %v8191_v31 = vpop.f32.mrf.mxu0  ;;  %v3850_v60 = vshll.u32 %v5700_v20, 16  ;;  %v8201_v47 = vsel %vm6844_vm8, %v4459_v4, %v4460_v62  ;;  %v8203_v42 = vrot.slane %v3829_v10, 4  ;;  %v5782_v16 = vrot.slane %v5766_v33, 9 }
 0x10b   : > { %6277 = vmatprep.mubr.msk.bf16.mxu0 %vm750_vm4, %v6425_v6  ;;  %v6426_v6 = vld [vmem:[%s6526_s28 + $0xb4] sm:$0xff]   ;;  %9359 = vst [vmem:[#allocation18_spill] sm:$0xff] %v8191_v31  ;;  %v3856_v7 = vshll.u32 %v8158_v41, 16  ;;  %v3860_v8 = vshrl.u32 %v8158_v41, 16  ;;  %v4464_v49 = vrot.slane %v8096_v14, 5  ;;  %v8206_v40 = vcombine.low %v3811_v48, %v3821_v53 }
 0x10c   : > { %v3839_v37 = vor.u32 %v8164_v24, %v8162_v12  ;;  %v8210_v20 = vrot.slane %v3842_v27, 5  ;;  %v3871_v4 = vshrl.u32 %v5703_v19, 16  ;;  %v3874_v62 = vshll.u32 %v5703_v19, 16  ;;  %v8222_v33 = vld [vmem:[%s6526_s28 + $0x88] sm:$0xf]  ;;  %v8225_v24 = vpop.f32.mrf.mxu0 }
 0x10d   : > { %6240 = vmatmul.mubr.msk.bf16.gmra.mxu1 %vm750_vm4, %v9356_v36  ;;  %v8172_v55 = vpop.f32.mrf.mxu1  ;;  %9360 = vst [vmem:[#allocation19_spill] sm:$0xff] %v8206_v40  ;;  %v4467_v36 = vrot.slane %v8125_v56, 5  ;;  %v3880_v14 = vshll.u32 %v8196_v2, 16  ;;  %v3884_v10 = vshrl.u32 %v8196_v2, 16  ;;  %9362 = vst [vmem:[#allocation21_spill] sm:$0xff] %v8225_v24  ;;  %v3849_v56 = vrot.slane %v3847_v18, 4 }
 0x10e   : > { %9357 = vst [vmem:[#allocation17_spill] sm:$0xff] %v8172_v55  ;;  %6243 = vmatprep.mubr.msk.bf16.mxu1 %vm750_vm4, %v9358_v46  ;;  %v8214_v46 = vld [vmem:[%s6526_s28 + $0x74] sm:$0x1]  ;;  %v3852_v27 = vrot.slane %v3850_v60, 5  ;;  %v8227_v48 = vrot.slane %v3856_v7, 5  ;;  %v3862_v53 = vrot.slane %v3860_v8, 4  ;;  %v9363_v19 = vcombine.low %v7782_v22, %v7798_v28  ;;  %v8255_v40 = vpop.f32.mrf.mxu0 }
 0x10f   : > { %v8217_v0 = vpop.f32.mrf.mxu1  ;;  %v4466_v55 = vrot.slane %v4464_v49, 4  ;;  %v8240_v18 = vld [vmem:[%s6526_s28 + $0x80] sm:$0x1]  ;;  %v8243_v60 = vld [vmem:[%s6526_s28 + $0x6c] sm:$0xe]  ;;  %v3895_v7 = vshrl.u32 %v5706_v43, 16 }
 0x110   : > { %9361 = vst [vmem:[#allocation20_spill] sm:$0xff] %v8217_v0  ;;  %v8236_v0 = vsel %vm6844_vm8, %v5782_v16, %v4464_v49  ;;  %v3898_v8 = vshll.u32 %v5706_v43, 16  ;;  %v3908_v58 = vshrl.u32 %v8222_v33, 16  ;;  %v3873_v49 = vrot.slane %v3871_v4, 4  ;;  %9365 = vst [vmem:[#allocation23_spill] sm:$0xff] %v8255_v40 }
 0x111   : > { %v8251_v16 = vpop.f32.mrf.mxu1  ;;  %v3876_v24 = vrot.slane %v3874_v62, 5  ;;  %v8253_v31 = vrot.slane %v3880_v14, 5  ;;  %v3886_v44 = vrot.slane %v3884_v10, 4  ;;  %v9366_v43 = vcombine.low %v7802_v9, %v7830_v3  ;;  %v8274_v3 = vld [vmem:[%s6526_s28 + $0x8c] sm:$0x1] }
 0x112   : > { %6278 = vmatmul.mubr.msk.bf16.gmra.mxu0 %vm750_vm4, %v6426_v6  ;;  %v3866_v6 = vshll.u32 %v8214_v46, 16  ;;  %9364 = vst [vmem:[#allocation22_spill] sm:$0xff] %v8251_v16  ;;  %v3853_v22 = vor.u32 %v3852_v27, %v3849_v56  ;;  %v3863_v28 = vor.u32 %v3862_v53, %v8227_v48  ;;  %v3890_v4 = vshll.u32 %v8240_v18, 16  ;;  %v5768_v56 = vld [vmem:[%s6526_s28 + $0x78] sm:$0xe] }
 0x113   : > { %6281 = vmatprep.mubr.msk.bf16.mxu0 %vm750_vm4, %v6427_v61  ;;  %v3904_v61 = vshll.u32 %v8222_v33, 16  ;;  %v8265_v62 = vrot.slane %v3839_v37, 4  ;;  %v8269_v14 = vsel %vm6844_vm8, %v4466_v55, %v4467_v36  ;;  %v5783_v10 = vrot.slane %v8243_v60, 9  ;;  %v8279_v16 = vpop.f32.mrf.mxu1  ;;  %v5709_v60 = vld [vmem:[%s6526_s28 + $0x90] sm:$0xf] }
 0x114   : > { %v4478_v9 = vrot.slane %v8196_v2, 5  ;;  %v3897_v27 = vrot.slane %v3895_v7, 4  ;;  %v3900_v53 = vrot.slane %v3898_v8, 5  ;;  %9367 = vst [vmem:[#allocation24_spill] sm:$0xff] %v8279_v16  ;;  %v3868_v37 = vrot.slane %v3866_v6, 5 }
 0x115   : > { %6244 = vmatmul.mubr.msk.bf16.gmra.mxu1 %vm750_vm4, %v9363_v19  ;;  %v4471_v19 = vrot.slane %v8158_v41, 5  ;;  %v8277_v41 = vrot.slane %v3904_v61, 5  ;;  %v4474_v40 = vrot.slane %v8214_v46, 5  ;;  %v3877_v55 = vor.u32 %v3876_v24, %v3873_v49  ;;  %v8288_v61 = vld [vmem:[%s6526_s28 + $0x94] sm:$0xf] }
 0x116   : > { %6247 = vmatprep.mubr.msk.bf16.mxu1 %vm750_vm4, %v9366_v43  ;;  %v3910_v43 = vrot.slane %v3908_v58, 4  ;;  %v3887_v36 = vor.u32 %v3886_v44, %v8253_v31  ;;  %v3854_v2 = vrot.slane %v3853_v22, 4  ;;  %v3864_v7 = vrot.slane %v3863_v28, 4 }
 0x117   : > { %v4473_v17 = vrot.slane %v4471_v19, 4  ;;  %v3892_v8 = vrot.slane %v3890_v4, 5  ;;  %v9368_v58 = vcombine.low %v7921_v39, %v7925_v29  ;;  %v5784_v46 = vrot.slane %v5768_v56, 9 }
 0x118   : > { %v4480_v24 = vrot.slane %v4478_v9, 4  ;;  %v4481_v44 = vrot.slane %v8240_v18, 5  ;;  %v3914_v6 = vshll.u32 %v8274_v3, 16  ;;  %v3911_v22 = vor.u32 %v3910_v43, %v8277_v41 }
 0x119   : > { %v3919_v28 = vshrl.u32 %v5709_v60, 16  ;;  %v3922_v4 = vshll.u32 %v5709_v60, 16  ;;  %v9370_v39 = vcombine.low %v7842_v34, %v7847_v57  ;;  %v3878_v29 = vrot.slane %v3877_v55, 4 }
 0x11a   : > { %v8284_v11 = vpop.f32.mrf.mxu0  ;;  %6282 = vmatmul.mubr.msk.bf16.gmra.mxu0 %vm750_vm4, %v6428_v45  ;;  %v3901_v45 = vor.u32 %v3900_v53, %v3897_v27  ;;  %v3888_v56 = vrot.slane %v3887_v36, 4  ;;  %v3928_v18 = vshll.u32 %v8288_v61, 16  ;;  %v3845_v27 = vsel %vm6578_vm5, %v8265_v62, %v8210_v20 }
 0x11b   : > { %6321 = vmatprep.mubr.msk.bf16.mxu0 %vm750_vm4, %v9368_v58  ;;  %v3932_v58 = vshrl.u32 %v8288_v61, 16  ;;  %v3859_v34 = vsel %vm6578_vm5, %v3854_v2, %v8227_v48  ;;  %v8320_v57 = vsel %vm6844_vm8, %v5783_v10, %v4471_v19  ;;  %v8324_v53 = vsel %vm6844_vm8, %v4473_v17, %v4474_v40  ;;  %v5769_v19 = vld [vmem:[%s6526_s28 + $0x84] sm:$0xe]  ;;  %v9409_v38 = vld [vmem:[#allocation24_spill] sm:$0xff] }
 0x11c   : > { %v8296_v49 = vpop.f32.mrf.mxu0  ;;  %v8332_v20 = vsel %vm6844_vm8, %v5784_v46, %v4478_v9  ;;  %v8336_v48 = vsel %vm6844_vm8, %v4480_v24, %v4481_v44  ;;  %v3916_v62 = vrot.slane %v3914_v6, 5  ;;  %v3902_v17 = vrot.slane %v3901_v45, 4  ;;  %v8360_v45 = vld [vmem:[%s6526_s28 + $0x98] sm:$0x1] }
 0x11d   : > { %9369 = vst [vmem:[#allocation25_spill] sm:$0xff] %v8296_v49  ;;  %v8299_v16 = vpop.f32.mrf.mxu1  ;;  %6248 = vmatmul.mubr.msk.bf16.gmra.mxu1 %vm750_vm4, %v9370_v39  ;;  %v3912_v40 = vrot.slane %v3911_v22, 4  ;;  %v3921_v55 = vrot.slane %v3919_v28, 4  ;;  %v3924_v36 = vrot.slane %v3922_v4, 5  ;;  %v3883_v9 = vsel %vm6578_vm5, %v3878_v29, %v8253_v31  ;;  %v5712_v22 = vld [vmem:[%s6526_s28 + $0x9c] sm:$0xf] }
 0x11e   : > { %v8307_v49 = vpop.f32.mrf.mxu0  ;;  %6287 = vmatprep.mubr.msk.bf16.mxu1 %vm750_vm4, %v7991_v30  ;;  %v3869_v30 = vsel %vm6578_vm5, %v3864_v7, %v3868_v37  ;;  %v3893_v37 = vsel %vm6578_vm5, %v3888_v56, %v3892_v8  ;;  %v8348_v2 = vrot.slane %v3928_v18, 5  ;;  %v3934_v7 = vrot.slane %v3932_v58, 4  ;;  %v8391_v58 = vld [vmem:[%s6526_s28 + $0xa0] sm:$0xf] }
 0x11f   : > { %v8326_v43 = vpop.f32.mrf.mxu1  ;;  %v9371_v24 = vcombine.low %v7961_v25, %v7965_v1  ;;  %v5798_v44 = vcombine.low %v8184_v52, %v8201_v47  ;;  %v5799_v6 = vcombine.low %v8236_v0, %v8269_v14  ;;  %v5785_v31 = vrot.slane %v5769_v19, 9 }
 0x120   : > { %v8339_v10 = vpop.f32.mrf.mxu0  ;;  %v4485_v8 = vrot.slane %v8222_v33, 5  ;;  %v9372_v25 = vcombine.low %v8044_v23, %v8048_v21  ;;  %v9373_v1 = vsel %vm6578_vm5, %v8203_v42, %v8162_v12  ;;  %v8376_v39 = vcombine.low %v3859_v34, %v3869_v30  ;;  %v5770_v42 = vld [vmem:[%s6526_s28 + $0x90] sm:$0xe]  ;;  %v9380_v33 = vld [vmem:[#allocation11_spill] sm:$0xff] }
 0x121   : > { %v8341_v60 = vpop.f32.mrf.mxu1  ;;  %v8374_v4 = vcombine.low %v9373_v1, %v3845_v27  ;;  %v8382_v18 = vcombine.low %v3883_v9, %v3893_v37  ;;  %v3907_v23 = vsel %vm6578_vm5, %v3902_v17, %v8277_v41  ;;  %v3917_v21 = vsel %vm6578_vm5, %v3912_v40, %v3916_v62 }
 0x122   : > { %v6119_v46 = vpop.f32.mrf.mxu0  ;;  %6322 = vmatmul.mubr.msk.bf16.vlgmr.msra.gmra.mxu0 %vm750_vm4, %v9371_v24  ;;  %v3925_v12 = vor.u32 %v3924_v36, %v3921_v55  ;;  %v3935_v34 = vor.u32 %v3934_v7, %v8348_v2  ;;  %v3938_v30 = vshll.u32 %v8360_v45, 16  ;;  %v3943_v19 = vshrl.u32 %v5712_v22, 16 }
 0x123   : > { %v8363_v28 = vpop.f32.mrf.mxu1  ;;  %6325 = vmatprep.mubr.msk.bf16.mxu0 %vm750_vm4, %v9372_v25  ;;  %v3946_v9 = vshll.u32 %v5712_v22, 16  ;;  %v8402_v62 = vsel %vm6844_vm8, %v5785_v31, %v4485_v8  ;;  %v4487_v17 = vrot.slane %v4485_v8, 4  ;;  %v4488_v40 = vrot.slane %v8274_v3, 5 }
 0x124   : > { %v1557_v56 = vpop.f32.mrf.mxu0  ;;  %v5786_v55 = vrot.slane %v5770_v42, 9  ;;  %v4492_v36 = vrot.slane %v8288_v61, 5  ;;  %v3952_v7 = vshll.u32 %v8391_v58, 16  ;;  %v3956_v24 = vshrl.u32 %v8391_v58, 16 }
 0x125   : > { %v6085_v27 = vpop.f32.mrf.mxu1  ;;  %6288 = vmatmul.mubr.msk.bf16.vlgmr.msra.gmra.mxu1 %vm750_vm4, %v7993_v59  ;;  %v8411_v25 = vcombine.low %v3907_v23, %v3917_v21  ;;  %v8413_v31 = vrot.slane %v3925_v12, 4  ;;  %v3936_v3 = vrot.slane %v3935_v34, 4  ;;  %v3940_v1 = vrot.slane %v3938_v30, 5  ;;  %v5715_v21 = vld [vmem:[%s6526_s28 + $0xa8] sm:$0xf] }
 0x126   : > { %v1141_v37 = vadd.f32 %v6085_v27, %v7889_v5  ;;  %v6120_v41 = vpop.f32.mrf.mxu0  ;;  %6291 = vmatprep.mubr.msk.bf16.mxu1 %vm750_vm4, %v8140_v50  ;;  %v3945_v42 = vrot.slane %v3943_v19, 4  ;;  %v3948_v61 = vrot.slane %v3946_v9, 5  ;;  %v4495_v23 = vrot.slane %v8360_v45, 5  ;;  %v8439_v30 = vld [vmem:[%s6526_s28 + $0xac] sm:$0xf] }
 0x127   : > { %v1132_v59 = vpop.f32.mrf.mxu1  ;;  %v3958_v34 = vrot.slane %v3956_v24, 4  ;;  %v9377_v24 = vld [vmem:[#allocation3_spill] sm:$0xff] }
 0x128   : > { %v8408_v5 = vadd.f32 %v6119_v46, %v1141_v37  ;;  %v1133_v50 = vadd.f32 %v1132_v59, %v7913_v15  ;;  %v1560_v22 = vpop.f32.mrf.mxu0  ;;  %v9374_v37 = vcombine.low %v8081_v13, %v8107_v32  ;;  %v8424_v15 = vsel %vm6844_vm8, %v4487_v17, %v4488_v40  ;;  %v5771_v17 = vld [vmem:[%s6526_s28 + $0x9c] sm:$0xe] }
 0x129   : > { %v6086_v8 = vpop.f32.mrf.mxu1  ;;  %v4494_v13 = vrot.slane %v4492_v36, 4  ;;  %v8436_v32 = vrot.slane %v3952_v7, 5  ;;  %v4499_v40 = vrot.slane %v8391_v58, 5  ;;  %v3976_v58 = vshll.u32 %v8439_v30, 16 }
 0x12a   : > { %v8415_v27 = vadd.f32 %v1557_v56, %v1133_v50  ;;  %v1144_v29 = vadd.f32 %v6086_v8, %v7932_v26  ;;  %v6123_v46 = vpop.f32.mrf.mxu0  ;;  %6326 = vmatmul.mubr.msk.bf16.gmra.mxu0 %vm750_vm4, %v9374_v37  ;;  %v9375_v56 = vcombine.low %v8146_v54, %v8150_v35  ;;  %v8434_v26 = vsel %vm6844_vm8, %v5786_v55, %v4492_v36  ;;  %v5714_v35 = vld [vmem:[%s6526_s28 + $0xa4] sm:$0x1]  ;;  %v9376_v55 = vld [vmem:[#allocation15_spill] sm:$0xff] }
 0x12b   : > { %v1135_v12 = vpop.f32.mrf.mxu1  ;;  %v3931_v54 = vsel %vm6578_vm5, %v8413_v31, %v8348_v2  ;;  %v3967_v36 = vshrl.u32 %v5715_v21, 16  ;;  %v9378_v2 = vld [vmem:[#allocation16_spill] sm:$0xff]  ;;  %v3980_v31 = vshrl.u32 %v8439_v30, 16 }
 0x12c   : > { %6329 = vmatprep.mubr.msk.bf16.mxu0 %vm750_vm4, %v9375_v56  ;;  %v8441_v19 = vadd.f32 %v6120_v41, %v1144_v29  ;;  %v1136_v45 = vadd.f32 %v1135_v12, %v7977_v51  ;;  %v1573_v9 = vpop.f32.mrf.mxu0  ;;  %v3941_v29 = vsel %vm6578_vm5, %v3936_v3, %v3940_v1  ;;  %v3949_v41 = vor.u32 %v3948_v61, %v3945_v42  ;;  %v9379_v61 = vld [vmem:[#allocation10_spill] sm:$0xff] }
 0x12d   : > { %v6089_v59 = vpop.f32.mrf.mxu1  ;;  %6292 = vmatmul.mubr.msk.bf16.gmra.mxu1 %vm750_vm4, %v9376_v55  ;;  %v3970_v51 = vshll.u32 %v5715_v21, 16  ;;  %v8464_v12 = vsel %vm6844_vm8, %v4494_v13, %v4495_v23  ;;  %v3959_v3 = vor.u32 %v3958_v34, %v8436_v32  ;;  %v3962_v1 = vshll.u32 %v5714_v35, 16 }
 0x12e   : > { %v8455_v7 = vadd.f32 %v1560_v22, %v1136_v45  ;;  %v1157_v50 = vadd.f32 %v6089_v59, %v9377_v24  ;;  %v6124_v8 = vpop.f32.mrf.mxu0  ;;  %6295 = vmatprep.mubr.msk.bf16.mxu1 %vm750_vm4, %v9378_v2  ;;  %v5787_v22 = vrot.slane %v5771_v17, 9  ;;  %v4501_v45 = vrot.slane %v4499_v40, 4 }
 0x12f   : > { %v1148_v37 = vpop.f32.mrf.mxu1  ;;  %v4502_v59 = vrot.slane %v5714_v35, 5  ;;  %v8472_v2 = vrot.slane %v3949_v41, 4  ;;  %v3969_v23 = vrot.slane %v3967_v36, 4  ;;  %v3972_v13 = vrot.slane %v3970_v51, 5  ;;  %v8482_v35 = vld [vmem:[%s6526_s28 + $0xb0] sm:$0x1] }
 0x130   : > { %v8467_v42 = vadd.f32 %v6123_v46, %v1157_v50  ;;  %v1149_v21 = vadd.f32 %v1148_v37, %v9379_v61  ;;  %v1576_v56 = vpop.f32.mrf.mxu0  ;;  %v8484_v50 = vrot.slane %v3976_v58, 5  ;;  %v3982_v41 = vrot.slane %v3980_v31, 4  ;;  %v9381_v51 = vld [vmem:[#allocation2_spill] sm:$0xff] }
 0x131   : > { %v6090_v55 = vpop.f32.mrf.mxu1  ;;  %v8494_v52 = vrot.slane %v3959_v3, 4  ;;  %v8496_v47 = vrot.slane %v3962_v1, 5  ;;  %v8504_v0 = vsel %vm6844_vm8, %v5787_v22, %v4499_v40  ;;  %v8508_v14 = vsel %vm6844_vm8, %v4501_v45, %v4502_v59  ;;  %v8520_v22 = vld [vmem:[%s6526_s28 + $0xb8] sm:$0xf] }
 0x132   : > { %v8474_v34 = vadd.f32 %v1573_v9, %v1149_v21  ;;  %v1160_v17 = vadd.f32 %v6090_v55, %v9380_v33  ;;  %v6127_v46 = vpop.f32.mrf.mxu0  ;;  %6330 = vmatmul.mubr.msk.bf16.gmra.mxu0 %vm750_vm4, %v5798_v44  ;;  %v8490_v9 = vcombine.low %v3931_v54, %v3941_v29  ;;  %v5772_v44 = vld [vmem:[%s6526_s28 + $0xa8] sm:$0xe]  ;;  %v3973_v3 = vor.u32 %v3972_v13, %v3969_v23  ;;  %v9383_v21 = vld [vmem:[#allocation14_spill] sm:$0xff] }
 0x133   : > { %v1151_v37 = vpop.f32.mrf.mxu1  ;;  %6333 = vmatprep.mubr.msk.bf16.mxu0 %vm750_vm4, %v5799_v6  ;;  %v5718_v6 = vld [vmem:[%s6526_s28 + $0xb4] sm:$0xf]  ;;  %v9382_v29 = vld [vmem:[#allocation19_spill] sm:$0xff]  ;;  %v3986_v1 = vshll.u32 %v8482_v35, 16  ;;  %v4506_v40 = vrot.slane %v8439_v30, 5  ;;  %v3983_v55 = vor.u32 %v3982_v41, %v8484_v50  ;;  %v3965_v30 = vsel %vm6578_vm5, %v8494_v52, %v8496_v47 }
 0x134   : > { %v8499_v36 = vadd.f32 %v6124_v8, %v1160_v17  ;;  %v1152_v58 = vadd.f32 %v1151_v37, %v9381_v51  ;;  %v1589_v31 = vpop.f32.mrf.mxu0  ;;  %v5788_v17 = vrot.slane %v5772_v44, 9  ;;  %v3991_v23 = vshrl.u32 %v5718_v6, 16 }
 0x135   : > { %v6093_v54 = vpop.f32.mrf.mxu1  ;;  %6296 = vmatmul.mubr.msk.bf16.gmra.mxu1 %vm750_vm4, %v9382_v29  ;;  %v3994_v13 = vshll.u32 %v5718_v6, 16  ;;  %v4000_v41 = vshll.u32 %v8520_v22, 16  ;;  %v4004_v44 = vshrl.u32 %v8520_v22, 16  ;;  %v5721_v29 = vld [vmem:[%s6526_s28 + $0xc0] sm:$0xf]  ;;  %v3974_v33 = vrot.slane %v3973_v3, 4 }
 0x136   : > { %v8522_v61 = vadd.f32 %v1576_v56, %v1152_v58  ;;  %v1173_v45 = vadd.f32 %v6093_v54, %v9383_v21  ;;  %v6128_v59 = vpop.f32.mrf.mxu0  ;;  %6299 = vmatprep.mubr.msk.bf16.mxu1 %vm750_vm4, %v8374_v4  ;;  %v9385_v58 = vld [vmem:[#allocation18_spill] sm:$0xff]  ;;  %v3988_v52 = vrot.slane %v3986_v1, 5  ;;  %v4508_v47 = vrot.slane %v4506_v40, 4 }
 0x137   : > { %v1164_v37 = vpop.f32.mrf.mxu1  ;;  %v4509_v56 = vrot.slane %v8482_v35, 5  ;;  %v8550_v8 = vsel %vm6844_vm8, %v5788_v17, %v4506_v40  ;;  %v8553_v3 = vld [vmem:[%s6526_s28 + $0xc4] sm:$0xf]  ;;  %v9389_v35 = vcombine.low %v8332_v20, %v8336_v48  ;;  %v8565_v17 = vrot.slane %v4000_v41, 5 }
 0x138   : > { %v8534_v51 = vadd.f32 %v6127_v46, %v1173_v45  ;;  %v1165_v54 = vadd.f32 %v1164_v37, %v9385_v58  ;;  %v1592_v4 = vpop.f32.mrf.mxu0  ;;  %v9387_v46 = vld [vmem:[#allocation21_spill] sm:$0xff]  ;;  %v9388_v37 = vcombine.low %v8320_v57, %v8324_v53  ;;  %v3984_v58 = vrot.slane %v3983_v55, 4  ;;  %v9390_v55 = vld [vmem:[#allocation23_spill] sm:$0xff] }
 0x139   : > { %v6094_v21 = vpop.f32.mrf.mxu1  ;;  %v4015_v57 = vshrl.u32 %v5721_v29, 16  ;;  %v4018_v53 = vshll.u32 %v5721_v29, 16  ;;  %v3979_v20 = vsel %vm6578_vm5, %v3974_v33, %v8484_v50  ;;  %v8574_v48 = vsel %vm6844_vm8, %v4508_v47, %v4509_v56  ;;  %v5773_v29 = vld [vmem:[%s6526_s28 + $0xb4] sm:$0xe] }
 0x13a   : > { %9384 = vst [vmem:[#allocation15_spill] sm:$0xff] %v8534_v51  ;;  %v8541_v24 = vadd.f32 %v1589_v31, %v1165_v54  ;;  %v1176_v6 = vadd.f32 %v6094_v21, %v9387_v46  ;;  %v6131_v45 = vpop.f32.mrf.mxu0  ;;  %6334 = vmatmul.mubr.msk.bf16.gmra.mxu0 %vm750_vm4, %v9388_v37  ;;  %v8560_v31 = vld [vmem:[%s6526_s28 + $0xbc] sm:$0x1]  ;;  %v3993_v54 = vrot.slane %v3991_v23, 4  ;;  %v3996_v21 = vrot.slane %v3994_v13, 5 }
 0x13b   : > { %v1167_v1 = vpop.f32.mrf.mxu1  ;;  %6337 = vmatprep.mubr.msk.bf16.mxu0 %vm750_vm4, %v9389_v35  ;;  %v4028_v23 = vshrl.u32 %v8553_v3, 16  ;;  %v4010_v50 = vshll.u32 %v8560_v31, 16  ;;  %v4513_v47 = vrot.slane %v8520_v22, 5  ;;  %v9391_v35 = vld [vmem:[#allocation25_spill] sm:$0xff] }
 0x13c   : > { %9386 = vst [vmem:[#allocation3_spill] sm:$0xff] %v8541_v24  ;;  %v8562_v46 = vadd.f32 %v6128_v59, %v1176_v6  ;;  %v1168_v37 = vadd.f32 %v1167_v1, %v9390_v55  ;;  %v1605_v40 = vpop.f32.mrf.mxu0  ;;  %v4006_v24 = vrot.slane %v4004_v44, 4  ;;  %v4024_v59 = vshll.u32 %v8553_v3, 16 }
 0x13d   : > { %v6097_v51 = vpop.f32.mrf.mxu1  ;;  %6300 = vmatmul.mubr.msk.bf16.gmra.mxu1 %vm750_vm4, %v8376_v39  ;;  %v3989_v39 = vsel %vm6578_vm5, %v3984_v58, %v3988_v52  ;;  %v3997_v56 = vor.u32 %v3996_v21, %v3993_v54  ;;  %v4017_v6 = vrot.slane %v4015_v57, 4  ;;  %v4020_v1 = vrot.slane %v4018_v53, 5 }
 0x13e   : > { %v8578_v13 = vadd.f32 %v1592_v4, %v1168_v37  ;;  %v1189_v41 = vadd.f32 %v6097_v51, %v8284_v11  ;;  %v6132_v44 = vpop.f32.mrf.mxu0  ;;  %6303 = vmatprep.mubr.msk.bf16.mxu1 %vm750_vm4, %v8382_v18  ;;  %v9392_v18 = vsel %vm6578_vm5, %v8472_v2, %v8436_v32  ;;  %v4007_v58 = vor.u32 %v4006_v24, %v8565_v17 }
 0x13f   : > { %v1180_v33 = vpop.f32.mrf.mxu1  ;;  %v8596_v52 = vcombine.low %v9392_v18, %v3965_v30  ;;  %v8599_v22 = vcombine.low %v3979_v20, %v3989_v39  ;;  %v8603_v21 = vrot.slane %v4024_v59, 5  ;;  %v4030_v57 = vrot.slane %v4028_v23, 4  ;;  %v5723_v30 = vld [vmem:[%s6526_s28 + $0xc8] sm:$0x1] }
 0x140   : > { %v8588_v4 = vadd.f32 %v6131_v45, %v1189_v41  ;;  %v1181_v11 = vadd.f32 %v1180_v33, %v9391_v35  ;;  %v1608_v51 = vpop.f32.mrf.mxu0  ;;  %v5805_v45 = vcombine.low %v8550_v8, %v8574_v48  ;;  %v9393_v32 = vcombine.low %v8402_v62, %v8424_v15  ;;  %v5724_v8 = vld [vmem:[%s6526_s28 + $0xcc] sm:$0xf]  ;;  %v8624_v15 = vld [vmem:[%s6526_s28 + $0xd0] sm:$0xf]  ;;  %v5774_v33 = vld [vmem:[%s6526_s28 + $0xc0] sm:$0xe] }
 0x141   : > { %v6098_v54 = vpop.f32.mrf.mxu1  ;;  %v8612_v24 = vrot.slane %v4010_v50, 5  ;;  %v5789_v2 = vrot.slane %v5773_v29, 9  ;;  %v9394_v48 = vcombine.low %v8434_v26, %v8464_v12  ;;  %v4516_v59 = vrot.slane %v8560_v31, 5 }
 0x142   : > { %v8605_v53 = vadd.f32 %v1605_v40, %v1181_v11  ;;  %v1192_v55 = vadd.f32 %v6098_v54, %v8307_v49  ;;  %v6135_v37 = vpop.f32.mrf.mxu0  ;;  %6338 = vmatmul.mubr.msk.bf16.gmra.mxu0 %vm750_vm4, %v9393_v32  ;;  %v8620_v40 = vrot.slane %v3997_v56, 4  ;;  %v4515_v49 = vrot.slane %v4513_v47, 4 }
 0x143   : > { %v1183_v20 = vpop.f32.mrf.mxu1  ;;  %6341 = vmatprep.mubr.msk.bf16.mxu0 %vm750_vm4, %v9394_v48  ;;  %v4021_v62 = vor.u32 %v4020_v1, %v4017_v6  ;;  %v8629_v50 = vrot.slane %v4007_v58, 4  ;;  %v4520_v26 = vrot.slane %v8553_v3, 5  ;;  %v4031_v56 = vor.u32 %v4030_v57, %v8603_v21 }
 0x144   : > { %v8626_v23 = vadd.f32 %v6132_v44, %v1192_v55  ;;  %v1184_v41 = vadd.f32 %v1183_v20, %v8339_v10  ;;  %v1621_v39 = vpop.f32.mrf.mxu0  ;;  %v4034_v31 = vshll.u32 %v5723_v30, 16  ;;  %v4039_v29 = vshrl.u32 %v5724_v8, 16  ;;  %v9397_v44 = vld [vmem:[#allocation5_spill] sm:$0xff]  ;;  %v9398_v55 = vld [vmem:[#allocation6_spill] sm:$0xff] }
 0x145   : > { %v6101_v12 = vpop.f32.mrf.mxu1  ;;  %6304 = vmatmul.mubr.msk.bf16.gmra.mxu1 %vm750_vm4, %v8411_v25  ;;  %v4042_v6 = vshll.u32 %v5724_v8, 16  ;;  %v4048_v11 = vshll.u32 %v8624_v15, 16  ;;  %v4052_v3 = vshrl.u32 %v8624_v15, 16  ;;  %v4514_v25 = vsel %vm6844_vm8, %v5789_v2, %v4513_v47  ;;  %v9399_v47 = vld [vmem:[#allocation7_spill] sm:$0xff] }
 0x146   : > { %9395 = vst [vmem:[#allocation16_spill] sm:$0xff] %v8626_v23  ;;  %v8636_v1 = vadd.f32 %v1608_v51, %v1184_v41  ;;  %v1205_v35 = vadd.f32 %v6101_v12, %v9397_v44  ;;  %v6136_v10 = vpop.f32.mrf.mxu0  ;;  %6307 = vmatprep.mubr.msk.bf16.mxu1 %vm750_vm4, %v8490_v9  ;;  %v4517_v58 = vsel %vm6844_vm8, %v4515_v49, %v4516_v59  ;;  %v4022_v54 = vrot.slane %v4021_v62, 4 }
 0x147   : > { %v1196_v18 = vpop.f32.mrf.mxu1  ;;  %v5790_v51 = vrot.slane %v5774_v33, 9  ;;  %v4522_v20 = vrot.slane %v4520_v26, 4  ;;  %v4523_v9 = vrot.slane %v5723_v30, 5  ;;  %v4032_v41 = vrot.slane %v4031_v56, 4  ;;  %v5726_v56 = vld [vmem:[%s6526_s28 + $0xd4] sm:$0x1] }
 0x148   : > { %9396 = vst [vmem:[#allocation10_spill] sm:$0xff] %v8636_v1  ;;  %v8647_v57 = vadd.f32 %v6135_v37, %v1205_v35  ;;  %v1197_v32 = vadd.f32 %v1196_v18, %v9398_v55  ;;  %v1624_v8 = vpop.f32.mrf.mxu0  ;;  %v4036_v12 = vrot.slane %v4034_v31, 5  ;;  %v4041_v44 = vrot.slane %v4039_v29, 4  ;;  %v9401_v31 = vld [vmem:[#allocation8_spill] sm:$0xff] }
 0x149   : > { %v6102_v48 = vpop.f32.mrf.mxu1  ;;  %v4044_v1 = vrot.slane %v4042_v6, 5  ;;  %v9400_v37 = vcombine.low %v8504_v0, %v8508_v14  ;;  %v8657_v59 = vrot.slane %v4048_v11, 5  ;;  %v4054_v30 = vrot.slane %v4052_v3, 4 }
 0x14a   : > { %v8650_v23 = vadd.f32 %v1621_v39, %v1197_v32  ;;  %v1208_v2 = vadd.f32 %v6102_v48, %v9399_v47  ;;  %v6139_v49 = vpop.f32.mrf.mxu0  ;;  %v4003_v39 = vsel %vm6578_vm5, %v8620_v40, %v8565_v17  ;;  %v4013_v33 = vsel %vm6578_vm5, %v8629_v50, %v8612_v24  ;;  %v5775_v17 = vld [vmem:[%s6526_s28 + $0xcc] sm:$0xe] }
 0x14b   : > { %6342 = vmatmul.mubr.msk.bf16.gmra.mxu0 %vm750_vm4, %v9400_v37  ;;  %v1199_v62 = vpop.f32.mrf.mxu1  ;;  %v4527_v0 = vrot.slane %v8624_v15, 5  ;;  %v4524_v35 = vsel %vm6844_vm8, %v4522_v20, %v4523_v9  ;;  %v5806_v24 = vcombine.low %v4514_v25, %v4517_v58  ;;  %v4027_v15 = vsel %vm6578_vm5, %v4022_v54, %v8603_v21  ;;  %v9403_v20 = vld [vmem:[#allocation12_spill] sm:$0xff] }
 0x14c   : > { %6345 = vmatprep.mubr.msk.bf16.mxu0 %vm750_vm4, %v5805_v45  ;;  %v8670_v14 = vadd.f32 %v6136_v10, %v1208_v2  ;;  %v1200_v29 = vadd.f32 %v1199_v62, %v9401_v31  ;;  %v1637_v6 = vpop.f32.mrf.mxu0  ;;  %v4521_v45 = vsel %vm6844_vm8, %v5790_v51, %v4520_v26  ;;  %v4037_v50 = vsel %vm6578_vm5, %v4032_v41, %v4036_v12  ;;  %v9402_v26 = vld [vmem:[#allocation9_spill] sm:$0xff] }
 0x14d   : > { %v6105_v40 = vpop.f32.mrf.mxu1  ;;  %6308 = vmatmul.mubr.msk.bf16.gmra.mxu1 %vm750_vm4, %v8596_v52  ;;  %v4045_v10 = vor.u32 %v4044_v1, %v4041_v44  ;;  %v4055_v51 = vor.u32 %v4054_v30, %v8657_v59  ;;  %v4058_v52 = vshll.u32 %v5726_v56, 16  ;;  %v5807_v58 = vcombine.low %v4521_v45, %v4524_v35 }
 0x14e   : > { %v8685_v11 = vadd.f32 %v1624_v8, %v1200_v29  ;;  %v1221_v3 = vadd.f32 %v6105_v40, %v9402_v26  ;;  %v6140_v18 = vpop.f32.mrf.mxu0  ;;  %6311 = vmatprep.mubr.msk.bf16.mxu1 %vm750_vm4, %v8599_v22  ;;  %v5791_v55 = vrot.slane %v5775_v17, 9  ;;  %v4529_v32 = vrot.slane %v4527_v0, 4  ;;  %v9404_v22 = vld [vmem:[#allocation4_spill] sm:$0xff]  ;;  %v9406_v17 = vld [vmem:[#allocation17_spill] sm:$0xff] }
 0x14f   : > { %v1212_v25 = vpop.f32.mrf.mxu1  ;;  %v4530_v21 = vrot.slane %v5726_v56, 5  ;;  %v5741_v48 = vcombine.low %v4003_v39, %v4013_v33  ;;  %v5742_v41 = vcombine.low %v4027_v15, %v4037_v50  ;;  %v4046_v12 = vrot.slane %v4045_v10, 4  ;;  %v9405_v56 = vld [vmem:[#allocation13_spill] sm:$0xff]  ;;  %v9407_v10 = vld [vmem:[#allocation20_spill] sm:$0xff] }
 0x150   : > { %v8691_v54 = vadd.f32 %v6139_v49, %v1221_v3  ;;  %v1213_v1 = vadd.f32 %v1212_v25, %v9403_v20  ;;  %v1640_v8 = vpop.f32.mrf.mxu0  ;;  %v4056_v37 = vrot.slane %v4055_v51, 4  ;;  %v4060_v30 = vrot.slane %v4058_v52, 5  ;;  %v9408_v52 = vld [vmem:[#allocation22_spill] sm:$0xff] }
 0x151   : > { %v6106_v9 = vpop.f32.mrf.mxu1  ;;  %v4528_v49 = vsel %vm6844_vm8, %v5791_v55, %v4527_v0  ;;  %v4531_v39 = vsel %vm6844_vm8, %v4529_v32, %v4530_v21  ;;  %v4051_v45 = vsel %vm6578_vm5, %v4046_v12, %v8657_v59 }
 0x152   : > { %v8694_v44 = vadd.f32 %v1637_v6, %v1213_v1  ;;  %v1224_v47 = vadd.f32 %v6106_v9, %v9404_v22  ;;  %v6143_v2 = vpop.f32.mrf.mxu0  ;;  %v4061_v63 = vsel %vm6578_vm5, %v4056_v37, %v4060_v30 }
 0x153   : > { %6346 = vmatmul.mubr.msk.bf16.gmra.mxu0 %vm750_vm4, %v5806_v24  ;;  %v1215_v62 = vpop.f32.mrf.mxu1  ;;  %v5808_v24 = vcombine.low %v4528_v49, %v4531_v39  ;;  %v5743_v51 = vcombine.low %v4051_v45, %v4061_v63 }
 0x154   : > { %6349 = vmatprep.mubr.msk.bf16.mxu0 %vm750_vm4, %v5807_v58  ;;  %v8703_v33 = vadd.f32 %v6140_v18, %v1224_v47  ;;  %v1216_v31 = vadd.f32 %v1215_v62, %v9405_v56  ;;  %v1653_v29 = vpop.f32.mrf.mxu0 }
 0x155   : > { %v6109_v6 = vpop.f32.mrf.mxu1  ;;  %6312 = vmatmul.mubr.msk.bf16.gmra.mxu1 %vm750_vm4, %v5741_v48 }
 0x156   : > { %v8710_v35 = vadd.f32 %v1640_v8, %v1216_v31  ;;  %v1237_v40 = vadd.f32 %v6109_v6, %v9406_v17  ;;  %v6144_v0 = vpop.f32.mrf.mxu0  ;;  %6315 = vmatprep.mubr.msk.bf16.mxu1 %vm750_vm4, %v5742_v41 }
 0x157   : > { %v1228_v15 = vpop.f32.mrf.mxu1 }
 0x158   : > { %v8716_v50 = vadd.f32 %v6143_v2, %v1237_v40  ;;  %v1229_v26 = vadd.f32 %v1228_v15, %v9407_v10  ;;  %v1656_v3 = vpop.f32.mrf.mxu0 }
 0x159   : > { %v6110_v18 = vpop.f32.mrf.mxu1 }
 0x15a   : > { %v8719_v59 = vadd.f32 %v1653_v29, %v1229_v26  ;;  %v1240_v25 = vadd.f32 %v6110_v18, %v9408_v52  ;;  %v6147_v58 = vpop.f32.mrf.mxu0 }
 0x15b   : > { %6350 = vmatmul.mubr.msk.bf16.gmra.mxu0 %vm750_vm4, %v5808_v24  ;;  %v1231_v55 = vpop.f32.mrf.mxu1 }
 0x15c   : > { %v8723_v32 = vadd.f32 %v6144_v0, %v1240_v25  ;;  %v1232_v21 = vadd.f32 %v1231_v55, %v9409_v38  ;;  %v1669_v20 = vpop.f32.mrf.mxu0 }
 0x15d   : > { %v6113_v1 = vpop.f32.mrf.mxu1  ;;  %6316 = vmatmul.mubr.msk.bf16.gmra.mxu1 %vm750_vm4, %v5743_v51 }
 0x15e   : > { %v8727_v8 = vadd.f32 %v1656_v3, %v1232_v21  ;;  %v1253_v9 = vadd.f32 %v6113_v1, %v8299_v16  ;;  %v6148_v48 = vpop.f32.mrf.mxu0 }
 0x15f   : > { %v1244_v41 = vpop.f32.mrf.mxu1 }
 0x160   : > { %v8730_v12 = vadd.f32 %v6147_v58, %v1253_v9  ;;  %v1245_v22 = vadd.f32 %v1244_v41, %v8326_v43  ;;  %v1672_v47 = vpop.f32.mrf.mxu0 }
 0x161   : > { %v6114_v2 = vpop.f32.mrf.mxu1 }
 0x162   : > { %v8733_v37 = vadd.f32 %v1669_v20, %v1245_v22  ;;  %v1256_v30 = vadd.f32 %v6114_v2, %v8341_v60  ;;  %v6187_v62 = vpop.f32.mrf.mxu0  ;;  %v9410_v22 = vld [vmem:[#allocation15_spill] sm:$0xff] }
 0x163   : > { %v1247_v49 = vpop.f32.mrf.mxu1 }
 0x164   : > { %v8736_v39 = vadd.f32 %v6148_v48, %v1256_v30  ;;  %v1248_v56 = vadd.f32 %v1247_v49, %v8363_v28  ;;  %v2642_v31 = vpop.f32.mrf.mxu0 }
 0x165   : > { %v6153_v16 = vpop.f32.mrf.mxu1 }
 0x166   : > { %v8739_v29 = vadd.f32 %v1672_v47, %v1248_v56  ;;  %v2045_v6 = vadd.f32 %v6153_v16, %v8408_v5  ;;  %v6188_v45 = vpop.f32.mrf.mxu0 }
 0x167   : > { %v1916_v43 = vpop.f32.mrf.mxu1 }
 0x168   : > { %v8742_v17 = vadd.f32 %v6187_v62, %v2045_v6  ;;  %v2043_v40 = vadd.f32 %v1916_v43, %v8415_v27  ;;  %v2645_v0 = vpop.f32.mrf.mxu0  ;;  %v9411_v62 = vld [vmem:[#allocation3_spill] sm:$0xff] }
 0x169   : > { %v6154_v60 = vpop.f32.mrf.mxu1 }
 0x16a   : > { %v8745_v63 = vadd.f32 %v2642_v31, %v2043_v40  ;;  %v2046_v24 = vadd.f32 %v6154_v60, %v8441_v19  ;;  %v6191_v15 = vpop.f32.mrf.mxu0 }
 0x16b   : > { %v1919_v28 = vpop.f32.mrf.mxu1 }
 0x16c   : > { %v8748_v10 = vadd.f32 %v6188_v45, %v2046_v24  ;;  %v2044_v26 = vadd.f32 %v1919_v28, %v8455_v7  ;;  %v2658_v3 = vpop.f32.mrf.mxu0 }
 0x16d   : > { %v6157_v5 = vpop.f32.mrf.mxu1 }
 0x16e   : > { %v8751_v18 = vadd.f32 %v2645_v0, %v2044_v26  ;;  %v2049_v51 = vadd.f32 %v6157_v5, %v8467_v42  ;;  %v6192_v52 = vpop.f32.mrf.mxu0 }
 0x16f   : > { %v1932_v27 = vpop.f32.mrf.mxu1 }
 0x170   : > { %v8754_v25 = vadd.f32 %v6191_v15, %v2049_v51  ;;  %v2047_v58 = vadd.f32 %v1932_v27, %v8474_v34  ;;  %v2661_v55 = vpop.f32.mrf.mxu0 }
 0x171   : > { %v6158_v19 = vpop.f32.mrf.mxu1 }
 0x172   : > { %v8757_v38 = vadd.f32 %v2658_v3, %v2047_v58  ;;  %v2050_v21 = vadd.f32 %v6158_v19, %v8499_v36  ;;  %v6195_v20 = vpop.f32.mrf.mxu0  ;;  %v9413_v19 = vld [vmem:[#allocation10_spill] sm:$0xff] }
 0x173   : > { %v1935_v7 = vpop.f32.mrf.mxu1 }
 0x174   : > { %v8760_v1 = vadd.f32 %v6192_v52, %v2050_v21  ;;  %v2048_v9 = vadd.f32 %v1935_v7, %v8522_v61  ;;  %v2674_v48 = vpop.f32.mrf.mxu0  ;;  %v9412_v52 = vld [vmem:[#allocation16_spill] sm:$0xff] }
 0x175   : > { %v6161_v42 = vpop.f32.mrf.mxu1 }
 0x176   : > { %v8763_v41 = vadd.f32 %v2661_v55, %v2048_v9  ;;  %v2053_v47 = vadd.f32 %v6161_v42, %v9410_v22  ;;  %v6196_v2 = vpop.f32.mrf.mxu0 }
 0x177   : > { %v1948_v34 = vpop.f32.mrf.mxu1 }
 0x178   : > { %v8766_v30 = vadd.f32 %v6195_v20, %v2053_v47  ;;  %v2051_v49 = vadd.f32 %v1948_v34, %v9411_v62  ;;  %v2677_v56 = vpop.f32.mrf.mxu0 }
 0x179   : > { %v6162_v36 = vpop.f32.mrf.mxu1 }
 0x17a   : > { %v8769_v31 = vadd.f32 %v2674_v48, %v2051_v49  ;;  %v2054_v16 = vadd.f32 %v6162_v36, %v8562_v46  ;;  %v6199_v6 = vpop.f32.mrf.mxu0 }
 0x17b   : > { %v1951_v61 = vpop.f32.mrf.mxu1 }
 0x17c   : > { %v8772_v45 = vadd.f32 %v6196_v2, %v2054_v16  ;;  %v2052_v43 = vadd.f32 %v1951_v61, %v8578_v13  ;;  %v2690_v40 = vpop.f32.mrf.mxu0 }
 0x17d   : > { %v6165_v0 = vpop.f32.mrf.mxu1 }
 0x17e   : > { %v8775_v60 = vadd.f32 %v2677_v56, %v2052_v43  ;;  %v2057_v24 = vadd.f32 %v6165_v0, %v8588_v4  ;;  %v6200_v15 = vpop.f32.mrf.mxu0 }
 0x17f   : > { %v1964_v28 = vpop.f32.mrf.mxu1 }
 0x180   : > { %v8778_v26 = vadd.f32 %v6199_v6, %v2057_v24  ;;  %v2055_v3 = vadd.f32 %v1964_v28, %v8605_v53  ;;  %v2693_v5 = vpop.f32.mrf.mxu0 }
 0x181   : > { %v6166_v46 = vpop.f32.mrf.mxu1 }
 0x182   : > { %v8781_v51 = vadd.f32 %v2690_v40, %v2055_v3  ;;  %v2058_v27 = vadd.f32 %v6166_v46, %v9412_v52  ;;  %v6203_v58 = vpop.f32.mrf.mxu0 }
 0x183   : > { %v1967_v13 = vpop.f32.mrf.mxu1 }
 0x184   : > { %v8784_v55 = vadd.f32 %v6200_v15, %v2058_v27  ;;  %v2056_v21 = vadd.f32 %v1967_v13, %v9413_v19  ;;  %v2706_v20 = vpop.f32.mrf.mxu0 }
 0x185   : > { %v6169_v4 = vpop.f32.mrf.mxu1 }
 0x186   : > { %v8787_v7 = vadd.f32 %v2693_v5, %v2056_v21  ;;  %v2061_v9 = vadd.f32 %v6169_v4, %v8647_v57  ;;  %v6204_v48 = vpop.f32.mrf.mxu0 }
 0x187   : > { %v1980_v53 = vpop.f32.mrf.mxu1 }
 0x188   : > { %v8790_v42 = vadd.f32 %v6203_v58, %v2061_v9  ;;  %v2059_v22 = vadd.f32 %v1980_v53, %v8650_v23  ;;  %v2709_v47 = vpop.f32.mrf.mxu0 }
 0x189   : > { %v6170_v2 = vpop.f32.mrf.mxu1 }
 0x18a   : > { %v8793_v34 = vadd.f32 %v2706_v20, %v2059_v22  ;;  %v2062_v62 = vadd.f32 %v6170_v2, %v8670_v14  ;;  %v6207_v49 = vpop.f32.mrf.mxu0 }
 0x18b   : > { %v1983_v56 = vpop.f32.mrf.mxu1 }
 0x18c   : > { %v8796_v36 = vadd.f32 %v6204_v48, %v2062_v62  ;;  %v2060_v16 = vadd.f32 %v1983_v56, %v8685_v11  ;;  %v2722_v6 = vpop.f32.mrf.mxu0 }
 0x18d   : > { %v6173_v57 = vpop.f32.mrf.mxu1 }
 0x18e   : > { %9414 = vst [vmem:[#allocation11_spill] sm:$0xff] %v8796_v36  ;;  %v8799_v61 = vadd.f32 %v2709_v47, %v2060_v16  ;;  %v2065_v43 = vadd.f32 %v6173_v57, %v8691_v54  ;;  %v6208_v40 = vpop.f32.mrf.mxu0 }
 0x18f   : > { %v1996_v23 = vpop.f32.mrf.mxu1 }
 0x190   : > { %9415 = vst [vmem:[#allocation2_spill] sm:$0xff] %v8799_v61  ;;  %v8802_v0 = vadd.f32 %v6207_v49, %v2065_v43  ;;  %v2063_v24 = vadd.f32 %v1996_v23, %v8694_v44  ;;  %v2725_v15 = vpop.f32.mrf.mxu0 }
 0x191   : > { %v6174_v14 = vpop.f32.mrf.mxu1 }
 0x192   : > { %9416 = vst [vmem:[#allocation19_spill] sm:$0xff] %v8802_v0  ;;  %v8805_v28 = vadd.f32 %v2722_v6, %v2063_v24  ;;  %v2066_v3 = vadd.f32 %v6174_v14, %v8703_v33  ;;  %v6211_v5 = vpop.f32.mrf.mxu0 }
 0x193   : > { %v1999_v11 = vpop.f32.mrf.mxu1 }
 0x194   : > { %9417 = vst [vmem:[#allocation14_spill] sm:$0xff] %v8805_v28  ;;  %v8808_v46 = vadd.f32 %v6208_v40, %v2066_v3  ;;  %v2064_v52 = vadd.f32 %v1999_v11, %v8710_v35  ;;  %v2738_v27 = vpop.f32.mrf.mxu0 }
 0x195   : > { %v6177_v54 = vpop.f32.mrf.mxu1 }
 0x196   : > { %9418 = vst [vmem:[#allocation18_spill] sm:$0xff] %v8808_v46  ;;  %v8811_v58 = vadd.f32 %v2725_v15, %v2064_v52  ;;  %v2069_v13 = vadd.f32 %v6177_v54, %v8716_v50  ;;  %v6212_v19 = vpop.f32.mrf.mxu0 }
 0x197   : > { %v2012_v44 = vpop.f32.mrf.mxu1 }
 0x198   : > { %v8814_v21 = vadd.f32 %v6211_v5, %v2069_v13  ;;  %v2067_v20 = vadd.f32 %v2012_v44, %v8719_v59  ;;  %v2741_v4 = vpop.f32.mrf.mxu0 }
 0x199   : > { %v6178_v33 = vpop.f32.mrf.mxu1 }
 0x19a   : > { %9419 = vst [vmem:[#allocation21_spill] sm:$0xff] %v8814_v21  ;;  %v8817_v9 = vadd.f32 %v2738_v27, %v2067_v20  ;;  %v2070_v48 = vadd.f32 %v6178_v33, %v8723_v32  ;;  %v6215_v53 = vpop.f32.mrf.mxu0 }
 0x19b   : > { %v2015_v35 = vpop.f32.mrf.mxu1 }
 0x19c   : > { %9420 = vst [vmem:[#allocation23_spill] sm:$0xff] %v8817_v9  ;;  %v8820_v22 = vadd.f32 %v6212_v19, %v2070_v48  ;;  %v2068_v47 = vadd.f32 %v2015_v35, %v8727_v8  ;;  %v2754_v2 = vpop.f32.mrf.mxu0 }
 0x19d   : > { %v6181_v50 = vpop.f32.mrf.mxu1 }
 0x19e   : > { %9421 = vst [vmem:[#allocation25_spill] sm:$0xff] %v8820_v22  ;;  %v8823_v62 = vadd.f32 %v2741_v4, %v2068_v47  ;;  %v2073_v49 = vadd.f32 %v6181_v50, %v8730_v12  ;;  %v6216_v56 = vpop.f32.mrf.mxu0 }
 0x19f   : > { %v2028_v59 = vpop.f32.mrf.mxu1 }
 0x1a0   : > { %9422 = vst [vmem:[#allocation5_spill] sm:$0xff] %v8823_v62  ;;  %v8826_v16 = vadd.f32 %v6215_v53, %v2073_v49  ;;  %v2071_v6 = vadd.f32 %v2028_v59, %v8733_v37  ;;  %v2757_v57 = vpop.f32.mrf.mxu0 }
 0x1a1   : > { %v6182_v32 = vpop.f32.mrf.mxu1 }
 0x1a2   : > { %9423 = vst [vmem:[#allocation6_spill] sm:$0xff] %v8826_v16  ;;  %v8829_v43 = vadd.f32 %v2754_v2, %v2071_v6  ;;  %v2074_v40 = vadd.f32 %v6182_v32, %v8736_v39  ;;  %v8832_v23 = vpop.f32.mrf.mxu0 }
 0x1a3   : > { %v2031_v8 = vpop.f32.mrf.mxu1 }
 0x1a4   : > { %9424 = vst [vmem:[#allocation7_spill] sm:$0xff] %v8829_v43  ;;  %v8834_v24 = vadd.f32 %v6216_v56, %v2074_v40  ;;  %v2072_v15 = vadd.f32 %v2031_v8, %v8739_v29  ;;  %v8837_v12 = vpop.f32.mrf.mxu0 }
 0x1a5   : > { %v6221_v14 = vpop.f32.mrf.mxu1 }
 0x1a6   : > { %v8839_v3 = vadd.f32 %v2757_v57, %v2072_v15  ;;  %v8841_v5 = vpop.f32.mrf.mxu0 }
 0x1a7   : > { %v3112_v37 = vpop.f32.mrf.mxu1 }
 0x1a8   : > { %9425 = vst [vmem:[#allocation8_spill] sm:$0xff] %v8839_v3  ;;  %v8843_v11 = vpop.f32.mrf.mxu0 }
 0x1a9   : > { %v6222_v52 = vpop.f32.mrf.mxu1 }
 0x1aa   : > { %v8845_v27 = vpop.f32.mrf.mxu0 }
 0x1ab   : > { %v3115_v39 = vpop.f32.mrf.mxu1 }
 0x1ac   : > { %v8847_v54 = vpop.f32.mrf.mxu0 }
 0x1ad   : > { %v6225_v13 = vpop.f32.mrf.mxu1 }
 0x1ae   : > { %v8849_v19 = vpop.f32.mrf.mxu0 }
 0x1af   : > { %v3128_v29 = vpop.f32.mrf.mxu1 }
 0x1b0   : > { %v8851_v44 = vpop.f32.mrf.mxu0 }
 0x1b1   : > { %v6226_v20 = vpop.f32.mrf.mxu1 }
 0x1b2   : > { %v8853_v4 = vpop.f32.mrf.mxu0 }
 0x1b3   : > { %v3131_v33 = vpop.f32.mrf.mxu1 }
 0x1b4   : > { %v8855_v48 = vpop.f32.mrf.mxu0 }
 0x1b5   : > { %v6229_v53 = vpop.f32.mrf.mxu1 }
 0x1b6   : > { %v8857_v35 = vpop.f32.mrf.mxu0 }
 0x1b7   : > { %v3144_v47 = vpop.f32.mrf.mxu1 }
 0x1b8   : > { %v8859_v2 = vpop.f32.mrf.mxu0 }
 0x1b9   : > { %v6230_v50 = vpop.f32.mrf.mxu1 }
 0x1ba   : > { %v8861_v49 = vpop.f32.mrf.mxu0 }
 0x1bb   : > { %v3147_v56 = vpop.f32.mrf.mxu1 }
 0x1bc   : > { %v8863_v59 = vpop.f32.mrf.mxu0 }
 0x1bd   : > { %v6233_v6 = vpop.f32.mrf.mxu1 }
 0x1be   : > { %v8865_v57 = vpop.f32.mrf.mxu0 }
 0x1bf   : > { %9426 = vst [vmem:[#allocation9_spill] sm:$0xff] %v8865_v57  ;;  %v3160_v32 = vpop.f32.mrf.mxu1 }
 0x1c0   : > { %v8867_v40 = vpop.f32.mrf.mxu0 }
 0x1c1   : > { %9427 = vst [vmem:[#allocation12_spill] sm:$0xff] %v8867_v40  ;;  %v6234_v8 = vpop.f32.mrf.mxu1 }
 0x1c2   : > { %v8869_v15 = vpop.f32.mrf.mxu0 }
 0x1c3   : > { %9428 = vst [vmem:[#allocation4_spill] sm:$0xff] %v8869_v15  ;;  %v3163_v3 = vpop.f32.mrf.mxu1 }
 0x1c4   : > { %v8871_v43 = vpop.f32.mrf.mxu0 }
 0x1c5   : > { %9429 = vst [vmem:[#allocation13_spill] sm:$0xff] %v8871_v43  ;;  %v6237_v16 = vpop.f32.mrf.mxu1 }
 0x1c6   : > { %v8873_v62 = vpop.f32.mrf.mxu0 }
 0x1c7   : > { %9430 = vst [vmem:[#allocation17_spill] sm:$0xff] %v8873_v62  ;;  %v8875_v22 = vpop.f32.mrf.mxu1 }
 0x1c8   : > { %v8877_v9 = vpop.f32.mrf.mxu0 }
 0x1c9   : > { %9431 = vst [vmem:[#allocation20_spill] sm:$0xff] %v8877_v9  ;;  %v8879_v21 = vpop.f32.mrf.mxu1 }
 0x1ca   : > { %9432 = vst [vmem:[#allocation22_spill] sm:$0xff] %v8879_v21  ;;  %v8881_v46 = vpop.f32.mrf.mxu0 }
 0x1cb   : > { %9433 = vst [vmem:[#allocation24_spill] sm:$0xff] %v8881_v46  ;;  %v8883_v28 = vpop.f32.mrf.mxu1 }
 0x1cc   : > { %9434 = vst [vmem:[#allocation15_spill] sm:$0xff] %v8883_v28  ;;  %v8885_v0 = vpop.f32.mrf.mxu0 }
 0x1cd   : > { %9435 = vst [vmem:[#allocation3_spill] sm:$0xff] %v8885_v0  ;;  %v8887_v40 = vpop.f32.mrf.mxu1 }
 0x1ce   : > { %9436 = vst [vmem:[#allocation16_spill] sm:$0xff] %v8887_v40  ;;  %v8889_v15 = vpop.f32.mrf.mxu0 }
 0x1cf   : > { %9437 = vst [vmem:[#allocation10_spill] sm:$0xff] %v8889_v15  ;;  %v8891_v43 = vpop.f32.mrf.mxu1 }
 0x1d0   : > { %9438 = vst [vmem:[#allocation26_spill] sm:$0xff] %v8891_v43  ;;  %v3554_v61 = vpop.f32.mrf.mxu0 }
 0x1d1   : > { %v8893_v62 = vpop.f32.mrf.mxu1 }
 0x1d2   : > { %9439 = vst [vmem:[#allocation27_spill] sm:$0xff] %v8893_v62  ;;  %v8895_v36 = vpop.f32.mrf.mxu0 }
 0x1d3   : > { %9440 = vst [vmem:[#allocation28_spill] sm:$0xff] %v8895_v36  ;;  %v3195_v9 = vpop.f32.mrf.mxu1 }
 0x1d4   : > { %v3260_v21 = vadd.f32 %v3195_v9, %v8811_v58  ;;  %v8898_v57 = vpop.f32.mrf.mxu0  ;;  %v3241_v58 = vadd.f32 %v6221_v14, %v8742_v17  ;;  %v3239_v9 = vadd.f32 %v3112_v37, %v8745_v63  ;;  %v3244_v37 = vadd.f32 %v3131_v33, %v8763_v41 }
 0x1d5   : > { %9441 = vst [vmem:[#allocation29_spill] sm:$0xff] %v8898_v57  ;;  %v8900_v46 = vpop.f32.mrf.mxu1  ;;  %v3242_v57 = vadd.f32 %v6222_v52, %v8748_v10  ;;  %v3246_v10 = vadd.f32 %v6226_v20, %v8760_v1  ;;  %v9449_v20 = vld [vmem:[#allocation11_spill] sm:$0xff] }
 0x1d6   : > { %v8902_v28 = vadd.f32 %v3554_v61, %v3260_v21  ;;  %v8904_v0 = vpop.f32.mrf.mxu0  ;;  %v3598_v17 = vadd.f32 %v8837_v12, %v3239_v9  ;;  %v3253_v12 = vadd.f32 %v6233_v6, %v8778_v26  ;;  %v3257_v26 = vadd.f32 %v6237_v16, %v8790_v42  ;;  %v9455_v6 = vld [vmem:[#allocation19_spill] sm:$0xff]  ;;  %v9459_v9 = vld [vmem:[#allocation18_spill] sm:$0xff] }
 0x1d7   : > { %9443 = vst [vmem:[#allocation31_spill] sm:$0xff] %v8904_v0  ;;  %v8906_v40 = vpop.f32.mrf.mxu1  ;;  %v3601_v63 = vadd.f32 %v8841_v5, %v3242_v57  ;;  %v9456_v57 = vld [vmem:[#allocation16_spill] sm:$0xff] }
 0x1d8   : > { %9442 = vst [vmem:[#allocation30_spill] sm:$0xff] %v8902_v28  ;;  %v8908_v15 = vpop.f32.mrf.mxu0  ;;  %v3240_v28 = vadd.f32 %v3115_v39, %v8751_v18  ;;  %v3249_v18 = vadd.f32 %v6229_v53, %v8766_v30  ;;  %v3251_v30 = vadd.f32 %v3160_v32, %v8781_v51  ;;  %v8975_v42 = vadd.f32 %v8861_v49, %v3253_v12  ;;  %v9452_v53 = vld [vmem:[#allocation15_spill] sm:$0xff] }
 0x1d9   : > { %9444 = vst [vmem:[#allocation32_spill] sm:$0xff] %v8908_v15  ;;  %v8910_v43 = vpop.f32.mrf.mxu1  ;;  %v3245_v15 = vadd.f32 %v6225_v13, %v8754_v25  ;;  %v3247_v25 = vadd.f32 %v3144_v47, %v8769_v31  ;;  %v3254_v31 = vadd.f32 %v6234_v8, %v8784_v55  ;;  %v8992_v47 = vld [vmem:[%s9237_s2] ss:$0 sm:$0xff]  ;;  %v3261_v32 = vadd.f32 %v9456_v57, %v9455_v6 }
 0x1da   : > { %9445 = vst [vmem:[#allocation33_spill] sm:$0xff] %v8910_v43  ;;  %v8912_v62 = vpop.f32.mrf.mxu0  ;;  %v3243_v43 = vadd.f32 %v3128_v29, %v8757_v38  ;;  %v3250_v38 = vadd.f32 %v6230_v50, %v8772_v45  ;;  %v3599_v39 = vadd.f32 %v8843_v11, %v3240_v28  ;;  %v8953_v28 = vadd.f32 %v8849_v19, %v3246_v10  ;;  %v9448_v29 = vld [vmem:[#allocation9_spill] sm:$0xff]  ;;  %v9457_v8 = vld [vmem:[#allocation14_spill] sm:$0xff]  ;;  %v9460_v10 = vld [vmem:[#allocation27_spill] sm:$0xff] }
 0x1db   : > { %9446 = vst [vmem:[#allocation34_spill] sm:$0xff] %v8912_v62  ;;  %v8914_v36 = vpop.f32.mrf.mxu1  ;;  %v8943_v13 = vadd.f32 %v8845_v27, %v3245_v15  ;;  %v8960_v27 = vadd.f32 %v8851_v44, %v3244_v37  ;;  %v8966_v51 = vadd.f32 %v8855_v48, %v3247_v25  ;;  %v8980_v19 = vadd.f32 %v8863_v59, %v3251_v30  ;;  %v9451_v48 = vld [vmem:[#allocation2_spill] sm:$0xff] }
 0x1dc   : > { %9447 = vst [vmem:[#allocation35_spill] sm:$0xff] %v8914_v36  ;;  %v8919_v61 = vpop.f32.mrf.mxu0  ;;  %v3600_v36 = vadd.f32 %v8832_v23, %v3241_v58  ;;  %v3248_v23 = vadd.f32 %v3147_v56, %v8775_v60  ;;  %v8946_v41 = vadd.f32 %v8847_v54, %v3243_v43  ;;  %v3252_v60 = vadd.f32 %v3163_v3, %v8787_v7  ;;  %v9458_v15 = vld [vmem:[#allocation26_spill] sm:$0xff] }
 0x1dd   : > { %v8921_v21 = vpop.f32.mrf.mxu1  ;;  %v8963_v43 = vadd.f32 %v8853_v4, %v3249_v18  ;;  %v8969_v55 = vadd.f32 %v8857_v35, %v3250_v38  ;;  %v8983_v44 = vadd.f32 %v9448_v29, %v3254_v31  ;;  %v9450_v4 = vld [vmem:[#allocation22_spill] sm:$0xff]  ;;  %v3256_v35 = vadd.f32 %v9452_v53, %v9451_v48  ;;  %v9461_v18 = vld [vmem:[#allocation21_spill] sm:$0xff] }
 0x1de   : > { %v6284_v0 = vpop.f32.mrf.mxu0  ;;  %v8972_v7 = vadd.f32 %v8859_v2, %v3248_v23  ;;  %v3258_v33 = vadd.f32 %v9450_v4, %v9449_v20  ;;  %v9454_v2 = vld [vmem:[#allocation4_spill] sm:$0xff]  ;;  %v3259_v58 = vadd.f32 %v9458_v15, %v9457_v8  ;;  %v3262_v37 = vadd.f32 %v9460_v10, %v9459_v9  ;;  %v9011_v38 = vld [vmem:[%s9238_s3] ss:$0 sm:$0xff]  ;;  %v9463_v31 = vld [vmem:[#allocation17_spill] sm:$0xff] }
 0x1df   : > { %v8926_v62 = vpop.f32.mrf.mxu1  ;;  %v8998_v50 = vadd.f32 %v9454_v2, %v3257_v26  ;;  %v3265_v25 = vadd.f32 %v8900_v46, %v9461_v18  ;;  %v9464_v26 = vld [vmem:[#allocation20_spill] sm:$0xff]  ;;  %v9466_v29 = vld [vmem:[#allocation25_spill] sm:$0xff]  ;;  %v9469_v2 = vld [vmem:[#allocation3_spill] sm:$0xff] }
 0x1e0   : > { %v8932_v14 = vpop.f32.mrf.mxu0  ;;  %v9021_v46 = vadd.f32 %v9464_v26, %v3256_v35  ;;  %v9033_v35 = vadd.f32 %v9469_v2, %v3259_v58  ;;  %v9473_v58 = vld [vmem:[#allocation31_spill] sm:$0xff] }
 0x1e1   : > { %v6250_v52 = vpop.f32.mrf.mxu1  ;;  %v9467_v20 = vld [vmem:[#allocation33_spill] sm:$0xff] }
 0x1e2   : > { %v3270_v5 = vadd.f32 %v6250_v52, %v8834_v24  ;;  %v6323_v1 = vpop.f32.mrf.mxu0  ;;  %v3266_v4 = vadd.f32 %v9467_v20, %v9466_v29 }
 0x1e3   : > { %v8950_v45 = vpop.f32.mrf.mxu1 }
 0x1e4   : > { %v8957_v24 = vadd.f32 %v6284_v0, %v3270_v5  ;;  %v4667_v11 = vpop.f32.mrf.mxu0  ;;  %v3255_v0 = vadd.f32 %v8875_v22, %v8793_v34  ;;  %v9048_v10 = vadd.f32 %v9473_v58, %v3266_v4 }
 0x1e5   : > { %v6289_v54 = vpop.f32.mrf.mxu1 }
 0x1e6   : > { %v4326_v16 = vadd.f32 %v6289_v54, %v3600_v36  ;;  %v6324_v3 = vpop.f32.mrf.mxu0  ;;  %v9453_v36 = vld [vmem:[#allocation12_spill] sm:$0xff]  ;;  %v9465_v54 = vld [vmem:[#allocation23_spill] sm:$0xff] }
 0x1e7   : > { %v4197_v34 = vpop.f32.mrf.mxu1  ;;  %v8995_v22 = vadd.f32 %v9453_v36, %v3252_v60  ;;  %v9018_v60 = vadd.f32 %v9463_v31, %v3258_v33  ;;  %v9468_v36 = vld [vmem:[#allocation24_spill] sm:$0xff] }
 0x1e8   : > { %v4796_v49 = vadd.f32 %v6323_v1, %v4326_v16  ;;  %v4324_v56 = vadd.f32 %v4197_v34, %v3598_v17  ;;  %v4670_v59 = vpop.f32.mrf.mxu0  ;;  %v9462_v17 = vld [vmem:[#allocation13_spill] sm:$0xff]  ;;  %v3263_v16 = vadd.f32 %v8906_v40, %v9465_v54  ;;  %v9030_v33 = vadd.f32 %v9468_v36, %v3261_v32  ;;  %v9471_v40 = vld [vmem:[#allocation28_spill] sm:$0xff] }
 0x1e9   : > { %v6290_v52 = vpop.f32.mrf.mxu1  ;;  %v9014_v23 = vadd.f32 %v9462_v17, %v3255_v0  ;;  %v9039_v6 = vadd.f32 %v9471_v40, %v3265_v25  ;;  %v9472_v32 = vld [vmem:[#allocation29_spill] sm:$0xff] }
 0x1ea   : > { %v4835_v12 = vmul.f32 %v8992_v47, %v4796_v49  ;;  %v4794_v5 = vadd.f32 %v4667_v11, %v4324_v56  ;;  %v4327_v1 = vadd.f32 %v6290_v52, %v3601_v63  ;;  %v6327_v30 = vpop.f32.mrf.mxu0  ;;  %v9470_v49 = vld [vmem:[#allocation10_spill] sm:$0xff]  ;;  %v9045_v9 = vadd.f32 %v9472_v32, %v3263_v16 }
 0x1eb   : > { %v4200_v0 = vpop.f32.mrf.mxu1  ;;  %v9036_v56 = vadd.f32 %v9470_v49, %v3262_v37 }
 0x1ec   : > { %v4874_v48 = vadd.f32 %v9011_v38, %v4835_v12  ;;  %v4833_v11 = vmul.f32 %v8992_v47, %v4794_v5  ;;  %v4797_v63 = vadd.f32 %v6324_v3, %v4327_v1  ;;  %v4325_v53 = vadd.f32 %v4200_v0, %v3599_v39  ;;  %v4683_v34 = vpop.f32.mrf.mxu0 }
 0x1ed   : > { %v6293_v57 = vpop.f32.mrf.mxu1 }
 0x1ee   : > { %vm4906_vm10 = vcmp.ge.f32.partialorder %v4874_v48, 0.0  ;;  %v4938_v8 = vmul.f32 0.2, %v4874_v48  ;;  %v4872_v3 = vadd.f32 %v9011_v38, %v4833_v11  ;;  %v4836_v39 = vmul.f32 %v8992_v47, %v4797_v63  ;;  %v6328_v15 = vpop.f32.mrf.mxu0 }
 0x1ef   : > { %v4795_v37 = vadd.f32 %v4670_v59, %v4325_v53  ;;  %v4330_v18 = vadd.f32 %v6293_v57, %v8943_v13  ;;  %v4213_v25 = vpop.f32.mrf.mxu1  ;;  %v9475_v53 = vld [vmem:[#allocation35_spill] sm:$0xff] }
 0x1f0   : > { %v4970_v52 = vsel %vm4906_vm10, %v4874_v48, %v4938_v8  ;;  %vm4904_vm11 = vcmp.ge.f32.partialorder %v4872_v3, 0.0  ;;  %v4936_v17 = vmul.f32 0.2, %v4872_v3  ;;  %v4875_v12 = vadd.f32 %v9011_v38, %v4836_v39  ;;  %v4686_v5 = vpop.f32.mrf.mxu0 }
 0x1f1   : > { %v5864_v1 = vpack.c.bf16 %v4970_v52, %v4970_v52  ;;  %v4834_v31 = vmul.f32 %v8992_v47, %v4795_v37  ;;  %v4800_v26 = vadd.f32 %v6327_v30, %v4330_v18  ;;  %v4328_v59 = vadd.f32 %v4213_v25, %v8946_v41  ;;  %v6294_v13 = vpop.f32.mrf.mxu1  ;;  %v9474_v30 = vld [vmem:[#allocation5_spill] sm:$0xff] }
 0x1f2   : > { %v4968_v54 = vsel %vm4904_vm11, %v4872_v3, %v4936_v17  ;;  %vm4907_vm12 = vcmp.ge.f32.partialorder %v4875_v12, 0.0  ;;  %v4939_v16 = vmul.f32 0.2, %v4875_v12  ;;  %v4331_v29 = vadd.f32 %v6294_v13, %v8953_v28  ;;  %v6331_v20 = vpop.f32.mrf.mxu0 }
 0x1f3   : > { %5131 = vst.msk [vmem:[%s9054_s25 + $0x8] sm:$0xf] %vm5128_vm9, %v5864_v1  ;;  %v5862_v4 = vpack.c.bf16 %v4968_v54, %v4968_v54  ;;  %v4873_v0 = vadd.f32 %v9011_v38, %v4834_v31  ;;  %v4839_v48 = vmul.f32 %v8992_v47, %v4800_v26  ;;  %v4798_v11 = vadd.f32 %v4683_v34, %v4328_v59  ;;  %v4216_v63 = vpop.f32.mrf.mxu1 }
 0x1f4   : > { %v3264_v41 = vadd.f32 %v9475_v53, %v9474_v30  ;;  %v4971_v36 = vsel %vm4907_vm12, %v4875_v12, %v4939_v16  ;;  %v4801_v2 = vadd.f32 %v6328_v15, %v4331_v29  ;;  %v4329_v49 = vadd.f32 %v4216_v63, %v8960_v27  ;;  %v4699_v40 = vpop.f32.mrf.mxu0  ;;  %v9476_v15 = vld [vmem:[#allocation6_spill] sm:$0xff] }
 0x1f5   : > { %5129 = vst.msk [vmem:[%s9054_s25] sm:$0xf] %vm5128_vm9, %v5862_v4  ;;  %v5865_v28 = vpack.c.bf16 %v4971_v36, %v4971_v36  ;;  %vm4905_vm13 = vcmp.ge.f32.partialorder %v4873_v0, 0.0  ;;  %v4937_v57 = vmul.f32 0.2, %v4873_v0  ;;  %v4878_v8 = vadd.f32 %v9011_v38, %v4839_v48  ;;  %v6297_v3 = vpop.f32.mrf.mxu1  ;;  %v9478_v53 = vld [vmem:[#allocation34_spill] sm:$0xff] }
 0x1f6   : > { %v4837_v34 = vmul.f32 %v8992_v47, %v4798_v11  ;;  %v4840_v39 = vmul.f32 %v8992_v47, %v4801_v2  ;;  %v4799_v32 = vadd.f32 %v4686_v5, %v4329_v49  ;;  %v4334_v58 = vadd.f32 %v6297_v3, %v8963_v43  ;;  %v6332_v37 = vpop.f32.mrf.mxu0  ;;  %v9477_v43 = vld [vmem:[#allocation32_spill] sm:$0xff] }
 0x1f7   : > { %v3269_v27 = vadd.f32 %v8921_v21, %v9476_v15  ;;  %5132 = vst.msk [vmem:[%s9054_s25 + $0xc] sm:$0xf] %vm5128_vm9, %v5865_v28  ;;  %v4969_v18 = vsel %vm4905_vm13, %v4873_v0, %v4937_v57  ;;  %vm4910_vm14 = vcmp.ge.f32.partialorder %v4878_v8, 0.0  ;;  %v4942_v25 = vmul.f32 0.2, %v4878_v8  ;;  %v4229_v52 = vpop.f32.mrf.mxu1 }
 0x1f8   : > { %v5863_v17 = vpack.c.bf16 %v4969_v18, %v4969_v18  ;;  %v4876_v12 = vadd.f32 %v9011_v38, %v4837_v34  ;;  %v4879_v1 = vadd.f32 %v9011_v38, %v4840_v39  ;;  %v4838_v5 = vmul.f32 %v8992_v47, %v4799_v32  ;;  %v4702_v31 = vpop.f32.mrf.mxu0 }
 0x1f9   : > { %v9081_v26 = vadd.f32 %v9477_v43, %v3264_v41  ;;  %v4974_v59 = vsel %vm4910_vm14, %v4878_v8, %v4942_v25  ;;  %v4804_v21 = vadd.f32 %v6331_v20, %v4334_v58  ;;  %v4332_v13 = vadd.f32 %v4229_v52, %v8966_v51  ;;  %v6298_v54 = vpop.f32.mrf.mxu1  ;;  %v9479_v58 = vld [vmem:[#allocation7_spill] sm:$0xff] }
 0x1fa   : > { %5130 = vst.msk [vmem:[%s9054_s25 + $0x4] sm:$0xf] %vm5128_vm9, %v5863_v17  ;;  %v5868_v16 = vpack.c.bf16 %v4974_v59, %v4974_v59  ;;  %vm4908_vm15 = vcmp.ge.f32.partialorder %v4876_v12, 0.0  ;;  %v4940_v29 = vmul.f32 0.2, %v4876_v12  ;;  %vm4911_vm0 = vcmp.ge.f32.partialorder %v4879_v1, 0.0  ;;  %v6335_v4 = vpop.f32.mrf.mxu0 }
 0x1fb   : > { %v4943_v0 = vmul.f32 0.2, %v4879_v1  ;;  %v4877_v48 = vadd.f32 %v9011_v38, %v4838_v5  ;;  %v4843_v11 = vmul.f32 %v8992_v47, %v4804_v21  ;;  %v4802_v63 = vadd.f32 %v4699_v40, %v4332_v13  ;;  %v4232_v30 = vpop.f32.mrf.mxu1 }
 0x1fc   : > { %v9089_v41 = vadd.f32 %v9478_v53, %v3269_v27  ;;  %5135 = vst.msk [vmem:[%s9054_s25 + $0x18] sm:$0xf] %vm5128_vm9, %v5868_v16  ;;  %v4972_v51 = vsel %vm4908_vm15, %v4876_v12, %v4940_v29  ;;  %v4335_v20 = vadd.f32 %v6298_v54, %v8969_v55  ;;  %v4333_v36 = vadd.f32 %v4232_v30, %v8972_v7  ;;  %v4715_v2 = vpop.f32.mrf.mxu0 }
 0x1fd   : > { %v5866_v49 = vpack.c.bf16 %v4972_v51, %v4972_v51  ;;  %v4975_v28 = vsel %vm4911_vm0, %v4879_v1, %v4943_v0  ;;  %vm4909_vm1 = vcmp.ge.f32.partialorder %v4877_v48, 0.0  ;;  %v4941_v57 = vmul.f32 0.2, %v4877_v48  ;;  %v6301_v8 = vpop.f32.mrf.mxu1 }
 0x1fe   : > { %v5869_v40 = vpack.c.bf16 %v4975_v28, %v4975_v28  ;;  %v4882_v3 = vadd.f32 %v9011_v38, %v4843_v11  ;;  %v4841_v34 = vmul.f32 %v8992_v47, %v4802_v63  ;;  %v4805_v39 = vadd.f32 %v6332_v37, %v4335_v20  ;;  %v6336_v32 = vpop.f32.mrf.mxu0 }
 0x1ff   : > { %v3267_v15 = vadd.f32 %v8926_v62, %v9479_v58  ;;  %5133 = vst.msk [vmem:[%s9054_s25 + $0x10] sm:$0xf] %vm5128_vm9, %v5866_v49  ;;  %v4973_v55 = vsel %vm4909_vm1, %v4877_v48, %v4941_v57  ;;  %v4803_v7 = vadd.f32 %v4702_v31, %v4333_v36  ;;  %v4338_v27 = vadd.f32 %v6301_v8, %v8975_v42  ;;  %v4245_v18 = vpop.f32.mrf.mxu1 }
 0x200   : > { %5136 = vst.msk [vmem:[%s9054_s25 + $0x1c] sm:$0xf] %vm5128_vm9, %v5869_v40  ;;  %v5867_v25 = vpack.c.bf16 %v4973_v55, %v4973_v55  ;;  %vm4914_vm2 = vcmp.ge.f32.partialorder %v4882_v3, 0.0  ;;  %v4946_v52 = vmul.f32 0.2, %v4882_v3  ;;  %v4880_v17 = vadd.f32 %v9011_v38, %v4841_v34  ;;  %v4718_v37 = vpop.f32.mrf.mxu0 }
 0x201   : > { %v4844_v12 = vmul.f32 %v8992_v47, %v4805_v39  ;;  %v4842_v62 = vmul.f32 %v8992_v47, %v4803_v7  ;;  %v4808_v1 = vadd.f32 %v6335_v4, %v4338_v27  ;;  %v4336_v5 = vadd.f32 %v4245_v18, %v8980_v19  ;;  %v6302_v43 = vpop.f32.mrf.mxu1 }
 0x202   : > { %5134 = vst.msk [vmem:[%s9054_s25 + $0x14] sm:$0xf] %vm5128_vm9, %v5867_v25  ;;  %v4978_v42 = vsel %vm4914_vm2, %v4882_v3, %v4946_v52  ;;  %vm4912_vm3 = vcmp.ge.f32.partialorder %v4880_v17, 0.0  ;;  %v4944_v31 = vmul.f32 0.2, %v4880_v17  ;;  %v4339_v59 = vadd.f32 %v6302_v43, %v8983_v44  ;;  %v6339_v21 = vpop.f32.mrf.mxu0 }
 0x203   : > { %v5872_v13 = vpack.c.bf16 %v4978_v42, %v4978_v42  ;;  %v4883_v54 = vadd.f32 %v9011_v38, %v4844_v12  ;;  %v4881_v16 = vadd.f32 %v9011_v38, %v4842_v62  ;;  %v4847_v29 = vmul.f32 %v8992_v47, %v4808_v1  ;;  %v4248_v4 = vpop.f32.mrf.mxu1 }
 0x204   : > { %v4976_v0 = vsel %vm4912_vm3, %v4880_v17, %v4944_v31  ;;  %v4806_v19 = vadd.f32 %v4715_v2, %v4336_v5  ;;  %v4809_v48 = vadd.f32 %v6336_v32, %v4339_v59  ;;  %v4337_v11 = vadd.f32 %v4248_v4, %v8995_v22  ;;  %v4731_v63 = vpop.f32.mrf.mxu0  ;;  %v9480_v31 = vld [vmem:[#allocation8_spill] sm:$0xff] }
 0x205   : > { %5139 = vst.msk [vmem:[%s9054_s25 + $0x28] sm:$0xf] %vm5128_vm9, %v5872_v13  ;;  %v5870_v30 = vpack.c.bf16 %v4976_v0, %v4976_v0  ;;  %vm4915_vm4 = vcmp.ge.f32.partialorder %v4883_v54, 0.0  ;;  %v4947_v44 = vmul.f32 0.2, %v4883_v54  ;;  %vm4913_vm5 = vcmp.ge.f32.partialorder %v4881_v16, 0.0  ;;  %v6305_v53 = vpop.f32.mrf.mxu1 }
 0x206   : > { %v4945_v51 = vmul.f32 0.2, %v4881_v16  ;;  %v4886_v20 = vadd.f32 %v9011_v38, %v4847_v29  ;;  %v4845_v36 = vmul.f32 %v8992_v47, %v4806_v19  ;;  %v4848_v49 = vmul.f32 %v8992_v47, %v4809_v48  ;;  %v6340_v2 = vpop.f32.mrf.mxu0 }
 0x207   : > { %v9121_v28 = vadd.f32 %v8919_v61, %v3267_v15  ;;  %5137 = vst.msk [vmem:[%s9054_s25 + $0x20] sm:$0xf] %vm5128_vm9, %v5870_v30  ;;  %v4979_v22 = vsel %vm4915_vm4, %v4883_v54, %v4947_v44  ;;  %v4807_v57 = vadd.f32 %v4718_v37, %v4337_v11  ;;  %v4342_v8 = vadd.f32 %v6305_v53, %v8998_v50  ;;  %v4261_v40 = vpop.f32.mrf.mxu1 }
 0x208   : > { %v5873_v3 = vpack.c.bf16 %v4979_v22, %v4979_v22  ;;  %v4977_v34 = vsel %vm4913_vm5, %v4881_v16, %v4945_v51  ;;  %vm4918_vm6 = vcmp.ge.f32.partialorder %v4886_v20, 0.0  ;;  %v4950_v39 = vmul.f32 0.2, %v4886_v20  ;;  %v4734_v32 = vpop.f32.mrf.mxu0 }
 0x209   : > { %v5871_v58 = vpack.c.bf16 %v4977_v34, %v4977_v34  ;;  %v4884_v55 = vadd.f32 %v9011_v38, %v4845_v36  ;;  %v4887_v61 = vadd.f32 %v9011_v38, %v4848_v49  ;;  %v4846_v15 = vmul.f32 %v8992_v47, %v4807_v57  ;;  %v6306_v7 = vpop.f32.mrf.mxu1 }
 0x20a   : > { %5140 = vst.msk [vmem:[%s9054_s25 + $0x2c] sm:$0xf] %vm5128_vm9, %v5873_v3  ;;  %v4982_v27 = vsel %vm4918_vm6, %v4886_v20, %v4950_v39  ;;  %v4812_v18 = vadd.f32 %v6339_v21, %v4342_v8  ;;  %v4340_v50 = vadd.f32 %v4261_v40, %v9014_v23  ;;  %v4343_v25 = vadd.f32 %v6306_v7, %v9018_v60 }
 0x20b   : > { %v6343_v52 = vpop.f32.mrf.mxu0  ;;  %5138 = vst.msk [vmem:[%s9054_s25 + $0x24] sm:$0xf] %vm5128_vm9, %v5871_v58  ;;  %v5876_v17 = vpack.c.bf16 %v4982_v27, %v4982_v27  ;;  %vm4916_vm7 = vcmp.ge.f32.partialorder %v4884_v55, 0.0  ;;  %v4948_v37 = vmul.f32 0.2, %v4884_v55  ;;  %vm4919_vm8 = vcmp.ge.f32.partialorder %v4887_v61, 0.0  ;;  %v4264_v12 = vpop.f32.mrf.mxu1 }
 0x20c   : > { %v4951_v62 = vmul.f32 0.2, %v4887_v61  ;;  %v4885_v1 = vadd.f32 %v9011_v38, %v4846_v15  ;;  %v4851_v5 = vmul.f32 %v8992_v47, %v4812_v18  ;;  %v4810_v43 = vadd.f32 %v4731_v63, %v4340_v50 }
 0x20d   : > { %v4747_v42 = vpop.f32.mrf.mxu0  ;;  %v9139_v23 = vadd.f32 %v8950_v45, %v9480_v31  ;;  %5143 = vst.msk [vmem:[%s9054_s25 + $0x38] sm:$0xf] %vm5128_vm9, %v5876_v17  ;;  %v4980_v60 = vsel %vm4916_vm7, %v4884_v55, %v4948_v37  ;;  %v4813_v59 = vadd.f32 %v6340_v2, %v4343_v25  ;;  %v4341_v21 = vadd.f32 %v4264_v12, %v9021_v46  ;;  %v6309_v13 = vpop.f32.mrf.mxu1 }
 0x20e   : > { %v5874_v54 = vpack.c.bf16 %v4980_v60, %v4980_v60  ;;  %v4983_v16 = vsel %vm4919_vm8, %v4887_v61, %v4951_v62  ;;  %vm4917_vm10 = vcmp.ge.f32.partialorder %v4885_v1, 0.0  ;;  %v4949_v29 = vmul.f32 0.2, %v4885_v1 }
 0x20f   : > { %v6344_v4 = vpop.f32.mrf.mxu0  ;;  %v5877_v0 = vpack.c.bf16 %v4983_v16, %v4983_v16  ;;  %v4890_v19 = vadd.f32 %v9011_v38, %v4851_v5  ;;  %v4849_v45 = vmul.f32 %v8992_v47, %v4810_v43  ;;  %v4852_v48 = vmul.f32 %v8992_v47, %v4813_v59  ;;  %v4277_v11 = vpop.f32.mrf.mxu1  ;;  %v9481_v43 = vld [vmem:[#allocation30_spill] sm:$0xff] }
 0x210   : > { %5141 = vst.msk [vmem:[%s9054_s25 + $0x30] sm:$0xf] %vm5128_vm9, %v5874_v54  ;;  %v4981_v63 = vsel %vm4917_vm10, %v4885_v1, %v4949_v29  ;;  %v4811_v46 = vadd.f32 %v4734_v32, %v4341_v21  ;;  %v4346_v30 = vadd.f32 %v6309_v13, %v9030_v33  ;;  %v4344_v44 = vadd.f32 %v4277_v11, %v9033_v35 }
 0x211   : > { %v4750_v53 = vpop.f32.mrf.mxu0  ;;  %5144 = vst.msk [vmem:[%s9054_s25 + $0x3c] sm:$0xf] %vm5128_vm9, %v5877_v0  ;;  %v5875_v51 = vpack.c.bf16 %v4981_v63, %v4981_v63  ;;  %vm4922_vm11 = vcmp.ge.f32.partialorder %v4890_v19, 0.0  ;;  %v4954_v20 = vmul.f32 0.2, %v4890_v19  ;;  %v4888_v36 = vadd.f32 %v9011_v38, %v4849_v45  ;;  %v6310_v49 = vpop.f32.mrf.mxu1 }
 0x212   : > { %v4891_v2 = vadd.f32 %v9011_v38, %v4852_v48  ;;  %v4850_v22 = vmul.f32 %v8992_v47, %v4811_v46  ;;  %v4816_v57 = vadd.f32 %v6343_v52, %v4346_v30  ;;  %v4814_v8 = vadd.f32 %v4747_v42, %v4344_v44 }
 0x213   : > { %v6347_v40 = vpop.f32.mrf.mxu0  ;;  %5142 = vst.msk [vmem:[%s9054_s25 + $0x34] sm:$0xf] %vm5128_vm9, %v5875_v51  ;;  %v4986_v33 = vsel %vm4922_vm11, %v4890_v19, %v4954_v20  ;;  %vm4920_vm12 = vcmp.ge.f32.partialorder %v4888_v36, 0.0  ;;  %v4952_v35 = vmul.f32 0.2, %v4888_v36  ;;  %v4347_v3 = vadd.f32 %v6310_v49, %v9036_v56  ;;  %v4280_v34 = vpop.f32.mrf.mxu1 }
 0x214   : > { %v5880_v39 = vpack.c.bf16 %v4986_v33, %v4986_v33  ;;  %vm4923_vm13 = vcmp.ge.f32.partialorder %v4891_v2, 0.0  ;;  %v4955_v32 = vmul.f32 0.2, %v4891_v2  ;;  %v4889_v58 = vadd.f32 %v9011_v38, %v4850_v22 }
 0x215   : > { %v4763_v55 = vpop.f32.mrf.mxu0  ;;  %v4984_v61 = vsel %vm4920_vm12, %v4888_v36, %v4952_v35  ;;  %v4855_v15 = vmul.f32 %v8992_v47, %v4816_v57  ;;  %v4853_v7 = vmul.f32 %v8992_v47, %v4814_v8  ;;  %v4817_v27 = vadd.f32 %v6344_v4, %v4347_v3  ;;  %v6313_v18 = vpop.f32.mrf.mxu1 }
 0x216   : > { %5147 = vst.msk [vmem:[%s9054_s25 + $0x48] sm:$0xf] %vm5128_vm9, %v5880_v39  ;;  %v5878_v50 = vpack.c.bf16 %v4984_v61, %v4984_v61  ;;  %v4987_v56 = vsel %vm4923_vm13, %v4891_v2, %v4955_v32  ;;  %vm4921_vm14 = vcmp.ge.f32.partialorder %v4889_v58, 0.0  ;;  %v4953_v25 = vmul.f32 0.2, %v4889_v58 }
 0x217   : > { %v6348_v52 = vpop.f32.mrf.mxu0  ;;  %v5881_v17 = vpack.c.bf16 %v4987_v56, %v4987_v56  ;;  %v4894_v37 = vadd.f32 %v9011_v38, %v4855_v15  ;;  %v4892_v12 = vadd.f32 %v9011_v38, %v4853_v7  ;;  %v4856_v62 = vmul.f32 %v8992_v47, %v4817_v27  ;;  %v4293_v1 = vpop.f32.mrf.mxu1 }
 0x218   : > { %5145 = vst.msk [vmem:[%s9054_s25 + $0x40] sm:$0xf] %vm5128_vm9, %v5878_v50  ;;  %v4985_v5 = vsel %vm4921_vm14, %v4889_v58, %v4953_v25  ;;  %v4345_v42 = vadd.f32 %v4280_v34, %v9481_v43  ;;  %v4350_v31 = vadd.f32 %v6313_v18, %v9039_v6  ;;  %v4348_v60 = vadd.f32 %v4293_v1, %v9045_v9 }
 0x219   : > { %v4766_v59 = vpop.f32.mrf.mxu0  ;;  %5148 = vst.msk [vmem:[%s9054_s25 + $0x4c] sm:$0xf] %vm5128_vm9, %v5881_v17  ;;  %v5879_v21 = vpack.c.bf16 %v4985_v5, %v4985_v5  ;;  %vm4926_vm15 = vcmp.ge.f32.partialorder %v4894_v37, 0.0  ;;  %v4958_v13 = vmul.f32 0.2, %v4894_v37  ;;  %vm4924_vm0 = vcmp.ge.f32.partialorder %v4892_v12, 0.0  ;;  %v6314_v54 = vpop.f32.mrf.mxu1 }
 0x21a   : > { %v4956_v16 = vmul.f32 0.2, %v4892_v12  ;;  %v4895_v29 = vadd.f32 %v9011_v38, %v4856_v62  ;;  %v4815_v4 = vadd.f32 %v4750_v53, %v4345_v42  ;;  %v4820_v0 = vadd.f32 %v6347_v40, %v4350_v31 }
 0x21b   : > { %v3627_v19 = vadd.f32 %v8932_v14, %v9139_v23  ;;  %5146 = vst.msk [vmem:[%s9054_s25 + $0x44] sm:$0xf] %vm5128_vm9, %v5879_v21  ;;  %v4990_v6 = vsel %vm4926_vm15, %v4894_v37, %v4958_v13  ;;  %v4818_v9 = vadd.f32 %v4763_v55, %v4348_v60  ;;  %v4351_v45 = vadd.f32 %v6314_v54, %v9048_v10  ;;  %v4296_v48 = vpop.f32.mrf.mxu1  ;;  %v6351_v30 = vpop.f32.mrf.mxu0 }
 0x21c   : > { %v5884_v11 = vpack.c.bf16 %v4990_v6, %v4990_v6  ;;  %v4988_v63 = vsel %vm4924_vm0, %v4892_v12, %v4956_v16  ;;  %vm4927_vm1 = vcmp.ge.f32.partialorder %v4895_v29, 0.0  ;;  %v4959_v46 = vmul.f32 0.2, %v4895_v29 }
 0x21d   : > { %v5882_v44 = vpack.c.bf16 %v4988_v63, %v4988_v63  ;;  %v4854_v53 = vmul.f32 %v8992_v47, %v4815_v4  ;;  %v4859_v51 = vmul.f32 %v8992_v47, %v4820_v0  ;;  %v4857_v14 = vmul.f32 %v8992_v47, %v4818_v9  ;;  %v6317_v23 = vpop.f32.mrf.mxu1  ;;  %v4779_v39 = vpop.f32.mrf.mxu0 }
 0x21e   : > { %5151 = vst.msk [vmem:[%s9054_s25 + $0x58] sm:$0xf] %vm5128_vm9, %v5884_v11  ;;  %v4991_v20 = vsel %vm4927_vm1, %v4895_v29, %v4959_v46  ;;  %v4821_v10 = vadd.f32 %v6348_v52, %v4351_v45  ;;  %v4349_v36 = vadd.f32 %v4296_v48, %v9081_v26  ;;  %v4354_v49 = vadd.f32 %v6317_v23, %v9089_v41 }
 0x21f   : > { %5149 = vst.msk [vmem:[%s9054_s25 + $0x50] sm:$0xf] %vm5128_vm9, %v5882_v44  ;;  %v5885_v2 = vpack.c.bf16 %v4991_v20, %v4991_v20  ;;  %v4893_v22 = vadd.f32 %v9011_v38, %v4854_v53  ;;  %v4898_v57 = vadd.f32 %v9011_v38, %v4859_v51  ;;  %v4896_v8 = vadd.f32 %v9011_v38, %v4857_v14  ;;  %v4309_v40 = vpop.f32.mrf.mxu1  ;;  %v6352_v52 = vpop.f32.mrf.mxu0 }
 0x220   : > { %v4860_v33 = vmul.f32 %v8992_v47, %v4821_v10  ;;  %v4819_v35 = vadd.f32 %v4766_v59, %v4349_v36  ;;  %v4824_v3 = vadd.f32 %v6351_v30, %v4354_v49  ;;  %v4352_v34 = vadd.f32 %v4309_v40, %v9121_v28 }
 0x221   : > { %5152 = vst.msk [vmem:[%s9054_s25 + $0x5c] sm:$0xf] %vm5128_vm9, %v5885_v2  ;;  %vm4925_vm2 = vcmp.ge.f32.partialorder %v4893_v22, 0.0  ;;  %v4957_v26 = vmul.f32 0.2, %v4893_v22  ;;  %vm4930_vm3 = vcmp.ge.f32.partialorder %v4898_v57, 0.0  ;;  %v6318_v32 = vpop.f32.mrf.mxu1  ;;  %v4782_v54 = vpop.f32.mrf.mxu0 }
 0x222   : > { %v4962_v41 = vmul.f32 0.2, %v4898_v57  ;;  %vm4928_vm4 = vcmp.ge.f32.partialorder %v4896_v8, 0.0  ;;  %v4960_v58 = vmul.f32 0.2, %v4896_v8  ;;  %v4899_v55 = vadd.f32 %v9011_v38, %v4860_v33 }
 0x223   : > { %v4858_v61 = vmul.f32 %v8992_v47, %v4819_v35  ;;  %v4989_v15 = vsel %vm4925_vm2, %v4893_v22, %v4957_v26  ;;  %v4863_v28 = vmul.f32 %v8992_v47, %v4824_v3  ;;  %v4822_v27 = vadd.f32 %v4779_v39, %v4352_v34  ;;  %v4312_v18 = vpop.f32.mrf.mxu1 }
 0x224   : > { %v4994_v7 = vsel %vm4930_vm3, %v4898_v57, %v4962_v41  ;;  %v5883_v50 = vpack.c.bf16 %v4989_v15, %v4989_v15  ;;  %v4992_v25 = vsel %vm4928_vm4, %v4896_v8, %v4960_v58  ;;  %vm4931_vm5 = vcmp.ge.f32.partialorder %v4899_v55, 0.0 }
 0x225   : > { %v5888_v56 = vpack.c.bf16 %v4994_v7, %v4994_v7  ;;  %v5886_v17 = vpack.c.bf16 %v4992_v25, %v4992_v25  ;;  %v4963_v37 = vmul.f32 0.2, %v4899_v55  ;;  %v4897_v12 = vadd.f32 %v9011_v38, %v4858_v61 }
 0x226   : > { %v4902_v62 = vadd.f32 %v9011_v38, %v4863_v28  ;;  %5150 = vst.msk [vmem:[%s9054_s25 + $0x54] sm:$0xf] %vm5128_vm9, %v5883_v50  ;;  %v4861_v1 = vmul.f32 %v8992_v47, %v4822_v27  ;;  %v4355_v5 = vadd.f32 %v6318_v32, %v8957_v24  ;;  %v4353_v43 = vadd.f32 %v4312_v18, %v3627_v19 }
 0x227   : > { %5155 = vst.msk [vmem:[%s9054_s25 + $0x68] sm:$0xf] %vm5128_vm9, %v5888_v56  ;;  %5153 = vst.msk [vmem:[%s9054_s25 + $0x60] sm:$0xf] %vm5128_vm9, %v5886_v17  ;;  %v4995_v42 = vsel %vm4931_vm5, %v4899_v55, %v4963_v37  ;;  %vm4929_vm6 = vcmp.ge.f32.partialorder %v4897_v12, 0.0 }
 0x228   : > { %v4961_v31 = vmul.f32 0.2, %v4897_v12  ;;  %vm4934_vm7 = vcmp.ge.f32.partialorder %v4902_v62, 0.0  ;;  %v5889_v60 = vpack.c.bf16 %v4995_v42, %v4995_v42  ;;  %v4966_v59 = vmul.f32 0.2, %v4902_v62 }
 0x229   : > { %v4900_v21 = vadd.f32 %v9011_v38, %v4861_v1  ;;  %v4825_v13 = vadd.f32 %v6352_v52, %v4355_v5  ;;  %v4823_v29 = vadd.f32 %v4782_v54, %v4353_v43 }
 0x22a   : > { %v4993_v16 = vsel %vm4929_vm6, %v4897_v12, %v4961_v31  ;;  %5156 = vst.msk [vmem:[%s9054_s25 + $0x6c] sm:$0xf] %vm5128_vm9, %v5889_v60  ;;  %v4998_v4 = vsel %vm4934_vm7, %v4902_v62, %v4966_v59 }
 0x22b   : > { %v5887_v24 = vpack.c.bf16 %v4993_v16, %v4993_v16  ;;  %vm4932_vm8 = vcmp.ge.f32.partialorder %v4900_v21, 0.0  ;;  %v4964_v0 = vmul.f32 0.2, %v4900_v21  ;;  %v5892_v19 = vpack.c.bf16 %v4998_v4, %v4998_v4 }
 0x22c   : > { %v4864_v6 = vmul.f32 %v8992_v47, %v4825_v13  ;;  %v4862_v9 = vmul.f32 %v8992_v47, %v4823_v29 }
 0x22d   : > { %5154 = vst.msk [vmem:[%s9054_s25 + $0x64] sm:$0xf] %vm5128_vm9, %v5887_v24  ;;  %v4996_v45 = vsel %vm4932_vm8, %v4900_v21, %v4964_v0  ;;  %5159 = vst.msk [vmem:[%s9054_s25 + $0x78] sm:$0xf] %vm5128_vm9, %v5892_v19 }
 0x22e   : > { %v5890_v48 = vpack.c.bf16 %v4996_v45, %v4996_v45  ;;  %v4903_v11 = vadd.f32 %v9011_v38, %v4864_v6  ;;  %v4901_v63 = vadd.f32 %v9011_v38, %v4862_v9 }
 0x230   : > { %5157 = vst.msk [vmem:[%s9054_s25 + $0x70] sm:$0xf] %vm5128_vm9, %v5890_v48  ;;  %vm4935_vm10 = vcmp.ge.f32.partialorder %v4903_v11, 0.0  ;;  %v4967_v46 = vmul.f32 0.2, %v4903_v11  ;;  %vm4933_vm11 = vcmp.ge.f32.partialorder %v4901_v63, 0.0 }
 0x231   : > { %v4965_v30 = vmul.f32 0.2, %v4901_v63 }
 0x232   : > { %v4999_v44 = vsel %vm4935_vm10, %v4903_v11, %v4967_v46 }
 0x233   : > { %v4997_v47 = vsel %vm4933_vm11, %v4901_v63, %v4965_v30  ;;  %v5893_v53 = vpack.c.bf16 %v4999_v44, %v4999_v44 }
 0x234   : > { %v5891_v51 = vpack.c.bf16 %v4997_v47, %v4997_v47 }
 0x235   : > { %5160 = vst.msk [vmem:[%s9054_s25 + $0x7c] sm:$0xf] %vm5128_vm9, %v5893_v53 }
 0x236   : > { %5158 = vst.msk [vmem:[%s9054_s25 + $0x74] sm:$0xf] %vm5128_vm9, %v5891_v51 }
 0x237 PF: > { %s14_s17 = sadd.s32 1, %s6456_s17   ;;  %s9482_s15 = smov %s6452_s16 }
 0x238   : > { %p11_p5 = scmp.ge.s32.totalorder %s14_s17, 4   ;;  %s9483_s16 = smov %s9485_s18 }
 0x23a   :  { %13 = sbr.rel (!%p11_p5) target bundleno = 2 (0x2), region = 85 }

// kernel: discriminator_forward.13
= control target key start
LH: loop header
LB: loop body
LE: loop exit
PB: predicated region body
PF: predicated region fallthrough
CT: control target
= control target key end

     0   :  { %s1976_s15 = smov 0   ;;  %s1978_s16 = smov 0   ;;  %s2214_s0 = inlined_call_operand.vmem [shape: bf16[2,6,6,32], index: 0, kind: input, shape index: {}]   ;;  %s2215_s1 = inlined_call_operand.vmem [shape: bf16[3,3,32,64], index: 1, kind: input, shape index: {}]   ;;  %s2216_s2 = inlined_call_operand.vmem [shape: f32[1,64], index: 2, kind: input, shape index: {}]   ;;  %s2217_s3 = inlined_call_operand.vmem [shape: f32[1,64], index: 3, kind: input, shape index: {}]   ;;  %s2218_s4 = inlined_call_operand.vmem [shape: bf16[2,4,4,64], index: 4, kind: output, shape index: {}]  }
   0x1   :  { %s1980_s17 = smov 0  }
   0x2 LB: > { %s26_s18 = sadd.s32 1, %s1942_s16  ;;  %p1639_p0 = scmp.ge.s32.totalorder %s1946_s17, 1  ;;  %s1946_s17 = sphi %s1980_s17, %s14_s17   ;;  %s1942_s16 = sphi %s1978_s16, %s2224_s16   ;;  %s1938_s15 = sphi %s1976_s15, %s2223_s15  }
   0x3   : > { %p28_p1 = scmp.ge.s32.totalorder %s26_s18, 2  ;;  %p201_p2 = scmp.lt.s32.totalorder %s1946_s17, 3 }
   0x5   : > { %s2226_s18 = smov (%p28_p1, %s26_s18), 0  ;;  %p202_p3 = pnand %p1639_p0, %p201_p2 }
   0x6   : > { %p240_p4 = scmp.lt.s32.totalorder (!%p202_p3), %s1938_s15, 1 }
   0x7   : > { %205 = sbr.rel (%p202_p3) target bundleno = 283 (0x11b), region = 36 }
   0xc   : > { %v1894_v0 = vld [vmem:[%s2215_s1 + $0x18] sm:$0xff]   ;;  %v1948_v1 = vmov 0.0   ;;  %v1895_v2 = vld [vmem:[%s2215_s1 + $0x8] sm:$0xff]   ;;  %v1896_v3 = vld [vmem:[%s2215_s1 + $0x10] sm:$0xff]   ;;  %vm1949_vm0 = vmmov 0   ;;  %v385_v5 = vlaneseq  ;;  %s2228_s15 = smov (!%p240_p4, %s1938_s15), 1 }
   0xd   : > { %1794 = vmatprep.subr.bf16.mxu0 %v1948_v1  ;;  %1802 = vmatprep.subr.bf16.mxu1 %v1948_v1  ;;  %v1897_v4 = vld [vmem:[%s2215_s1] sm:$0xff]   ;;  %vm312_vm1 = vsmask.f32 1280  ;;  %vm313_vm2 = vsmask.f32 3336  ;;  %s1866_s27 = smul.u32 24, %s2228_s15 }
   0xe   : > { %1795 = vmatpush3.bf16.msra.mxu0 %v1894_v0  ;;  %1798 = vmatprep.mubr.msk.bf16.mxu0 %vm1949_vm0, %v1948_v1  ;;  %vm315_vm3 = vsmask.f32 5392  ;;  %v1950_v6 = vmov 1983009808   ;;  %vm317_vm4 = vsmask.f32 7448  ;;  %vm314_vm8 = vmor %vm312_vm1, %vm313_vm2 }
   0xf   : > { %1803 = vmatpush3.bf16.msra.mxu1 %v1895_v2  ;;  %1796 = vmatprep.subr.bf16.mxu0 %v1948_v1  ;;  %v383_v7 = vunpack.c.l.s4 %v1950_v6  ;;  %v386_v8 = vshrl.u32 %v385_v5, 7  ;;  %vm571_vm5 = vcmask 1040384   ;;  %s2021_s30 = scalar_lea.vmem %s2214_s0, %s1866_s27  ;;  %vm572_vm6 = vcmask 1042434   ;;  %vm316_vm9 = vmor %vm314_vm8, %vm315_vm3  ;;  %v1901_v49 = vld [vmem:[%s2215_s1 + $0x38] sm:$0xff]   ;;  %s1766_s19 = sshll.u32 %s2228_s15, 3 }
  0x10   : > { %1804 = vmatprep.subr.bf16.mxu1 %v1948_v1  ;;  %1806 = vmatprep.mubr.msk.bf16.mxu1 %vm1949_vm0, %v1948_v1  ;;  %vm574_vm7 = vcmask 1044484   ;;  %v1643_v10 = vld.sshfl [vmem:[%s2021_s30] sm:$0x13 pattern:$0x76325410]  ;;  %vm409_vm10 = vcmask 261120   ;;  %vm2034_vm11 = vmor %vm316_vm9, %vm317_vm4  ;;  %s262_s22 = scalar_lea.vmem %s2218_s4, %s1766_s19 }
  0x11   : > { %v384_v9 = vunpack.c.0.s8 %v383_v7  ;;  %v1644_v11 = vld.sshfl [vmem:[%s2021_s30 + $0x4] sm:$0x13 pattern:$0x76325410]  ;;  %v287_v12 = vcombine.high %v1643_v10, %v1643_v10  ;;  %v320_v13 = vshrl.u32 %v1643_v10, 16  ;;  %v323_v14 = vshll.u32 %v1643_v10, 16  ;;  %vm573_vm12 = vmor %vm571_vm5, %vm572_vm6 }
  0x12   : > { %1797 = vmatpush3.bf16.msra.mxu0 %v1896_v3  ;;  %v1645_v15 = vld.sshfl [vmem:[%s2021_s30 + $0x8] sm:$0x13 pattern:$0x76325410]  ;;  %v295_v16 = vcombine.high %v1644_v11, %v1644_v11  ;;  %v334_v17 = vshrl.u32 %v1644_v11, 16  ;;  %v337_v18 = vshll.u32 %v1644_v11, 16  ;;  %vm575_vm14 = vmor %vm573_vm12, %vm574_vm7 }
  0x13   : > { %1805 = vmatpush3.bf16.msra.mxu1 %v1897_v4  ;;  %1810 = vmatprep.subr.bf16.mxu0 %v1948_v1  ;;  %v1646_v19 = vld.sshfl [vmem:[%s2021_s30 + $0xc] sm:$0x13 pattern:$0x76325410]  ;;  %v303_v20 = vcombine.high %v1645_v15, %v1645_v15  ;;  %v322_v21 = vrot.slane %v320_v13, 6  ;;  %v325_v22 = vrot.slane %v323_v14, 7  ;;  %v2031_v23 = vsub.s32 %v384_v9, %v386_v8 }
  0x14   : > { %1818 = vmatprep.subr.bf16.mxu1 %v1948_v1  ;;  %v311_v24 = vcombine.high %v1646_v19, %v1646_v19  ;;  %v329_v25 = vshll.u32 %v287_v12, 16  ;;  %v336_v26 = vrot.slane %v334_v17, 6  ;;  %v339_v27 = vrot.slane %v337_v18, 7  ;;  %v1903_v8 = vld [vmem:[%s2215_s1 + $0x30] sm:$0xff]  }
  0x15   : > { %v326_v28 = vor.u32 %v325_v22, %v322_v21  ;;  %v343_v29 = vshll.u32 %v295_v16, 16  ;;  %v348_v30 = vshrl.u32 %v1645_v15, 16  ;;  %v351_v31 = vshll.u32 %v1645_v15, 16  ;;  %v1900_v22 = vld [vmem:[%s2215_s1 + $0x28] sm:$0xff]  }
  0x16   : > { %v331_v33 = vrot.slane %v329_v25, 7  ;;  %v340_v34 = vor.u32 %v339_v27, %v336_v26  ;;  %v357_v35 = vshll.u32 %v303_v20, 16  ;;  %v362_v36 = vshrl.u32 %v1646_v19, 16 }
  0x17   : > { %v327_v37 = vrot.slane %v326_v28, 2  ;;  %v345_v38 = vrot.slane %v343_v29, 7  ;;  %v350_v39 = vrot.slane %v348_v30, 6  ;;  %v353_v40 = vrot.slane %v351_v31, 7  ;;  %v1907_v28 = vld [vmem:[%s2215_s1 + $0x58] sm:$0xff]  }
  0x18   : > { %v1918_v41 = vld.sshfl [vmem:[%s2021_s30] sm:$0xf pattern:$0x76325410]  ;;  %v341_v42 = vrot.slane %v340_v34, 2  ;;  %v364_v43 = vrot.slane %v362_v36, 6 }
  0x19   : > { %v365_v44 = vshll.u32 %v1646_v19, 16  ;;  %v1919_v45 = vld.sshfl [vmem:[%s2021_s30 + $0x8] sm:$0xf pattern:$0x76325410]  ;;  %vm576_vm13 = vcmask 1046534   ;;  %v354_v46 = vor.u32 %v353_v40, %v350_v39  ;;  %v332_v50 = vsel %vm2034_vm11, %v327_v37, %v331_v33 }
  0x1a   : > { %v359_v47 = vrot.slane %v357_v35, 7  ;;  %v371_v48 = vshll.u32 %v311_v24, 16  ;;  %v2049_v51 = vsel %vm2034_vm11, %v341_v42, %v345_v38  ;;  %v1657_v55 = vld.sshfl [vmem:[%s2021_s30] sm:$0x12 pattern:$0x76325410]  ;;  %v474_v57 = vcombine.low %v1918_v41, %v1919_v45  ;;  %vm2057_vm15 = vmor %vm575_vm14, %vm576_vm13 }
  0x1b   : > { %v367_v52 = vrot.slane %v365_v44, 7  ;;  %v355_v53 = vrot.slane %v354_v46, 2  ;;  %v1658_v58 = vld.sshfl [vmem:[%s2021_s30 + $0x4] sm:$0x12 pattern:$0x76325410]  ;;  %v546_v59 = vcombine.high %v1657_v55, %v1657_v55  ;;  %v380_v61 = vcombine.low %v332_v50, %v2049_v51 }
  0x1c   : > { %v373_v54 = vrot.slane %v371_v48, 7  ;;  %v1661_v60 = vrot.slane %v1657_v55, 9  ;;  %v1659_v62 = vld.sshfl [vmem:[%s2021_s30 + $0x8] sm:$0x12 pattern:$0x76325410]  ;;  %v554_v63 = vcombine.high %v1658_v58, %v1658_v58  ;;  %1807 = vmatmul.mubr.msk.bf16.vlgmr.msra.gmra.mxu1 %vm409_vm10, %v474_v57 }
  0x1d   : > { %v368_v56 = vor.u32 %v367_v52, %v364_v43  ;;  %v1662_v2 = vrot.slane %v1658_v58, 9  ;;  %v2063_v3 = vsel %vm2034_vm11, %v355_v53, %v359_v47  ;;  %v1660_v5 = vld.sshfl [vmem:[%s2021_s30 + $0xc] sm:$0x12 pattern:$0x76325410]  ;;  %v562_v6 = vcombine.high %v1659_v62, %v1659_v62  ;;  %1819 = vmatpush3.bf16.msra.mxu1 %v1901_v49  ;;  %1822 = vmatprep.mubr.msk.bf16.mxu1 %vm1949_vm0, %v1948_v1  ;;  %v1902_v42 = vld [vmem:[%s2215_s1 + $0x20] sm:$0xff]  }
  0x1e   : > { %v580_v7 = vrot.slane %v546_v59, 7  ;;  %v570_v9 = vcombine.high %v1660_v5, %v1660_v5  ;;  %v584_v10 = vrot.slane %v554_v63, 7  ;;  %v1663_v11 = vrot.slane %v1659_v62, 9  ;;  %1820 = vmatprep.subr.bf16.mxu1 %v1948_v1  ;;  %v1909_v47 = vld [vmem:[%s2215_s1 + $0x50] sm:$0xff]   ;;  %v1906_v55 = vld [vmem:[%s2215_s1 + $0x48] sm:$0xff]  }
  0x1f   : > { %v369_v4 = vrot.slane %v368_v56, 2  ;;  %v1664_v12 = vrot.slane %v1660_v5, 9  ;;  %v588_v15 = vrot.slane %v562_v6, 7  ;;  %v388_v17 = vrot.slane %v380_v61, %v2031_v23  ;;  %v1908_v6 = vld [vmem:[%s2215_s1 + $0x40] sm:$0xff]  }
  0x20   : > { %v581_v14 = vsel %vm2057_vm15, %v1661_v60, %v580_v7  ;;  %v585_v18 = vsel %vm2057_vm15, %v1662_v2, %v584_v10  ;;  %v592_v19 = vrot.slane %v570_v9, 7  ;;  %v1920_v20 = vld.sshfl [vmem:[%s2021_s30 + $0x4] sm:$0xf pattern:$0x76325410]  ;;  %v864_v52 = vcombine.low %v2049_v51, %v2063_v3  ;;  %v1911_v51 = vld [vmem:[%s2215_s1 + $0x78] sm:$0xff]  }
  0x21   : > { %v2074_v13 = vsel %vm2034_vm11, %v369_v4, %v373_v54  ;;  %v1921_v21 = vld.sshfl [vmem:[%s2021_s30 + $0xc] sm:$0xf pattern:$0x76325410]  ;;  %v589_v24 = vsel %vm2057_vm15, %v1663_v11, %v588_v15  ;;  %v599_v25 = vcombine.low %v581_v14, %v585_v18  ;;  %1821 = vmatpush3.bf16.msra.mxu1 %v1903_v8  ;;  %vm1510_vm1 = vcmask 517120  }
  0x22   : > { %v381_v16 = vcombine.low %v2063_v3, %v2074_v13  ;;  %v593_v27 = vsel %vm2057_vm15, %v1664_v12, %v592_v19  ;;  %1834 = vmatprep.subr.bf16.mxu1 %v1948_v1  ;;  %v704_v31 = vcombine.low %v1920_v20, %v1921_v21  ;;  %v1690_v33 = vld.sshfl [vmem:[%s2021_s30 + $0x10] sm:$0x13 pattern:$0x76325410]  ;;  %v1000_v46 = vcombine.low %v585_v18, %v589_v24  ;;  %v1910_v19 = vld [vmem:[%s2215_s1 + $0x68] sm:$0xff]  }
  0x23   : > { %v600_v29 = vcombine.low %v589_v24, %v593_v27  ;;  %v802_v34 = vcombine.high %v1690_v33, %v1690_v33  ;;  %v846_v35 = vshrl.u32 %v1690_v33, 16  ;;  %v849_v36 = vshll.u32 %v1690_v33, 16  ;;  %v1705_v37 = vld.sshfl [vmem:[%s2021_s30 + $0x10] sm:$0x12 pattern:$0x76325410] }
  0x24   : > { %v2092_v26 = vrot.slane %v381_v16, %v2031_v23  ;;  %v607_v38 = vrot.slane %v599_v25, %v2031_v23  ;;  %1823 = vmatmul.mubr.msk.bf16.vlgmr.msra.gmra.mxu1 %vm409_vm10, %v704_v31  ;;  %v978_v40 = vcombine.high %v1705_v37, %v1705_v37  ;;  %v1709_v41 = vrot.slane %v1705_v37, 9  ;;  %v1735_v59 = vld.sshfl [vmem:[%s2021_s30 + $0x14] sm:$0x13 pattern:$0x76325410]  ;;  %v1912_v25 = vld [vmem:[%s2215_s1 + $0x60] sm:$0xff]  }
  0x25   : > { %v2106_v39 = vrot.slane %v600_v29, %v2031_v23  ;;  %v848_v43 = vrot.slane %v846_v35, 6  ;;  %v851_v44 = vrot.slane %v849_v36, 7  ;;  %v855_v45 = vshll.u32 %v802_v34, 16  ;;  %1835 = vmatpush3.bf16.msra.mxu1 %v1907_v28  ;;  %1838 = vmatprep.mubr.msk.bf16.mxu1 %vm1949_vm0, %v1948_v1  ;;  %v1913_v14 = vld [vmem:[%s2215_s1 + $0x70] sm:$0xff]   ;;  %v1916_v33 = vld [vmem:[%s2215_s1 + $0x88] sm:$0xff]   ;;  %v1917_v34 = vld [vmem:[%s2215_s1 + $0x80] sm:$0xff]  }
  0x26   : > { %v396_v30 = vcombine.low %v388_v17, %v2092_v26  ;;  %v993_v48 = vrot.slane %v978_v40, 7  ;;  %1836 = vmatprep.subr.bf16.mxu1 %v1948_v1  ;;  %v1008_v58 = vrot.slane %v1000_v46, %v2031_v23  ;;  %v872_v61 = vrot.slane %v864_v52, %v2031_v23  ;;  %v1750_v5 = vld.sshfl [vmem:[%s2021_s30 + $0x14] sm:$0x12 pattern:$0x76325410] }
  0x27   : > { %v852_v49 = vor.u32 %v851_v44, %v848_v43  ;;  %v857_v50 = vrot.slane %v855_v45, 7  ;;  %v615_v53 = vcombine.low %v607_v38, %v2106_v39  ;;  %v1203_v2 = vcombine.high %v1735_v59, %v1735_v59  ;;  %v1922_v15 = vld.sshfl [vmem:[%s2021_s30 + $0x8] sm:$0xf pattern:$0x76325410] }
  0x28   : > { %1799 = vmatmul.mubr.msk.bf16.vlgmr.msra.gmra.mxu0 %vm409_vm10, %v396_v30  ;;  %v2126_v54 = vsel %vm2057_vm15, %v1709_v41, %v993_v48  ;;  %v1247_v3 = vshrl.u32 %v1735_v59, 16  ;;  %v1250_v4 = vshll.u32 %v1735_v59, 16  ;;  %v1379_v8 = vcombine.high %v1750_v5, %v1750_v5  ;;  %v1923_v16 = vld.sshfl [vmem:[%s2021_s30 + $0x10] sm:$0xf pattern:$0x76325410] }
  0x29   : > { %1811 = vmatpush3.bf16.msra.mxu0 %v1900_v22  ;;  %1814 = vmatprep.mubr.msk.bf16.mxu0 %vm1949_vm0, %v1948_v1  ;;  %v853_v56 = vrot.slane %v852_v49, 2  ;;  %v1001_v57 = vcombine.low %v593_v27, %v2126_v54  ;;  %v1256_v12 = vshll.u32 %v1203_v2, 16  ;;  %v1754_v20 = vrot.slane %v1750_v5, 9 }
  0x2a   : > { %1812 = vmatprep.subr.bf16.mxu0 %v1948_v1  ;;  %1837 = vmatpush3.bf16.msra.mxu1 %v1909_v47  ;;  %v1249_v10 = vrot.slane %v1247_v3, 6  ;;  %v1252_v11 = vrot.slane %v1250_v4, 7  ;;  %v1394_v21 = vrot.slane %v1379_v8, 7  ;;  %v1105_v30 = vcombine.low %v1922_v15, %v1923_v16 }
  0x2b   : > { %v858_v60 = vsel %vm2034_vm11, %v853_v56, %v857_v50  ;;  %v1015_v62 = vrot.slane %v1001_v57, %v2031_v23  ;;  %1850 = vmatprep.subr.bf16.mxu1 %v1948_v1  ;;  %v1258_v18 = vrot.slane %v1256_v12, 7 }
  0x2c   : > { %v865_v63 = vcombine.low %v2074_v13, %v858_v60  ;;  %v1253_v17 = vor.u32 %v1252_v11, %v1249_v10  ;;  %v1395_v28 = vsel %vm2057_vm15, %v1754_v20, %v1394_v21 }
  0x2d   : > { %1813 = vmatpush3.bf16.msra.mxu0 %v1902_v42  ;;  %v1016_v7 = vcombine.low %v1008_v58, %v1015_v62  ;;  %v1402_v32 = vcombine.low %v2126_v54, %v1395_v28 }
  0x2e   : > { %1826 = vmatprep.subr.bf16.mxu0 %v1948_v1  ;;  %v879_v9 = vrot.slane %v865_v63, %v2031_v23  ;;  %v1254_v22 = vrot.slane %v1253_v17, 2  ;;  %v1762_v17 = vld [vmem:[%s2216_s2] ss:$0 sm:$0xff] }
  0x2f   : > { %1839 = vmatmul.mubr.msk.bf16.vlgmr.msra.gmra.mxu1 %vm409_vm10, %v1016_v7  ;;  %v1416_v0 = vrot.slane %v1402_v32, %v2031_v23 }
  0x30   : > { %1815 = vmatmul.mubr.msk.bf16.vlgmr.msra.gmra.mxu0 %vm409_vm10, %v615_v53  ;;  %v880_v13 = vcombine.low %v872_v61, %v879_v9  ;;  %1851 = vmatpush3.bf16.msra.mxu1 %v1911_v51  ;;  %v1259_v24 = vsel %vm2034_vm11, %v1254_v22, %v1258_v18 }
  0x31   : > { %1827 = vmatpush3.bf16.msra.mxu0 %v1906_v55  ;;  %1830 = vmatprep.mubr.msk.bf16.mxu0 %vm1949_vm0, %v1948_v1  ;;  %v1266_v27 = vcombine.low %v858_v60, %v1259_v24 }
  0x32   : > { %1828 = vmatprep.subr.bf16.mxu0 %v1948_v1  ;;  %1854 = vmatprep.mubr.msk.bf16.mxu1 %vm1949_vm0, %v1948_v1 }
  0x33   : > { %1852 = vmatprep.subr.bf16.mxu1 %v1948_v1  ;;  %v1280_v29 = vrot.slane %v1266_v27, %v2031_v23 }
  0x34   : > { %1853 = vmatpush3.bf16.msra.mxu1 %v1913_v14 }
  0x35   : > { %1829 = vmatpush3.bf16.msra.mxu0 %v1908_v6  ;;  %v1281_v31 = vcombine.low %v2092_v26, %v1280_v29  ;;  %v1417_v26 = vcombine.low %v2106_v39, %v1416_v0 }
  0x36   : > { %1842 = vmatprep.subr.bf16.mxu0 %v1948_v1 }
  0x37   : > { %1855 = vmatmul.mubr.msk.bf16.vlgmr.msra.gmra.mxu1 %vm409_vm10, %v1281_v31 }
  0x38   : > { %1831 = vmatmul.mubr.msk.bf16.vlgmr.msra.gmra.mxu0 %vm409_vm10, %v880_v13 }
  0x39   : > { %1843 = vmatpush3.bf16.msra.mxu0 %v1910_v19  ;;  %1846 = vmatprep.mubr.msk.bf16.mxu0 %vm1949_vm0, %v1948_v1  ;;  %v1763_v19 = vld [vmem:[%s2217_s3] ss:$0 sm:$0xff] }
  0x3a   : > { %1844 = vmatprep.subr.bf16.mxu0 %v1948_v1 }
  0x3d   : > { %1845 = vmatpush3.bf16.msra.mxu0 %v1912_v25 }
  0x3e   : > { %1858 = vmatprep.subr.bf16.mxu0 %v1948_v1 }
  0x40   : > { %1847 = vmatmul.mubr.msk.bf16.vlgmr.msra.gmra.mxu0 %vm409_vm10, %v1105_v30 }
  0x41   : > { %1859 = vmatpush3.bf16.msra.mxu0 %v1916_v33  ;;  %1862 = vmatprep.mubr.msk.bf16.mxu0 %vm1949_vm0, %v1948_v1 }
  0x42   : > { %1860 = vmatprep.subr.bf16.mxu0 %v1948_v1 }
  0x45   : > { %1861 = vmatpush3.bf16.msra.mxu0 %v1917_v34 }
  0x48   : > { %1863 = vmatmul.mubr.msk.bf16.vlgmr.msra.gmra.mxu0 %vm409_vm10, %v1417_v26 }
  0xdc   : > { %v524_v35 = vpop.f32.mrf.mxu1 }
  0xde   : > { %v1808_v36 = vpop.f32.mrf.mxu1 }
  0xe0   : > { %v527_v37 = vpop.f32.mrf.mxu1 }
  0xe2   : > { %v1809_v38 = vpop.f32.mrf.mxu1 }
  0xe4   : > { %v754_v40 = vpop.f32.mrf.mxu1 }
  0xe6   : > { %v1824_v42 = vpop.f32.mrf.mxu1 }
  0xe8   : > { %v447_v23 = vpop.f32.mrf.mxu0  ;;  %v757_v44 = vpop.f32.mrf.mxu1 }
  0xe9   : > { %v525_v39 = vadd.f32 %v524_v35, %v447_v23 }
  0xea   : > { %v1800_v41 = vpop.f32.mrf.mxu0  ;;  %v1825_v46 = vpop.f32.mrf.mxu1 }
  0xec   : > { %v450_v43 = vpop.f32.mrf.mxu0 }
  0xed   : > { %v528_v56 = vadd.f32 %v527_v37, %v450_v43 }
  0xee   : > { %v1801_v45 = vpop.f32.mrf.mxu0 }
  0xef   : > { %v1066_v1 = vpop.f32.mrf.mxu1 }
  0xf0   : > { %v665_v47 = vpop.f32.mrf.mxu0 }
  0xf1   : > { %v1840_v50 = vpop.f32.mrf.mxu1  ;;  %v672_v53 = vadd.f32 %v665_v47, %v525_v39 }
  0xf2   : > { %v1816_v48 = vpop.f32.mrf.mxu0 }
  0xf3   : > { %v1069_v54 = vpop.f32.mrf.mxu1  ;;  %v761_v51 = vadd.f32 %v754_v40, %v672_v53 }
  0xf4   : > { %v668_v49 = vpop.f32.mrf.mxu0 }
  0xf5   : > { %v1841_v57 = vpop.f32.mrf.mxu1  ;;  %v673_v59 = vadd.f32 %v668_v49, %v528_v56 }
  0xf6   : > { %v1817_v52 = vpop.f32.mrf.mxu0 }
  0xf7   : > { %v762_v63 = vadd.f32 %v757_v44, %v673_v59  ;;  %v1331_v2 = vpop.f32.mrf.mxu1 }
  0xf8   : > { %v930_v55 = vpop.f32.mrf.mxu0 }
  0xf9   : > { %v937_v61 = vadd.f32 %v930_v55, %v761_v51  ;;  %v1856_v6 = vpop.f32.mrf.mxu1 }
  0xfa   : > { %v1832_v58 = vpop.f32.mrf.mxu0 }
  0xfb   : > { %v1073_v4 = vadd.f32 %v1066_v1, %v937_v61  ;;  %v1334_v9 = vpop.f32.mrf.mxu1 }
  0xfc   : > { %v933_v60 = vpop.f32.mrf.mxu0 }
  0xfd   : > { %v938_v5 = vadd.f32 %v933_v60, %v762_v63  ;;  %v1857_v12 = vpop.f32.mrf.mxu1 }
  0xfe   : > { %v1833_v62 = vpop.f32.mrf.mxu0 }
  0xff   : > { %v1074_v11 = vadd.f32 %v1069_v54, %v938_v5 }
 0x100   : > { %v1155_v3 = vpop.f32.mrf.mxu0 }
 0x101   : > { %v1162_v8 = vadd.f32 %v1155_v3, %v1073_v4 }
 0x102   : > { %v1848_v7 = vpop.f32.mrf.mxu0 }
 0x103   : > { %v1338_v14 = vadd.f32 %v1331_v2, %v1162_v8 }
 0x104   : > { %v1158_v10 = vpop.f32.mrf.mxu0 }
 0x105   : > { %v1163_v15 = vadd.f32 %v1158_v10, %v1074_v11 }
 0x106   : > { %v1849_v13 = vpop.f32.mrf.mxu0 }
 0x107   : > { %v1339_v21 = vadd.f32 %v1334_v9, %v1163_v15 }
 0x108   : > { %v1467_v16 = vpop.f32.mrf.mxu0 }
 0x109   : > { %v1474_v18 = vadd.f32 %v1467_v16, %v1338_v14 }
 0x10a   : > { %v1864_v20 = vpop.f32.mrf.mxu0 }
 0x10b   : > { %v1483_v22 = vmul.f32 %v1762_v17, %v1474_v18 }
 0x10c   : > { %v1470_v24 = vpop.f32.mrf.mxu0 }
 0x10d   : > { %v1492_v25 = vadd.f32 %v1763_v19, %v1483_v22  ;;  %v1475_v27 = vadd.f32 %v1470_v24, %v1339_v21 }
 0x10e   : > { %v1865_v28 = vpop.f32.mrf.mxu0 }
 0x10f   : > { %vm1494_vm0 = vcmp.ge.f32.partialorder %v1492_v25, 0.0  ;;  %v1496_v29 = vmul.f32 0.2, %v1492_v25  ;;  %v1484_v30 = vmul.f32 %v1762_v17, %v1475_v27 }
 0x111   : > { %v1498_v32 = vsel %vm1494_vm0, %v1492_v25, %v1496_v29  ;;  %v1493_v31 = vadd.f32 %v1763_v19, %v1484_v30 }
 0x112   : > { %v1502_v33 = vcombine.high %v1498_v32, %v1498_v32  ;;  %v1506_v0 = vpack.c.bf16 %v1498_v32, %v1498_v32 }
 0x113   : > { %vm1495_vm2 = vcmp.ge.f32.partialorder %v1493_v31, 0.0  ;;  %v1497_v34 = vmul.f32 0.2, %v1493_v31 }
 0x114   : > { %v1507_v26 = vpack.c.bf16 %v1502_v33, %v1502_v33  ;;  %1511 = vst.msk [vmem:[%s262_s22] sm:$0x3] %vm1510_vm1, %v1506_v0 }
 0x115   : > { %v1499_v35 = vsel %vm1495_vm2, %v1493_v31, %v1497_v34 }
 0x116   : > { %1512 = vst.msk [vmem:[%s262_s22 + $0x2] sm:$0x3] %vm1510_vm1, %v1507_v26  ;;  %v1503_v36 = vcombine.high %v1499_v35, %v1499_v35  ;;  %v1508_v37 = vpack.c.bf16 %v1499_v35, %v1499_v35 }
 0x118   : > { %v1509_v38 = vpack.c.bf16 %v1503_v36, %v1503_v36  ;;  %1513 = vst.msk [vmem:[%s262_s22 + $0x4] sm:$0x3] %vm1510_vm1, %v1508_v37 }
 0x11a   : > { %1514 = vst.msk [vmem:[%s262_s22 + $0x6] sm:$0x3] %vm1510_vm1, %v1509_v38 }
 0x11b PF: > { %s14_s17 = sadd.s32 1, %s1946_s17   ;;  %s2223_s15 = smov %s1942_s16 }
 0x11c   : > { %p11_p5 = scmp.ge.s32.totalorder %s14_s17, 4   ;;  %s2224_s16 = smov %s2226_s18 }
 0x11e   :  { %13 = sbr.rel (!%p11_p5) target bundleno = 2 (0x2), region = 85 }

// kernel: discriminator_forward.14
= control target key start
LH: loop header
LB: loop body
LE: loop exit
PB: predicated region body
PF: predicated region fallthrough
CT: control target
= control target key end

     0   :  { %s1818_s15 = smov 0   ;;  %s1820_s16 = smov 0   ;;  %s2097_s0 = inlined_call_operand.vmem [shape: bf16[4,6,3,64], index: 0, kind: input, shape index: {}]   ;;  %s2098_s1 = inlined_call_operand.vmem [shape: bf16[3,3,64,64], index: 1, kind: input, shape index: {}]   ;;  %s2099_s2 = inlined_call_operand.vmem [shape: f32[1,64], index: 2, kind: input, shape index: {}]   ;;  %s2100_s3 = inlined_call_operand.vmem [shape: f32[1,64], index: 3, kind: input, shape index: {}]   ;;  %s2101_s4 = inlined_call_operand.vmem [shape: bf16[2,2,2,64], index: 4, kind: output, shape index: {}]  }
   0x1   :  { %s1822_s17 = smov 0  }
   0x2 LB: > { %s26_s18 = sadd.s32 1, %s1783_s16  ;;  %p1404_p0 = scmp.ge.s32.totalorder %s1787_s17, 1  ;;  %s1787_s17 = sphi %s1822_s17, %s14_s17   ;;  %s1783_s16 = sphi %s1820_s16, %s2105_s16   ;;  %s1779_s15 = sphi %s1818_s15, %s2104_s15  }
   0x3   : > { %p28_p1 = scmp.ge.s32.totalorder %s26_s18, 2  ;;  %p203_p2 = scmp.lt.s32.totalorder %s1787_s17, 3 }
   0x5   : > { %s2107_s18 = smov (%p28_p1, %s26_s18), 0  ;;  %p204_p3 = pnand %p1404_p0, %p203_p2 }
   0x6   : > { %s1405_s25 = sshll.u32 (!%p204_p3), %s1779_s15, 1  ;;  %p259_p5 = scmp.lt.s32.totalorder (!%p204_p3), %s1779_s15, 1 }
   0x7   : > { %207 = sbr.rel (%p204_p3) target bundleno = 302 (0x12e), region = 36  ;;  %p243_p4 = scmp.lt.s32.totalorder (!%p204_p3), %s1405_s25, 3 }
   0xc   : > { %v1729_v0 = vld [vmem:[%s2098_s1 + $0x38] sm:$0xff]   ;;  %v1789_v1 = vmov 0.0   ;;  %v1731_v3 = vld [vmem:[%s2098_s1 + $0x30] sm:$0xff]   ;;  %vm1790_vm0 = vmmov 0   ;;  %s2109_s25 = smov (!%p243_p4, %s1405_s25), 3  ;;  %v295_v5 = vlaneseq  ;;  %v1733_v6 = vld [vmem:[%s2098_s1 + $0x28] sm:$0xff]  }
   0xd   : > { %1592 = vmatprep.subr.bf16.mxu0 %v1789_v1  ;;  %1604 = vmatprep.subr.bf16.mxu1 %v1789_v1  ;;  %v1730_v2 = vld [vmem:[%s2098_s1 + $0x18] sm:$0xff]   ;;  %v1732_v4 = vld [vmem:[%s2098_s1 + $0x10] sm:$0xff]   ;;  %v1734_v7 = vld [vmem:[%s2098_s1 + $0x8] sm:$0xff]   ;;  %s1700_s6 = smul.u32 12, %s2109_s25  ;;  %v1791_v9 = vmov 1966171168  }
   0xe   : > { %1593 = vmatpush3.bf16.msra.mxu0 %v1729_v0  ;;  %1600 = vmatprep.mubr.msk.bf16.mxu0 %vm1790_vm0, %v1789_v1  ;;  %v1735_v8 = vld [vmem:[%s2098_s1 + $0x20] sm:$0xff]   ;;  %v293_v10 = vunpack.c.l.s4 %v1791_v9  ;;  %v1875_v11 = vshrl.u32 %v295_v5, 7  ;;  %v1737_v23 = vld [vmem:[%s2098_s1 + $0x58] sm:$0xff]   ;;  %vm330_vm1 = vcmask 523264   ;;  %vm478_vm2 = vsmask.f32 256 }
   0xf   : > { %1605 = vmatpush3.bf16.msra.mxu1 %v1730_v2  ;;  %1594 = vmatprep.subr.bf16.mxu0 %v1789_v1  ;;  %s1873_s11 = scalar_lea.vmem %s2097_s0, %s1700_s6  ;;  %v1736_v15 = vld [vmem:[%s2098_s1] sm:$0xff]   ;;  %v1738_v24 = vld [vmem:[%s2098_s1 + $0x78] sm:$0xff]   ;;  %v1739_v27 = vld [vmem:[%s2098_s1 + $0x50] sm:$0xff]   ;;  %vm479_vm3 = vsmask.f32 1284  ;;  %s2111_s15 = smov (!%p259_p5, %s1779_s15), 1 }
  0x10   : > { %1606 = vmatprep.subr.bf16.mxu1 %v1789_v1  ;;  %1612 = vmatprep.mubr.msk.bf16.mxu1 %vm1790_vm0, %v1789_v1  ;;  %v1408_v12 = vld [vmem:[%s1873_s11 + $0x6] sm:$0x1]  ;;  %v1409_v13 = vld [vmem:[%s1873_s11 + $0x8] sm:$0x1]  ;;  %v267_v14 = vld [vmem:[%s1873_s11] sm:$0x1]  ;;  %v294_v17 = vunpack.c.0.s8 %v293_v10 }
  0x11   : > { %v291_v16 = vcombine.low %v1408_v12, %v1409_v13  ;;  %v268_v18 = vld [vmem:[%s1873_s11 + $0x2] sm:$0x1]  ;;  %v1740_v28 = vld [vmem:[%s2098_s1 + $0x70] sm:$0xff]   ;;  %vm480_vm4 = vmor %vm478_vm2, %vm479_vm3  ;;  %vm481_vm5 = vsmask.f32 2312  ;;  %s1407_s9 = sshll.u32 %s2111_s15, 1 }
  0x12   : > { %1595 = vmatpush3.bf16.msra.mxu0 %v1731_v3  ;;  %v376_v19 = vcombine.low %v267_v14, %v268_v18  ;;  %v1887_v20 = vsub.s32 %v294_v17, %v1875_v11  ;;  %v1428_v29 = vld.sshfl [vmem:[%s1873_s11] sm:$0x11 pattern:$0x75316420]  ;;  %vm482_vm6 = vmor %vm480_vm4, %vm481_vm5  ;;  %vm483_vm7 = vsmask.f32 3340  ;;  %s265_s13 = scalar_lea.vmem %s2101_s4, %s1407_s9 }
  0x13   : > { %1607 = vmatpush3.bf16.msra.mxu1 %v1732_v4  ;;  %1596 = vmatprep.subr.bf16.mxu0 %v1789_v1  ;;  %v1429_v30 = vld.sshfl [vmem:[%s1873_s11 + $0x2] sm:$0x11 pattern:$0x75316420]  ;;  %v469_v31 = vcombine.high %v1428_v29, %v1428_v29  ;;  %vm485_vm8 = vsmask.f32 4368  ;;  %vm484_vm10 = vmor %vm482_vm6, %vm483_vm7 }
  0x14   : > { %1608 = vmatprep.subr.bf16.mxu1 %v1789_v1  ;;  %v298_v21 = vrot.slane %v291_v16, %v1887_v20  ;;  %v383_v22 = vrot.slane %v376_v19, %v1887_v20  ;;  %v477_v32 = vcombine.high %v1429_v30, %v1429_v30  ;;  %vm487_vm9 = vsmask.f32 5396  ;;  %v1741_v35 = vld [vmem:[%s2098_s1 + $0x48] sm:$0xff]   ;;  %vm486_vm13 = vmor %vm484_vm10, %vm485_vm8  ;;  %v1743_v45 = vld [vmem:[%s2098_s1 + $0x40] sm:$0xff]  }
  0x15   : > { %vm489_vm11 = vsmask.f32 6424  ;;  %vm491_vm12 = vsmask.f32 7452  ;;  %v494_v33 = vshrl.u32 %v1428_v29, 16  ;;  %v499_v34 = vshll.u32 %v469_v31, 16  ;;  %vm488_vm14 = vmor %vm486_vm13, %vm487_vm9 }
  0x16   : > { %1597 = vmatpush3.bf16.msra.mxu0 %v1733_v6  ;;  %v305_v25 = vrot.slane %v298_v21, %v1887_v20  ;;  %v390_v26 = vrot.slane %v383_v22, %v1887_v20  ;;  %v1742_v36 = vld [vmem:[%s2098_s1 + $0x68] sm:$0xff]   ;;  %v503_v37 = vshrl.u32 %v1429_v30, 16  ;;  %v508_v38 = vshll.u32 %v477_v32, 16  ;;  %vm490_vm15 = vmor %vm488_vm14, %vm489_vm11  ;;  %v1744_v48 = vld [vmem:[%s2098_s1 + $0x60] sm:$0xff]  }
  0x17   : > { %1609 = vmatpush3.bf16.msra.mxu1 %v1734_v7  ;;  %1598 = vmatprep.subr.bf16.mxu0 %v1789_v1  ;;  %v1445_v39 = vld [vmem:[%s1873_s11 + $0xc] sm:$0x1]  ;;  %v1446_v40 = vld [vmem:[%s1873_s11 + $0xe] sm:$0x1]  ;;  %vm1930_vm2 = vmor %vm490_vm15, %vm491_vm12 }
  0x18   : > { %1610 = vmatprep.subr.bf16.mxu1 %v1789_v1  ;;  %v617_v41 = vcombine.low %v1445_v39, %v1446_v40  ;;  %v501_v43 = vsel %vm1930_vm2, %v494_v33, %v499_v34  ;;  %v1938_v44 = vsel %vm1930_vm2, %v503_v37, %v508_v38  ;;  %v1745_v51 = vld [vmem:[%s2098_s1 + $0x98] sm:$0xff]   ;;  %v1477_v54 = vld.sshfl [vmem:[%s1873_s11 + $0xc] sm:$0x11 pattern:$0x75316420]  ;;  %v1747_v60 = vld [vmem:[%s2098_s1 + $0x90] sm:$0xff]  }
  0x19   : > { %v520_v46 = vcombine.low %v501_v43, %v1938_v44  ;;  %v1746_v53 = vld [vmem:[%s2098_s1 + $0xb8] sm:$0xff]   ;;  %v1460_v55 = vld [vmem:[%s1873_s11 + $0x12] sm:$0x1]  ;;  %v1461_v56 = vld [vmem:[%s1873_s11 + $0x14] sm:$0x1]  ;;  %v808_v58 = vcombine.high %v1477_v54, %v1477_v54  ;;  %v818_v59 = vshrl.u32 %v1477_v54, 16 }
  0x1a   : > { %1599 = vmatpush3.bf16.msra.mxu0 %v1735_v8  ;;  %v624_v47 = vrot.slane %v617_v41, %v1887_v20  ;;  %v1478_v57 = vld.sshfl [vmem:[%s1873_s11 + $0xe] sm:$0x11 pattern:$0x75316420]  ;;  %v1748_v63 = vld [vmem:[%s2098_s1 + $0xb0] sm:$0xff]   ;;  %v714_v5 = vcombine.low %v1460_v55, %v1461_v56  ;;  %v1751_v9 = vld [vmem:[%s2098_s1 + $0x80] sm:$0xff]  }
  0x1b   : > { %1611 = vmatpush3.bf16.msra.mxu1 %v1736_v15  ;;  %1616 = vmatprep.subr.bf16.mxu0 %v1789_v1  ;;  %v527_v49 = vrot.slane %v520_v46, %v1887_v20  ;;  %v816_v61 = vcombine.high %v1478_v57, %v1478_v57  ;;  %v827_v62 = vshrl.u32 %v1478_v57, 16  ;;  %v823_v0 = vshll.u32 %v808_v58, 16  ;;  %v1749_v3 = vld [vmem:[%s2098_s1 + $0x88] sm:$0xff]   ;;  %v1752_v13 = vld [vmem:[%s2098_s1 + $0xa0] sm:$0xff]   ;;  %v1753_v16 = vld [vmem:[%s2098_s1 + $0xd8] sm:$0xff]  }
  0x1c   : > { %1628 = vmatprep.subr.bf16.mxu1 %v1789_v1  ;;  %v631_v52 = vrot.slane %v624_v47, %v1887_v20  ;;  %v1750_v7 = vld [vmem:[%s2098_s1 + $0xa8] sm:$0xff]   ;;  %v721_v10 = vrot.slane %v714_v5, %v1887_v20  ;;  %v1754_v17 = vld [vmem:[%s2098_s1 + $0xf8] sm:$0xff]   ;;  %v1755_v18 = vld [vmem:[%s2098_s1 + $0xd0] sm:$0xff]  }
  0x1d   : > { %1601 = vmatmul.mubr.msk.bf16.vlgmr.msra.gmra.mxu0 %vm330_vm1, %v305_v25  ;;  %v534_v50 = vrot.slane %v527_v49, %v1887_v20  ;;  %v832_v2 = vshll.u32 %v816_v61, 16  ;;  %v825_v4 = vsel %vm1930_vm2, %v818_v59, %v823_v0  ;;  %v1756_v19 = vld [vmem:[%s2098_s1 + $0xf0] sm:$0xff]   ;;  %v1494_v21 = vld [vmem:[%s1873_s11 + $0x2] sm:$0x1]  ;;  %v1495_v22 = vld [vmem:[%s1873_s11 + $0x4] sm:$0x1] }
  0x1e   : > { %1613 = vmatmul.mubr.msk.bf16.vlgmr.msra.gmra.mxu1 %vm330_vm1, %v390_v26  ;;  %1617 = vmatpush3.bf16.msra.mxu0 %v1737_v23  ;;  %v728_v14 = vrot.slane %v721_v10, %v1887_v20  ;;  %v1509_v23 = vld [vmem:[%s1873_s11 + $0x8] sm:$0x1]  ;;  %v941_v25 = vcombine.low %v1494_v21, %v1495_v22  ;;  %v1527_v29 = vld.sshfl [vmem:[%s1873_s11 + $0x4] sm:$0x11 pattern:$0x75316420] }
  0x1f   : > { %1629 = vmatpush3.bf16.msra.mxu1 %v1738_v24  ;;  %1618 = vmatprep.subr.bf16.mxu0 %v1789_v1  ;;  %v834_v6 = vsel %vm1930_vm2, %v827_v62, %v832_v2  ;;  %v1510_v24 = vld [vmem:[%s1873_s11 + $0xa] sm:$0x1]  ;;  %v1759_v32 = vld [vmem:[%s2098_s1 + $0xc0] sm:$0xff]   ;;  %v1140_v34 = vcombine.high %v1527_v29, %v1527_v29  ;;  %v1761_v37 = vld [vmem:[%s2098_s1 + $0x118] sm:$0xff]   ;;  %v1151_v38 = vshrl.u32 %v1527_v29, 16 }
  0x20   : > { %1630 = vmatprep.subr.bf16.mxu1 %v1789_v1  ;;  %1624 = vmatprep.mubr.msk.bf16.mxu0 %vm1790_vm0, %v1789_v1  ;;  %v844_v8 = vcombine.low %v825_v4, %v834_v6  ;;  %v1038_v26 = vcombine.low %v1509_v23, %v1510_v24  ;;  %v948_v30 = vrot.slane %v941_v25, %v1887_v20  ;;  %v1760_v33 = vld [vmem:[%s2098_s1 + $0xe0] sm:$0xff]   ;;  %v1762_v40 = vld [vmem:[%s2098_s1 + $0x110] sm:$0xff]   ;;  %v1792_v22 = vmov 1983009808  }
  0x21   : > { %1636 = vmatprep.mubr.msk.bf16.mxu1 %vm1790_vm0, %v1789_v1  ;;  %v1156_v39 = vshll.u32 %v1140_v34, 16  ;;  %v1764_v47 = vld [vmem:[%s2098_s1 + $0x100] sm:$0xff]   ;;  %v1272_v23 = vunpack.c.l.s4 %v1792_v22 }
  0x22   : > { %1619 = vmatpush3.bf16.msra.mxu0 %v1739_v27  ;;  %v851_v12 = vrot.slane %v844_v8, %v1887_v20  ;;  %v1757_v27 = vld [vmem:[%s2098_s1 + $0xc8] sm:$0xff]   ;;  %v1045_v31 = vrot.slane %v1038_v26, %v1887_v20  ;;  %v1543_v26 = vld [vmem:[%s2099_s2] ss:$0 sm:$0xff] }
  0x23   : > { %1631 = vmatpush3.bf16.msra.mxu1 %v1740_v28  ;;  %1620 = vmatprep.subr.bf16.mxu0 %v1789_v1  ;;  %v1758_v28 = vld [vmem:[%s2098_s1 + $0xe8] sm:$0xff]   ;;  %v1158_v41 = vsel %vm1930_vm2, %v1151_v38, %v1156_v39  ;;  %v1273_v29 = vunpack.c.0.s8 %v1272_v23 }
  0x24   : > { %1632 = vmatprep.subr.bf16.mxu1 %v1789_v1  ;;  %v858_v15 = vrot.slane %v851_v12, %v1887_v20  ;;  %v1168_v43 = vcombine.low %v1938_v44, %v1158_v41 }
  0x25   : > { %v1276_v34 = vsub.s32 %v1273_v29, %v1875_v11 }
  0x26   : > { %1621 = vmatpush3.bf16.msra.mxu0 %v1741_v35  ;;  %v955_v35 = vrot.slane %v948_v30, %v1887_v20  ;;  %v1175_v46 = vrot.slane %v1168_v43, %v1887_v20 }
  0x27   : > { %1633 = vmatpush3.bf16.msra.mxu1 %v1742_v36  ;;  %1622 = vmatprep.subr.bf16.mxu0 %v1789_v1  ;;  %v1052_v36 = vrot.slane %v1045_v31, %v1887_v20 }
  0x28   : > { %1634 = vmatprep.subr.bf16.mxu1 %v1789_v1  ;;  %v1182_v42 = vrot.slane %v1175_v46, %v1887_v20 }
  0x2a   : > { %1623 = vmatpush3.bf16.msra.mxu0 %v1743_v45  ;;  %v1763_v45 = vld [vmem:[%s2098_s1 + $0x108] sm:$0xff]  }
  0x2b   : > { %1635 = vmatpush3.bf16.msra.mxu1 %v1744_v48  ;;  %1640 = vmatprep.subr.bf16.mxu0 %v1789_v1 }
  0x2c   : > { %1652 = vmatprep.subr.bf16.mxu1 %v1789_v1 }
  0x2d   : > { %1625 = vmatmul.mubr.msk.bf16.vlgmr.msra.gmra.mxu0 %vm330_vm1, %v534_v50 }
  0x2e   : > { %1637 = vmatmul.mubr.msk.bf16.vlgmr.msra.gmra.mxu1 %vm330_vm1, %v631_v52  ;;  %1641 = vmatpush3.bf16.msra.mxu0 %v1745_v51 }
  0x2f   : > { %1653 = vmatpush3.bf16.msra.mxu1 %v1746_v53  ;;  %1642 = vmatprep.subr.bf16.mxu0 %v1789_v1 }
  0x30   : > { %1654 = vmatprep.subr.bf16.mxu1 %v1789_v1  ;;  %1648 = vmatprep.mubr.msk.bf16.mxu0 %vm1790_vm0, %v1789_v1 }
  0x31   : > { %1660 = vmatprep.mubr.msk.bf16.mxu1 %vm1790_vm0, %v1789_v1 }
  0x32   : > { %1643 = vmatpush3.bf16.msra.mxu0 %v1747_v60 }
  0x33   : > { %1655 = vmatpush3.bf16.msra.mxu1 %v1748_v63  ;;  %1644 = vmatprep.subr.bf16.mxu0 %v1789_v1 }
  0x34   : > { %1656 = vmatprep.subr.bf16.mxu1 %v1789_v1 }
  0x36   : > { %1645 = vmatpush3.bf16.msra.mxu0 %v1749_v3 }
  0x37   : > { %1657 = vmatpush3.bf16.msra.mxu1 %v1750_v7  ;;  %1646 = vmatprep.subr.bf16.mxu0 %v1789_v1 }
  0x38   : > { %1658 = vmatprep.subr.bf16.mxu1 %v1789_v1 }
  0x3a   : > { %1647 = vmatpush3.bf16.msra.mxu0 %v1751_v9 }
  0x3b   : > { %1659 = vmatpush3.bf16.msra.mxu1 %v1752_v13  ;;  %1664 = vmatprep.subr.bf16.mxu0 %v1789_v1 }
  0x3c   : > { %1676 = vmatprep.subr.bf16.mxu1 %v1789_v1 }
  0x3d   : > { %1649 = vmatmul.mubr.msk.bf16.vlgmr.msra.gmra.mxu0 %vm330_vm1, %v728_v14 }
  0x3e   : > { %1661 = vmatmul.mubr.msk.bf16.vlgmr.msra.gmra.mxu1 %vm330_vm1, %v858_v15  ;;  %1665 = vmatpush3.bf16.msra.mxu0 %v1753_v16 }
  0x3f   : > { %1677 = vmatpush3.bf16.msra.mxu1 %v1754_v17  ;;  %1666 = vmatprep.subr.bf16.mxu0 %v1789_v1 }
  0x40   : > { %1678 = vmatprep.subr.bf16.mxu1 %v1789_v1  ;;  %1672 = vmatprep.mubr.msk.bf16.mxu0 %vm1790_vm0, %v1789_v1 }
  0x41   : > { %1684 = vmatprep.mubr.msk.bf16.mxu1 %vm1790_vm0, %v1789_v1 }
  0x42   : > { %1667 = vmatpush3.bf16.msra.mxu0 %v1755_v18 }
  0x43   : > { %1679 = vmatpush3.bf16.msra.mxu1 %v1756_v19  ;;  %1668 = vmatprep.subr.bf16.mxu0 %v1789_v1 }
  0x44   : > { %1680 = vmatprep.subr.bf16.mxu1 %v1789_v1 }
  0x46   : > { %1669 = vmatpush3.bf16.msra.mxu0 %v1757_v27 }
  0x47   : > { %1681 = vmatpush3.bf16.msra.mxu1 %v1758_v28  ;;  %1670 = vmatprep.subr.bf16.mxu0 %v1789_v1  ;;  %v1544_v28 = vld [vmem:[%s2100_s3] ss:$0 sm:$0xff] }
  0x48   : > { %1682 = vmatprep.subr.bf16.mxu1 %v1789_v1 }
  0x4a   : > { %1671 = vmatpush3.bf16.msra.mxu0 %v1759_v32 }
  0x4b   : > { %1683 = vmatpush3.bf16.msra.mxu1 %v1760_v33  ;;  %1688 = vmatprep.subr.bf16.mxu0 %v1789_v1 }
  0x4d   : > { %1673 = vmatmul.mubr.msk.bf16.vlgmr.msra.gmra.mxu0 %vm330_vm1, %v955_v35 }
  0x4e   : > { %1685 = vmatmul.mubr.msk.bf16.vlgmr.msra.gmra.mxu1 %vm330_vm1, %v1052_v36  ;;  %1689 = vmatpush3.bf16.msra.mxu0 %v1761_v37 }
  0x4f   : > { %1696 = vmatprep.mubr.msk.bf16.mxu0 %vm1790_vm0, %v1789_v1  ;;  %1690 = vmatprep.subr.bf16.mxu0 %v1789_v1 }
  0x52   : > { %1691 = vmatpush3.bf16.msra.mxu0 %v1762_v40 }
  0x53   : > { %1692 = vmatprep.subr.bf16.mxu0 %v1789_v1 }
  0x56   : > { %1693 = vmatpush3.bf16.msra.mxu0 %v1763_v45 }
  0x57   : > { %1694 = vmatprep.subr.bf16.mxu0 %v1789_v1 }
  0x5a   : > { %1695 = vmatpush3.bf16.msra.mxu0 %v1764_v47 }
  0x5d   : > { %1697 = vmatmul.mubr.msk.bf16.vlgmr.msra.gmra.mxu0 %vm330_vm1, %v1182_v42  ;;  %vm1283_vm1 = vcmask 516096  }
  0xdd   : > { %v368_v44 = vpop.f32.mrf.mxu0 }
  0xde   : > { %v452_v48 = vpop.f32.mrf.mxu1 }
  0xdf   : > { %v1602_v49 = vpop.f32.mrf.mxu0  ;;  %v453_v6 = vadd.f32 %v452_v48, %v368_v44 }
  0xe0   : > { %v1614_v50 = vpop.f32.mrf.mxu1 }
  0xe1   : > { %v371_v51 = vpop.f32.mrf.mxu0 }
  0xe2   : > { %v455_v52 = vpop.f32.mrf.mxu1 }
  0xe3   : > { %v1603_v53 = vpop.f32.mrf.mxu0 }
  0xe4   : > { %v1615_v54 = vpop.f32.mrf.mxu1 }
  0xed   : > { %v596_v55 = vpop.f32.mrf.mxu0 }
  0xee   : > { %v693_v56 = vpop.f32.mrf.mxu1  ;;  %v602_v7 = vadd.f32 %v596_v55, %v453_v6 }
  0xef   : > { %v1626_v57 = vpop.f32.mrf.mxu0 }
  0xf0   : > { %v1638_v58 = vpop.f32.mrf.mxu1  ;;  %v699_v13 = vadd.f32 %v693_v56, %v602_v7 }
  0xf1   : > { %v599_v59 = vpop.f32.mrf.mxu0 }
  0xf2   : > { %v696_v60 = vpop.f32.mrf.mxu1 }
  0xf3   : > { %v1627_v1 = vpop.f32.mrf.mxu0 }
  0xf4   : > { %v1639_v61 = vpop.f32.mrf.mxu1 }
  0xfd   : > { %v790_v20 = vpop.f32.mrf.mxu0 }
  0xfe   : > { %v920_v62 = vpop.f32.mrf.mxu1  ;;  %v796_v16 = vadd.f32 %v790_v20, %v699_v13 }
  0xff   : > { %v1650_v63 = vpop.f32.mrf.mxu0 }
 0x100   : > { %v1662_v0 = vpop.f32.mrf.mxu1  ;;  %v926_v19 = vadd.f32 %v920_v62, %v796_v16 }
 0x101   : > { %v793_v2 = vpop.f32.mrf.mxu0 }
 0x102   : > { %v923_v3 = vpop.f32.mrf.mxu1 }
 0x103   : > { %v1651_v4 = vpop.f32.mrf.mxu0 }
 0x104   : > { %v1663_v5 = vpop.f32.mrf.mxu1 }
 0x10d   : > { %v1017_v8 = vpop.f32.mrf.mxu0 }
 0x10e   : > { %v1114_v9 = vpop.f32.mrf.mxu1  ;;  %v1023_v21 = vadd.f32 %v1017_v8, %v926_v19 }
 0x10f   : > { %v1674_v10 = vpop.f32.mrf.mxu0 }
 0x110   : > { %v1686_v12 = vpop.f32.mrf.mxu1  ;;  %v1120_v24 = vadd.f32 %v1114_v9, %v1023_v21 }
 0x111   : > { %v1020_v14 = vpop.f32.mrf.mxu0 }
 0x112   : > { %v1117_v15 = vpop.f32.mrf.mxu1 }
 0x113   : > { %v1675_v17 = vpop.f32.mrf.mxu0 }
 0x114   : > { %v1687_v18 = vpop.f32.mrf.mxu1 }
 0x11d   : > { %v1244_v25 = vpop.f32.mrf.mxu0 }
 0x11e   : > { %v1250_v27 = vadd.f32 %v1244_v25, %v1120_v24 }
 0x11f   : > { %v1698_v30 = vpop.f32.mrf.mxu0 }
 0x120   : > { %v1258_v31 = vmul.f32 %v1543_v26, %v1250_v27 }
 0x121   : > { %v1247_v32 = vpop.f32.mrf.mxu0 }
 0x122   : > { %v1266_v33 = vadd.f32 %v1544_v28, %v1258_v31 }
 0x123   : > { %v1699_v35 = vpop.f32.mrf.mxu0 }
 0x124   : > { %vm1267_vm0 = vcmp.ge.f32.partialorder %v1266_v33, 0.0  ;;  %v1268_v36 = vmul.f32 0.2, %v1266_v33 }
 0x126   : > { %v1269_v37 = vsel %vm1267_vm0, %v1266_v33, %v1268_v36 }
 0x127   : > { %v1277_v38 = vrot.slane %v1269_v37, %v1276_v34 }
 0x129   : > { %v1278_v39 = vcombine.high %v1277_v38, %v1277_v38  ;;  %v1281_v40 = vpack.c.bf16 %v1277_v38, %v1277_v38 }
 0x12b   : > { %v1282_v41 = vpack.c.bf16 %v1278_v39, %v1278_v39  ;;  %1284 = vst.msk [vmem:[%s265_s13] sm:$0x1] %vm1283_vm1, %v1281_v40 }
 0x12d   : > { %1285 = vst.msk [vmem:[%s265_s13 + $0x1] sm:$0x1] %vm1283_vm1, %v1282_v41 }
 0x12e PF: > { %s14_s17 = sadd.s32 1, %s1787_s17   ;;  %s2104_s15 = smov %s1783_s16 }
 0x12f   : > { %p11_p6 = scmp.ge.s32.totalorder %s14_s17, 4   ;;  %s2105_s16 = smov %s2107_s18 }
 0x131   :  { %13 = sbr.rel (!%p11_p6) target bundleno = 2 (0x2), region = 88 }

// kernel: discriminator_forward.15
= control target key start
LH: loop header
LB: loop body
LE: loop exit
PB: predicated region body
PF: predicated region fallthrough
CT: control target
= control target key end

     0   :  { %s1864_s15 = smov 0   ;;  %s1866_s16 = smov 0   ;;  %s2136_s0 = inlined_call_operand.vmem [shape: bf16[2,4,4,64], index: 0, kind: input, shape index: {}]   ;;  %s2137_s1 = inlined_call_operand.vmem [shape: bf16[3,3,64,128], index: 1, kind: input, shape index: {}]   ;;  %s2138_s2 = inlined_call_operand.vmem [shape: f32[1,128], index: 2, kind: input, shape index: {}]   ;;  %s2139_s3 = inlined_call_operand.vmem [shape: f32[1,128], index: 3, kind: input, shape index: {}]   ;;  %s2140_s4 = inlined_call_operand.vmem [shape: bf16[2,2,2,128], index: 4, kind: output, shape index: {}]  }
   0x1   :  { %s1868_s17 = smov 0  }
   0x2 LB: > { %s26_s18 = sadd.s32 1, %s1829_s16  ;;  %p1443_p0 = scmp.ge.s32.totalorder %s1833_s17, 1  ;;  %s1833_s17 = sphi %s1868_s17, %s14_s17   ;;  %s1829_s16 = sphi %s1866_s16, %s2144_s16   ;;  %s1825_s15 = sphi %s1864_s15, %s2143_s15  }
   0x3   : > { %p28_p1 = scmp.ge.s32.totalorder %s26_s18, 2  ;;  %p201_p2 = scmp.lt.s32.totalorder %s1833_s17, 3 }
   0x5   : > { %s2146_s18 = smov (%p28_p1, %s26_s18), 0  ;;  %p202_p3 = pnand %p1443_p0, %p201_p2 }
   0x6   : > { %p239_p4 = scmp.lt.s32.totalorder (!%p202_p3), %s1825_s15, 1 }
   0x7   : > { %205 = sbr.rel (%p202_p3) target bundleno = 303 (0x12f), region = 36 }
   0xc   : > { %v1775_v0 = vld [vmem:[%s2137_s1 + $0x38] sm:$0xff]   ;;  %v1835_v1 = vmov 0.0   ;;  %v1777_v3 = vld [vmem:[%s2137_s1 + $0x30] sm:$0xff]   ;;  %vm1836_vm0 = vmmov 0   ;;  %s2148_s15 = smov (!%p239_p4, %s1825_s15), 1  ;;  %v1779_v5 = vld [vmem:[%s2137_s1 + $0x28] sm:$0xff]   ;;  %v338_v12 = vlaneseq }
   0xd   : > { %1639 = vmatprep.subr.bf16.mxu0 %v1835_v1  ;;  %1651 = vmatprep.subr.bf16.mxu1 %v1835_v1  ;;  %v1776_v2 = vld [vmem:[%s2137_s1 + $0x18] sm:$0xff]   ;;  %v1778_v4 = vld [vmem:[%s2137_s1 + $0x10] sm:$0xff]   ;;  %s1593_s29 = sshll.u32 %s2148_s15, 3  ;;  %v1780_v6 = vld [vmem:[%s2137_s1 + $0x8] sm:$0xff]   ;;  %vm292_vm1 = vsmask.f32 256 }
   0xe   : > { %1640 = vmatpush3.bf16.msra.mxu0 %v1775_v0  ;;  %1647 = vmatprep.mubr.msk.bf16.mxu0 %vm1836_vm0, %v1835_v1  ;;  %s1915_s8 = scalar_lea.vmem %s2136_s0, %s1593_s29  ;;  %v1781_v7 = vld [vmem:[%s2137_s1 + $0x20] sm:$0xff]   ;;  %vm293_vm2 = vsmask.f32 1284  ;;  %vm295_vm4 = vsmask.f32 2312  ;;  %v1930_v22 = vshrl.u32 %v338_v12, 7 }
   0xf   : > { %1652 = vmatpush3.bf16.msra.mxu1 %v1776_v2  ;;  %1641 = vmatprep.subr.bf16.mxu0 %v1835_v1  ;;  %v1447_v8 = vld.sshfl [vmem:[%s1915_s8] sm:$0x11 pattern:$0x75316420]  ;;  %vm294_vm3 = vmor %vm292_vm1, %vm293_vm2  ;;  %vm297_vm5 = vsmask.f32 3340 }
  0x10   : > { %1653 = vmatprep.subr.bf16.mxu1 %v1835_v1  ;;  %1659 = vmatprep.mubr.msk.bf16.mxu1 %vm1836_vm0, %v1835_v1  ;;  %v1782_v9 = vld [vmem:[%s2137_s1] sm:$0xff]   ;;  %v283_v11 = vcombine.high %v1447_v8, %v1447_v8  ;;  %vm299_vm6 = vsmask.f32 4368  ;;  %vm296_vm7 = vmor %vm294_vm3, %vm295_vm4  ;;  %vm301_vm8 = vsmask.f32 5396  ;;  %v308_v14 = vshrl.u32 %v1447_v8, 16 }
  0x11   : > { %v1448_v10 = vld.sshfl [vmem:[%s1915_s8 + $0x2] sm:$0x11 pattern:$0x75316420]  ;;  %vm303_vm9 = vsmask.f32 6424  ;;  %vm298_vm11 = vmor %vm296_vm7, %vm297_vm5 }
  0x12   : > { %1642 = vmatpush3.bf16.msra.mxu0 %v1777_v3  ;;  %v291_v13 = vcombine.high %v1448_v10, %v1448_v10  ;;  %vm305_vm10 = vsmask.f32 7452  ;;  %v313_v15 = vshll.u32 %v283_v11, 16  ;;  %v317_v16 = vshrl.u32 %v1448_v10, 16  ;;  %v262_v18 = vld [vmem:[%s1915_s8] sm:$0x1]  ;;  %vm300_vm12 = vmor %vm298_vm11, %vm299_vm6 }
  0x13   : > { %1654 = vmatpush3.bf16.msra.mxu1 %v1778_v4  ;;  %1643 = vmatprep.subr.bf16.mxu0 %v1835_v1  ;;  %v263_v19 = vld [vmem:[%s1915_s8 + $0x2] sm:$0x1]  ;;  %vm302_vm13 = vmor %vm300_vm12, %vm301_vm8  ;;  %v1837_v20 = vmov 1966171168   ;;  %v1783_v32 = vld [vmem:[%s2137_s1 + $0x58] sm:$0xff]   ;;  %vm373_vm1 = vcmask 523264  }
  0x14   : > { %1655 = vmatprep.subr.bf16.mxu1 %v1835_v1  ;;  %v322_v17 = vshll.u32 %v291_v13, 16  ;;  %v336_v21 = vunpack.c.l.s4 %v1837_v20  ;;  %vm304_vm14 = vmor %vm302_vm13, %vm303_vm9  ;;  %v419_v25 = vcombine.low %v262_v18, %v263_v19  ;;  %v1784_v33 = vld [vmem:[%s2137_s1 + $0x78] sm:$0xff]   ;;  %v1469_v36 = vld.sshfl [vmem:[%s1915_s8] sm:$0x10 pattern:$0x75316420] }
  0x15   : > { %vm1935_vm15 = vmor %vm304_vm14, %vm305_vm10  ;;  %v1785_v37 = vld [vmem:[%s2137_s1 + $0x50] sm:$0xff]   ;;  %v1470_v39 = vld.sshfl [vmem:[%s1915_s8 + $0x2] sm:$0x10 pattern:$0x75316420]  ;;  %s1446_s9 = sshll.u32 %s2148_s15, 1 }
  0x16   : > { %1644 = vmatpush3.bf16.msra.mxu0 %v1779_v5  ;;  %v337_v24 = vunpack.c.0.s8 %v336_v21  ;;  %v315_v26 = vsel %vm1935_vm15, %v308_v14, %v313_v15  ;;  %v1944_v27 = vsel %vm1935_vm15, %v317_v16, %v322_v17  ;;  %v1786_v38 = vld [vmem:[%s2137_s1 + $0x70] sm:$0xff]   ;;  %v1485_v40 = vld [vmem:[%s1915_s8 + $0x2] sm:$0x1]  ;;  %v1486_v41 = vld [vmem:[%s1915_s8 + $0x4] sm:$0x1]  ;;  %v1479_v43 = vcombine.high %v1469_v36, %v1470_v39  ;;  %s260_s12 = scalar_lea.vmem %s2140_s4, %s1446_s9 }
  0x17   : > { %1656 = vmatpush3.bf16.msra.mxu1 %v1780_v6  ;;  %1645 = vmatprep.subr.bf16.mxu0 %v1835_v1  ;;  %v334_v28 = vcombine.low %v315_v26, %v1944_v27  ;;  %v1787_v42 = vld [vmem:[%s2137_s1 + $0x48] sm:$0xff]   ;;  %v627_v44 = vcombine.low %v1485_v40, %v1486_v41  ;;  %v1789_v46 = vld [vmem:[%s2137_s1 + $0x40] sm:$0xff]   ;;  %v1791_v52 = vld [vmem:[%s2137_s1 + $0x98] sm:$0xff]  }
  0x18   : > { %1657 = vmatprep.subr.bf16.mxu1 %v1835_v1  ;;  %v1948_v29 = vsub.s32 %v337_v24, %v1930_v22  ;;  %v1788_v45 = vld [vmem:[%s2137_s1 + $0x68] sm:$0xff]   ;;  %v1503_v49 = vld.sshfl [vmem:[%s1915_s8 + $0x4] sm:$0x11 pattern:$0x75316420]  ;;  %v1792_v53 = vld [vmem:[%s2137_s1 + $0xb8] sm:$0xff]  }
  0x19   : > { %v1790_v50 = vld [vmem:[%s2137_s1 + $0x60] sm:$0xff]   ;;  %v729_v51 = vcombine.high %v1503_v49, %v1503_v49  ;;  %v740_v56 = vshrl.u32 %v1503_v49, 16  ;;  %v1793_v58 = vld [vmem:[%s2137_s1 + $0x90] sm:$0xff]   ;;  %v1795_v62 = vld [vmem:[%s2137_s1 + $0x88] sm:$0xff]  }
  0x1a   : > { %1646 = vmatpush3.bf16.msra.mxu0 %v1781_v7  ;;  %v341_v30 = vrot.slane %v334_v28, %v1948_v29  ;;  %v426_v31 = vrot.slane %v419_v25, %v1948_v29  ;;  %v537_v47 = vrot.slane %v1479_v43, %v1948_v29  ;;  %v634_v48 = vrot.slane %v627_v44, %v1948_v29  ;;  %v1794_v59 = vld [vmem:[%s2137_s1 + $0xb0] sm:$0xff]   ;;  %v1522_v61 = vld.sshfl [vmem:[%s1915_s8 + $0x4] sm:$0x10 pattern:$0x75316420]  ;;  %v1796_v2 = vld [vmem:[%s2137_s1 + $0xa8] sm:$0xff]  }
  0x1b   : > { %1658 = vmatpush3.bf16.msra.mxu1 %v1782_v9  ;;  %1663 = vmatprep.subr.bf16.mxu0 %v1835_v1  ;;  %v745_v57 = vshll.u32 %v729_v51, 16  ;;  %v1531_v0 = vcombine.high %v1470_v39, %v1522_v61  ;;  %v1555_v3 = vld.sshfl [vmem:[%s1915_s8 + $0x6] sm:$0x11 pattern:$0x75316420]  ;;  %v1799_v15 = vld [vmem:[%s2137_s1 + $0xd8] sm:$0xff]  }
  0x1c   : > { %1675 = vmatprep.subr.bf16.mxu1 %v1835_v1  ;;  %v348_v34 = vrot.slane %v341_v30, %v1948_v29  ;;  %v433_v35 = vrot.slane %v426_v31, %v1948_v29  ;;  %v544_v54 = vrot.slane %v537_v47, %v1948_v29  ;;  %v641_v55 = vrot.slane %v634_v48, %v1948_v29  ;;  %v1574_v4 = vld.sshfl [vmem:[%s1915_s8 + $0x6] sm:$0x10 pattern:$0x75316420]  ;;  %v1800_v16 = vld [vmem:[%s2137_s1 + $0xf8] sm:$0xff]   ;;  %v1801_v19 = vld [vmem:[%s2137_s1 + $0xd0] sm:$0xff]  }
  0x1d   : > { %v747_v60 = vsel %vm1935_vm15, %v740_v56, %v745_v57  ;;  %v876_v6 = vrot.slane %v1531_v0, %v1948_v29  ;;  %v1583_v7 = vcombine.high %v1522_v61, %v1574_v4  ;;  %v1797_v8 = vld [vmem:[%s2137_s1 + $0x80] sm:$0xff]   ;;  %v1068_v10 = vcombine.high %v1555_v3, %v1555_v3  ;;  %v1802_v20 = vld [vmem:[%s2137_s1 + $0xf0] sm:$0xff]   ;;  %v1803_v28 = vld [vmem:[%s2137_s1 + $0xc8] sm:$0xff]  }
  0x1e   : > { %1648 = vmatmul.mubr.msk.bf16.vlgmr.msra.gmra.mxu0 %vm373_vm1, %v348_v34  ;;  %1660 = vmatmul.mubr.msk.bf16.vlgmr.msra.gmra.mxu1 %vm373_vm1, %v433_v35  ;;  %v757_v63 = vcombine.low %v1944_v27, %v747_v60  ;;  %v1798_v9 = vld [vmem:[%s2137_s1 + $0xa0] sm:$0xff]   ;;  %v1079_v17 = vshrl.u32 %v1555_v3, 16  ;;  %v1804_v23 = vld [vmem:[%s2137_s1 + $0xe8] sm:$0xff]   ;;  %v1807_v36 = vld [vmem:[%s2137_s1 + $0x118] sm:$0xff]  }
  0x1f   : > { %1664 = vmatpush3.bf16.msra.mxu0 %v1783_v32  ;;  %1676 = vmatpush3.bf16.msra.mxu1 %v1784_v33  ;;  %v1215_v11 = vrot.slane %v1583_v7, %v1948_v29  ;;  %v883_v13 = vrot.slane %v876_v6, %v1948_v29  ;;  %v1084_v18 = vshll.u32 %v1068_v10, 16  ;;  %v1537_v21 = vld [vmem:[%s1915_s8 + $0x4] sm:$0x1]  ;;  %v1538_v24 = vld [vmem:[%s1915_s8 + $0x6] sm:$0x1] }
  0x20   : > { %1665 = vmatprep.subr.bf16.mxu0 %v1835_v1  ;;  %1677 = vmatprep.subr.bf16.mxu1 %v1835_v1  ;;  %v764_v5 = vrot.slane %v757_v63, %v1948_v29  ;;  %v966_v26 = vcombine.low %v1537_v21, %v1538_v24  ;;  %v1805_v32 = vld [vmem:[%s2137_s1 + $0xc0] sm:$0xff]  }
  0x21   : > { %1671 = vmatprep.mubr.msk.bf16.mxu0 %vm1836_vm0, %v1835_v1  ;;  %1683 = vmatprep.mubr.msk.bf16.mxu1 %vm1836_vm0, %v1835_v1  ;;  %v1222_v14 = vrot.slane %v1215_v11, %v1948_v29  ;;  %v1086_v25 = vsel %vm1935_vm15, %v1079_v17, %v1084_v18  ;;  %v1806_v33 = vld [vmem:[%s2137_s1 + $0xe0] sm:$0xff]  }
  0x22   : > { %v771_v12 = vrot.slane %v764_v5, %v1948_v29  ;;  %v1096_v27 = vcombine.low %v747_v60, %v1086_v25  ;;  %v973_v30 = vrot.slane %v966_v26, %v1948_v29  ;;  %v1589_v17 = vld [vmem:[%s2138_s2] ss:$0 sm:$0xff] }
  0x23   : > { %1666 = vmatpush3.bf16.msra.mxu0 %v1785_v37  ;;  %1678 = vmatpush3.bf16.msra.mxu1 %v1786_v38  ;;  %v1808_v37 = vld [vmem:[%s2137_s1 + $0x110] sm:$0xff]   ;;  %v1810_v38 = vld [vmem:[%s2137_s1 + $0x100] sm:$0xff]  }
  0x24   : > { %1667 = vmatprep.subr.bf16.mxu0 %v1835_v1  ;;  %1679 = vmatprep.subr.bf16.mxu1 %v1835_v1  ;;  %v1103_v31 = vrot.slane %v1096_v27, %v1948_v29  ;;  %v980_v34 = vrot.slane %v973_v30, %v1948_v29 }
  0x26   : > { %v1110_v35 = vrot.slane %v1103_v31, %v1948_v29  ;;  %v1809_v29 = vld [vmem:[%s2137_s1 + $0x108] sm:$0xff]  }
  0x27   : > { %1668 = vmatpush3.bf16.msra.mxu0 %v1787_v42  ;;  %1680 = vmatpush3.bf16.msra.mxu1 %v1788_v45 }
  0x28   : > { %1669 = vmatprep.subr.bf16.mxu0 %v1835_v1  ;;  %1681 = vmatprep.subr.bf16.mxu1 %v1835_v1 }
  0x2b   : > { %1670 = vmatpush3.bf16.msra.mxu0 %v1789_v46  ;;  %1682 = vmatpush3.bf16.msra.mxu1 %v1790_v50 }
  0x2c   : > { %1687 = vmatprep.subr.bf16.mxu0 %v1835_v1  ;;  %1699 = vmatprep.subr.bf16.mxu1 %v1835_v1 }
  0x2e   : > { %1672 = vmatmul.mubr.msk.bf16.vlgmr.msra.gmra.mxu0 %vm373_vm1, %v544_v54  ;;  %1684 = vmatmul.mubr.msk.bf16.vlgmr.msra.gmra.mxu1 %vm373_vm1, %v641_v55 }
  0x2f   : > { %1688 = vmatpush3.bf16.msra.mxu0 %v1791_v52  ;;  %1700 = vmatpush3.bf16.msra.mxu1 %v1792_v53 }
  0x30   : > { %1689 = vmatprep.subr.bf16.mxu0 %v1835_v1  ;;  %1701 = vmatprep.subr.bf16.mxu1 %v1835_v1 }
  0x31   : > { %1695 = vmatprep.mubr.msk.bf16.mxu0 %vm1836_vm0, %v1835_v1  ;;  %1707 = vmatprep.mubr.msk.bf16.mxu1 %vm1836_vm0, %v1835_v1 }
  0x33   : > { %1690 = vmatpush3.bf16.msra.mxu0 %v1793_v58  ;;  %1702 = vmatpush3.bf16.msra.mxu1 %v1794_v59 }
  0x34   : > { %1691 = vmatprep.subr.bf16.mxu0 %v1835_v1  ;;  %1703 = vmatprep.subr.bf16.mxu1 %v1835_v1 }
  0x37   : > { %1692 = vmatpush3.bf16.msra.mxu0 %v1795_v62  ;;  %1704 = vmatpush3.bf16.msra.mxu1 %v1796_v2 }
  0x38   : > { %1693 = vmatprep.subr.bf16.mxu0 %v1835_v1  ;;  %1705 = vmatprep.subr.bf16.mxu1 %v1835_v1 }
  0x3b   : > { %1694 = vmatpush3.bf16.msra.mxu0 %v1797_v8  ;;  %1706 = vmatpush3.bf16.msra.mxu1 %v1798_v9 }
  0x3c   : > { %1711 = vmatprep.subr.bf16.mxu0 %v1835_v1  ;;  %1723 = vmatprep.subr.bf16.mxu1 %v1835_v1 }
  0x3e   : > { %1696 = vmatmul.mubr.msk.bf16.vlgmr.msra.gmra.mxu0 %vm373_vm1, %v771_v12  ;;  %1708 = vmatmul.mubr.msk.bf16.vlgmr.msra.gmra.mxu1 %vm373_vm1, %v883_v13  ;;  %v1838_v13 = vmov 1983009808  }
  0x3f   : > { %1712 = vmatpush3.bf16.msra.mxu0 %v1799_v15  ;;  %1724 = vmatpush3.bf16.msra.mxu1 %v1800_v16 }
  0x40   : > { %1713 = vmatprep.subr.bf16.mxu0 %v1835_v1  ;;  %1725 = vmatprep.subr.bf16.mxu1 %v1835_v1 }
  0x41   : > { %1719 = vmatprep.mubr.msk.bf16.mxu0 %vm1836_vm0, %v1835_v1  ;;  %1731 = vmatprep.mubr.msk.bf16.mxu1 %vm1836_vm0, %v1835_v1 }
  0x43   : > { %1714 = vmatpush3.bf16.msra.mxu0 %v1801_v19  ;;  %1726 = vmatpush3.bf16.msra.mxu1 %v1802_v20  ;;  %v1590_v19 = vld [vmem:[%s2139_s3] ss:$0 sm:$0xff] }
  0x44   : > { %1715 = vmatprep.subr.bf16.mxu0 %v1835_v1  ;;  %1727 = vmatprep.subr.bf16.mxu1 %v1835_v1 }
  0x47   : > { %1716 = vmatpush3.bf16.msra.mxu0 %v1803_v28  ;;  %1728 = vmatpush3.bf16.msra.mxu1 %v1804_v23 }
  0x48   : > { %1717 = vmatprep.subr.bf16.mxu0 %v1835_v1  ;;  %1729 = vmatprep.subr.bf16.mxu1 %v1835_v1 }
  0x4b   : > { %1718 = vmatpush3.bf16.msra.mxu0 %v1805_v32  ;;  %1730 = vmatpush3.bf16.msra.mxu1 %v1806_v33 }
  0x4c   : > { %1735 = vmatprep.subr.bf16.mxu0 %v1835_v1 }
  0x4e   : > { %1720 = vmatmul.mubr.msk.bf16.vlgmr.msra.gmra.mxu0 %vm373_vm1, %v980_v34  ;;  %1732 = vmatmul.mubr.msk.bf16.vlgmr.msra.gmra.mxu1 %vm373_vm1, %v1110_v35 }
  0x4f   : > { %1736 = vmatpush3.bf16.msra.mxu0 %v1807_v36  ;;  %1743 = vmatprep.mubr.msk.bf16.mxu0 %vm1836_vm0, %v1835_v1 }
  0x50   : > { %1737 = vmatprep.subr.bf16.mxu0 %v1835_v1 }
  0x53   : > { %1738 = vmatpush3.bf16.msra.mxu0 %v1808_v37 }
  0x54   : > { %1739 = vmatprep.subr.bf16.mxu0 %v1835_v1 }
  0x57   : > { %1740 = vmatpush3.bf16.msra.mxu0 %v1809_v29 }
  0x58   : > { %1741 = vmatprep.subr.bf16.mxu0 %v1835_v1 }
  0x5b   : > { %1742 = vmatpush3.bf16.msra.mxu0 %v1810_v38 }
  0x5e   : > { %1744 = vmatmul.mubr.msk.bf16.vlgmr.msra.gmra.mxu0 %vm373_vm1, %v1222_v14  ;;  %v1312_v14 = vunpack.c.l.s4 %v1838_v13 }
  0x60   : > { %v1313_v20 = vunpack.c.0.s8 %v1312_v14 }
  0x62   : > { %v1316_v27 = vsub.s32 %v1313_v20, %v1930_v22 }
  0xde   : > { %v411_v39 = vpop.f32.mrf.mxu0  ;;  %v495_v40 = vpop.f32.mrf.mxu1 }
  0xdf   : > { %v496_v62 = vadd.f32 %v495_v40, %v411_v39 }
  0xe0   : > { %v1649_v41 = vpop.f32.mrf.mxu0  ;;  %v1661_v42 = vpop.f32.mrf.mxu1 }
  0xe2   : > { %v414_v43 = vpop.f32.mrf.mxu0  ;;  %v498_v44 = vpop.f32.mrf.mxu1 }
  0xe4   : > { %v1650_v45 = vpop.f32.mrf.mxu0  ;;  %v1662_v46 = vpop.f32.mrf.mxu1 }
  0xee   : > { %v606_v47 = vpop.f32.mrf.mxu0  ;;  %v703_v48 = vpop.f32.mrf.mxu1 }
  0xef   : > { %v612_v63 = vadd.f32 %v606_v47, %v496_v62 }
  0xf0   : > { %v1673_v49 = vpop.f32.mrf.mxu0  ;;  %v1685_v50 = vpop.f32.mrf.mxu1 }
  0xf1   : > { %v709_v5 = vadd.f32 %v703_v48, %v612_v63 }
  0xf2   : > { %v609_v51 = vpop.f32.mrf.mxu0  ;;  %v706_v52 = vpop.f32.mrf.mxu1 }
  0xf4   : > { %v1674_v53 = vpop.f32.mrf.mxu0  ;;  %v1686_v54 = vpop.f32.mrf.mxu1 }
  0xfe   : > { %v833_v1 = vpop.f32.mrf.mxu0  ;;  %v945_v55 = vpop.f32.mrf.mxu1 }
  0xff   : > { %v839_v8 = vadd.f32 %v833_v1, %v709_v5 }
 0x100   : > { %v1697_v56 = vpop.f32.mrf.mxu0  ;;  %v1709_v57 = vpop.f32.mrf.mxu1 }
 0x101   : > { %v951_v11 = vadd.f32 %v945_v55, %v839_v8 }
 0x102   : > { %v836_v58 = vpop.f32.mrf.mxu0  ;;  %v948_v59 = vpop.f32.mrf.mxu1 }
 0x104   : > { %v1698_v60 = vpop.f32.mrf.mxu0  ;;  %v1710_v61 = vpop.f32.mrf.mxu1 }
 0x10e   : > { %v1042_v0 = vpop.f32.mrf.mxu0  ;;  %v1172_v2 = vpop.f32.mrf.mxu1 }
 0x10f   : > { %v1048_v12 = vadd.f32 %v1042_v0, %v951_v11 }
 0x110   : > { %v1721_v3 = vpop.f32.mrf.mxu0  ;;  %v1733_v4 = vpop.f32.mrf.mxu1 }
 0x111   : > { %v1178_v15 = vadd.f32 %v1172_v2, %v1048_v12 }
 0x112   : > { %v1045_v6 = vpop.f32.mrf.mxu0  ;;  %v1175_v7 = vpop.f32.mrf.mxu1 }
 0x114   : > { %v1722_v9 = vpop.f32.mrf.mxu0  ;;  %v1734_v10 = vpop.f32.mrf.mxu1 }
 0x11e   : > { %v1284_v16 = vpop.f32.mrf.mxu0 }
 0x11f   : > { %v1290_v18 = vadd.f32 %v1284_v16, %v1178_v15 }
 0x120   : > { %v1745_v21 = vpop.f32.mrf.mxu0 }
 0x121   : > { %v1298_v24 = vmul.f32 %v1589_v17, %v1290_v18 }
 0x122   : > { %v1287_v25 = vpop.f32.mrf.mxu0 }
 0x123   : > { %v1306_v26 = vadd.f32 %v1590_v19, %v1298_v24 }
 0x124   : > { %v1746_v28 = vpop.f32.mrf.mxu0 }
 0x125   : > { %vm1307_vm0 = vcmp.ge.f32.partialorder %v1306_v26, 0.0  ;;  %v1308_v23 = vmul.f32 0.2, %v1306_v26 }
 0x127   : > { %v1309_v30 = vsel %vm1307_vm0, %v1306_v26, %v1308_v23 }
 0x128   : > { %v1317_v31 = vrot.slane %v1309_v30, %v1316_v27 }
 0x12a   : > { %v1318_v32 = vcombine.high %v1317_v31, %v1317_v31  ;;  %v1321_v33 = vpack.c.bf16 %v1317_v31, %v1317_v31 }
 0x12c   : > { %v1322_v34 = vpack.c.bf16 %v1318_v32, %v1318_v32  ;;  %1323 = vst [vmem:[%s260_s12] sm:$0x1] %v1321_v33 }
 0x12e   : > { %1324 = vst [vmem:[%s260_s12 + $0x1] sm:$0x1] %v1322_v34 }
 0x12f PF: > { %s14_s17 = sadd.s32 1, %s1833_s17   ;;  %s2143_s15 = smov %s1829_s16 }
 0x130   : > { %p11_p5 = scmp.ge.s32.totalorder %s14_s17, 4   ;;  %s2144_s16 = smov %s2146_s18 }
 0x132   :  { %13 = sbr.rel (!%p11_p5) target bundleno = 2 (0x2), region = 85 }

// kernel: discriminator_forward.17
= control target key start
LH: loop header
LB: loop body
LE: loop exit
PB: predicated region body
PF: predicated region fallthrough
CT: control target
= control target key end

     0   :  { %v325_v3 = vmov 0.0   ;;  %v62_v23 = vlaneseq  ;;  %vm82_vm0 = vcmask 1041409   ;;  %vm277_vm3 = vcmask 1024   ;;  %s572_s1 = inlined_call_operand.vmem [shape: f32[128,256], index: 1, kind: input, shape index: {}]   ;;  %s573_s3 = inlined_call_operand.vmem [shape: f32[256,1], index: 3, kind: input, shape index: {}]   ;;  %s574_s0 = inlined_call_operand.vmem [shape: bf16[2,1,128], index: 0, kind: input, shape index: {}]   ;;  %s575_s2 = inlined_call_operand.vmem [shape: f32[1,256], index: 2, kind: input, shape index: {}]   ;;  %s576_s4 = inlined_call_operand.<no memory space> [shape: f32[1,1], index: 4, kind: input, shape index: {}]   ;;  %s577_s5 = inlined_call_operand.vmem [shape: f32[2,1], index: 5, kind: output, shape index: {}]  }
   0x1   :  { %v59_v0 = vld [vmem:[%s572_s1 + $0xf8] sm:$0xff]  ;;  %v58_v1 = vld [vmem:[%s572_s1 + $0xf0] sm:$0xff]  ;;  %v57_v2 = vld [vmem:[%s572_s1 + $0xe8] sm:$0xff]  ;;  %149 = vmatprep.mubr.f32.mxu0 %v325_v3 }
   0x2   :  { %85 = vmatprep.subr.mxu0 %v59_v0  ;;  %v56_v4 = vld [vmem:[%s572_s1 + $0xe0] sm:$0xff]  ;;  %v55_v5 = vld [vmem:[%s572_s1 + $0xd8] sm:$0xff]  ;;  %v54_v6 = vld [vmem:[%s572_s1 + $0xd0] sm:$0xff]  ;;  %v449_v33 = vshrl.u32 %v62_v23, 7  ;;  %v10_v23 = vstv %s576_s4 }
   0x3   :  { %86 = vmatpush1.msra.mxu0 %v58_v1  ;;  %v53_v7 = vld [vmem:[%s572_s1 + $0xc8] sm:$0xff]  ;;  %v52_v8 = vld [vmem:[%s572_s1 + $0xc0] sm:$0xff]  ;;  %v51_v9 = vld [vmem:[%s572_s1 + $0xb8] sm:$0xff]  ;;  %11 = vst [vmem:[#allocation2] sm:$0x1] %v10_v23 }
   0x4   :  { %87 = vmatprep.subr.mxu0 %v57_v2  ;;  %v50_v10 = vld [vmem:[%s572_s1 + $0xb0] sm:$0xff]  ;;  %v49_v11 = vld [vmem:[%s572_s1 + $0xa8] sm:$0xff]  ;;  %v48_v12 = vld [vmem:[%s572_s1 + $0xa0] sm:$0xff]  ;;  %v479_v45 = vsub.s32 0, %v449_v33 }
   0x5   :  { %88 = vmatpush1.msra.mxu0 %v56_v4  ;;  %v47_v13 = vld [vmem:[%s572_s1 + $0x98] sm:$0xff]  ;;  %v46_v14 = vld [vmem:[%s572_s1 + $0x90] sm:$0xff]  ;;  %v45_v17 = vld [vmem:[%s572_s1 + $0x88] sm:$0xff] }
   0x6   :  { %89 = vmatprep.subr.mxu0 %v55_v5  ;;  %v193_v15 = vld [vmem:[%s573_s3 + $0xf8] sm:$0xff]  ;;  %v192_v18 = vld [vmem:[%s573_s3 + $0xf0] sm:$0xff]  ;;  %v44_v20 = vld [vmem:[%s572_s1 + $0x80] sm:$0xff] }
   0x7   :  { %90 = vmatpush1.msra.mxu0 %v54_v6  ;;  %v177_v16 = vld [vmem:[%s573_s3 + $0x78] sm:$0xff]  ;;  %285 = vmatprep.subr.mxu1 %v193_v15  ;;  %v176_v19 = vld [vmem:[%s573_s3 + $0x70] sm:$0xff]  ;;  %v191_v21 = vld [vmem:[%s573_s3 + $0xe8] sm:$0xff] }
   0x8   :  { %91 = vmatprep.subr.mxu0 %v53_v7  ;;  %286 = vmatpush3.msra.mxu1 %v177_v16  ;;  %v43_v22 = vld [vmem:[%s572_s1 + $0x78] sm:$0xff]  ;;  %v175_v24 = vld [vmem:[%s573_s3 + $0x68] sm:$0xff]  ;;  %v42_v25 = vld [vmem:[%s572_s1 + $0x70] sm:$0xff] }
   0x9   :  { %92 = vmatpush1.msra.mxu0 %v52_v8  ;;  %287 = vmatprep.subr.mxu1 %v192_v18  ;;  %v190_v26 = vld [vmem:[%s573_s3 + $0xe0] sm:$0xff]  ;;  %v41_v27 = vld [vmem:[%s572_s1 + $0x68] sm:$0xff]  ;;  %v189_v30 = vld [vmem:[%s573_s3 + $0xd8] sm:$0xff] }
   0xa   :  { %93 = vmatprep.subr.mxu0 %v51_v9  ;;  %288 = vmatpush3.msra.mxu1 %v176_v19  ;;  %v174_v28 = vld [vmem:[%s573_s3 + $0x60] sm:$0xff]  ;;  %v39_v31 = vld [vmem:[%s572_s1 + $0x58] sm:$0xff]  ;;  %v38_v32 = vld [vmem:[%s572_s1 + $0x50] sm:$0xff] }
   0xb   :  { %94 = vmatpush1.msra.mxu0 %v50_v10  ;;  %289 = vmatprep.subr.mxu1 %v191_v21  ;;  %v40_v29 = vld [vmem:[%s572_s1 + $0x60] sm:$0xff]  ;;  %v173_v34 = vld [vmem:[%s573_s3 + $0x58] sm:$0xff]  ;;  %v188_v37 = vld [vmem:[%s573_s3 + $0xd0] sm:$0xff] }
   0xc   :  { %95 = vmatprep.subr.mxu0 %v49_v11  ;;  %290 = vmatpush3.msra.mxu1 %v175_v24  ;;  %v22_v35 = vld [vmem:[%s574_s0] sm:$0x1]  ;;  %v23_v36 = vld [vmem:[%s574_s0 + $0x1] sm:$0x1]  ;;  %v37_v38 = vld [vmem:[%s572_s1 + $0x48] sm:$0xff] }
   0xd   :  { %96 = vmatpush1.msra.mxu0 %v48_v12  ;;  %291 = vmatprep.subr.mxu1 %v190_v26  ;;  %v172_v39 = vld [vmem:[%s573_s3 + $0x50] sm:$0xff]  ;;  %v36_v40 = vld [vmem:[%s572_s1 + $0x40] sm:$0xff]  ;;  %v187_v41 = vld [vmem:[%s573_s3 + $0xc8] sm:$0xff]  ;;  %v24_v43 = vunpack.c.l.bf16 %v22_v35  ;;  %v25_v44 = vunpack.c.l.bf16 %v23_v36  ;;  %v68_v12 = vsub.s32 1, %v449_v33 }
   0xe   :  { %97 = vmatprep.subr.mxu0 %v47_v13  ;;  %292 = vmatpush3.msra.mxu1 %v174_v28  ;;  %v35_v42 = vld [vmem:[%s572_s1 + $0x38] sm:$0xff]  ;;  %v171_v46 = vld [vmem:[%s573_s3 + $0x48] sm:$0xff]  ;;  %v34_v47 = vld [vmem:[%s572_s1 + $0x30] sm:$0xff] }
   0xf   :  { %98 = vmatpush1.msra.mxu0 %v46_v14  ;;  %293 = vmatprep.subr.mxu1 %v189_v30  ;;  %v186_v48 = vld [vmem:[%s573_s3 + $0xc0] sm:$0xff]  ;;  %v33_v49 = vld [vmem:[%s572_s1 + $0x28] sm:$0xff]  ;;  %v185_v52 = vld [vmem:[%s573_s3 + $0xb8] sm:$0xff]  ;;  %v77_v54 = vrot.slane %v24_v43, %v479_v45  ;;  %v81_v55 = vrot.slane %v25_v44, %v479_v45 }
  0x10   :  { %99 = vmatprep.subr.mxu0 %v45_v17  ;;  %294 = vmatpush3.msra.mxu1 %v173_v34  ;;  %v170_v50 = vld [vmem:[%s573_s3 + $0x40] sm:$0xff]  ;;  %v31_v53 = vld [vmem:[%s572_s1 + $0x18] sm:$0xff]  ;;  %v30_v57 = vld [vmem:[%s572_s1 + $0x10] sm:$0xff] }
  0x11   :  { %100 = vmatpush1.msra.mxu0 %v44_v20  ;;  %295 = vmatprep.subr.mxu1 %v188_v37  ;;  %v32_v51 = vld [vmem:[%s572_s1 + $0x20] sm:$0xff]  ;;  %v169_v56 = vld [vmem:[%s573_s3 + $0x38] sm:$0xff]  ;;  %v184_v58 = vld [vmem:[%s573_s3 + $0xb0] sm:$0xff]  ;;  %v83_v63 = vsel %vm82_vm0, %v81_v55, %v77_v54 }
  0x12   :  { %101 = vmatprep.subr.mxu0 %v43_v22  ;;  %296 = vmatpush3.msra.mxu1 %v172_v39  ;;  %v29_v59 = vld [vmem:[%s572_s1 + $0x8] sm:$0xff]  ;;  %v168_v60 = vld [vmem:[%s573_s3 + $0x30] sm:$0xff]  ;;  %v28_v61 = vld [vmem:[%s572_s1] sm:$0xff] }
  0x13   :  { %102 = vmatpush1.msra.mxu0 %v42_v25  ;;  %297 = vmatprep.subr.mxu1 %v187_v41  ;;  %v183_v62 = vld [vmem:[%s573_s3 + $0xa8] sm:$0xff]  ;;  %v182_v1 = vld [vmem:[%s573_s3 + $0xa0] sm:$0xff]  ;;  %v181_v3 = vld [vmem:[%s573_s3 + $0x98] sm:$0xff] }
  0x14   :  { %103 = vmatprep.subr.mxu0 %v41_v27  ;;  %298 = vmatpush3.msra.mxu1 %v171_v46  ;;  %v167_v0 = vld [vmem:[%s573_s3 + $0x28] sm:$0xff]  ;;  %v166_v2 = vld [vmem:[%s573_s3 + $0x20] sm:$0xff]  ;;  %v165_v4 = vld [vmem:[%s573_s3 + $0x18] sm:$0xff] }
  0x15   :  { %104 = vmatpush1.msra.mxu0 %v40_v29  ;;  %299 = vmatprep.subr.mxu1 %v186_v48  ;;  %v180_v5 = vld [vmem:[%s573_s3 + $0x90] sm:$0xff]  ;;  %v179_v7 = vld [vmem:[%s573_s3 + $0x88] sm:$0xff]  ;;  %v178_v9 = vld [vmem:[%s573_s3 + $0x80] sm:$0xff] }
  0x16   :  { %105 = vmatprep.subr.mxu0 %v39_v31  ;;  %300 = vmatpush3.msra.mxu1 %v170_v50  ;;  %v164_v6 = vld [vmem:[%s573_s3 + $0x10] sm:$0xff]  ;;  %v163_v8 = vld [vmem:[%s573_s3 + $0x8] sm:$0xff]  ;;  %v162_v10 = vld [vmem:[%s573_s3] sm:$0xff] }
  0x17   :  { %106 = vmatpush1.msra.mxu0 %v38_v32  ;;  %301 = vmatprep.subr.mxu1 %v185_v52  ;;  %v60_v11 = vld [vmem:[%s575_s2] sm:$0x3] }
  0x18   :  { %107 = vmatprep.subr.mxu0 %v37_v38  ;;  %302 = vmatpush3.msra.mxu1 %v169_v56  ;;  %v65_v13 = vrot.slane %v60_v11, %v479_v45  ;;  %v69_v14 = vrot.slane %v60_v11, %v68_v12  ;;  %v283_v25 = vld [vmem:[#allocation2] ss:$0 sm:$0xff] }
  0x19   :  { %108 = vmatpush1.msra.mxu0 %v36_v40  ;;  %303 = vmatprep.subr.mxu1 %v184_v58 }
  0x1a   :  { %109 = vmatprep.subr.mxu0 %v35_v42  ;;  %304 = vmatpush3.msra.mxu1 %v168_v60 }
  0x1b   :  { %110 = vmatpush1.msra.mxu0 %v34_v47  ;;  %305 = vmatprep.subr.mxu1 %v183_v62 }
  0x1c   :  { %111 = vmatprep.subr.mxu0 %v33_v49  ;;  %306 = vmatpush3.msra.mxu1 %v167_v0 }
  0x1d   :  { %112 = vmatpush1.msra.mxu0 %v32_v51  ;;  %307 = vmatprep.subr.mxu1 %v182_v1 }
  0x1e   :  { %113 = vmatprep.subr.mxu0 %v31_v53  ;;  %308 = vmatpush3.msra.mxu1 %v166_v2 }
  0x1f   :  { %114 = vmatpush1.msra.mxu0 %v30_v57  ;;  %309 = vmatprep.subr.mxu1 %v181_v3 }
  0x20   :  { %115 = vmatprep.subr.mxu0 %v29_v59  ;;  %310 = vmatpush3.msra.mxu1 %v165_v4 }
  0x21   :  { %116 = vmatpush1.msra.mxu0 %v28_v61  ;;  %311 = vmatprep.subr.mxu1 %v180_v5 }
  0x22   :  { %150 = vmatmul.mubr.f32.vlgmr.msra.gmra.mxu0 %v83_v63  ;;  %312 = vmatpush3.msra.mxu1 %v164_v6 }
  0x23   :  { %313 = vmatprep.subr.mxu1 %v179_v7 }
  0x24   :  { %314 = vmatpush3.msra.mxu1 %v163_v8 }
  0x25   :  { %315 = vmatprep.subr.mxu1 %v178_v9 }
  0x26   :  { %316 = vmatpush3.msra.mxu1 %v162_v10 }
  0xe2   :  { %v151_v15 = vpop.f32.mrf.mxu0 }
  0xe3   :  { %v152_v16 = vadd.f32 %v151_v15, %v65_v13 }
  0xe4   :  { %v153_v17 = vpop.f32.mrf.mxu0 }
  0xe5   :  { %v154_v18 = vadd.f32 %v153_v17, %v69_v14  ;;  %v158_v19 = vmul.f32 0.2, %v152_v16  ;;  %vm156_vm2 = vcmp.ge.f32.partialorder %v152_v16, 0.0 }
  0xe7   :  { %vm157_vm1 = vcmp.ge.f32.partialorder %v154_v18, 0.0  ;;  %v159_v20 = vmul.f32 0.2, %v154_v18  ;;  %v160_v22 = vsel %vm156_vm2, %v152_v16, %v158_v19 }
  0xe9   :  { %v161_v21 = vsel %vm157_vm1, %v154_v18, %v159_v20 }
  0xea   :  { %265 = vmatprep.mubr.f32.mxu1 %v161_v21 }
  0xeb   :  { %266 = vmatmul.mubr.f32.vlgmr.msra.gmra.mxu1 %v160_v22 }
 0x1ab   :  { %v317_v24 = vpop.f32.mrf.mxu1 }
 0x1ad   :  { %v318_v26 = vpop.f32.mrf.mxu1 }
 0x1ae   :  { %v319_v27 = vadd.f32 %v318_v26, %v317_v24 }
 0x1b0   :  { %v268_v28 = vadd.f32 %v319_v27, %v283_v25 }
 0x1b2   :  { %v284_v29 = vmul.f32 -1.442695, %v268_v28 }
 0x1b4   :  { %321 = vpow2.f32 %v284_v29 }
 0x1c1   :  { %v322_v30 = vpop.eup %321 }
 0x1c2   :  { %v274_v31 = vadd.f32 1.0, %v322_v30 }
 0x1c4   :  { %323 = vrcp.f32 %v274_v31 }
 0x1d1   :  { %v324_v32 = vpop.eup %323 }
 0x1d2   :  { %278 = vst.msk [vmem:[%s577_s5] sm:$0x3] %vm277_vm3, %v324_v32 }

// kernel: discriminator_forward.16
= control target key start
LH: loop header
LB: loop body
LE: loop exit
PB: predicated region body
PF: predicated region fallthrough
CT: control target
= control target key end

     0   :  { %s2029_s15 = smov 0   ;;  %s2031_s16 = smov 0   ;;  %s2402_s0 = inlined_call_operand.vmem [shape: bf16[4,4,2,128], index: 0, kind: input, shape index: {}]   ;;  %s2403_s1 = inlined_call_operand.vmem [shape: bf16[3,3,128,128], index: 1, kind: input, shape index: {}]   ;;  %s2404_s2 = inlined_call_operand.vmem [shape: f32[1,128], index: 2, kind: input, shape index: {}]   ;;  %s2405_s3 = inlined_call_operand.vmem [shape: f32[1,128], index: 3, kind: input, shape index: {}]   ;;  %s2406_s4 = inlined_call_operand.vmem [shape: bf16[2,1,1,128], index: 4, kind: output, shape index: {}]  }
   0x1   :  { %s2033_s17 = smov 0  }
   0x2 LB: > { %s26_s18 = sadd.s32 1, %s1995_s16  ;;  %p1407_p0 = scmp.ge.s32.totalorder %s1999_s17, 1  ;;  %s1999_s17 = sphi %s2033_s17, %s14_s17   ;;  %s1995_s16 = sphi %s2031_s16, %s2408_s16   ;;  %s1991_s15 = sphi %s2029_s15, %s2407_s15  }
   0x3   : > { %p28_p1 = scmp.ge.s32.totalorder %s26_s18, 2  ;;  %p202_p2 = scmp.lt.s32.totalorder %s1999_s17, 3 }
   0x5   : > { %s2410_s18 = smov (%p28_p1, %s26_s18), 0  ;;  %p203_p3 = pnand %p1407_p0, %p202_p2 }
   0x6   : > { %s1408_s9 = sshll.u32 (!%p203_p3), %s1991_s15, 1  ;;  %p255_p5 = scmp.lt.s32.totalorder (!%p203_p3), %s1991_s15, 1 }
   0x7   : > { %206 = sbr.rel (%p203_p3) target bundleno = 379 (0x17b), region = 36  ;;  %p240_p4 = scmp.lt.s32.totalorder (!%p203_p3), %s1408_s9, 3 }
   0xc   : > { %v1905_v0 = vld [vmem:[%s2403_s1 + $0x78] sm:$0xff]   ;;  %v2001_v1 = vmov 0.0   ;;  %v1907_v3 = vld [vmem:[%s2403_s1 + $0x70] sm:$0xff]   ;;  %vm2002_vm0 = vmmov 0   ;;  %v1909_v5 = vld [vmem:[%s2403_s1 + $0x68] sm:$0xff]   ;;  %s2412_s9 = smov (!%p240_p4, %s1408_s9), 3  ;;  %v495_v27 = vlaneseq }
   0xd   : > { %1698 = vmatprep.subr.bf16.mxu0 %v2001_v1  ;;  %1718 = vmatprep.subr.bf16.mxu1 %v2001_v1  ;;  %v1906_v2 = vld [vmem:[%s2403_s1 + $0x38] sm:$0xff]   ;;  %v1908_v4 = vld [vmem:[%s2403_s1 + $0x30] sm:$0xff]   ;;  %v1910_v6 = vld [vmem:[%s2403_s1 + $0x28] sm:$0xff]   ;;  %s1409_s24 = sshll.u32 %s2412_s9, 2  ;;  %v2003_v25 = vmov 1966171168  }
   0xe   : > { %1699 = vmatpush3.bf16.msra.mxu0 %v1905_v0  ;;  %1714 = vmatprep.mubr.msk.bf16.mxu0 %vm2002_vm0, %v2001_v1  ;;  %v1911_v7 = vld [vmem:[%s2403_s1 + $0x60] sm:$0xff]   ;;  %v1913_v9 = vld [vmem:[%s2403_s1 + $0x58] sm:$0xff]   ;;  %v1915_v11 = vld [vmem:[%s2403_s1 + $0x50] sm:$0xff]   ;;  %s2113_s29 = scalar_lea.vmem %s2402_s0, %s1409_s24  ;;  %v493_v26 = vunpack.c.l.s4 %v2003_v25  ;;  %v496_v31 = vshrl.u32 %v495_v27, 7  ;;  %s2414_s15 = smov (!%p255_p5, %s1991_s15), 1  ;;  %vm1289_vm1 = vcmask 1040384  }
   0xf   : > { %1719 = vmatpush3.bf16.msra.mxu1 %v1906_v2  ;;  %1700 = vmatprep.subr.bf16.mxu0 %v2001_v1  ;;  %v1912_v8 = vld [vmem:[%s2403_s1 + $0x20] sm:$0xff]   ;;  %v1914_v10 = vld [vmem:[%s2403_s1 + $0x18] sm:$0xff]   ;;  %v1916_v12 = vld [vmem:[%s2403_s1 + $0x10] sm:$0xff]   ;;  %s260_s24 = scalar_lea.vmem %s2406_s4, %s2414_s15  ;;  %vm1290_vm2 = vsmask.f32 256 }
  0x10   : > { %1720 = vmatprep.subr.bf16.mxu1 %v2001_v1  ;;  %1734 = vmatprep.mubr.msk.bf16.mxu1 %vm2002_vm0, %v2001_v1  ;;  %v1917_v13 = vld [vmem:[%s2403_s1 + $0x48] sm:$0xff]   ;;  %v1919_v15 = vld [vmem:[%s2403_s1 + $0x40] sm:$0xff]   ;;  %v1921_v19 = vld [vmem:[%s2403_s1 + $0xb8] sm:$0xff]   ;;  %v494_v30 = vunpack.c.0.s8 %v493_v26 }
  0x11   : > { %v1918_v14 = vld [vmem:[%s2403_s1 + $0x8] sm:$0xff]   ;;  %v1920_v16 = vld [vmem:[%s2403_s1] sm:$0xff]   ;;  %v1922_v20 = vld [vmem:[%s2403_s1 + $0xf8] sm:$0xff]  }
  0x12   : > { %1701 = vmatpush3.bf16.msra.mxu0 %v1907_v3  ;;  %v1410_v17 = vld [vmem:[%s2113_s29 + $0x2] sm:$0x1]  ;;  %v262_v18 = vld [vmem:[%s2113_s29] sm:$0x1]  ;;  %v1923_v21 = vld [vmem:[%s2403_s1 + $0xb0] sm:$0xff]   ;;  %v2169_v34 = vsub.s32 %v494_v30, %v496_v31 }
  0x13   : > { %1721 = vmatpush3.bf16.msra.mxu1 %v1908_v4  ;;  %1702 = vmatprep.subr.bf16.mxu0 %v2001_v1  ;;  %v1924_v22 = vld [vmem:[%s2403_s1 + $0xf0] sm:$0xff]   ;;  %v1925_v23 = vld [vmem:[%s2403_s1 + $0xa8] sm:$0xff]   ;;  %v1927_v28 = vld [vmem:[%s2403_s1 + $0xa0] sm:$0xff]  }
  0x14   : > { %1722 = vmatprep.subr.bf16.mxu1 %v2001_v1  ;;  %v1926_v24 = vld [vmem:[%s2403_s1 + $0xe8] sm:$0xff]   ;;  %v1928_v29 = vld [vmem:[%s2403_s1 + $0xe0] sm:$0xff]   ;;  %v1929_v32 = vld [vmem:[%s2403_s1 + $0x98] sm:$0xff]   ;;  %v498_v37 = vrot.slane %v262_v18, %v2169_v34 }
  0x15   : > { %v1930_v33 = vld [vmem:[%s2403_s1 + $0xd8] sm:$0xff]   ;;  %v1931_v35 = vld [vmem:[%s2403_s1 + $0x90] sm:$0xff]   ;;  %v1933_v38 = vld [vmem:[%s2403_s1 + $0x88] sm:$0xff]  }
  0x16   : > { %1703 = vmatpush3.bf16.msra.mxu0 %v1909_v5  ;;  %v1932_v36 = vld [vmem:[%s2403_s1 + $0xd0] sm:$0xff]   ;;  %v1934_v39 = vld [vmem:[%s2403_s1 + $0xc8] sm:$0xff]   ;;  %v505_v40 = vrot.slane %v498_v37, %v2169_v34  ;;  %v1935_v41 = vld [vmem:[%s2403_s1 + $0x80] sm:$0xff]  }
  0x17   : > { %1723 = vmatpush3.bf16.msra.mxu1 %v1910_v6  ;;  %1704 = vmatprep.subr.bf16.mxu0 %v2001_v1  ;;  %v1936_v42 = vld [vmem:[%s2403_s1 + $0xc0] sm:$0xff]   ;;  %v1937_v44 = vld [vmem:[%s2403_s1 + $0x138] sm:$0xff]   ;;  %v1939_v48 = vld [vmem:[%s2403_s1 + $0x130] sm:$0xff]  }
  0x18   : > { %1724 = vmatprep.subr.bf16.mxu1 %v2001_v1  ;;  %v507_v43 = vshrl.u32 %v505_v40, 16  ;;  %v1467_v45 = vld [vmem:[%s2113_s29 + $0x4] sm:$0x1]  ;;  %v1938_v46 = vld [vmem:[%s2403_s1 + $0x178] sm:$0xff]   ;;  %v2207_v47 = vld [vmem:[%s2113_s29 + $0x1] sm:$0x1] }
  0x19   : > { %v1180_v49 = vrot.slane %v2207_v47, %v2169_v34  ;;  %v1940_v50 = vld [vmem:[%s2403_s1 + $0x170] sm:$0xff]   ;;  %v1941_v52 = vld [vmem:[%s2403_s1 + $0x128] sm:$0xff]   ;;  %v1943_v54 = vld [vmem:[%s2403_s1 + $0x120] sm:$0xff]   ;;  %v839_v60 = vrot.slane %v1467_v45, %v2169_v34 }
  0x1a   : > { %1705 = vmatpush3.bf16.msra.mxu0 %v1911_v7  ;;  %v1942_v53 = vld [vmem:[%s2403_s1 + $0x168] sm:$0xff]   ;;  %v1944_v55 = vld [vmem:[%s2403_s1 + $0x160] sm:$0xff]   ;;  %v1945_v56 = vld [vmem:[%s2403_s1 + $0x118] sm:$0xff]  }
  0x1b   : > { %1725 = vmatpush3.bf16.msra.mxu1 %v1912_v8  ;;  %1706 = vmatprep.subr.bf16.mxu0 %v2001_v1  ;;  %v2222_v51 = vrot.slane %v1180_v49, %v2169_v34  ;;  %v1946_v57 = vld [vmem:[%s2403_s1 + $0x158] sm:$0xff]   ;;  %v1947_v58 = vld [vmem:[%s2403_s1 + $0x110] sm:$0xff]   ;;  %v1949_v61 = vld [vmem:[%s2403_s1 + $0x108] sm:$0xff]   ;;  %v846_v63 = vrot.slane %v839_v60, %v2169_v34 }
  0x1c   : > { %1726 = vmatprep.subr.bf16.mxu1 %v2001_v1  ;;  %v1948_v59 = vld [vmem:[%s2403_s1 + $0x150] sm:$0xff]   ;;  %v1950_v62 = vld [vmem:[%s2403_s1 + $0x148] sm:$0xff]   ;;  %v1951_v0 = vld [vmem:[%s2403_s1 + $0x100] sm:$0xff]  }
  0x1d   : > { %v1952_v2 = vld [vmem:[%s2403_s1 + $0x140] sm:$0xff]   ;;  %v848_v3 = vshrl.u32 %v846_v63, 16  ;;  %v1953_v5 = vld [vmem:[%s2403_s1 + $0x1b8] sm:$0xff]   ;;  %v1955_v7 = vld [vmem:[%s2403_s1 + $0x1b0] sm:$0xff]   ;;  %v1189_v30 = vshrl.u32 %v2222_v51, 16 }
  0x1e   : > { %1707 = vmatpush3.bf16.msra.mxu0 %v1913_v9  ;;  %v1492_v4 = vld [vmem:[%s2113_s29 + $0x6] sm:$0x1]  ;;  %v1954_v6 = vld [vmem:[%s2403_s1 + $0x1f8] sm:$0xff]   ;;  %v1956_v8 = vld [vmem:[%s2403_s1 + $0x1f0] sm:$0xff]  }
  0x1f   : > { %1727 = vmatpush3.bf16.msra.mxu1 %v1914_v10  ;;  %1708 = vmatprep.subr.bf16.mxu0 %v2001_v1  ;;  %v1957_v9 = vld [vmem:[%s2403_s1 + $0x1a8] sm:$0xff]   ;;  %v1972_v25 = vld [vmem:[%s2403_s1 + $0x220] sm:$0xff]   ;;  %v1973_v26 = vld [vmem:[%s2403_s1 + $0x218] sm:$0xff]  }
  0x20   : > { %1728 = vmatprep.subr.bf16.mxu1 %v2001_v1  ;;  %v1958_v10 = vld [vmem:[%s2403_s1 + $0x1e8] sm:$0xff]   ;;  %v1974_v27 = vld [vmem:[%s2403_s1 + $0x210] sm:$0xff]   ;;  %vm1291_vm4 = vmand %vm1289_vm1, %vm1290_vm2 }
  0x22   : > { %1709 = vmatpush3.bf16.msra.mxu0 %v1915_v11  ;;  %v1959_v11 = vld [vmem:[%s2403_s1 + $0x1a0] sm:$0xff]  }
  0x23   : > { %1729 = vmatpush3.bf16.msra.mxu1 %v1916_v12  ;;  %1710 = vmatprep.subr.bf16.mxu0 %v2001_v1  ;;  %v1960_v12 = vld [vmem:[%s2403_s1 + $0x1e0] sm:$0xff]  }
  0x24   : > { %1730 = vmatprep.subr.bf16.mxu1 %v2001_v1 }
  0x26   : > { %1711 = vmatpush3.bf16.msra.mxu0 %v1917_v13  ;;  %v1961_v13 = vld [vmem:[%s2403_s1 + $0x198] sm:$0xff]  }
  0x27   : > { %1731 = vmatpush3.bf16.msra.mxu1 %v1918_v14  ;;  %1712 = vmatprep.subr.bf16.mxu0 %v2001_v1  ;;  %v1962_v14 = vld [vmem:[%s2403_s1 + $0x1d8] sm:$0xff]  }
  0x28   : > { %1732 = vmatprep.subr.bf16.mxu1 %v2001_v1 }
  0x2a   : > { %1713 = vmatpush3.bf16.msra.mxu0 %v1919_v15  ;;  %v1963_v15 = vld [vmem:[%s2403_s1 + $0x190] sm:$0xff]  }
  0x2b   : > { %1733 = vmatpush3.bf16.msra.mxu1 %v1920_v16  ;;  %1738 = vmatprep.subr.bf16.mxu0 %v2001_v1  ;;  %v1964_v16 = vld [vmem:[%s2403_s1 + $0x1d0] sm:$0xff]  }
  0x2c   : > { %1758 = vmatprep.subr.bf16.mxu1 %v2001_v1 }
  0x2d   : > { %1715 = vmatmul.mubr.bf16.vlgmr.msra.gmra.mxu0 %v1410_v17  ;;  %v1965_v17 = vld [vmem:[%s2403_s1 + $0x188] sm:$0xff]  }
  0x2e   : > { %1735 = vmatmul.mubr.bf16.vlgmr.msra.gmra.mxu1 %v262_v18  ;;  %1739 = vmatpush3.bf16.msra.mxu0 %v1921_v19  ;;  %v1966_v18 = vld [vmem:[%s2403_s1 + $0x1c8] sm:$0xff]   ;;  %v1967_v19 = vld [vmem:[%s2403_s1 + $0x180] sm:$0xff]  }
  0x2f   : > { %1759 = vmatpush3.bf16.msra.mxu1 %v1922_v20  ;;  %1740 = vmatprep.subr.bf16.mxu0 %v2001_v1  ;;  %v1968_v20 = vld [vmem:[%s2403_s1 + $0x1c0] sm:$0xff]  }
  0x30   : > { %1760 = vmatprep.subr.bf16.mxu1 %v2001_v1  ;;  %1754 = vmatprep.mubr.msk.bf16.mxu0 %vm2002_vm0, %v2001_v1 }
  0x31   : > { %1774 = vmatprep.mubr.msk.bf16.mxu1 %vm2002_vm0, %v2001_v1 }
  0x32   : > { %1741 = vmatpush3.bf16.msra.mxu0 %v1923_v21  ;;  %v1969_v21 = vld [vmem:[%s2403_s1 + $0x238] sm:$0xff]  }
  0x33   : > { %1761 = vmatpush3.bf16.msra.mxu1 %v1924_v22  ;;  %1742 = vmatprep.subr.bf16.mxu0 %v2001_v1  ;;  %v1566_v22 = vld [vmem:[%s2113_s29 + $0x3] sm:$0x1] }
  0x34   : > { %1762 = vmatprep.subr.bf16.mxu1 %v2001_v1 }
  0x36   : > { %1743 = vmatpush3.bf16.msra.mxu0 %v1925_v23  ;;  %v1970_v23 = vld [vmem:[%s2403_s1 + $0x230] sm:$0xff]  }
  0x37   : > { %1763 = vmatpush3.bf16.msra.mxu1 %v1926_v24  ;;  %1744 = vmatprep.subr.bf16.mxu0 %v2001_v1  ;;  %v1971_v24 = vld [vmem:[%s2403_s1 + $0x228] sm:$0xff]  }
  0x38   : > { %1764 = vmatprep.subr.bf16.mxu1 %v2001_v1 }
  0x3a   : > { %1745 = vmatpush3.bf16.msra.mxu0 %v1927_v28  ;;  %v1975_v28 = vld [vmem:[%s2403_s1 + $0x208] sm:$0xff]  }
  0x3b   : > { %1765 = vmatpush3.bf16.msra.mxu1 %v1928_v29  ;;  %1746 = vmatprep.subr.bf16.mxu0 %v2001_v1  ;;  %v1976_v29 = vld [vmem:[%s2403_s1 + $0x200] sm:$0xff]  }
  0x3c   : > { %1766 = vmatprep.subr.bf16.mxu1 %v2001_v1 }
  0x3e   : > { %1747 = vmatpush3.bf16.msra.mxu0 %v1929_v32 }
  0x3f   : > { %1767 = vmatpush3.bf16.msra.mxu1 %v1930_v33  ;;  %1748 = vmatprep.subr.bf16.mxu0 %v2001_v1 }
  0x40   : > { %1768 = vmatprep.subr.bf16.mxu1 %v2001_v1 }
  0x42   : > { %1749 = vmatpush3.bf16.msra.mxu0 %v1931_v35 }
  0x43   : > { %1769 = vmatpush3.bf16.msra.mxu1 %v1932_v36  ;;  %1750 = vmatprep.subr.bf16.mxu0 %v2001_v1 }
  0x44   : > { %1770 = vmatprep.subr.bf16.mxu1 %v2001_v1 }
  0x46   : > { %1751 = vmatpush3.bf16.msra.mxu0 %v1933_v38 }
  0x47   : > { %1771 = vmatpush3.bf16.msra.mxu1 %v1934_v39  ;;  %1752 = vmatprep.subr.bf16.mxu0 %v2001_v1 }
  0x48   : > { %1772 = vmatprep.subr.bf16.mxu1 %v2001_v1 }
  0x4a   : > { %1753 = vmatpush3.bf16.msra.mxu0 %v1935_v41 }
  0x4b   : > { %1773 = vmatpush3.bf16.msra.mxu1 %v1936_v42  ;;  %1778 = vmatprep.subr.bf16.mxu0 %v2001_v1 }
  0x4c   : > { %1798 = vmatprep.subr.bf16.mxu1 %v2001_v1 }
  0x4d   : > { %1755 = vmatmul.mubr.bf16.vlgmr.msra.gmra.mxu0 %v507_v43 }
  0x4e   : > { %1779 = vmatpush3.bf16.msra.mxu0 %v1937_v44  ;;  %1775 = vmatmul.mubr.bf16.vlgmr.msra.gmra.mxu1 %v1467_v45 }
  0x4f   : > { %1799 = vmatpush3.bf16.msra.mxu1 %v1938_v46  ;;  %1780 = vmatprep.subr.bf16.mxu0 %v2001_v1 }
  0x50   : > { %1800 = vmatprep.subr.bf16.mxu1 %v2001_v1  ;;  %1794 = vmatprep.mubr.msk.bf16.mxu0 %vm2002_vm0, %v2001_v1 }
  0x51   : > { %1814 = vmatprep.mubr.msk.bf16.mxu1 %vm2002_vm0, %v2001_v1 }
  0x52   : > { %1781 = vmatpush3.bf16.msra.mxu0 %v1939_v48 }
  0x53   : > { %1801 = vmatpush3.bf16.msra.mxu1 %v1940_v50  ;;  %1782 = vmatprep.subr.bf16.mxu0 %v2001_v1 }
  0x54   : > { %1802 = vmatprep.subr.bf16.mxu1 %v2001_v1 }
  0x56   : > { %1783 = vmatpush3.bf16.msra.mxu0 %v1941_v52 }
  0x57   : > { %1803 = vmatpush3.bf16.msra.mxu1 %v1942_v53  ;;  %1784 = vmatprep.subr.bf16.mxu0 %v2001_v1 }
  0x58   : > { %1804 = vmatprep.subr.bf16.mxu1 %v2001_v1 }
  0x5a   : > { %1785 = vmatpush3.bf16.msra.mxu0 %v1943_v54 }
  0x5b   : > { %1805 = vmatpush3.bf16.msra.mxu1 %v1944_v55  ;;  %1786 = vmatprep.subr.bf16.mxu0 %v2001_v1 }
  0x5c   : > { %1806 = vmatprep.subr.bf16.mxu1 %v2001_v1 }
  0x5e   : > { %1787 = vmatpush3.bf16.msra.mxu0 %v1945_v56 }
  0x5f   : > { %1807 = vmatpush3.bf16.msra.mxu1 %v1946_v57  ;;  %1788 = vmatprep.subr.bf16.mxu0 %v2001_v1 }
  0x60   : > { %1808 = vmatprep.subr.bf16.mxu1 %v2001_v1 }
  0x62   : > { %1789 = vmatpush3.bf16.msra.mxu0 %v1947_v58 }
  0x63   : > { %1809 = vmatpush3.bf16.msra.mxu1 %v1948_v59  ;;  %1790 = vmatprep.subr.bf16.mxu0 %v2001_v1 }
  0x64   : > { %1810 = vmatprep.subr.bf16.mxu1 %v2001_v1 }
  0x66   : > { %1791 = vmatpush3.bf16.msra.mxu0 %v1949_v61 }
  0x67   : > { %1811 = vmatpush3.bf16.msra.mxu1 %v1950_v62  ;;  %1792 = vmatprep.subr.bf16.mxu0 %v2001_v1 }
  0x68   : > { %1812 = vmatprep.subr.bf16.mxu1 %v2001_v1 }
  0x6a   : > { %1793 = vmatpush3.bf16.msra.mxu0 %v1951_v0 }
  0x6b   : > { %1813 = vmatpush3.bf16.msra.mxu1 %v1952_v2  ;;  %1818 = vmatprep.subr.bf16.mxu0 %v2001_v1 }
  0x6c   : > { %1838 = vmatprep.subr.bf16.mxu1 %v2001_v1 }
  0x6d   : > { %1795 = vmatmul.mubr.bf16.vlgmr.msra.gmra.mxu0 %v1492_v4 }
  0x6e   : > { %1819 = vmatpush3.bf16.msra.mxu0 %v1953_v5  ;;  %1815 = vmatmul.mubr.bf16.vlgmr.msra.gmra.mxu1 %v848_v3 }
  0x6f   : > { %1839 = vmatpush3.bf16.msra.mxu1 %v1954_v6  ;;  %1820 = vmatprep.subr.bf16.mxu0 %v2001_v1 }
  0x70   : > { %1840 = vmatprep.subr.bf16.mxu1 %v2001_v1  ;;  %1834 = vmatprep.mubr.msk.bf16.mxu0 %vm2002_vm0, %v2001_v1 }
  0x71   : > { %1854 = vmatprep.mubr.msk.bf16.mxu1 %vm2002_vm0, %v2001_v1 }
  0x72   : > { %1821 = vmatpush3.bf16.msra.mxu0 %v1955_v7  ;;  %v1281_v7 = vld [vmem:[%s2404_s2] sm:$0x1] }
  0x73   : > { %1841 = vmatpush3.bf16.msra.mxu1 %v1956_v8  ;;  %1822 = vmatprep.subr.bf16.mxu0 %v2001_v1 }
  0x74   : > { %1842 = vmatprep.subr.bf16.mxu1 %v2001_v1 }
  0x76   : > { %1823 = vmatpush3.bf16.msra.mxu0 %v1957_v9  ;;  %v1283_v9 = vld [vmem:[%s2405_s3] sm:$0x1] }
  0x77   : > { %1843 = vmatpush3.bf16.msra.mxu1 %v1958_v10  ;;  %1824 = vmatprep.subr.bf16.mxu0 %v2001_v1 }
  0x78   : > { %1844 = vmatprep.subr.bf16.mxu1 %v2001_v1 }
  0x7a   : > { %1825 = vmatpush3.bf16.msra.mxu0 %v1959_v11 }
  0x7b   : > { %1845 = vmatpush3.bf16.msra.mxu1 %v1960_v12  ;;  %1826 = vmatprep.subr.bf16.mxu0 %v2001_v1 }
  0x7c   : > { %1846 = vmatprep.subr.bf16.mxu1 %v2001_v1 }
  0x7e   : > { %1827 = vmatpush3.bf16.msra.mxu0 %v1961_v13 }
  0x7f   : > { %1847 = vmatpush3.bf16.msra.mxu1 %v1962_v14  ;;  %1828 = vmatprep.subr.bf16.mxu0 %v2001_v1 }
  0x80   : > { %1848 = vmatprep.subr.bf16.mxu1 %v2001_v1 }
  0x82   : > { %1829 = vmatpush3.bf16.msra.mxu0 %v1963_v15 }
  0x83   : > { %1849 = vmatpush3.bf16.msra.mxu1 %v1964_v16  ;;  %1830 = vmatprep.subr.bf16.mxu0 %v2001_v1 }
  0x84   : > { %1850 = vmatprep.subr.bf16.mxu1 %v2001_v1 }
  0x86   : > { %1831 = vmatpush3.bf16.msra.mxu0 %v1965_v17  ;;  %v1292_v17 = vld [vmem:[%s260_s24] sm:$0x1] }
  0x87   : > { %1851 = vmatpush3.bf16.msra.mxu1 %v1966_v18  ;;  %1832 = vmatprep.subr.bf16.mxu0 %v2001_v1 }
  0x88   : > { %1852 = vmatprep.subr.bf16.mxu1 %v2001_v1 }
  0x8a   : > { %1833 = vmatpush3.bf16.msra.mxu0 %v1967_v19 }
  0x8b   : > { %1853 = vmatpush3.bf16.msra.mxu1 %v1968_v20  ;;  %1858 = vmatprep.subr.bf16.mxu0 %v2001_v1 }
  0x8d   : > { %1835 = vmatmul.mubr.bf16.vlgmr.msra.gmra.mxu0 %v2207_v47 }
  0x8e   : > { %1859 = vmatpush3.bf16.msra.mxu0 %v1969_v21  ;;  %1855 = vmatmul.mubr.bf16.vlgmr.msra.gmra.mxu1 %v1566_v22 }
  0x8f   : > { %1860 = vmatprep.subr.bf16.mxu0 %v2001_v1  ;;  %1874 = vmatprep.mubr.msk.bf16.mxu0 %vm2002_vm0, %v2001_v1 }
  0x92   : > { %1861 = vmatpush3.bf16.msra.mxu0 %v1970_v23 }
  0x93   : > { %1862 = vmatprep.subr.bf16.mxu0 %v2001_v1 }
  0x96   : > { %1863 = vmatpush3.bf16.msra.mxu0 %v1971_v24 }
  0x97   : > { %1864 = vmatprep.subr.bf16.mxu0 %v2001_v1 }
  0x9a   : > { %1865 = vmatpush3.bf16.msra.mxu0 %v1972_v25 }
  0x9b   : > { %1866 = vmatprep.subr.bf16.mxu0 %v2001_v1 }
  0x9e   : > { %1867 = vmatpush3.bf16.msra.mxu0 %v1973_v26 }
  0x9f   : > { %1868 = vmatprep.subr.bf16.mxu0 %v2001_v1 }
  0xa2   : > { %1869 = vmatpush3.bf16.msra.mxu0 %v1974_v27 }
  0xa3   : > { %1870 = vmatprep.subr.bf16.mxu0 %v2001_v1 }
  0xa6   : > { %1871 = vmatpush3.bf16.msra.mxu0 %v1975_v28 }
  0xa7   : > { %1872 = vmatprep.subr.bf16.mxu0 %v2001_v1 }
  0xaa   : > { %1873 = vmatpush3.bf16.msra.mxu0 %v1976_v29 }
  0xad   : > { %1875 = vmatmul.mubr.bf16.vlgmr.msra.gmra.mxu0 %v1189_v30 }
  0xed   : > { %v380_v31 = vpop.f32.mrf.mxu0 }
  0xee   : > { %v468_v32 = vpop.f32.mrf.mxu1 }
  0xef   : > { %v469_v33 = vadd.f32 %v468_v32, %v380_v31  ;;  %v1716_v34 = vpop.f32.mrf.mxu0 }
  0xf0   : > { %v1736_v35 = vpop.f32.mrf.mxu1 }
  0xf1   : > { %v383_v36 = vpop.f32.mrf.mxu0 }
  0xf2   : > { %v471_v37 = vpop.f32.mrf.mxu1 }
  0xf3   : > { %v1717_v38 = vpop.f32.mrf.mxu0 }
  0xf4   : > { %v1737_v39 = vpop.f32.mrf.mxu1 }
 0x10d   : > { %v592_v40 = vpop.f32.mrf.mxu0 }
 0x10e   : > { %v598_v41 = vadd.f32 %v592_v40, %v469_v33  ;;  %v700_v42 = vpop.f32.mrf.mxu1 }
 0x10f   : > { %v1756_v43 = vpop.f32.mrf.mxu0 }
 0x110   : > { %v706_v44 = vadd.f32 %v700_v42, %v598_v41  ;;  %v1776_v45 = vpop.f32.mrf.mxu1 }
 0x111   : > { %v595_v1 = vpop.f32.mrf.mxu0 }
 0x112   : > { %v703_v46 = vpop.f32.mrf.mxu1 }
 0x113   : > { %v1757_v47 = vpop.f32.mrf.mxu0 }
 0x114   : > { %v1777_v48 = vpop.f32.mrf.mxu1 }
 0x12d   : > { %v808_v49 = vpop.f32.mrf.mxu0 }
 0x12e   : > { %v933_v50 = vpop.f32.mrf.mxu1  ;;  %v814_v2 = vadd.f32 %v808_v49, %v706_v44 }
 0x12f   : > { %v1796_v51 = vpop.f32.mrf.mxu0 }
 0x130   : > { %v1816_v52 = vpop.f32.mrf.mxu1  ;;  %v939_v3 = vadd.f32 %v933_v50, %v814_v2 }
 0x131   : > { %v811_v53 = vpop.f32.mrf.mxu0 }
 0x132   : > { %v936_v54 = vpop.f32.mrf.mxu1 }
 0x133   : > { %v1797_v55 = vpop.f32.mrf.mxu0 }
 0x134   : > { %v1817_v56 = vpop.f32.mrf.mxu1 }
 0x14d   : > { %v1041_v57 = vpop.f32.mrf.mxu0 }
 0x14e   : > { %v1149_v58 = vpop.f32.mrf.mxu1  ;;  %v1047_v4 = vadd.f32 %v1041_v57, %v939_v3 }
 0x14f   : > { %v1836_v59 = vpop.f32.mrf.mxu0 }
 0x150   : > { %v1856_v60 = vpop.f32.mrf.mxu1  ;;  %v1155_v5 = vadd.f32 %v1149_v58, %v1047_v4 }
 0x151   : > { %v1044_v61 = vpop.f32.mrf.mxu0 }
 0x152   : > { %v1152_v62 = vpop.f32.mrf.mxu1 }
 0x153   : > { %v1837_v63 = vpop.f32.mrf.mxu0 }
 0x154   : > { %v1857_v0 = vpop.f32.mrf.mxu1 }
 0x16d   : > { %v1274_v6 = vpop.f32.mrf.mxu0 }
 0x16e   : > { %v1280_v8 = vadd.f32 %v1274_v6, %v1155_v5 }
 0x16f   : > { %v1876_v10 = vpop.f32.mrf.mxu0 }
 0x170   : > { %v1282_v11 = vmul.f32 %v1281_v7, %v1280_v8 }
 0x171   : > { %v1277_v12 = vpop.f32.mrf.mxu0 }
 0x172   : > { %v1284_v13 = vadd.f32 %v1283_v9, %v1282_v11 }
 0x173   : > { %v1877_v14 = vpop.f32.mrf.mxu0 }
 0x174   : > { %vm1285_vm3 = vcmp.ge.f32.partialorder %v1284_v13, 0.0  ;;  %v1286_v15 = vmul.f32 0.2, %v1284_v13 }
 0x176   : > { %v1287_v16 = vsel %vm1285_vm3, %v1284_v13, %v1286_v15 }
 0x177   : > { %v1288_v18 = vpack.c.bf16 %v1287_v16, %v1287_v16 }
 0x179   : > { %v1293_v19 = vsel %vm1291_vm4, %v1288_v18, %v1292_v17 }
 0x17a   : > { %1294 = vst [vmem:[%s260_s24] sm:$0x1] %v1293_v19 }
 0x17b PF: > { %s14_s17 = sadd.s32 1, %s1999_s17   ;;  %s2407_s15 = smov %s1995_s16 }
 0x17c   : > { %p11_p6 = scmp.ge.s32.totalorder %s14_s17, 4   ;;  %s2408_s16 = smov %s2410_s18 }
 0x17e   :  { %13 = sbr.rel (!%p11_p6) target bundleno = 2 (0x2), region = 88 }

</bundles_post_ra>
